<compile_context>
chip_gen: v5e
topology: v5e:2x2
jax: 0.10.0
libtpu: 0.0.40
codegen_flags: <defaults>
</compile_context>

<pallas_src>
import numpy as np
import jax
import jax.numpy as jnp
from jax.experimental import pallas as pl
from jax.experimental.pallas import tpu as pltpu

# ---- problem sizes (small, consistent with the module) ----
BATCH = 512           # example batch; any batch works (wrapper pads to TILE_B)
IN_DIM = 32
HIDDEN = 128
OUT_DIM = 6
ATOM_SIZE = 51
ATOM_PAD = 128        # atoms padded to a full lane group
TILE_B = 256          # batch tile (multiple of 8 for f32 / 16 for bf16 casts)
V_MIN, V_MAX = -10.0, 10.0
NEG_PAD = -1e30       # bias for padded value-logit columns -> exp() == 0


def rainbow_kernel(x_ref, w1_ref, b1_ref,
                   wh_ref, bh_ref,
                   wa_ref, ba_ref,
                   wv_ref, bv_ref,
                   s_ref, q_ref):
    """One (TILE_B,) batch tile of the full forward pass, all operands in VMEM.

    x_ref:  (TB, IN_DIM)   f32
    w1_ref: (IN_DIM, 128)  bf16    b1_ref: (1, 128)       f32
    wh_ref: (128, 256)     bf16    bh_ref: (1, 256)       f32   [adv_hid | val_hid]
    wa_ref: (128, 6*128)   bf16    ba_ref: (1, 6*128)     f32   [6 heads, 51->128 pad]
    wv_ref: (128, 128)     bf16    bv_ref: (1, 128)       f32   [pad bias = -1e30]
    s_ref:  (6*128, 128)   f32     block-diag support: s[a*128+k, a] = support[k]
    q_ref:  (TB, 128)      f32     columns [0:OUT_DIM] hold Q(s, a), rest are 0
    """
    # feature = ReLU(Linear(in_dim, 128)(x))
    x_bf = x_ref[...].astype(jnp.bfloat16)
    feat = jnp.dot(x_bf, w1_ref[...], preferred_element_type=jnp.float32) + b1_ref[...]
    feat = jnp.maximum(feat, 0.0)

    # fused hidden NoisyLinear layers: one (TB,128)@(128,256) matmul, lane-aligned split
    hid = (jnp.dot(feat.astype(jnp.bfloat16), wh_ref[...],
                   preferred_element_type=jnp.float32) + bh_ref[...])
    hid = jnp.maximum(hid, 0.0)
    adv_hid = hid[:, 0:HIDDEN].astype(jnp.bfloat16)      # ReLU(NoisyLinear(128,128)(feat))
    val_hid = hid[:, HIDDEN:2 * HIDDEN].astype(jnp.bfloat16)

    # value head: (TB, 128 padded atoms); padded logit columns carry -1e30 bias
    value = (jnp.dot(val_hid, wv_ref[...],
                     preferred_element_type=jnp.float32) + bv_ref[...])

    # all 6 advantage heads in one matmul: (TB, 6*128), each head lane-group aligned
    adv = (jnp.dot(adv_hid, wa_ref[...],
                   preferred_element_type=jnp.float32) + ba_ref[...])

    # advantage.mean over the action dim (per atom); padded atoms are exactly 0
    adv_sum = adv[:, 0:ATOM_PAD]
    for a in range(1, OUT_DIM):
        adv_sum = adv_sum + adv[:, a * ATOM_PAD:(a + 1) * ATOM_PAD]
    base = value - adv_sum * (1.0 / OUT_DIM)             # (TB, 128)

    # per-head softmax over the padded 128 atoms (identical to the 51-atom softmax:
    # padded q_atoms are ~-1e30 so exp() contributes exactly 0 to the denominator)
    dists = []
    for a in range(OUT_DIM):
        q_atoms = base + adv[:, a * ATOM_PAD:(a + 1) * ATOM_PAD]
        m = jnp.max(q_atoms, axis=-1, keepdims=True)
        e = jnp.exp(q_atoms - m)
        denom = jnp.sum(e, axis=-1, keepdims=True)
        dist = e * pl.reciprocal(denom, approx=True)
        dists.append(jnp.maximum(dist, 0.001))           # dist.clamp(min=0.001)
    dist_all = jnp.concatenate(dists, axis=-1)           # (TB, 6*128)

    # Q(s, a) = sum_k dist[a, k] * support[k] for all actions at once on the MXU;
    # one lane-dense (TB, 128) store. Padded atoms hit all-zero rows of S.
    q_ref[...] = jnp.dot(dist_all, s_ref[...], preferred_element_type=jnp.float32)


def rainbow_forward(x, params, tile_b=TILE_B):
    (w1, b1, wh, bh, wa, ba, wv, bv, s_mat) = params
    nb = x.shape[0]
    nb_pad = ((nb + tile_b - 1) // tile_b) * tile_b
    if nb_pad != nb:
        x = jnp.pad(x, ((0, nb_pad - nb), (0, 0)))

    const = lambda i: (0, 0)  # weights: block index never changes -> DMA'd once, VMEM-resident

    q_pad = pl.pallas_call(
        rainbow_kernel,
        out_shape=jax.ShapeDtypeStruct((nb_pad, ATOM_PAD), jnp.float32),
        grid_spec=pltpu.PrefetchScalarGridSpec(
            num_scalar_prefetch=0,
            grid=(nb_pad // tile_b,),
            in_specs=[
                pl.BlockSpec((tile_b, IN_DIM), lambda i: (i, 0)),        # x
                pl.BlockSpec((IN_DIM, HIDDEN), const),                   # w1
                pl.BlockSpec((1, HIDDEN), const),                        # b1
                pl.BlockSpec((HIDDEN, 2 * HIDDEN), const),               # wh
                pl.BlockSpec((1, 2 * HIDDEN), const),                    # bh
                pl.BlockSpec((HIDDEN, OUT_DIM * ATOM_PAD), const),       # wa
                pl.BlockSpec((1, OUT_DIM * ATOM_PAD), const),            # ba
                pl.BlockSpec((HIDDEN, ATOM_PAD), const),                 # wv
                pl.BlockSpec((1, ATOM_PAD), const),                      # bv
                pl.BlockSpec((OUT_DIM * ATOM_PAD, ATOM_PAD), const),     # S (block-diag support)
            ],
            out_specs=pl.BlockSpec((tile_b, ATOM_PAD), lambda i: (i, 0)),
        ),
        compiler_params=pltpu.CompilerParams(
            dimension_semantics=("parallel",)),  # v7x: batch tiles shard across both TCs
    )(x, w1, b1, wh, bh, wa, ba, wv, bv, s_mat)

    return q_pad[:nb, :OUT_DIM]


# ---------------- parameter construction (deterministic, in-script) ----------------

def _linear_params(key, fan_in, fan_out):
    """Mimics torch.nn.Linear default init. Returns (out, in) weight, (out,) bias."""
    k1, k2 = jax.random.split(key)
    bound = 1.0 / np.sqrt(fan_in)
    w = jax.random.uniform(k1, (fan_out, fan_in), jnp.float32, -bound, bound)
    b = jax.random.uniform(k2, (fan_out,), jnp.float32, -bound, bound)
    return w, b


def _noisy_linear_params(key, fan_in, fan_out, std_init=0.5):
    """Effective NoisyLinear weights: mu + sigma * factorized Gaussian noise."""
    k1, k2, k3, k4 = jax.random.split(key, 4)
    mu_range = 1.0 / np.sqrt(fan_in)
    w_mu = jax.random.uniform(k1, (fan_out, fan_in), jnp.float32, -mu_range, mu_range)
    b_mu = jax.random.uniform(k2, (fan_out,), jnp.float32, -mu_range, mu_range)
    w_sigma = jnp.full((fan_out, fan_in), std_init / np.sqrt(fan_in), jnp.float32)
    b_sigma = jnp.full((fan_out,), std_init / np.sqrt(fan_out), jnp.float32)

    def f(v):  # scaled-sign noise as in NoisyNet
        return jnp.sign(v) * jnp.sqrt(jnp.abs(v))

    eps_in = f(jax.random.normal(k3, (fan_in,), jnp.float32))
    eps_out = f(jax.random.normal(k4, (fan_out,), jnp.float32))
    w = w_mu + w_sigma * jnp.outer(eps_out, eps_in)
    b = b_mu + b_sigma * eps_out
    return w, b


def build_params(key):
    keys = jax.random.split(key, 5)
    # feature_layer: Linear(in_dim, 128)
    w1, b1 = _linear_params(keys[0], IN_DIM, HIDDEN)
    # noisy layers
    w_ah, b_ah = _noisy_linear_params(keys[1], HIDDEN, HIDDEN)
    w_a, b_a = _noisy_linear_params(keys[2], HIDDEN, OUT_DIM * ATOM_SIZE)
    w_vh, b_vh = _noisy_linear_params(keys[3], HIDDEN, HIDDEN)
    w_v, b_v = _noisy_linear_params(keys[4], HIDDEN, ATOM_SIZE)

    # ---- repack for the kernel ----
    # feature layer
    w1_t = w1.T.astype(jnp.bfloat16)                         # (IN_DIM, 128)
    b1_r = b1.reshape(1, HIDDEN)

    # fused hidden layers: [adv_hidden | value_hidden] -> (128, 256)
    wh = jnp.concatenate([w_ah.T, w_vh.T], axis=1).astype(jnp.bfloat16)
    bh = jnp.concatenate([b_ah, b_vh]).reshape(1, 2 * HIDDEN)

    # fused advantage heads, each padded 51 -> 128 atoms (zero weight / zero bias).
    # One head per 128-lane group keeps the in-kernel softmax mask-free.
    w_a_t = w_a.T                                             # (128, OUT_DIM*ATOM_SIZE)
    wa = jnp.zeros((HIDDEN, OUT_DIM * ATOM_PAD), jnp.float32)
    ba = jnp.zeros((1, OUT_DIM * ATOM_PAD), jnp.float32)
    for a in range(OUT_DIM):
        wa = wa.at[:, a * ATOM_PAD:a * ATOM_PAD + ATOM_SIZE].set(
            w_a_t[:, a * ATOM_SIZE:(a + 1) * ATOM_SIZE])
        ba = ba.at[0, a * ATOM_PAD:a * ATOM_PAD + ATOM_SIZE].set(
            b_a[a * ATOM_SIZE:(a + 1) * ATOM_SIZE])
    wa = wa.astype(jnp.bfloat16)

    # value head padded 51 -> 128 atoms; padded bias = -1e30 so softmax ignores them
    wv = jnp.zeros((HIDDEN, ATOM_PAD), jnp.float32).at[:, :ATOM_SIZE].set(w_v.T)
    wv = wv.astype(jnp.bfloat16)
    bv = jnp.full((1, ATOM_PAD), NEG_PAD, jnp.float32).at[0, :ATOM_SIZE].set(b_v)

    # block-diagonal support matrix: S[a*128 + k, a] = support[k]; everything else 0,
    # so the final Q matmul is lane-dense and padded atoms contribute nothing.
    support = jnp.linspace(V_MIN, V_MAX, ATOM_SIZE, dtype=jnp.float32)
    s_mat = jnp.zeros((OUT_DIM * ATOM_PAD, ATOM_PAD), jnp.float32)
    for a in range(OUT_DIM):
        s_mat = s_mat.at[a * ATOM_PAD:a * ATOM_PAD + ATOM_SIZE, a].set(support)

    return (w1_t, b1_r, wh, bh, wa, ba, wv, bv, s_mat)


# ---------------- pure-JAX reference on the same packed params ----------------

def rainbow_reference(x, params):
    (w1, b1, wh, bh, wa, ba, wv, bv, s_mat) = params
    f32 = jnp.float32
    feat = jnp.maximum(x @ w1.astype(f32) + b1, 0.0)
    hid = jnp.maximum(feat @ wh.astype(f32) + bh, 0.0)
    adv_hid, val_hid = hid[:, :HIDDEN], hid[:, HIDDEN:]
    value = val_hid @ wv.astype(f32) + bv
    adv = (adv_hid @ wa.astype(f32) + ba).reshape(-1, OUT_DIM, ATOM_PAD)
    q_atoms = value[:, None, :] + adv - adv.mean(axis=1, keepdims=True)
    dist = jnp.maximum(jax.nn.softmax(q_atoms, axis=-1), 0.001)
    return (dist.reshape(-1, OUT_DIM * ATOM_PAD) @ s_mat)[:, :OUT_DIM]


if __name__ == "__main__":
    key = jax.random.PRNGKey(0)
    k_x, k_p = jax.random.split(key)

    x = jax.random.normal(k_x, (BATCH, IN_DIM), jnp.float32)
    params = build_params(k_p)

    q = jax.block_until_ready(rainbow_forward(x, params))

    assert q.shape == (BATCH, OUT_DIM)
    assert bool(jnp.all(jnp.isfinite(q)))

    # loose parity check vs f32 reference (bf16 weights + approx reciprocal in kernel)
    q_ref = rainbow_reference(x, params)
    err = float(jnp.max(jnp.abs(q - q_ref)))
    assert err < 0.1, f"max |q - q_ref| = {err}"

    print("KERNEL_OK")
</pallas_src>

<mosaic_0001>
module attributes {stable_mosaic.version = 11 : i64} {
  func.func @rainbow_kernel(%arg0: i32, %arg1: memref<256x32xf32, #tpu.memory_space<vmem>>, %arg2: memref<32x128xbf16, #tpu.memory_space<vmem>>, %arg3: memref<1x128xf32, #tpu.memory_space<vmem>>, %arg4: memref<128x256xbf16, #tpu.memory_space<vmem>>, %arg5: memref<1x256xf32, #tpu.memory_space<vmem>>, %arg6: memref<128x768xbf16, #tpu.memory_space<vmem>>, %arg7: memref<1x768xf32, #tpu.memory_space<vmem>>, %arg8: memref<128x128xbf16, #tpu.memory_space<vmem>>, %arg9: memref<1x128xf32, #tpu.memory_space<vmem>>, %arg10: memref<768x128xf32, #tpu.memory_space<vmem>>, %arg11: memref<256x128xf32, #tpu.memory_space<vmem>>) attributes {dimension_semantics = [#tpu.dimension_semantics<parallel>], iteration_bounds = array<i64: 2>, scalar_prefetch = 0 : i64, scratch_operands = 0 : i64, tpu.core_type = #tpu.core_type<tc>, window_params = [{transform_indices = @transform_0, window_bounds = array<i64: 256, 32>}, {pipeline_mode = #tpu.pipeline_mode<synchronous>, transform_indices = @transform_1, window_bounds = array<i64: 32, 128>}, {pipeline_mode = #tpu.pipeline_mode<synchronous>, transform_indices = @transform_2, window_bounds = array<i64: 1, 128>}, {pipeline_mode = #tpu.pipeline_mode<synchronous>, transform_indices = @transform_3, window_bounds = array<i64: 128, 256>}, {pipeline_mode = #tpu.pipeline_mode<synchronous>, transform_indices = @transform_4, window_bounds = array<i64: 1, 256>}, {pipeline_mode = #tpu.pipeline_mode<synchronous>, transform_indices = @transform_5, window_bounds = array<i64: 128, 768>}, {pipeline_mode = #tpu.pipeline_mode<synchronous>, transform_indices = @transform_6, window_bounds = array<i64: 1, 768>}, {pipeline_mode = #tpu.pipeline_mode<synchronous>, transform_indices = @transform_7, window_bounds = array<i64: 128, 128>}, {pipeline_mode = #tpu.pipeline_mode<synchronous>, transform_indices = @transform_8, window_bounds = array<i64: 1, 128>}, {pipeline_mode = #tpu.pipeline_mode<synchronous>, transform_indices = @transform_9, window_bounds = array<i64: 768, 128>}, {transform_indices = @transform_10, window_bounds = array<i64: 256, 128>}]} {
    %c0 = arith.constant 0 : index
    %c0_0 = arith.constant 0 : index
    %0 = vector.load %arg1[%c0, %c0_0] : memref<256x32xf32, #tpu.memory_space<vmem>>, vector<256x32xf32>
    %1 = arith.truncf %0 : vector<256x32xf32> to vector<256x32xbf16>
    %c0_1 = arith.constant 0 : index
    %c0_2 = arith.constant 0 : index
    %2 = vector.load %arg2[%c0_1, %c0_2] : memref<32x128xbf16, #tpu.memory_space<vmem>>, vector<32x128xbf16>
    %cst = arith.constant dense<0.000000e+00> : vector<256x128xf32>
    %3 = tpu.matmul %1, %2, %cst {dimension_numbers = #tpu.dot_dimension_numbers<[1], [0], [0], [1], [0, 0, 1, 1], [], []>} : vector<256x32xbf16>, vector<32x128xbf16>, vector<256x128xf32> -> vector<256x128xf32>
    %c0_3 = arith.constant 0 : index
    %c0_4 = arith.constant 0 : index
    %4 = vector.load %arg3[%c0_3, %c0_4] : memref<1x128xf32, #tpu.memory_space<vmem>>, vector<1x128xf32>
    %5 = vector.broadcast %4 : vector<1x128xf32> to vector<256x128xf32>
    %6 = arith.addf %3, %5 : vector<256x128xf32>
    %cst_5 = arith.constant 0.000000e+00 : f32
    %7 = vector.broadcast %cst_5 : f32 to vector<256x128xf32>
    %8 = arith.maximumf %6, %7 : vector<256x128xf32>
    %9 = arith.truncf %8 : vector<256x128xf32> to vector<256x128xbf16>
    %c0_6 = arith.constant 0 : index
    %c0_7 = arith.constant 0 : index
    %10 = vector.load %arg4[%c0_6, %c0_7] : memref<128x256xbf16, #tpu.memory_space<vmem>>, vector<128x256xbf16>
    %cst_8 = arith.constant dense<0.000000e+00> : vector<256x256xf32>
    %11 = tpu.matmul %9, %10, %cst_8 {dimension_numbers = #tpu.dot_dimension_numbers<[1], [0], [0], [1], [0, 0, 1, 1], [], []>} : vector<256x128xbf16>, vector<128x256xbf16>, vector<256x256xf32> -> vector<256x256xf32>
    %c0_9 = arith.constant 0 : index
    %c0_10 = arith.constant 0 : index
    %12 = vector.load %arg5[%c0_9, %c0_10] : memref<1x256xf32, #tpu.memory_space<vmem>>, vector<1x256xf32>
    %13 = vector.broadcast %12 : vector<1x256xf32> to vector<256x256xf32>
    %14 = arith.addf %11, %13 : vector<256x256xf32>
    %cst_11 = arith.constant 0.000000e+00 : f32
    %15 = vector.broadcast %cst_11 : f32 to vector<256x256xf32>
    %16 = arith.maximumf %14, %15 : vector<256x256xf32>
    %17 = vector.extract_strided_slice %16 {offsets = [0, 0], sizes = [256, 128], strides = [1, 1]} : vector<256x256xf32> to vector<256x128xf32>
    %18 = arith.truncf %17 : vector<256x128xf32> to vector<256x128xbf16>
    %19 = vector.extract_strided_slice %16 {offsets = [0, 128], sizes = [256, 128], strides = [1, 1]} : vector<256x256xf32> to vector<256x128xf32>
    %20 = arith.truncf %19 : vector<256x128xf32> to vector<256x128xbf16>
    %c0_12 = arith.constant 0 : index
    %c0_13 = arith.constant 0 : index
    %21 = vector.load %arg8[%c0_12, %c0_13] : memref<128x128xbf16, #tpu.memory_space<vmem>>, vector<128x128xbf16>
    %cst_14 = arith.constant dense<0.000000e+00> : vector<256x128xf32>
    %22 = tpu.matmul %20, %21, %cst_14 {dimension_numbers = #tpu.dot_dimension_numbers<[1], [0], [0], [1], [0, 0, 1, 1], [], []>} : vector<256x128xbf16>, vector<128x128xbf16>, vector<256x128xf32> -> vector<256x128xf32>
    %c0_15 = arith.constant 0 : index
    %c0_16 = arith.constant 0 : index
    %23 = vector.load %arg9[%c0_15, %c0_16] : memref<1x128xf32, #tpu.memory_space<vmem>>, vector<1x128xf32>
    %24 = vector.broadcast %23 : vector<1x128xf32> to vector<256x128xf32>
    %25 = arith.addf %22, %24 : vector<256x128xf32>
    %c0_17 = arith.constant 0 : index
    %c0_18 = arith.constant 0 : index
    %26 = vector.load %arg6[%c0_17, %c0_18] : memref<128x768xbf16, #tpu.memory_space<vmem>>, vector<128x768xbf16>
    %cst_19 = arith.constant dense<0.000000e+00> : vector<256x768xf32>
    %27 = tpu.matmul %18, %26, %cst_19 {dimension_numbers = #tpu.dot_dimension_numbers<[1], [0], [0], [1], [0, 0, 1, 1], [], []>} : vector<256x128xbf16>, vector<128x768xbf16>, vector<256x768xf32> -> vector<256x768xf32>
    %c0_20 = arith.constant 0 : index
    %c0_21 = arith.constant 0 : index
    %28 = vector.load %arg7[%c0_20, %c0_21] : memref<1x768xf32, #tpu.memory_space<vmem>>, vector<1x768xf32>
    %29 = vector.broadcast %28 : vector<1x768xf32> to vector<256x768xf32>
    %30 = arith.addf %27, %29 : vector<256x768xf32>
    %31 = vector.extract_strided_slice %30 {offsets = [0, 0], sizes = [256, 128], strides = [1, 1]} : vector<256x768xf32> to vector<256x128xf32>
    %32 = vector.extract_strided_slice %30 {offsets = [0, 128], sizes = [256, 128], strides = [1, 1]} : vector<256x768xf32> to vector<256x128xf32>
    %33 = arith.addf %31, %32 : vector<256x128xf32>
    %34 = vector.extract_strided_slice %30 {offsets = [0, 256], sizes = [256, 128], strides = [1, 1]} : vector<256x768xf32> to vector<256x128xf32>
    %35 = arith.addf %33, %34 : vector<256x128xf32>
    %36 = vector.extract_strided_slice %30 {offsets = [0, 384], sizes = [256, 128], strides = [1, 1]} : vector<256x768xf32> to vector<256x128xf32>
    %37 = arith.addf %35, %36 : vector<256x128xf32>
    %38 = vector.extract_strided_slice %30 {offsets = [0, 512], sizes = [256, 128], strides = [1, 1]} : vector<256x768xf32> to vector<256x128xf32>
    %39 = arith.addf %37, %38 : vector<256x128xf32>
    %40 = vector.extract_strided_slice %30 {offsets = [0, 640], sizes = [256, 128], strides = [1, 1]} : vector<256x768xf32> to vector<256x128xf32>
    %41 = arith.addf %39, %40 : vector<256x128xf32>
    %cst_22 = arith.constant 0.166666672 : f32
    %42 = vector.broadcast %cst_22 : f32 to vector<256x128xf32>
    %43 = arith.mulf %41, %42 : vector<256x128xf32>
    %44 = arith.subf %25, %43 : vector<256x128xf32>
    %45 = vector.extract_strided_slice %30 {offsets = [0, 0], sizes = [256, 128], strides = [1, 1]} : vector<256x768xf32> to vector<256x128xf32>
    %46 = arith.addf %44, %45 : vector<256x128xf32>
    %cst_23 = arith.constant dense<0xFF800000> : vector<256xf32>
    %47 = vector.multi_reduction <maximumf>, %46, %cst_23 [1] : vector<256x128xf32> to vector<256xf32>
    %48 = vector.shape_cast %47 : vector<256xf32> to vector<256x1xf32>
    %49 = vector.broadcast %48 : vector<256x1xf32> to vector<256x128xf32>
    %50 = arith.subf %46, %49 : vector<256x128xf32>
    %51 = math.exp %50 : vector<256x128xf32>
    %cst_24 = arith.constant dense<0.000000e+00> : vector<256xf32>
    %52 = vector.multi_reduction <add>, %51, %cst_24 [1] : vector<256x128xf32> to vector<256xf32>
    %53 = vector.shape_cast %52 : vector<256xf32> to vector<256x1xf32>
    %54 = tpu.reciprocal %53 {approx = true} : vector<256x1xf32> -> vector<256x1xf32>
    %55 = vector.broadcast %54 : vector<256x1xf32> to vector<256x128xf32>
    %56 = arith.mulf %51, %55 : vector<256x128xf32>
    %cst_25 = arith.constant 1.000000e-03 : f32
    %57 = vector.broadcast %cst_25 : f32 to vector<256x128xf32>
    %58 = arith.maximumf %56, %57 : vector<256x128xf32>
    %59 = vector.extract_strided_slice %30 {offsets = [0, 128], sizes = [256, 128], strides = [1, 1]} : vector<256x768xf32> to vector<256x128xf32>
    %60 = arith.addf %44, %59 : vector<256x128xf32>
    %cst_26 = arith.constant dense<0xFF800000> : vector<256xf32>
    %61 = vector.multi_reduction <maximumf>, %60, %cst_26 [1] : vector<256x128xf32> to vector<256xf32>
    %62 = vector.shape_cast %61 : vector<256xf32> to vector<256x1xf32>
    %63 = vector.broadcast %62 : vector<256x1xf32> to vector<256x128xf32>
    %64 = arith.subf %60, %63 : vector<256x128xf32>
    %65 = math.exp %64 : vector<256x128xf32>
    %cst_27 = arith.constant dense<0.000000e+00> : vector<256xf32>
    %66 = vector.multi_reduction <add>, %65, %cst_27 [1] : vector<256x128xf32> to vector<256xf32>
    %67 = vector.shape_cast %66 : vector<256xf32> to vector<256x1xf32>
    %68 = tpu.reciprocal %67 {approx = true} : vector<256x1xf32> -> vector<256x1xf32>
    %69 = vector.broadcast %68 : vector<256x1xf32> to vector<256x128xf32>
    %70 = arith.mulf %65, %69 : vector<256x128xf32>
    %cst_28 = arith.constant 1.000000e-03 : f32
    %71 = vector.broadcast %cst_28 : f32 to vector<256x128xf32>
    %72 = arith.maximumf %70, %71 : vector<256x128xf32>
    %73 = vector.extract_strided_slice %30 {offsets = [0, 256], sizes = [256, 128], strides = [1, 1]} : vector<256x768xf32> to vector<256x128xf32>
    %74 = arith.addf %44, %73 : vector<256x128xf32>
    %cst_29 = arith.constant dense<0xFF800000> : vector<256xf32>
    %75 = vector.multi_reduction <maximumf>, %74, %cst_29 [1] : vector<256x128xf32> to vector<256xf32>
    %76 = vector.shape_cast %75 : vector<256xf32> to vector<256x1xf32>
    %77 = vector.broadcast %76 : vector<256x1xf32> to vector<256x128xf32>
    %78 = arith.subf %74, %77 : vector<256x128xf32>
    %79 = math.exp %78 : vector<256x128xf32>
    %cst_30 = arith.constant dense<0.000000e+00> : vector<256xf32>
    %80 = vector.multi_reduction <add>, %79, %cst_30 [1] : vector<256x128xf32> to vector<256xf32>
    %81 = vector.shape_cast %80 : vector<256xf32> to vector<256x1xf32>
    %82 = tpu.reciprocal %81 {approx = true} : vector<256x1xf32> -> vector<256x1xf32>
    %83 = vector.broadcast %82 : vector<256x1xf32> to vector<256x128xf32>
    %84 = arith.mulf %79, %83 : vector<256x128xf32>
    %cst_31 = arith.constant 1.000000e-03 : f32
    %85 = vector.broadcast %cst_31 : f32 to vector<256x128xf32>
    %86 = arith.maximumf %84, %85 : vector<256x128xf32>
    %87 = vector.extract_strided_slice %30 {offsets = [0, 384], sizes = [256, 128], strides = [1, 1]} : vector<256x768xf32> to vector<256x128xf32>
    %88 = arith.addf %44, %87 : vector<256x128xf32>
    %cst_32 = arith.constant dense<0xFF800000> : vector<256xf32>
    %89 = vector.multi_reduction <maximumf>, %88, %cst_32 [1] : vector<256x128xf32> to vector<256xf32>
    %90 = vector.shape_cast %89 : vector<256xf32> to vector<256x1xf32>
    %91 = vector.broadcast %90 : vector<256x1xf32> to vector<256x128xf32>
    %92 = arith.subf %88, %91 : vector<256x128xf32>
    %93 = math.exp %92 : vector<256x128xf32>
    %cst_33 = arith.constant dense<0.000000e+00> : vector<256xf32>
    %94 = vector.multi_reduction <add>, %93, %cst_33 [1] : vector<256x128xf32> to vector<256xf32>
    %95 = vector.shape_cast %94 : vector<256xf32> to vector<256x1xf32>
    %96 = tpu.reciprocal %95 {approx = true} : vector<256x1xf32> -> vector<256x1xf32>
    %97 = vector.broadcast %96 : vector<256x1xf32> to vector<256x128xf32>
    %98 = arith.mulf %93, %97 : vector<256x128xf32>
    %cst_34 = arith.constant 1.000000e-03 : f32
    %99 = vector.broadcast %cst_34 : f32 to vector<256x128xf32>
    %100 = arith.maximumf %98, %99 : vector<256x128xf32>
    %101 = vector.extract_strided_slice %30 {offsets = [0, 512], sizes = [256, 128], strides = [1, 1]} : vector<256x768xf32> to vector<256x128xf32>
    %102 = arith.addf %44, %101 : vector<256x128xf32>
    %cst_35 = arith.constant dense<0xFF800000> : vector<256xf32>
    %103 = vector.multi_reduction <maximumf>, %102, %cst_35 [1] : vector<256x128xf32> to vector<256xf32>
    %104 = vector.shape_cast %103 : vector<256xf32> to vector<256x1xf32>
    %105 = vector.broadcast %104 : vector<256x1xf32> to vector<256x128xf32>
    %106 = arith.subf %102, %105 : vector<256x128xf32>
    %107 = math.exp %106 : vector<256x128xf32>
    %cst_36 = arith.constant dense<0.000000e+00> : vector<256xf32>
    %108 = vector.multi_reduction <add>, %107, %cst_36 [1] : vector<256x128xf32> to vector<256xf32>
    %109 = vector.shape_cast %108 : vector<256xf32> to vector<256x1xf32>
    %110 = tpu.reciprocal %109 {approx = true} : vector<256x1xf32> -> vector<256x1xf32>
    %111 = vector.broadcast %110 : vector<256x1xf32> to vector<256x128xf32>
    %112 = arith.mulf %107, %111 : vector<256x128xf32>
    %cst_37 = arith.constant 1.000000e-03 : f32
    %113 = vector.broadcast %cst_37 : f32 to vector<256x128xf32>
    %114 = arith.maximumf %112, %113 : vector<256x128xf32>
    %115 = vector.extract_strided_slice %30 {offsets = [0, 640], sizes = [256, 128], strides = [1, 1]} : vector<256x768xf32> to vector<256x128xf32>
    %116 = arith.addf %44, %115 : vector<256x128xf32>
    %cst_38 = arith.constant dense<0xFF800000> : vector<256xf32>
    %117 = vector.multi_reduction <maximumf>, %116, %cst_38 [1] : vector<256x128xf32> to vector<256xf32>
    %118 = vector.shape_cast %117 : vector<256xf32> to vector<256x1xf32>
    %119 = vector.broadcast %118 : vector<256x1xf32> to vector<256x128xf32>
    %120 = arith.subf %116, %119 : vector<256x128xf32>
    %121 = math.exp %120 : vector<256x128xf32>
    %cst_39 = arith.constant dense<0.000000e+00> : vector<256xf32>
    %122 = vector.multi_reduction <add>, %121, %cst_39 [1] : vector<256x128xf32> to vector<256xf32>
    %123 = vector.shape_cast %122 : vector<256xf32> to vector<256x1xf32>
    %124 = tpu.reciprocal %123 {approx = true} : vector<256x1xf32> -> vector<256x1xf32>
    %125 = vector.broadcast %124 : vector<256x1xf32> to vector<256x128xf32>
    %126 = arith.mulf %121, %125 : vector<256x128xf32>
    %cst_40 = arith.constant 1.000000e-03 : f32
    %127 = vector.broadcast %cst_40 : f32 to vector<256x128xf32>
    %128 = arith.maximumf %126, %127 : vector<256x128xf32>
    %129 = tpu.concatenate %58, %72, %86, %100, %114, %128 in 1 : vector<256x128xf32>, vector<256x128xf32>, vector<256x128xf32>, vector<256x128xf32>, vector<256x128xf32>, vector<256x128xf32> -> vector<256x768xf32>
    %c0_41 = arith.constant 0 : index
    %c0_42 = arith.constant 0 : index
    %130 = vector.load %arg10[%c0_41, %c0_42] : memref<768x128xf32, #tpu.memory_space<vmem>>, vector<768x128xf32>
    %cst_43 = arith.constant dense<0.000000e+00> : vector<256x128xf32>
    %131 = tpu.matmul %129, %130, %cst_43 {dimension_numbers = #tpu.dot_dimension_numbers<[1], [0], [0], [1], [0, 0, 1, 1], [], []>} : vector<256x768xf32>, vector<768x128xf32>, vector<256x128xf32> -> vector<256x128xf32>
    %c0_44 = arith.constant 0 : index
    %c0_45 = arith.constant 0 : index
    %132 = vector.load %arg11[%c0_44, %c0_45] : memref<256x128xf32, #tpu.memory_space<vmem>>, vector<256x128xf32>
    tpu.vector_store %arg11[%c0_44, %c0_45], %131 {strides = array<i32>} : memref<256x128xf32, #tpu.memory_space<vmem>>, vector<256x128xf32>,
    return
  }
  func.func @transform_0(%arg0: i32) -> (i32, i32) {
    %c0_i32 = arith.constant 0 : i32
    %c0_i32_0 = arith.constant 0 : i32
    return %arg0, %c0_i32 : i32, i32
  }
  func.func @transform_1(%arg0: i32) -> (i32, i32) {
    %c0_i32 = arith.constant 0 : i32
    %c0_i32_0 = arith.constant 0 : i32
    %c0_i32_1 = arith.constant 0 : i32
    return %c0_i32, %c0_i32_0 : i32, i32
  }
  func.func @transform_2(%arg0: i32) -> (i32, i32) {
    %c0_i32 = arith.constant 0 : i32
    %c0_i32_0 = arith.constant 0 : i32
    %c0_i32_1 = arith.constant 0 : i32
    return %c0_i32, %c0_i32_0 : i32, i32
  }
  func.func @transform_3(%arg0: i32) -> (i32, i32) {
    %c0_i32 = arith.constant 0 : i32
    %c0_i32_0 = arith.constant 0 : i32
    %c0_i32_1 = arith.constant 0 : i32
    return %c0_i32, %c0_i32_0 : i32, i32
  }
  func.func @transform_4(%arg0: i32) -> (i32, i32) {
    %c0_i32 = arith.constant 0 : i32
    %c0_i32_0 = arith.constant 0 : i32
    %c0_i32_1 = arith.constant 0 : i32
    return %c0_i32, %c0_i32_0 : i32, i32
  }
  func.func @transform_5(%arg0: i32) -> (i32, i32) {
    %c0_i32 = arith.constant 0 : i32
    %c0_i32_0 = arith.constant 0 : i32
    %c0_i32_1 = arith.constant 0 : i32
    return %c0_i32, %c0_i32_0 : i32, i32
  }
  func.func @transform_6(%arg0: i32) -> (i32, i32) {
    %c0_i32 = arith.constant 0 : i32
    %c0_i32_0 = arith.constant 0 : i32
    %c0_i32_1 = arith.constant 0 : i32
    return %c0_i32, %c0_i32_0 : i32, i32
  }
  func.func @transform_7(%arg0: i32) -> (i32, i32) {
    %c0_i32 = arith.constant 0 : i32
    %c0_i32_0 = arith.constant 0 : i32
    %c0_i32_1 = arith.constant 0 : i32
    return %c0_i32, %c0_i32_0 : i32, i32
  }
  func.func @transform_8(%arg0: i32) -> (i32, i32) {
    %c0_i32 = arith.constant 0 : i32
    %c0_i32_0 = arith.constant 0 : i32
    %c0_i32_1 = arith.constant 0 : i32
    return %c0_i32, %c0_i32_0 : i32, i32
  }
  func.func @transform_9(%arg0: i32) -> (i32, i32) {
    %c0_i32 = arith.constant 0 : i32
    %c0_i32_0 = arith.constant 0 : i32
    %c0_i32_1 = arith.constant 0 : i32
    return %c0_i32, %c0_i32_0 : i32, i32
  }
  func.func @transform_10(%arg0: i32) -> (i32, i32) {
    %c0_i32 = arith.constant 0 : i32
    %c0_i32_0 = arith.constant 0 : i32
    return %arg0, %c0_i32 : i32, i32
  }
}

</mosaic_0001>

<bundles_post_ra>
// kernel: tpu_custom_call.1
= control target key start
LH: loop header
LB: loop body
LE: loop exit
PB: predicated region body
PF: predicated region fallthrough
CT: control target
= control target key end

     0   :  { %15 = vsyncpa [#allocation3], 0  ;;  %s11361_s0 = inlined_call_operand.vmem [shape: f32[512,32], index: 0, kind: input, shape index: {}]   ;;  %s11362_s1 = inlined_call_operand.vmem [shape: bf16[32,128], index: 1, kind: input, shape index: {}]   ;;  %s11363_s2 = inlined_call_operand.vmem [shape: f32[1,128], index: 2, kind: input, shape index: {}]   ;;  %s11364_s3 = inlined_call_operand.vmem [shape: bf16[128,256], index: 3, kind: input, shape index: {}]   ;;  %s11365_s4 = inlined_call_operand.vmem [shape: f32[1,256], index: 4, kind: input, shape index: {}]   ;;  %s11366_s5 = inlined_call_operand.vmem [shape: bf16[128,768], index: 5, kind: input, shape index: {}]   ;;  %s11367_s6 = inlined_call_operand.vmem [shape: f32[1,768], index: 6, kind: input, shape index: {}]   ;;  %s11368_s7 = inlined_call_operand.vmem [shape: bf16[128,128], index: 7, kind: input, shape index: {}]   ;;  %s11369_s8 = inlined_call_operand.vmem [shape: f32[1,128], index: 8, kind: input, shape index: {}]   ;;  %s11370_s9 = inlined_call_operand.hbm [shape: f32[768,128], index: 9, kind: input, shape index: {}]   ;;  %s11371_s10 = inlined_call_operand.hbm [shape: f32[512,128], index: 10, kind: output, shape index: {}]  }
   0x1   :  { %16 = vsyncpa [#allocation4], 0 }
   0x2   :  { %18 = vsyncpa [#allocation4 + $0x1], 0  ;;  %s6618_s13 = smov 0   ;;  %s6620_s14 = smov 0  }
   0x3   :  { %s6622_s15 = smov 0   ;;  %s6624_s16 = smov 0  }
   0x4 LB: > { %s6639_s17 = sadd.s32 4294967295, %s6556_s16   ;;  %s5234_s18 = sadd.s32 4294967294, %s6556_s16   ;;  %s6556_s16 = sphi %s6624_s16, %s12926_s16   ;;  %s6552_s15 = sphi %s6622_s15, %s12925_s15   ;;  %s6548_s14 = sphi %s6620_s14, %s12924_s14   ;;  %s6544_s13 = sphi %s6618_s13, %s12923_s13  }
   0x5   : > { %s6643_s19 = sadd.s32 1, %s6556_s16   ;;  %s246_s20 = sadd.s32 1, %s6552_s15 }
   0x6   : > { %s243_s21 = ssub.s32 %s6556_s16, %s6643_s19  ;;  %p256_p0 = scmp.ne.s32.totalorder %s6552_s15, %s6548_s14 }
   0x7   : > { %p244_p1 = scmp.eq.s32.totalorder %s243_s21, 0  ;;  %p257_p2 = scmp.eq.s32.totalorder %s6639_s17, 1 }
   0x8   : > { %p262_p3 = scmp.ne.s32.totalorder %s6548_s14, %s6544_s13  ;;  %p263_p4 = scmp.eq.s32.totalorder %s5234_s18, 1 }
   0x9   : > { %s6654_s22 = scalar_select %p244_p1, %s6552_s15, %s246_s20  }
   0xa   : > { %p6656_p5 = por %p257_p2, %p256_p0  ;;  %p6660_p6 = por %p263_p4, %p262_p3 }
   0xb   : > { %p5235_p7 = scmp.ge.s32.totalorder %s6556_s16, 1  ;;  %p270_p8 = scmp.lt.s32.totalorder %s6556_s16, 3 }
   0xc   : > { %p5649_p9 = scmp.eq.s32.totalorder %s6639_s17, 0  ;;  %s305_s27 = sshll.u32 %s11370_s9, 4  ;;  %s306_s27 = int_to_ptr.hbm [resolvable:$true] %s305_s27 }
   0xd   : > { %p271_p10 = pnand %p5235_p7, %p270_p8  ;;  %s6558_s28 = smov [#allocation2]  }
   0xe   : > { %s307_s29 = sshll.u32 %s6558_s28, 4  ;;  %s6559_s30 = smov 128   ;;  %s308_s29 = int_to_ptr.vmem [resolvable:$true] %s307_s29 }
   0xf   : > { %p5641_p11 = pneg %p271_p10  ;;  %s6560_s11 = smov 8  }
  0x10   : > { %332 = sbr.rel (%p271_p10) target bundleno = 2279 (0x8e7), region = 60 }
  0x11   : > { %p5642_p12 = pnand %p5649_p9, %p5641_p11 }
  0x13   : > { %5644 = dma.hbm_to_vmem [thread:$0]  (!%p5642_p12), %s306_s27, 12288, %s308_s29, [#allocation3], %s6559_s30, %s6559_s30, %s6560_s11  }
  0x15   : > { %6535 = dma.done.wait (%p5649_p9), [#allocation3], 12288  }
  0x16   : > { %6537 = vsyncadd (%p5649_p9), [#allocation3], 4294955008  ;;  %s5241_s12 = sshll.u32 %s6639_s17, 5  ;;  %v5561_v0 = vld [vmem:[%s11362_s1 + $0x8] sm:$0xff]  ;;  %v5560_v1 = vld [vmem:[%s11362_s1] sm:$0xff]  ;;  %vm447_vm0 = vcmask 261120  }
  0x17   : > { %p372_p13 = scmp.lt.s32.totalorder %s5241_s12, 63  ;;  %502 = vmatpush.bf16.msra.mxu0 %v5561_v0  ;;  %v5325_v17 = vld [vmem:[%s11364_s3 + $0x70] sm:$0xf]  ;;  %v5577_v18 = vld [vmem:[%s11364_s3 + $0x74] sm:$0xf0]  ;;  %s368_s26 = sand.u32 1, %s6548_s14  }
  0x18   : > { %v5576_v19 = vld [vmem:[%s11364_s3 + $0x74] sm:$0xf]  ;;  %v5326_v20 = vor.u32 %v5577_v18, %v5325_v17  ;;  %v5327_v21 = vld [vmem:[%s11364_s3 + $0x78] sm:$0xf0]  ;;  %v5317_v26 = vld [vmem:[%s11364_s3 + $0x60] sm:$0xf] }
  0x19   : > { %s12928_s12 = smov (!%p372_p13, %s5241_s12), 63  ;;  %v5330_v22 = vor.u32 %v5576_v19, %v5327_v21  ;;  %v5575_v27 = vld [vmem:[%s11364_s3 + $0x64] sm:$0xf0]  ;;  %v5574_v28 = vld [vmem:[%s11364_s3 + $0x64] sm:$0xf]  ;;  %s5240_s28 = sshll.u32 %s368_s26, 8 }
  0x1a   : > { %s5242_s18 = sshll.u32 %s12928_s12, 3  ;;  %735 = vmatpush.bf16.msra.mxu1 %v5326_v20  ;;  %v5318_v29 = vor.u32 %v5575_v27, %v5317_v26  ;;  %v5319_v30 = vld [vmem:[%s11364_s3 + $0x68] sm:$0xf0]  ;;  %v5309_v32 = vld [vmem:[%s11364_s3 + $0x50] sm:$0xf]  ;;  %s11088_s27 = scalar_lea.vmem [#allocation5], %s5240_s28 }
  0x1b   : > { %s6680_s25 = scalar_lea.vmem %s11361_s0, %s5242_s18  ;;  %503 = vmatpush.bf16.msra.mxu0 %v5560_v1  ;;  %824 = vmatpush.bf16.msra.mxu2 %v5330_v22  ;;  %v5322_v31 = vor.u32 %v5574_v28, %v5319_v30  ;;  %v5573_v33 = vld [vmem:[%s11364_s3 + $0x54] sm:$0xf0]  ;;  %v5572_v34 = vld [vmem:[%s11364_s3 + $0x54] sm:$0xf]  ;;  %v5311_v36 = vld [vmem:[%s11364_s3 + $0x58] sm:$0xf0] }
  0x1c   : > { %v379_v2 = vld [vmem:[%s6680_s25] sm:$0xff]  ;;  %v380_v3 = vld [vmem:[%s6680_s25 + $0x8] sm:$0xff]  ;;  %v381_v5 = vld [vmem:[%s6680_s25 + $0x10] sm:$0xff]  ;;  %v5310_v35 = vor.u32 %v5573_v33, %v5309_v32  ;;  %v5314_v37 = vor.u32 %v5572_v34, %v5311_v36  ;;  %s5634_s29 = sshll.u32 %s6639_s17, 8  ;;  %s5157_s18 = sshll.u32 %s11088_s27, 4  ;;  %s5158_s18 = int_to_ptr.vmem [resolvable:$true] %s5157_s18 }
  0x1d   : > { %v411_v4 = vpack.c.bf16 %v380_v3, %v379_v2  ;;  %v382_v6 = vld [vmem:[%s6680_s25 + $0x18] sm:$0xff]  ;;  %v383_v8 = vld [vmem:[%s6680_s25 + $0x20] sm:$0xff]  ;;  %v384_v9 = vld [vmem:[%s6680_s25 + $0x28] sm:$0xff]  ;;  %s5156_s12 = scalar_lea.hbm %s11371_s10, %s5634_s29  ;;  %s5145_s17 = scalar_lea.sflag [#allocation4], %s368_s26 }
  0x1e   : > { %v412_v7 = vpack.c.bf16 %v382_v6, %v381_v5  ;;  %v413_v10 = vpack.c.bf16 %v384_v9, %v383_v8  ;;  %v385_v11 = vld [vmem:[%s6680_s25 + $0x30] sm:$0xff]  ;;  %v386_v12 = vld [vmem:[%s6680_s25 + $0x38] sm:$0xff]  ;;  %v387_v14 = vld [vmem:[%s6680_s25 + $0x40] sm:$0xff]  ;;  %736 = vmatpush.bf16.msra.mxu1 %v5318_v29  ;;  %s6510_s30 = scalar_lea.hbm %s11371_s10, 512 }
  0x1f   : > { %5251 = vmatmul.msk.bf16.vlgmr.msra.gmra.mxu0 %vm447_vm0, %v411_v4  ;;  %v414_v13 = vpack.c.bf16 %v386_v12, %v385_v11  ;;  %v388_v15 = vld [vmem:[%s6680_s25 + $0x48] sm:$0xff]  ;;  %v389_v23 = vld [vmem:[%s6680_s25 + $0x50] sm:$0xff]  ;;  %v390_v24 = vld [vmem:[%s6680_s25 + $0x58] sm:$0xff]  ;;  %825 = vmatpush.bf16.msra.mxu2 %v5322_v31 }
  0x20   : > { %v415_v16 = vpack.c.bf16 %v388_v15, %v387_v14  ;;  %v416_v25 = vpack.c.bf16 %v390_v24, %v389_v23  ;;  %v5301_v38 = vld [vmem:[%s11364_s3 + $0x40] sm:$0xf]  ;;  %v5571_v39 = vld [vmem:[%s11364_s3 + $0x44] sm:$0xf0]  ;;  %v5570_v40 = vld [vmem:[%s11364_s3 + $0x44] sm:$0xf] }
  0x21   : > { %v5303_v41 = vld [vmem:[%s11364_s3 + $0x48] sm:$0xf0]  ;;  %v5302_v42 = vor.u32 %v5571_v39, %v5301_v38  ;;  %v391_v44 = vld [vmem:[%s6680_s25 + $0x60] sm:$0xff]  ;;  %v5293_v46 = vld [vmem:[%s11364_s3 + $0x30] sm:$0xf] }
  0x22   : > { %737 = vmatpush.bf16.msra.mxu1 %v5310_v35  ;;  %v5306_v43 = vor.u32 %v5570_v40, %v5303_v41  ;;  %v392_v45 = vld [vmem:[%s6680_s25 + $0x68] sm:$0xff]  ;;  %v5569_v47 = vld [vmem:[%s11364_s3 + $0x34] sm:$0xf0]  ;;  %v5568_v48 = vld [vmem:[%s11364_s3 + $0x34] sm:$0xf] }
  0x23   : > { %826 = vmatpush.bf16.msra.mxu2 %v5314_v37  ;;  %v5294_v49 = vor.u32 %v5569_v47, %v5293_v46  ;;  %v5295_v50 = vld [vmem:[%s11364_s3 + $0x38] sm:$0xf0]  ;;  %v417_v51 = vpack.c.bf16 %v392_v45, %v391_v44  ;;  %v5285_v53 = vld [vmem:[%s11364_s3 + $0x20] sm:$0xf]  ;;  %v5567_v54 = vld [vmem:[%s11364_s3 + $0x24] sm:$0xf0] }
  0x24   : > { %v5298_v52 = vor.u32 %v5568_v48, %v5295_v50  ;;  %v5566_v55 = vld [vmem:[%s11364_s3 + $0x24] sm:$0xf]  ;;  %v5286_v56 = vor.u32 %v5567_v54, %v5285_v53  ;;  %v5287_v57 = vld [vmem:[%s11364_s3 + $0x28] sm:$0xf0]  ;;  %v5277_v59 = vld [vmem:[%s11364_s3 + $0x10] sm:$0xf] }
  0x25   : > { %v5290_v58 = vor.u32 %v5566_v55, %v5287_v57  ;;  %v5565_v60 = vld [vmem:[%s11364_s3 + $0x14] sm:$0xf0]  ;;  %v5564_v61 = vld [vmem:[%s11364_s3 + $0x14] sm:$0xf]  ;;  %v5279_v63 = vld [vmem:[%s11364_s3 + $0x18] sm:$0xf0] }
  0x26   : > { %738 = vmatpush.bf16.msra.mxu1 %v5302_v42  ;;  %v5278_v62 = vor.u32 %v5565_v60, %v5277_v59  ;;  %v5282_v0 = vor.u32 %v5564_v61, %v5279_v63  ;;  %v5269_v1 = vld [vmem:[%s11364_s3] sm:$0xf]  ;;  %v5563_v2 = vld [vmem:[%s11364_s3 + $0x4] sm:$0xf0]  ;;  %v5562_v3 = vld [vmem:[%s11364_s3 + $0x4] sm:$0xf] }
  0x27   : > { %827 = vmatpush.bf16.msra.mxu2 %v5306_v43  ;;  %v5270_v4 = vor.u32 %v5563_v2, %v5269_v1  ;;  %v5271_v5 = vld [vmem:[%s11364_s3 + $0x8] sm:$0xf0]  ;;  %v5631_v8 = vld [vmem:[%s11366_s5 + $0x164] sm:$0xf0]  ;;  %v393_v9 = vld [vmem:[%s6680_s25 + $0x70] sm:$0xff] }
  0x28   : > { %v5274_v6 = vor.u32 %v5562_v3, %v5271_v5  ;;  %v5535_v14 = vld [vmem:[%s11366_s5 + $0x168] sm:$0xf0]  ;;  %v6825_v20 = vld [vmem:[%s11363_s2] ss:$0 sm:$0xff]  ;;  %v5625_v27 = vld [vmem:[%s11366_s5 + $0x134] sm:$0xf0] }
  0x29   : > { %v396_v17 = vld [vmem:[%s6680_s25 + $0x88] sm:$0xff]  ;;  %v5509_v26 = vld [vmem:[%s11366_s5 + $0x120] sm:$0xf]  ;;  %v397_v28 = vld [vmem:[%s6680_s25 + $0x90] sm:$0xff] }
  0x2a   : > { %739 = vmatpush.bf16.msra.mxu1 %v5294_v49  ;;  %v398_v29 = vld [vmem:[%s6680_s25 + $0x98] sm:$0xff]  ;;  %v5510_v30 = vor.u32 %v5625_v27, %v5509_v26  ;;  %v5622_v33 = vld [vmem:[%s11366_s5 + $0x124] sm:$0xf]  ;;  %v400_v43 = vld [vmem:[%s6680_s25 + $0xa8] sm:$0xff] }
  0x2b   : > { %828 = vmatpush.bf16.msra.mxu2 %v5298_v52  ;;  %v420_v32 = vpack.c.bf16 %v398_v29, %v397_v28  ;;  %v5511_v34 = vld [vmem:[%s11366_s5 + $0x138] sm:$0xf0]  ;;  %v399_v42 = vld [vmem:[%s6680_s25 + $0xa0] sm:$0xff]  ;;  %v5485_v52 = vld [vmem:[%s11366_s5 + $0xf0] sm:$0xf] }
  0x2c   : > { %v5514_v36 = vor.u32 %v5622_v33, %v5511_v34  ;;  %v421_v45 = vpack.c.bf16 %v400_v43, %v399_v42  ;;  %v5619_v53 = vld [vmem:[%s11366_s5 + $0x104] sm:$0xf0]  ;;  %v401_v54 = vld [vmem:[%s6680_s25 + $0xb0] sm:$0xff]  ;;  %v402_v55 = vld [vmem:[%s6680_s25 + $0xb8] sm:$0xff] }
  0x2d   : > { %v5616_v59 = vld [vmem:[%s11366_s5 + $0xf4] sm:$0xf]  ;;  %v5487_v60 = vld [vmem:[%s11366_s5 + $0x108] sm:$0xf0]  ;;  %v5437_v42 = vld [vmem:[%s11366_s5 + $0x90] sm:$0xf] }
  0x2e   : > { %740 = vmatpush.bf16.msra.mxu1 %v5286_v56  ;;  %v5486_v56 = vor.u32 %v5619_v53, %v5485_v52  ;;  %v404_v5 = vld [vmem:[%s6680_s25 + $0xc8] sm:$0xff]  ;;  %v5601_v52 = vld [vmem:[%s11366_s5 + $0x74] sm:$0xf0] }
  0x2f   : > { %5252 = vmatmul.msk.bf16.gmra.mxu0 %vm447_vm0, %v412_v7  ;;  %829 = vmatpush.bf16.msra.mxu2 %v5290_v58  ;;  %v5533_v7 = vld [vmem:[%s11366_s5 + $0x150] sm:$0xf]  ;;  %v422_v58 = vpack.c.bf16 %v402_v55, %v401_v54  ;;  %v5607_v43 = vld [vmem:[%s11366_s5 + $0xa4] sm:$0xf0]  ;;  %v5604_v55 = vld [vmem:[%s11366_s5 + $0x94] sm:$0xf] }
  0x30   : > { %v5534_v11 = vor.u32 %v5631_v8, %v5533_v7 }
  0x32   : > { %741 = vmatpush.bf16.msra.mxu1 %v5278_v62  ;;  %1468 = vmatpush.bf16.msrb.mxu0 %v5534_v11  ;;  %v5490_v62 = vor.u32 %v5616_v59, %v5487_v60  ;;  %v5581_v59 = vld [vmem:[%s11368_s7 + $0x18] sm:$0xff]  ;;  %v5389_v60 = vld [vmem:[%s11366_s5 + $0x30] sm:$0xf] }
  0x33   : > { %830 = vmatpush.bf16.msra.mxu2 %v5282_v0 }
  0x36   : > { %742 = vmatpush.bf16.msra.mxu1 %v5270_v4  ;;  %1469 = vmatpush.bf16.msrb.mxu0 %v5510_v30  ;;  %v403_v4 = vld [vmem:[%s6680_s25 + $0xc0] sm:$0xff] }
  0x37   : > { %831 = vmatpush.bf16.msra.mxu2 %v5274_v6  ;;  %v423_v7 = vpack.c.bf16 %v404_v5, %v403_v4  ;;  %v5579_v5 = vld [vmem:[%s11368_s7 + $0x8] sm:$0xff] }
  0x3a   : > { %1470 = vmatpush.bf16.msrb.mxu0 %v5486_v56  ;;  %v5439_v56 = vld [vmem:[%s11366_s5 + $0xa8] sm:$0xf0] }
  0x3f   : > { %5253 = vmatmul.msk.bf16.gmra.mxu0 %vm447_vm0, %v413_v10  ;;  %v394_v10 = vld [vmem:[%s6680_s25 + $0x78] sm:$0xff] }
  0x40   : > { %v418_v12 = vpack.c.bf16 %v394_v10, %v393_v9 }
  0x4f   : > { %5254 = vmatmul.msk.bf16.gmra.mxu0 %vm447_vm0, %v414_v13  ;;  %v5628_v13 = vld [vmem:[%s11366_s5 + $0x154] sm:$0xf] }
  0x50   : > { %v5538_v15 = vor.u32 %v5628_v13, %v5535_v14  ;;  %v5461_v14 = vld [vmem:[%s11366_s5 + $0xc0] sm:$0xf] }
  0x52   : > { %1557 = vmatpush.bf16.msrb.mxu1 %v5538_v15  ;;  %v5613_v15 = vld [vmem:[%s11366_s5 + $0xd4] sm:$0xf0] }
  0x56   : > { %1558 = vmatpush.bf16.msrb.mxu1 %v5514_v36  ;;  %v5585_v36 = vld [vmem:[%s11368_s7 + $0x38] sm:$0xff] }
  0x57   : > { %1077 = vmatpush.bf16.msra.mxu3 %v5585_v36 }
  0x5a   : > { %1559 = vmatpush.bf16.msrb.mxu1 %v5490_v62 }
  0x5f   : > { %5255 = vmatmul.msk.bf16.gmra.mxu0 %vm447_vm0, %v415_v16  ;;  %v395_v16 = vld [vmem:[%s6680_s25 + $0x80] sm:$0xff] }
  0x60   : > { %v419_v18 = vpack.c.bf16 %v396_v17, %v395_v16  ;;  %v405_v16 = vld [vmem:[%s6680_s25 + $0xd0] sm:$0xff]  ;;  %v406_v17 = vld [vmem:[%s6680_s25 + $0xd8] sm:$0xff] }
  0x6f   : > { %5256 = vmatmul.msk.bf16.gmra.mxu0 %vm447_vm0, %v416_v25 }
  0x7f   : > { %5257 = vmatmul.msk.bf16.gmra.mxu0 %vm447_vm0, %v417_v51 }
  0x8f   : > { %5258 = vmatmul.msk.bf16.gmra.mxu0 %vm447_vm0, %v418_v12 }
  0x9c   : > { %v505_v19 = vpop.f32.mrf.mxu0 }
  0x9d   : > { %v506_v21 = vadd.f32 %v6825_v20, %v505_v19 }
  0x9f   : > { %5259 = vmatmul.msk.bf16.gmra.mxu0 %vm447_vm0, %v419_v18  ;;  %v585_v24 = vmax.f32 %v506_v21, 0.0  ;;  %v5462_v18 = vor.u32 %v5613_v15, %v5461_v14  ;;  %v424_v21 = vpack.c.bf16 %v406_v17, %v405_v16  ;;  %v649_v17 = vld [vmem:[%s11365_s4] sm:$0x3] }
  0xa1   : > { %1471 = vmatpush.bf16.msrb.mxu0 %v5462_v18 }
  0xa4   : > { %v507_v22 = vpop.f32.mrf.mxu0 }
  0xa5   : > { %v508_v23 = vadd.f32 %v6825_v20, %v507_v22  ;;  %v5610_v22 = vld [vmem:[%s11366_s5 + $0xc4] sm:$0xf] }
  0xa7   : > { %v586_v25 = vmax.f32 %v508_v23, 0.0  ;;  %v5463_v23 = vld [vmem:[%s11366_s5 + $0xd8] sm:$0xf0] }
  0xa9   : > { %v617_v31 = vpack.c.bf16 %v586_v25, %v585_v24  ;;  %v5466_v25 = vor.u32 %v5610_v22, %v5463_v23  ;;  %v5598_v22 = vld [vmem:[%s11366_s5 + $0x64] sm:$0xf]  ;;  %v5415_v23 = vld [vmem:[%s11366_s5 + $0x78] sm:$0xf0] }
  0xab   : > { %743 = vmatmul.bf16.vlgmr.msra.gmra.mxu1 %v617_v31  ;;  %832 = vmatmul.bf16.vlgmr.msra.gmra.mxu2 %v617_v31  ;;  %v407_v31 = vld [vmem:[%s6680_s25 + $0xe0] sm:$0xff] }
  0xac   : > { %v510_v35 = vpop.f32.mrf.mxu0  ;;  %1560 = vmatpush.bf16.msrb.mxu1 %v5466_v25  ;;  %v5418_v25 = vor.u32 %v5598_v22, %v5415_v23 }
  0xad   : > { %v511_v37 = vadd.f32 %v6825_v20, %v510_v35 }
  0xaf   : > { %5260 = vmatmul.msk.bf16.gmra.mxu0 %vm447_vm0, %v420_v32  ;;  %v587_v40 = vmax.f32 %v511_v37, 0.0  ;;  %v408_v32 = vld [vmem:[%s6680_s25 + $0xe8] sm:$0xff]  ;;  %v5584_v37 = vld [vmem:[%s11368_s7 + $0x30] sm:$0xff] }
  0xb0   : > { %v425_v34 = vpack.c.bf16 %v408_v32, %v407_v31  ;;  %1078 = vmatpush.bf16.msra.mxu3 %v5584_v37 }
  0xb4   : > { %v512_v38 = vpop.f32.mrf.mxu0 }
  0xb5   : > { %v513_v39 = vadd.f32 %v6825_v20, %v512_v38 }
  0xb7   : > { %v588_v41 = vmax.f32 %v513_v39, 0.0 }
  0xb9   : > { %v618_v44 = vpack.c.bf16 %v588_v41, %v587_v40  ;;  %v5583_v40 = vld [vmem:[%s11368_s7 + $0x28] sm:$0xff] }
  0xba   : > { %1079 = vmatpush.bf16.msra.mxu3 %v5583_v40 }
  0xbb   : > { %748 = vmatmul.bf16.gmra.mxu1 %v618_v44  ;;  %837 = vmatmul.bf16.gmra.mxu2 %v618_v44  ;;  %v5438_v44 = vor.u32 %v5607_v43, %v5437_v42 }
  0xbc   : > { %v515_v46 = vpop.f32.mrf.mxu0 }
  0xbd   : > { %v516_v47 = vadd.f32 %v6825_v20, %v515_v46  ;;  %1472 = vmatpush.bf16.msrb.mxu0 %v5438_v44 }
  0xbf   : > { %5261 = vmatmul.msk.bf16.gmra.mxu0 %vm447_vm0, %v421_v45  ;;  %v589_v50 = vmax.f32 %v516_v47, 0.0  ;;  %v409_v47 = vld [vmem:[%s6680_s25 + $0xf0] sm:$0xff] }
  0xc4   : > { %v517_v48 = vpop.f32.mrf.mxu0 }
  0xc5   : > { %v518_v49 = vadd.f32 %v6825_v20, %v517_v48  ;;  %v410_v48 = vld [vmem:[%s6680_s25 + $0xf8] sm:$0xff]  ;;  %s5159_s25 = sshll.u32 %s5156_s12, 4  ;;  %s5160_s25 = int_to_ptr.hbm [resolvable:$true] %s5159_s25 }
  0xc6   : > { %v426_v54 = vpack.c.bf16 %v410_v48, %v409_v47  ;;  %s6504_s20 = sshra.s32 %s5160_s25, 4  ;;  %s6505_s20 = int_to_ptr.hbm [resolvable:$true] %s6504_s20 }
  0xc7   : > { %v590_v51 = vmax.f32 %v518_v49, 0.0  ;;  %v5582_v49 = vld [vmem:[%s11368_s7 + $0x20] sm:$0xff]  ;;  %s6506_s21 = scalar_lea.hbm %s6505_s20, 256  ;;  %p6511_p3 = scmp.lt.s32.totalorder %s6505_s20, %s11371_s10 }
  0xc8   : > { %1080 = vmatpush.bf16.msra.mxu3 %v5582_v49  ;;  %p6507_p0 = scmp.ne.s32.totalorder %s6505_s20, %s6506_s21  ;;  %p6512_p4 = scmp.lt.s32.totalorder %s6510_s30, %s6506_s21 }
  0xc9   : > { %v619_v57 = vpack.c.bf16 %v590_v51, %v589_v50  ;;  %v5413_v51 = vld [vmem:[%s11366_s5 + $0x60] sm:$0xf] }
  0xca   : > { %v5414_v53 = vor.u32 %v5601_v52, %v5413_v51  ;;  %p6508_p1 = pnand %p6507_p0, %p6656_p5  ;;  %p6513_p7 = por %p6512_p4, %p6511_p3 }
  0xcb   : > { %753 = vmatmul.bf16.gmra.mxu1 %v619_v57  ;;  %842 = vmatmul.bf16.gmra.mxu2 %v619_v57 }
  0xcc   : > { %v520_v61 = vpop.f32.mrf.mxu0  ;;  %1473 = vmatpush.bf16.msrb.mxu0 %v5414_v53  ;;  %1081 = vmatpush.bf16.msra.mxu3 %v5581_v59  ;;  %p6509_p2 = pneg %p6508_p1 }
  0xcd   : > { %v521_v63 = vadd.f32 %v6825_v20, %v520_v61  ;;  %v5595_v61 = vld [vmem:[%s11366_s5 + $0x44] sm:$0xf0] }
  0xce   : > { %v5390_v62 = vor.u32 %v5595_v61, %v5389_v60  ;;  %p6514_p8 = pnand %p6513_p7, %p6509_p2 }
  0xcf   : > { %5262 = vmatmul.msk.bf16.gmra.mxu0 %vm447_vm0, %v422_v58  ;;  %v591_v2 = vmax.f32 %v521_v63, 0.0  ;;  %v5442_v58 = vor.u32 %v5604_v55, %v5439_v56  ;;  %v5580_v63 = vld [vmem:[%s11368_s7 + $0x10] sm:$0xff] }
  0xd0   : > { %1474 = vmatpush.bf16.msrb.mxu0 %v5390_v62  ;;  %1082 = vmatpush.bf16.msra.mxu3 %v5580_v63 }
  0xd1   : > { %1561 = vmatpush.bf16.msrb.mxu1 %v5442_v58 }
  0xd4   : > { %v522_v0 = vpop.f32.mrf.mxu0  ;;  %1083 = vmatpush.bf16.msra.mxu3 %v5579_v5  ;;  %v5391_v5 = vld [vmem:[%s11366_s5 + $0x48] sm:$0xf0] }
  0xd5   : > { %v523_v1 = vadd.f32 %v6825_v20, %v522_v0  ;;  %v5365_v0 = vld [vmem:[%s11366_s5] sm:$0xf]  ;;  %1562 = vmatpush.bf16.msrb.mxu1 %v5418_v25 }
  0xd7   : > { %v592_v3 = vmax.f32 %v523_v1, 0.0  ;;  %v5589_v1 = vld [vmem:[%s11366_s5 + $0x14] sm:$0xf0] }
  0xd9   : > { %v620_v6 = vpack.c.bf16 %v592_v3, %v591_v2  ;;  %v5366_v2 = vor.u32 %v5589_v1, %v5365_v0 }
  0xdb   : > { %758 = vmatmul.bf16.gmra.mxu1 %v620_v6  ;;  %847 = vmatmul.bf16.gmra.mxu2 %v620_v6 }
  0xdc   : > { %v525_v8 = vpop.f32.mrf.mxu0  ;;  %1475 = vmatpush.bf16.msrb.mxu0 %v5366_v2 }
  0xdd   : > { %v526_v9 = vadd.f32 %v6825_v20, %v525_v8 }
  0xdf   : > { %5263 = vmatmul.msk.bf16.gmra.mxu0 %vm447_vm0, %v423_v7  ;;  %v593_v12 = vmax.f32 %v526_v9, 0.0  ;;  %v5578_v9 = vld [vmem:[%s11368_s7] sm:$0xff] }
  0xe0   : > { %1084 = vmatpush.bf16.msra.mxu3 %v5578_v9 }
  0xe4   : > { %v527_v10 = vpop.f32.mrf.mxu0 }
  0xe5   : > { %v528_v11 = vadd.f32 %v6825_v20, %v527_v10 }
  0xe7   : > { %v594_v13 = vmax.f32 %v528_v11, 0.0 }
  0xe9   : > { %v621_v19 = vpack.c.bf16 %v594_v13, %v593_v12 }
  0xeb   : > { %763 = vmatmul.bf16.gmra.mxu1 %v621_v19  ;;  %852 = vmatmul.bf16.gmra.mxu2 %v621_v19 }
  0xec   : > { %v530_v24 = vpop.f32.mrf.mxu0 }
  0xed   : > { %v531_v26 = vadd.f32 %v6825_v20, %v530_v24 }
  0xef   : > { %5264 = vmatmul.msk.bf16.gmra.mxu0 %vm447_vm0, %v424_v21  ;;  %v595_v29 = vmax.f32 %v531_v26, 0.0  ;;  %v6960_v21 = vperm.slane %v649_v17, 0 }
  0xf4   : > { %v532_v27 = vpop.f32.mrf.mxu0 }
  0xf5   : > { %v533_v28 = vadd.f32 %v6825_v20, %v532_v27 }
  0xf7   : > { %v596_v30 = vmax.f32 %v533_v28, 0.0 }
  0xf9   : > { %v622_v33 = vpack.c.bf16 %v596_v30, %v595_v29  ;;  %v6969_v29 = vperm.slane %v649_v17, 1 }
  0xfb   : > { %768 = vmatmul.bf16.gmra.mxu1 %v622_v33  ;;  %857 = vmatmul.bf16.gmra.mxu2 %v622_v33 }
  0xfc   : > { %v535_v35 = vpop.f32.mrf.mxu0 }
  0xfd   : > { %v536_v38 = vadd.f32 %v6825_v20, %v535_v35 }
  0xff   : > { %5265 = vmatmul.msk.bf16.gmra.mxu0 %vm447_vm0, %v425_v34  ;;  %v597_v45 = vmax.f32 %v536_v38, 0.0 }
 0x104   : > { %v537_v39 = vpop.f32.mrf.mxu0 }
 0x105   : > { %v538_v41 = vadd.f32 %v6825_v20, %v537_v39 }
 0x107   : > { %v598_v46 = vmax.f32 %v538_v41, 0.0 }
 0x109   : > { %v623_v50 = vpack.c.bf16 %v598_v46, %v597_v45 }
 0x10b   : > { %773 = vmatmul.bf16.gmra.mxu1 %v623_v50  ;;  %862 = vmatmul.bf16.gmra.mxu2 %v623_v50 }
 0x10c   : > { %v540_v57 = vpop.f32.mrf.mxu0 }
 0x10d   : > { %v541_v3 = vadd.f32 %v6825_v20, %v540_v57 }
 0x10f   : > { %5266 = vmatmul.msk.bf16.gmra.mxu0 %vm447_vm0, %v426_v54  ;;  %v599_v7 = vmax.f32 %v541_v3, 0.0 }
 0x114   : > { %v542_v4 = vpop.f32.mrf.mxu0 }
 0x115   : > { %v543_v6 = vadd.f32 %v6825_v20, %v542_v4  ;;  %v5592_v4 = vld [vmem:[%s11366_s5 + $0x34] sm:$0xf] }
 0x117   : > { %v600_v8 = vmax.f32 %v543_v6, 0.0 }
 0x119   : > { %v624_v10 = vpack.c.bf16 %v600_v8, %v599_v7  ;;  %v5394_v7 = vor.u32 %v5592_v4, %v5391_v5  ;;  %v5493_v4 = vld [vmem:[%s11366_s5 + $0xf8] sm:$0xf]  ;;  %v5620_v5 = vld [vmem:[%s11366_s5 + $0x10c] sm:$0xf0] }
 0x11b   : > { %778 = vmatmul.bf16.gmra.mxu1 %v624_v10  ;;  %867 = vmatmul.bf16.gmra.mxu2 %v624_v10 }
 0x11c   : > { %v545_v11 = vpop.f32.mrf.mxu0  ;;  %1563 = vmatpush.bf16.msrb.mxu1 %v5394_v7 }
 0x11d   : > { %v546_v12 = vadd.f32 %v6825_v20, %v545_v11 }
 0x11f   : > { %v601_v15 = vmax.f32 %v546_v12, 0.0 }
 0x124   : > { %v547_v13 = vpop.f32.mrf.mxu0 }
 0x125   : > { %v548_v14 = vadd.f32 %v6825_v20, %v547_v13 }
 0x127   : > { %v602_v16 = vmax.f32 %v548_v14, 0.0 }
 0x128   : > { %v744_v18 = vpop.f32.mrf.mxu1 }
 0x129   : > { %v625_v19 = vpack.c.bf16 %v602_v16, %v601_v15  ;;  %v745_v27 = vadd.f32 %v744_v18, %v6960_v21 }
 0x12b   : > { %783 = vmatmul.bf16.gmra.mxu1 %v625_v19  ;;  %872 = vmatmul.bf16.gmra.mxu2 %v625_v19  ;;  %v913_v31 = vmax.f32 %v745_v27, 0.0 }
 0x12c   : > { %v550_v24 = vpop.f32.mrf.mxu0 }
 0x12d   : > { %v551_v32 = vadd.f32 %v6825_v20, %v550_v24 }
 0x12e   : > { %v833_v26 = vpop.f32.mrf.mxu2 }
 0x12f   : > { %v834_v35 = vadd.f32 %v833_v26, %v6969_v29  ;;  %v603_v39 = vmax.f32 %v551_v32, 0.0 }
 0x130   : > { %v746_v28 = vpop.f32.mrf.mxu1 }
 0x131   : > { %v747_v30 = vadd.f32 %v746_v28, %v6960_v21  ;;  %v914_v43 = vmax.f32 %v834_v35, 0.0 }
 0x133   : > { %v915_v33 = vmax.f32 %v747_v30, 0.0 }
 0x134   : > { %v552_v34 = vpop.f32.mrf.mxu0 }
 0x135   : > { %v6974_v36 = vpack.c.bf16 %v915_v33, %v913_v31  ;;  %v553_v37 = vadd.f32 %v6825_v20, %v552_v34 }
 0x136   : > { %v835_v38 = vpop.f32.mrf.mxu2 }
 0x137   : > { %v604_v40 = vmax.f32 %v553_v37, 0.0  ;;  %v836_v41 = vadd.f32 %v835_v38, %v6969_v29  ;;  %1476 = vmatmul.bf16.vlgmr.msrb.gmra.mxu0 %v6974_v36 }
 0x138   : > { %v749_v42 = vpop.f32.mrf.mxu1 }
 0x139   : > { %v916_v44 = vmax.f32 %v836_v41, 0.0  ;;  %v626_v45 = vpack.c.bf16 %v604_v40, %v603_v39  ;;  %v750_v49 = vadd.f32 %v749_v42, %v6960_v21 }
 0x13b   : > { %788 = vmatmul.bf16.gmra.mxu1 %v626_v45  ;;  %877 = vmatmul.bf16.gmra.mxu2 %v626_v45  ;;  %v993_v46 = vpack.c.bf16 %v916_v44, %v914_v43  ;;  %v917_v52 = vmax.f32 %v750_v49, 0.0 }
 0x13c   : > { %v555_v47 = vpop.f32.mrf.mxu0 }
 0x13d   : > { %1085 = vmatmul.bf16.vlgmr.msra.gmra.mxu3 %v993_v46  ;;  %v556_v53 = vadd.f32 %v6825_v20, %v555_v47 }
 0x13e   : > { %v838_v48 = vpop.f32.mrf.mxu2 }
 0x13f   : > { %v839_v56 = vadd.f32 %v838_v48, %v6969_v29  ;;  %v605_v60 = vmax.f32 %v556_v53, 0.0  ;;  %v5632_v53 = vld [vmem:[%s11366_s5 + $0x16c] sm:$0xf0] }
 0x140   : > { %v751_v50 = vpop.f32.mrf.mxu1 }
 0x141   : > { %v752_v51 = vadd.f32 %v751_v50, %v6960_v21  ;;  %v918_v0 = vmax.f32 %v839_v56, 0.0  ;;  %v5586_v56 = vld [vmem:[%s11366_s5 + $0x4] sm:$0xf] }
 0x143   : > { %v919_v54 = vmax.f32 %v752_v51, 0.0 }
 0x144   : > { %v557_v55 = vpop.f32.mrf.mxu0 }
 0x145   : > { %v6983_v57 = vpack.c.bf16 %v919_v54, %v917_v52  ;;  %v558_v58 = vadd.f32 %v6825_v20, %v557_v55  ;;  %v5541_v52 = vld [vmem:[%s11366_s5 + $0x158] sm:$0xf] }
 0x146   : > { %v840_v59 = vpop.f32.mrf.mxu2  ;;  %v5542_v54 = vor.u32 %v5632_v53, %v5541_v52  ;;  %v5629_v53 = vld [vmem:[%s11366_s5 + $0x15c] sm:$0xf] }
 0x147   : > { %v606_v61 = vmax.f32 %v558_v58, 0.0  ;;  %v841_v62 = vadd.f32 %v840_v59, %v6969_v29  ;;  %1481 = vmatmul.bf16.gmra.mxu0 %v6983_v57  ;;  %v5367_v58 = vld [vmem:[%s11366_s5 + $0x18] sm:$0xf0] }
 0x148   : > { %v754_v63 = vpop.f32.mrf.mxu1  ;;  %1646 = vmatpush.bf16.msrb.mxu2 %v5542_v54  ;;  %v5543_v54 = vld [vmem:[%s11366_s5 + $0x170] sm:$0xf0] }
 0x149   : > { %v920_v1 = vmax.f32 %v841_v62, 0.0  ;;  %v627_v2 = vpack.c.bf16 %v606_v61, %v605_v60  ;;  %v755_v9 = vadd.f32 %v754_v63, %v6960_v21  ;;  %v5370_v60 = vor.u32 %v5586_v56, %v5367_v58  ;;  %v5517_v61 = vld [vmem:[%s11366_s5 + $0x128] sm:$0xf]  ;;  %v5626_v62 = vld [vmem:[%s11366_s5 + $0x13c] sm:$0xf0] }
 0x14a   : > { %v5546_v58 = vor.u32 %v5629_v53, %v5543_v54 }
 0x14b   : > { %793 = vmatmul.bf16.gmra.mxu1 %v627_v2  ;;  %882 = vmatmul.bf16.gmra.mxu2 %v627_v2  ;;  %v994_v3 = vpack.c.bf16 %v920_v1, %v918_v0  ;;  %v921_v12 = vmax.f32 %v755_v9, 0.0  ;;  %v5518_v0 = vor.u32 %v5626_v62, %v5517_v61 }
 0x14c   : > { %v560_v6 = vpop.f32.mrf.mxu0  ;;  %1564 = vmatpush.bf16.msrb.mxu1 %v5370_v60  ;;  %1735 = vmatpush.bf16.msrb.mxu3 %v5546_v58  ;;  %v5627_v58 = vld [vmem:[%s11366_s5 + $0x144] sm:$0xf0] }
 0x14d   : > { %1090 = vmatmul.bf16.gmra.mxu3 %v994_v3  ;;  %v561_v13 = vadd.f32 %v6825_v20, %v560_v6  ;;  %1647 = vmatpush.bf16.msrb.mxu2 %v5518_v0  ;;  %v5494_v6 = vor.u32 %v5620_v5, %v5493_v4  ;;  %v5549_v5 = vld [vmem:[%s11366_s5 + $0x160] sm:$0xf] }
 0x14e   : > { %v843_v8 = vpop.f32.mrf.mxu2 }
 0x14f   : > { %v844_v16 = vadd.f32 %v843_v8, %v6969_v29  ;;  %v607_v22 = vmax.f32 %v561_v13, 0.0 }
 0x150   : > { %v756_v10 = vpop.f32.mrf.mxu1 }
 0x151   : > { %v757_v11 = vadd.f32 %v756_v10, %v6960_v21  ;;  %v922_v26 = vmax.f32 %v844_v16, 0.0  ;;  %1648 = vmatpush.bf16.msrb.mxu2 %v5494_v6  ;;  %v5633_v6 = vld [vmem:[%s11366_s5 + $0x174] sm:$0xf0] }
 0x153   : > { %v923_v14 = vmax.f32 %v757_v11, 0.0 }
 0x154   : > { %v562_v15 = vpop.f32.mrf.mxu0 }
 0x155   : > { %v6998_v17 = vpack.c.bf16 %v923_v14, %v921_v12  ;;  %v563_v18 = vadd.f32 %v6825_v20, %v562_v15  ;;  %v5469_v14 = vld [vmem:[%s11366_s5 + $0xc8] sm:$0xf]  ;;  %v5614_v15 = vld [vmem:[%s11366_s5 + $0xdc] sm:$0xf0] }
 0x156   : > { %v845_v19 = vpop.f32.mrf.mxu2 }
 0x157   : > { %v608_v23 = vmax.f32 %v563_v18, 0.0  ;;  %v846_v24 = vadd.f32 %v845_v19, %v6969_v29  ;;  %1486 = vmatmul.bf16.gmra.mxu0 %v6998_v17  ;;  %v5470_v18 = vor.u32 %v5614_v15, %v5469_v14 }
 0x158   : > { %v759_v25 = vpop.f32.mrf.mxu1 }
 0x159   : > { %v924_v27 = vmax.f32 %v846_v24, 0.0  ;;  %v628_v28 = vpack.c.bf16 %v608_v23, %v607_v22  ;;  %v760_v33 = vadd.f32 %v759_v25, %v6960_v21  ;;  %1649 = vmatpush.bf16.msrb.mxu2 %v5470_v18 }
 0x15b   : > { %798 = vmatmul.bf16.gmra.mxu1 %v628_v28  ;;  %887 = vmatmul.bf16.gmra.mxu2 %v628_v28  ;;  %v995_v30 = vpack.c.bf16 %v924_v27, %v922_v26  ;;  %v925_v37 = vmax.f32 %v760_v33, 0.0  ;;  %v5445_v28 = vld [vmem:[%s11366_s5 + $0x98] sm:$0xf] }
 0x15c   : > { %v565_v31 = vpop.f32.mrf.mxu0 }
 0x15d   : > { %1095 = vmatmul.bf16.gmra.mxu3 %v995_v30  ;;  %v566_v38 = vadd.f32 %v6825_v20, %v565_v31  ;;  %v5608_v30 = vld [vmem:[%s11366_s5 + $0xac] sm:$0xf0] }
 0x15e   : > { %v848_v32 = vpop.f32.mrf.mxu2  ;;  %v5446_v31 = vor.u32 %v5608_v30, %v5445_v28 }
 0x15f   : > { %v849_v41 = vadd.f32 %v848_v32, %v6969_v29  ;;  %v609_v45 = vmax.f32 %v566_v38, 0.0 }
 0x160   : > { %v761_v34 = vpop.f32.mrf.mxu1  ;;  %1650 = vmatpush.bf16.msrb.mxu2 %v5446_v31 }
 0x161   : > { %v762_v35 = vadd.f32 %v761_v34, %v6960_v21  ;;  %v926_v49 = vmax.f32 %v849_v41, 0.0  ;;  %v5421_v34 = vld [vmem:[%s11366_s5 + $0x68] sm:$0xf] }
 0x163   : > { %v927_v39 = vmax.f32 %v762_v35, 0.0  ;;  %v5602_v35 = vld [vmem:[%s11366_s5 + $0x7c] sm:$0xf0] }
 0x164   : > { %v567_v40 = vpop.f32.mrf.mxu0  ;;  %v5422_v38 = vor.u32 %v5602_v35, %v5421_v34 }
 0x165   : > { %v7007_v42 = vpack.c.bf16 %v927_v39, %v925_v37  ;;  %v568_v43 = vadd.f32 %v6825_v20, %v567_v40 }
 0x166   : > { %v850_v44 = vpop.f32.mrf.mxu2  ;;  %1651 = vmatpush.bf16.msrb.mxu2 %v5422_v38 }
 0x167   : > { %v610_v46 = vmax.f32 %v568_v43, 0.0  ;;  %v851_v47 = vadd.f32 %v850_v44, %v6969_v29  ;;  %1491 = vmatmul.bf16.gmra.mxu0 %v7007_v42  ;;  %v5397_v43 = vld [vmem:[%s11366_s5 + $0x38] sm:$0xf]  ;;  %v5596_v44 = vld [vmem:[%s11366_s5 + $0x4c] sm:$0xf0] }
 0x168   : > { %v764_v48 = vpop.f32.mrf.mxu1 }
 0x169   : > { %v928_v50 = vmax.f32 %v851_v47, 0.0  ;;  %v629_v51 = vpack.c.bf16 %v610_v46, %v609_v45  ;;  %v765_v1 = vadd.f32 %v764_v48, %v6960_v21  ;;  %v5398_v45 = vor.u32 %v5596_v44, %v5397_v43 }
 0x16b   : > { %803 = vmatmul.bf16.gmra.mxu1 %v629_v51  ;;  %892 = vmatmul.bf16.gmra.mxu2 %v629_v51  ;;  %v996_v55 = vpack.c.bf16 %v928_v50, %v926_v49  ;;  %v929_v7 = vmax.f32 %v765_v1, 0.0 }
 0x16c   : > { %v570_v59 = vpop.f32.mrf.mxu0  ;;  %1652 = vmatpush.bf16.msrb.mxu2 %v5398_v45 }
 0x16d   : > { %1100 = vmatmul.bf16.gmra.mxu3 %v996_v55  ;;  %v571_v8 = vadd.f32 %v6825_v20, %v570_v59  ;;  %v5373_v55 = vld [vmem:[%s11366_s5 + $0x8] sm:$0xf]  ;;  %v5590_v59 = vld [vmem:[%s11366_s5 + $0x1c] sm:$0xf0] }
 0x16e   : > { %v853_v63 = vpop.f32.mrf.mxu2 }
 0x16f   : > { %v854_v11 = vadd.f32 %v853_v63, %v6969_v29  ;;  %v611_v19 = vmax.f32 %v571_v8, 0.0  ;;  %v5374_v63 = vor.u32 %v5590_v59, %v5373_v55  ;;  %v5550_v8 = vor.u32 %v5633_v6, %v5549_v5 }
 0x170   : > { %v766_v2 = vpop.f32.mrf.mxu1 }
 0x171   : > { %v767_v3 = vadd.f32 %v766_v2, %v6960_v21  ;;  %v930_v25 = vmax.f32 %v854_v11, 0.0  ;;  %1653 = vmatpush.bf16.msrb.mxu2 %v5374_v63  ;;  %1824 = vmatpush.bf16.msra.mxu0 %v5550_v8 }
 0x173   : > { %v931_v9 = vmax.f32 %v767_v3, 0.0 }
 0x174   : > { %v572_v10 = vpop.f32.mrf.mxu0 }
 0x175   : > { %v7040_v12 = vpack.c.bf16 %v931_v9, %v929_v7  ;;  %v573_v13 = vadd.f32 %v6825_v20, %v572_v10  ;;  %v5630_v9 = vld [vmem:[%s11366_s5 + $0x164] sm:$0xf]  ;;  %v5551_v10 = vld [vmem:[%s11366_s5 + $0x178] sm:$0xf0] }
 0x176   : > { %v855_v16 = vpop.f32.mrf.mxu2  ;;  %v5554_v11 = vor.u32 %v5630_v9, %v5551_v10 }
 0x177   : > { %v612_v22 = vmax.f32 %v573_v13, 0.0  ;;  %v856_v23 = vadd.f32 %v855_v16, %v6969_v29  ;;  %1496 = vmatmul.bf16.gmra.mxu0 %v7040_v12 }
 0x178   : > { %v769_v24 = vpop.f32.mrf.mxu1  ;;  %1913 = vmatpush.bf16.msra.mxu1 %v5554_v11 }
 0x179   : > { %v932_v26 = vmax.f32 %v856_v23, 0.0  ;;  %v630_v27 = vpack.c.bf16 %v612_v22, %v611_v19  ;;  %v770_v39 = vadd.f32 %v769_v24, %v6960_v21 }
 0x17b   : > { %808 = vmatmul.bf16.gmra.mxu1 %v630_v27  ;;  %897 = vmatmul.bf16.gmra.mxu2 %v630_v27  ;;  %v997_v32 = vpack.c.bf16 %v932_v26, %v930_v25  ;;  %v933_v46 = vmax.f32 %v770_v39, 0.0 }
 0x17c   : > { %v575_v33 = vpop.f32.mrf.mxu0 }
 0x17d   : > { %1105 = vmatmul.bf16.gmra.mxu3 %v997_v32  ;;  %v576_v47 = vadd.f32 %v6825_v20, %v575_v33 }
 0x17e   : > { %v858_v37 = vpop.f32.mrf.mxu2 }
 0x17f   : > { %v859_v50 = vadd.f32 %v858_v37, %v6969_v29  ;;  %v613_v60 = vmax.f32 %v576_v47, 0.0  ;;  %v5519_v47 = vld [vmem:[%s11366_s5 + $0x140] sm:$0xf0] }
 0x180   : > { %v771_v40 = vpop.f32.mrf.mxu1 }
 0x181   : > { %v772_v41 = vadd.f32 %v771_v40, %v6960_v21  ;;  %v934_v1 = vmax.f32 %v859_v50, 0.0 }
 0x183   : > { %v935_v48 = vmax.f32 %v772_v41, 0.0 }
 0x184   : > { %v577_v49 = vpop.f32.mrf.mxu0 }
 0x185   : > { %v7073_v51 = vpack.c.bf16 %v935_v48, %v933_v46  ;;  %v578_v52 = vadd.f32 %v6825_v20, %v577_v49  ;;  %v5623_v46 = vld [vmem:[%s11366_s5 + $0x12c] sm:$0xf] }
 0x186   : > { %v860_v56 = vpop.f32.mrf.mxu2  ;;  %v5522_v49 = vor.u32 %v5623_v46, %v5519_v47  ;;  %v5618_v47 = vld [vmem:[%s11366_s5 + $0x104] sm:$0xf] }
 0x187   : > { %v614_v61 = vmax.f32 %v578_v52, 0.0  ;;  %v861_v62 = vadd.f32 %v860_v56, %v6969_v29  ;;  %1501 = vmatmul.bf16.gmra.mxu0 %v7073_v51  ;;  %v5525_v56 = vld [vmem:[%s11366_s5 + $0x130] sm:$0xf] }
 0x188   : > { %v774_v0 = vpop.f32.mrf.mxu1  ;;  %1736 = vmatpush.bf16.msrb.mxu3 %v5522_v49  ;;  %v5526_v59 = vor.u32 %v5627_v58, %v5525_v56 }
 0x189   : > { %v936_v2 = vmax.f32 %v861_v62, 0.0  ;;  %v631_v3 = vpack.c.bf16 %v614_v61, %v613_v60  ;;  %v775_v14 = vadd.f32 %v774_v0, %v6960_v21  ;;  %v5624_v60 = vld [vmem:[%s11366_s5 + $0x134] sm:$0xf]  ;;  %v5527_v61 = vld [vmem:[%s11366_s5 + $0x148] sm:$0xf0] }
 0x18a   : > { %v5530_v62 = vor.u32 %v5624_v60, %v5527_v61  ;;  %1825 = vmatpush.bf16.msra.mxu0 %v5526_v59 }
 0x18b   : > { %813 = vmatmul.bf16.gmra.mxu1 %v631_v3  ;;  %902 = vmatmul.bf16.gmra.mxu2 %v631_v3  ;;  %v998_v4 = vpack.c.bf16 %v936_v2, %v934_v1  ;;  %v937_v18 = vmax.f32 %v775_v14, 0.0 }
 0x18c   : > { %v580_v7 = vpop.f32.mrf.mxu0  ;;  %1914 = vmatpush.bf16.msra.mxu1 %v5530_v62 }
 0x18d   : > { %1110 = vmatmul.bf16.gmra.mxu3 %v998_v4  ;;  %v581_v19 = vadd.f32 %v6825_v20, %v580_v7 }
 0x18e   : > { %v863_v13 = vpop.f32.mrf.mxu2 }
 0x18f   : > { %v864_v24 = vadd.f32 %v863_v13, %v6969_v29  ;;  %v615_v28 = vmax.f32 %v581_v19, 0.0 }
 0x190   : > { %v776_v15 = vpop.f32.mrf.mxu1 }
 0x191   : > { %v777_v16 = vadd.f32 %v776_v15, %v6960_v21  ;;  %v938_v33 = vmax.f32 %v864_v24, 0.0 }
 0x193   : > { %v939_v22 = vmax.f32 %v777_v16, 0.0 }
 0x194   : > { %v582_v23 = vpop.f32.mrf.mxu0 }
 0x195   : > { %v7106_v25 = vpack.c.bf16 %v939_v22, %v937_v18  ;;  %v583_v26 = vadd.f32 %v6825_v20, %v582_v23 }
 0x196   : > { %v865_v27 = vpop.f32.mrf.mxu2 }
 0x197   : > { %v616_v30 = vmax.f32 %v583_v26, 0.0  ;;  %v866_v31 = vadd.f32 %v865_v27, %v6969_v29  ;;  %1506 = vmatmul.bf16.gmra.mxu0 %v7106_v25 }
 0x198   : > { %v779_v32 = vpop.f32.mrf.mxu1 }
 0x199   : > { %v940_v34 = vmax.f32 %v866_v31, 0.0  ;;  %v632_v35 = vpack.c.bf16 %v616_v30, %v615_v28  ;;  %v780_v39 = vadd.f32 %v779_v32, %v6960_v21  ;;  %v5617_v31 = vld [vmem:[%s11366_s5 + $0xfc] sm:$0xf]  ;;  %v5495_v32 = vld [vmem:[%s11366_s5 + $0x110] sm:$0xf0] }
 0x19b   : > { %818 = vmatmul.bf16.gmra.mxu1 %v632_v35  ;;  %907 = vmatmul.bf16.gmra.mxu2 %v632_v35  ;;  %v999_v37 = vpack.c.bf16 %v940_v34, %v938_v33  ;;  %v941_v41 = vmax.f32 %v780_v39, 0.0  ;;  %v5498_v34 = vor.u32 %v5617_v31, %v5495_v32 }
 0x19d   : > { %1115 = vmatmul.bf16.gmra.mxu3 %v999_v37 }
 0x19e   : > { %v868_v38 = vpop.f32.mrf.mxu2  ;;  %1737 = vmatpush.bf16.msrb.mxu3 %v5498_v34 }
 0x19f   : > { %v869_v44 = vadd.f32 %v868_v38, %v6969_v29 }
 0x1a0   : > { %v781_v40 = vpop.f32.mrf.mxu1 }
 0x1a1   : > { %v782_v20 = vadd.f32 %v781_v40, %v6960_v21  ;;  %v942_v53 = vmax.f32 %v869_v44, 0.0 }
 0x1a3   : > { %v943_v43 = vmax.f32 %v782_v20, 0.0 }
 0x1a5   : > { %v7114_v45 = vpack.c.bf16 %v943_v43, %v941_v41  ;;  %v5501_v41 = vld [vmem:[%s11366_s5 + $0x100] sm:$0xf]  ;;  %v5621_v43 = vld [vmem:[%s11366_s5 + $0x114] sm:$0xf0] }
 0x1a6   : > { %v870_v48 = vpop.f32.mrf.mxu2  ;;  %v5502_v46 = vor.u32 %v5621_v43, %v5501_v41 }
 0x1a7   : > { %v871_v50 = vadd.f32 %v870_v48, %v6969_v29  ;;  %1511 = vmatmul.bf16.gmra.mxu0 %v7114_v45  ;;  %v5503_v48 = vld [vmem:[%s11366_s5 + $0x118] sm:$0xf0] }
 0x1a8   : > { %v784_v52 = vpop.f32.mrf.mxu1  ;;  %v5506_v49 = vor.u32 %v5618_v47, %v5503_v48  ;;  %1826 = vmatpush.bf16.msra.mxu0 %v5502_v46  ;;  %v5612_v46 = vld [vmem:[%s11366_s5 + $0xd4] sm:$0xf]  ;;  %v5479_v47 = vld [vmem:[%s11366_s5 + $0xe8] sm:$0xf0] }
 0x1a9   : > { %v944_v54 = vmax.f32 %v871_v50, 0.0  ;;  %v785_v0 = vadd.f32 %v784_v52, %v6960_v21  ;;  %v5482_v48 = vor.u32 %v5612_v46, %v5479_v47  ;;  %v5609_v46 = vld [vmem:[%s11366_s5 + $0xb4] sm:$0xf0] }
 0x1aa   : > { %1915 = vmatpush.bf16.msra.mxu1 %v5506_v49 }
 0x1ab   : > { %1565 = vmatmul.bf16.vlgmr.msrb.gmra.mxu1 %v6974_v36  ;;  %1654 = vmatmul.bf16.vlgmr.msrb.gmra.mxu2 %v6974_v36  ;;  %v1000_v55 = vpack.c.bf16 %v944_v54, %v942_v53  ;;  %v945_v3 = vmax.f32 %v785_v0, 0.0 }
 0x1ad   : > { %1120 = vmatmul.bf16.gmra.mxu3 %v1000_v55 }
 0x1ae   : > { %v873_v63 = vpop.f32.mrf.mxu2  ;;  %1916 = vmatpush.bf16.msra.mxu1 %v5482_v48 }
 0x1af   : > { %v874_v6 = vadd.f32 %v873_v63, %v6969_v29 }
 0x1b0   : > { %v786_v1 = vpop.f32.mrf.mxu1 }
 0x1b1   : > { %v787_v2 = vadd.f32 %v786_v1, %v6960_v21  ;;  %v946_v11 = vmax.f32 %v874_v6, 0.0 }
 0x1b3   : > { %v947_v4 = vmax.f32 %v787_v2, 0.0 }
 0x1b4   : > { %v7140_v5 = vpop.f32.mrf.mxu0 }
 0x1b5   : > { %v7143_v7 = vpack.c.bf16 %v947_v4, %v945_v3 }
 0x1b6   : > { %v875_v8 = vpop.f32.mrf.mxu2 }
 0x1b7   : > { %v876_v9 = vadd.f32 %v875_v8, %v6969_v29  ;;  %1516 = vmatmul.bf16.gmra.mxu0 %v7143_v7 }
 0x1b8   : > { %v789_v10 = vpop.f32.mrf.mxu1 }
 0x1b9   : > { %v948_v13 = vmax.f32 %v876_v9, 0.0  ;;  %v790_v18 = vadd.f32 %v789_v10, %v6960_v21 }
 0x1bb   : > { %1570 = vmatmul.bf16.gmra.mxu1 %v6983_v57  ;;  %1659 = vmatmul.bf16.gmra.mxu2 %v6983_v57  ;;  %v1001_v14 = vpack.c.bf16 %v948_v13, %v946_v11  ;;  %v949_v24 = vmax.f32 %v790_v18, 0.0 }
 0x1bc   : > { %v7149_v15 = vpop.f32.mrf.mxu0 }
 0x1bd   : > { %1125 = vmatmul.bf16.gmra.mxu3 %v1001_v14 }
 0x1be   : > { %v878_v16 = vpop.f32.mrf.mxu2 }
 0x1bf   : > { %v879_v28 = vadd.f32 %v878_v16, %v6969_v29 }
 0x1c0   : > { %v791_v19 = vpop.f32.mrf.mxu1  ;;  %v7152_v22 = vpop.f32.mrf.mxu3 }
 0x1c1   : > { %v792_v23 = vadd.f32 %v791_v19, %v6960_v21  ;;  %v950_v39 = vmax.f32 %v879_v28, 0.0 }
 0x1c3   : > { %v951_v26 = vmax.f32 %v792_v23, 0.0 }
 0x1c4   : > { %v7155_v27 = vpop.f32.mrf.mxu0 }
 0x1c5   : > { %v7158_v30 = vpack.c.bf16 %v951_v26, %v949_v24  ;;  %v5611_v24 = vld [vmem:[%s11366_s5 + $0xcc] sm:$0xf]  ;;  %v5471_v26 = vld [vmem:[%s11366_s5 + $0xe0] sm:$0xf0] }
 0x1c6   : > { %v880_v33 = vpop.f32.mrf.mxu2  ;;  %v5474_v31 = vor.u32 %v5611_v24, %v5471_v26 }
 0x1c7   : > { %v881_v35 = vadd.f32 %v880_v33, %v6969_v29  ;;  %1521 = vmatmul.bf16.gmra.mxu0 %v7158_v30 }
 0x1c8   : > { %v794_v37 = vpop.f32.mrf.mxu1  ;;  %v7168_v38 = vpop.f32.mrf.mxu3  ;;  %1738 = vmatpush.bf16.msrb.mxu3 %v5474_v31 }
 0x1c9   : > { %v952_v40 = vmax.f32 %v881_v35, 0.0  ;;  %v795_v52 = vadd.f32 %v794_v37, %v6960_v21 }
 0x1cb   : > { %1575 = vmatmul.bf16.gmra.mxu1 %v6998_v17  ;;  %1664 = vmatmul.bf16.gmra.mxu2 %v6998_v17  ;;  %v1002_v20 = vpack.c.bf16 %v952_v40, %v950_v39  ;;  %v953_v56 = vmax.f32 %v795_v52, 0.0  ;;  %v5477_v40 = vld [vmem:[%s11366_s5 + $0xd0] sm:$0xf] }
 0x1cc   : > { %v7178_v44 = vpop.f32.mrf.mxu0 }
 0x1cd   : > { %1130 = vmatmul.bf16.gmra.mxu3 %v1002_v20  ;;  %v5615_v20 = vld [vmem:[%s11366_s5 + $0xe4] sm:$0xf0] }
 0x1ce   : > { %v883_v50 = vpop.f32.mrf.mxu2  ;;  %v5478_v43 = vor.u32 %v5615_v20, %v5477_v40  ;;  %v5453_v40 = vld [vmem:[%s11366_s5 + $0xa0] sm:$0xf] }
 0x1cf   : > { %v884_v60 = vadd.f32 %v883_v50, %v6969_v29  ;;  %v5454_v48 = vor.u32 %v5609_v46, %v5453_v40 }
 0x1d0   : > { %v796_v53 = vpop.f32.mrf.mxu1  ;;  %v7187_v54 = vpop.f32.mrf.mxu3  ;;  %1827 = vmatpush.bf16.msra.mxu0 %v5478_v43 }
 0x1d1   : > { %v797_v55 = vadd.f32 %v796_v53, %v6960_v21  ;;  %v954_v2 = vmax.f32 %v884_v60, 0.0 }
 0x1d3   : > { %v955_v58 = vmax.f32 %v797_v55, 0.0 }
 0x1d4   : > { %v7190_v59 = vpop.f32.mrf.mxu0  ;;  %1828 = vmatpush.bf16.msra.mxu0 %v5454_v48 }
 0x1d5   : > { %v7193_v61 = vpack.c.bf16 %v955_v58, %v953_v56 }
 0x1d6   : > { %v885_v62 = vpop.f32.mrf.mxu2 }
 0x1d7   : > { %11775 = vst [vmem:[#allocation8_spill] sm:$0xff] %v7193_v61  ;;  %v886_v63 = vadd.f32 %v885_v62, %v6969_v29  ;;  %1526 = vmatmul.bf16.gmra.mxu0 %v7193_v61 }
 0x1d8   : > { %v799_v0 = vpop.f32.mrf.mxu1  ;;  %v7197_v1 = vpop.f32.mrf.mxu3 }
 0x1d9   : > { %11776 = vst [vmem:[#allocation9_spill] sm:$0xff] %v7197_v1  ;;  %v956_v3 = vmax.f32 %v886_v63, 0.0  ;;  %v800_v9 = vadd.f32 %v799_v0, %v6960_v21 }
 0x1db   : > { %1580 = vmatmul.bf16.gmra.mxu1 %v7007_v42  ;;  %1669 = vmatmul.bf16.gmra.mxu2 %v7007_v42  ;;  %v1003_v4 = vpack.c.bf16 %v956_v3, %v954_v2  ;;  %v957_v14 = vmax.f32 %v800_v9, 0.0 }
 0x1dc   : > { %v7201_v6 = vpop.f32.mrf.mxu0 }
 0x1dd   : > { %1135 = vmatmul.bf16.gmra.mxu3 %v1003_v4 }
 0x1de   : > { %v888_v8 = vpop.f32.mrf.mxu2 }
 0x1df   : > { %v889_v19 = vadd.f32 %v888_v8, %v6969_v29 }
 0x1e0   : > { %v801_v10 = vpop.f32.mrf.mxu1  ;;  %v7204_v11 = vpop.f32.mrf.mxu3 }
 0x1e1   : > { %11777 = vst [vmem:[#allocation10_spill] sm:$0xff] %v7204_v11  ;;  %v802_v13 = vadd.f32 %v801_v10, %v6960_v21  ;;  %v958_v35 = vmax.f32 %v889_v19, 0.0 }
 0x1e3   : > { %v959_v16 = vmax.f32 %v802_v13, 0.0 }
 0x1e4   : > { %v7207_v18 = vpop.f32.mrf.mxu0 }
 0x1e5   : > { %v7210_v23 = vpack.c.bf16 %v959_v16, %v957_v14 }
 0x1e6   : > { %v890_v28 = vpop.f32.mrf.mxu2 }
 0x1e7   : > { %v891_v32 = vadd.f32 %v890_v28, %v6969_v29  ;;  %1531 = vmatmul.bf16.gmra.mxu0 %v7210_v23 }
 0x1e8   : > { %v804_v33 = vpop.f32.mrf.mxu1  ;;  %v7220_v34 = vpop.f32.mrf.mxu3 }
 0x1e9   : > { %11778 = vst [vmem:[#allocation11_spill] sm:$0xff] %v7220_v34  ;;  %v960_v37 = vmax.f32 %v891_v32, 0.0  ;;  %v805_v50 = vadd.f32 %v804_v33, %v6960_v21 }
 0x1eb   : > { %1585 = vmatmul.bf16.gmra.mxu1 %v7040_v12  ;;  %1674 = vmatmul.bf16.gmra.mxu2 %v7040_v12  ;;  %v1004_v39 = vpack.c.bf16 %v960_v37, %v958_v35  ;;  %v961_v56 = vmax.f32 %v805_v50, 0.0  ;;  %v5605_v37 = vld [vmem:[%s11366_s5 + $0x9c] sm:$0xf] }
 0x1ec   : > { %v7230_v41 = vpop.f32.mrf.mxu0 }
 0x1ed   : > { %1140 = vmatmul.bf16.gmra.mxu3 %v1004_v39  ;;  %v5447_v39 = vld [vmem:[%s11366_s5 + $0xb0] sm:$0xf0] }
 0x1ee   : > { %v893_v49 = vpop.f32.mrf.mxu2  ;;  %v5450_v43 = vor.u32 %v5605_v37, %v5447_v39 }
 0x1ef   : > { %v894_v62 = vadd.f32 %v893_v49, %v6969_v29 }
 0x1f0   : > { %v806_v52 = vpop.f32.mrf.mxu1  ;;  %v7239_v53 = vpop.f32.mrf.mxu3  ;;  %1739 = vmatpush.bf16.msrb.mxu3 %v5450_v43  ;;  %v5591_v43 = vld [vmem:[%s11366_s5 + $0x24] sm:$0xf0] }
 0x1f1   : > { %11779 = vst [vmem:[#allocation12_spill] sm:$0xff] %v7239_v53  ;;  %v807_v55 = vadd.f32 %v806_v52, %v6960_v21  ;;  %v962_v8 = vmax.f32 %v894_v62, 0.0 }
 0x1f3   : > { %v963_v58 = vmax.f32 %v807_v55, 0.0 }
 0x1f4   : > { %v7242_v60 = vpop.f32.mrf.mxu0 }
 0x1f5   : > { %v7245_v63 = vpack.c.bf16 %v963_v58, %v961_v56  ;;  %v5429_v56 = vld [vmem:[%s11366_s5 + $0x70] sm:$0xf]  ;;  %v5603_v58 = vld [vmem:[%s11366_s5 + $0x84] sm:$0xf0] }
 0x1f6   : > { %v895_v0 = vpop.f32.mrf.mxu2  ;;  %v5430_v62 = vor.u32 %v5603_v58, %v5429_v56 }
 0x1f7   : > { %v896_v2 = vadd.f32 %v895_v0, %v6969_v29  ;;  %1536 = vmatmul.bf16.gmra.mxu0 %v7245_v63 }
 0x1f8   : > { %v809_v3 = vpop.f32.mrf.mxu1  ;;  %v7249_v4 = vpop.f32.mrf.mxu3  ;;  %1829 = vmatpush.bf16.msra.mxu0 %v5430_v62 }
 0x1f9   : > { %11780 = vst [vmem:[#allocation13_spill] sm:$0xff] %v7249_v4  ;;  %v964_v9 = vmax.f32 %v896_v2, 0.0  ;;  %v810_v16 = vadd.f32 %v809_v3, %v6960_v21  ;;  %v5606_v2 = vld [vmem:[%s11366_s5 + $0xa4] sm:$0xf]  ;;  %v5455_v3 = vld [vmem:[%s11366_s5 + $0xb8] sm:$0xf0] }
 0x1fb   : > { %1590 = vmatmul.bf16.gmra.mxu1 %v7073_v51  ;;  %1679 = vmatmul.bf16.gmra.mxu2 %v7073_v51  ;;  %v1005_v10 = vpack.c.bf16 %v964_v9, %v962_v8  ;;  %v965_v28 = vmax.f32 %v810_v16, 0.0  ;;  %v5458_v9 = vor.u32 %v5606_v2, %v5455_v3  ;;  %v5587_v3 = vld [vmem:[%s11366_s5 + $0xc] sm:$0xf] }
 0x1fc   : > { %v7253_v13 = vpop.f32.mrf.mxu0 }
 0x1fd   : > { %1145 = vmatmul.bf16.gmra.mxu3 %v1005_v10  ;;  %v5405_v10 = vld [vmem:[%s11366_s5 + $0x40] sm:$0xf]  ;;  %1917 = vmatpush.bf16.msra.mxu1 %v5458_v9  ;;  %v5375_v9 = vld [vmem:[%s11366_s5 + $0x20] sm:$0xf0] }
 0x1fe   : > { %v898_v14 = vpop.f32.mrf.mxu2 }
 0x1ff   : > { %v899_v33 = vadd.f32 %v898_v14, %v6969_v29  ;;  %v5597_v14 = vld [vmem:[%s11366_s5 + $0x54] sm:$0xf0] }
 0x200   : > { %v811_v19 = vpop.f32.mrf.mxu1  ;;  %v7256_v24 = vpop.f32.mrf.mxu3 }
 0x201   : > { %11781 = vst [vmem:[#allocation14_spill] sm:$0xff] %v7256_v24  ;;  %v812_v26 = vadd.f32 %v811_v19, %v6960_v21  ;;  %v966_v52 = vmax.f32 %v899_v33, 0.0  ;;  %v5406_v19 = vor.u32 %v5597_v14, %v5405_v10 }
 0x203   : > { %v967_v31 = vmax.f32 %v812_v26, 0.0  ;;  %1830 = vmatpush.bf16.msra.mxu0 %v5406_v19 }
 0x204   : > { %v7259_v32 = vpop.f32.mrf.mxu0 }
 0x205   : > { %v7262_v35 = vpack.c.bf16 %v967_v31, %v965_v28  ;;  %v5599_v28 = vld [vmem:[%s11366_s5 + $0x6c] sm:$0xf]  ;;  %v5423_v31 = vld [vmem:[%s11366_s5 + $0x80] sm:$0xf0] }
 0x206   : > { %v900_v20 = vpop.f32.mrf.mxu2  ;;  %v5426_v39 = vor.u32 %v5599_v28, %v5423_v31 }
 0x207   : > { %v901_v47 = vadd.f32 %v900_v20, %v6969_v29  ;;  %1541 = vmatmul.bf16.gmra.mxu0 %v7262_v35  ;;  %v5381_v20 = vld [vmem:[%s11366_s5 + $0x10] sm:$0xf] }
 0x208   : > { %v814_v49 = vpop.f32.mrf.mxu1  ;;  %v7278_v50 = vpop.f32.mrf.mxu3  ;;  %1740 = vmatpush.bf16.msrb.mxu3 %v5426_v39  ;;  %v5382_v46 = vor.u32 %v5591_v43, %v5381_v20 }
 0x209   : > { %11782 = vst [vmem:[#allocation15_spill] sm:$0xff] %v7278_v50  ;;  %v968_v55 = vmax.f32 %v901_v47, 0.0  ;;  %v815_v26 = vadd.f32 %v814_v49, %v6960_v21  ;;  %v5593_v49 = vld [vmem:[%s11366_s5 + $0x3c] sm:$0xf] }
 0x20a   : > { %1831 = vmatpush.bf16.msra.mxu0 %v5382_v46  ;;  %v7350_v46 = vld [vmem:[%s11367_s6] sm:$0x3f] }
 0x20b   : > { %1595 = vmatmul.bf16.gmra.mxu1 %v7106_v25  ;;  %1684 = vmatmul.bf16.gmra.mxu2 %v7106_v25  ;;  %v1006_v0 = vpack.c.bf16 %v968_v55, %v966_v52  ;;  %v969_v47 = vmax.f32 %v815_v26, 0.0  ;;  %v5399_v52 = vld [vmem:[%s11366_s5 + $0x50] sm:$0xf0] }
 0x20c   : > { %v7294_v8 = vpop.f32.mrf.mxu0  ;;  %v5402_v56 = vor.u32 %v5593_v49, %v5399_v52  ;;  %v7355_v52 = vperm.slane %v7350_v46, 0 }
 0x20d   : > { %1150 = vmatmul.bf16.gmra.mxu3 %v1006_v0 }
 0x20e   : > { %v903_v16 = vpop.f32.mrf.mxu2  ;;  %1741 = vmatpush.bf16.msrb.mxu3 %v5402_v56  ;;  %v7486_v11 = vadd.f32 %v7201_v6, %v7355_v52 }
 0x20f   : > { %v904_v58 = vadd.f32 %v903_v16, %v6969_v29  ;;  %v5378_v16 = vor.u32 %v5587_v3, %v5375_v9 }
 0x210   : > { %v816_v33 = vpop.f32.mrf.mxu1  ;;  %v7309_v37 = vpop.f32.mrf.mxu3  ;;  %11799 = vst [vmem:[#allocation32_spill] sm:$0xff] %v7486_v11 }
 0x211   : > { %11783 = vst [vmem:[#allocation16_spill] sm:$0xff] %v7309_v37  ;;  %v817_v40 = vadd.f32 %v816_v33, %v6960_v21  ;;  %v970_v19 = vmax.f32 %v904_v58, 0.0 }
 0x212   : > { %1742 = vmatpush.bf16.msrb.mxu3 %v5378_v16 }
 0x213   : > { %v971_v48 = vmax.f32 %v817_v40, 0.0 }
 0x214   : > { %v7324_v55 = vpop.f32.mrf.mxu0 }
 0x215   : > { %v7327_v62 = vpack.c.bf16 %v971_v48, %v969_v47 }
 0x216   : > { %v905_v0 = vpop.f32.mrf.mxu2 }
 0x217   : > { %v906_v2 = vadd.f32 %v905_v0, %v6969_v29  ;;  %1546 = vmatmul.bf16.gmra.mxu0 %v7327_v62  ;;  %v7361_v0 = vperm.slane %v7350_v46, 1 }
 0x218   : > { %v819_v10 = vpop.f32.mrf.mxu1  ;;  %v7337_v14 = vpop.f32.mrf.mxu3 }
 0x219   : > { %11784 = vst [vmem:[#allocation17_spill] sm:$0xff] %v7337_v14  ;;  %v972_v26 = vmax.f32 %v906_v2, 0.0  ;;  %v820_v39 = vadd.f32 %v819_v10, %v6960_v21  ;;  %v7369_v10 = vadd.f32 %v7140_v5, %v7355_v52  ;;  %v5600_v5 = vld [vmem:[%s11366_s5 + $0x74] sm:$0xf] }
 0x21b   : > { %1600 = vmatmul.bf16.gmra.mxu1 %v7114_v45  ;;  %1689 = vmatmul.bf16.gmra.mxu2 %v7114_v45  ;;  %v1007_v28 = vpack.c.bf16 %v972_v26, %v970_v19  ;;  %v973_v47 = vmax.f32 %v820_v39, 0.0  ;;  %v5431_v39 = vld [vmem:[%s11366_s5 + $0x88] sm:$0xf0] }
 0x21c   : > { %v7341_v31 = vpop.f32.mrf.mxu0 }
 0x21d   : > { %1155 = vmatmul.bf16.gmra.mxu3 %v1007_v28 }
 0x21e   : > { %v908_v33 = vpop.f32.mrf.mxu2 }
 0x21f   : > { %v909_v56 = vadd.f32 %v908_v33, %v6969_v29  ;;  %v7379_v33 = vperm.slane %v7350_v46, 2 }
 0x220   : > { %v821_v40 = vpop.f32.mrf.mxu1  ;;  %v7344_v20 = vpop.f32.mrf.mxu3 }
 0x221   : > { %11785 = vst [vmem:[#allocation18_spill] sm:$0xff] %v7344_v20  ;;  %v822_v43 = vadd.f32 %v821_v40, %v6960_v21  ;;  %v974_v16 = vmax.f32 %v909_v56, 0.0 }
 0x222   : > { %11787 = vst [vmem:[#allocation20_spill] sm:$0xff] %v7379_v33 }
 0x223   : > { %v975_v48 = vmax.f32 %v822_v43, 0.0  ;;  %v5434_v43 = vor.u32 %v5600_v5, %v5431_v39 }
 0x224   : > { %v7352_v49 = vpop.f32.mrf.mxu0 }
 0x225   : > { %v7358_v58 = vpack.c.bf16 %v975_v48, %v973_v47  ;;  %1918 = vmatpush.bf16.msra.mxu1 %v5434_v43 }
 0x226   : > { %v910_v21 = vpop.f32.mrf.mxu2 }
 0x227   : > { %v911_v2 = vadd.f32 %v910_v21, %v6969_v29  ;;  %1551 = vmatmul.bf16.gmra.mxu0 %v7358_v58 }
 0x228   : > { %v7365_v3 = vpop.f32.mrf.mxu3  ;;  %v1566_v9 = vpop.f32.mrf.mxu1 }
 0x229   : > { %11786 = vst [vmem:[#allocation19_spill] sm:$0xff] %v7365_v3  ;;  %v976_v19 = vmax.f32 %v911_v2, 0.0  ;;  %v7372_v26 = vadd.f32 %v1566_v9, %v7361_v0  ;;  %v7396_v2 = vadd.f32 %v7149_v15, %v7355_v52 }
 0x22b   : > { %v2002_v28 = vadd.f32 %v7372_v26, %v7369_v10  ;;  %1605 = vmatmul.bf16.gmra.mxu1 %v7143_v7  ;;  %1694 = vmatmul.bf16.gmra.mxu2 %v7143_v7  ;;  %v1008_v29 = vpack.c.bf16 %v976_v19, %v974_v16 }
 0x22c   : > { %v7387_v40 = vpop.f32.mrf.mxu0 }
 0x22d   : > { %1160 = vmatmul.bf16.gmra.mxu3 %v1008_v29 }
 0x22e   : > { %v1655_v47 = vpop.f32.mrf.mxu2 }
 0x22f   : > { %v7390_v48 = vadd.f32 %v1655_v47, %v7379_v33 }
 0x230   : > { %v7392_v56 = vpop.f32.mrf.mxu3  ;;  %v1568_v21 = vpop.f32.mrf.mxu1 }
 0x231   : > { %11788 = vst [vmem:[#allocation21_spill] sm:$0xff] %v7392_v56  ;;  %v7399_v9 = vadd.f32 %v2002_v28, %v7390_v48  ;;  %v7402_v16 = vadd.f32 %v1568_v21, %v7361_v0  ;;  %v7416_v28 = vadd.f32 %v7155_v27, %v7355_v52 }
 0x233   : > { %v2003_v19 = vadd.f32 %v7402_v16, %v7396_v2 }
 0x234   : > { %v7406_v29 = vpop.f32.mrf.mxu0 }
 0x236   : > { %v1657_v5 = vpop.f32.mrf.mxu2 }
 0x237   : > { %v7409_v39 = vadd.f32 %v1657_v5, %v7379_v33  ;;  %1832 = vmatmul.bf16.vlgmr.msra.gmra.mxu0 %v6974_v36 }
 0x238   : > { %v7412_v43 = vpop.f32.mrf.mxu3  ;;  %v1571_v15 = vpop.f32.mrf.mxu1 }
 0x239   : > { %11789 = vst [vmem:[#allocation22_spill] sm:$0xff] %v7412_v43  ;;  %v7419_v47 = vadd.f32 %v2003_v19, %v7409_v39  ;;  %v7422_v21 = vadd.f32 %v1571_v15, %v7361_v0  ;;  %v7438_v15 = vadd.f32 %v7178_v44, %v7355_v52 }
 0x23b   : > { %v2004_v56 = vadd.f32 %v7422_v21, %v7416_v28  ;;  %1610 = vmatmul.bf16.gmra.mxu1 %v7158_v30  ;;  %1699 = vmatmul.bf16.gmra.mxu2 %v7158_v30  ;;  %11791 = vst [vmem:[#allocation24_spill] sm:$0xff] %v7438_v15 }
 0x23c   : > { %v7428_v5 = vpop.f32.mrf.mxu0 }
 0x23d   : > { %1743 = vmatmul.bf16.vlgmr.msrb.gmra.mxu3 %v6974_v36 }
 0x23e   : > { %v1660_v43 = vpop.f32.mrf.mxu2 }
 0x23f   : > { %v7432_v27 = vadd.f32 %v1660_v43, %v7379_v33 }
 0x240   : > { %v7434_v19 = vpop.f32.mrf.mxu3  ;;  %v1573_v3 = vpop.f32.mrf.mxu1 }
 0x241   : > { %11790 = vst [vmem:[#allocation23_spill] sm:$0xff] %v7434_v19  ;;  %v7441_v20 = vadd.f32 %v2004_v56, %v7432_v27  ;;  %v7444_v14 = vadd.f32 %v1573_v3, %v7361_v0  ;;  %v7458_v56 = vadd.f32 %v7190_v59, %v7355_v52  ;;  %v5407_v59 = vld [vmem:[%s11366_s5 + $0x58] sm:$0xf0] }
 0x243   : > { %11792 = vst [vmem:[#allocation25_spill] sm:$0xff] %v7444_v14  ;;  %v2005_v37 = vadd.f32 %v7444_v14, %v7438_v15 }
 0x244   : > { %v7448_v50 = vpop.f32.mrf.mxu0  ;;  %11795 = vst [vmem:[#allocation28_spill] sm:$0xff] %v7458_v56 }
 0x246   : > { %v1662_v43 = vpop.f32.mrf.mxu2 }
 0x247   : > { %v7451_v24 = vadd.f32 %v1662_v43, %v7379_v33  ;;  %1837 = vmatmul.bf16.gmra.mxu0 %v6983_v57  ;;  %v5594_v43 = vld [vmem:[%s11366_s5 + $0x44] sm:$0xf] }
 0x248   : > { %v7454_v19 = vpop.f32.mrf.mxu3  ;;  %v1576_v44 = vpop.f32.mrf.mxu1 }
 0x249   : > { %11793 = vst [vmem:[#allocation26_spill] sm:$0xff] %v7451_v24  ;;  %v7461_v3 = vadd.f32 %v2005_v37, %v7451_v24  ;;  %v7464_v4 = vadd.f32 %v1576_v44, %v7361_v0 }
 0x24a   : > { %11794 = vst [vmem:[#allocation27_spill] sm:$0xff] %v7454_v19  ;;  %v5410_v19 = vor.u32 %v5594_v43, %v5407_v59 }
 0x24b   : > { %11796 = vst [vmem:[#allocation29_spill] sm:$0xff] %v7464_v4  ;;  %v2006_v53 = vadd.f32 %v7464_v4, %v7458_v56  ;;  %1615 = vmatmul.bf16.gmra.mxu1 %v7193_v61  ;;  %1704 = vmatmul.bf16.gmra.mxu2 %v7193_v61 }
 0x24c   : > { %v7476_v37 = vpop.f32.mrf.mxu0  ;;  %1919 = vmatpush.bf16.msra.mxu1 %v5410_v19 }
 0x24d   : > { %1748 = vmatmul.bf16.gmra.mxu3 %v6983_v57 }
 0x24e   : > { %v1665_v44 = vpop.f32.mrf.mxu2 }
 0x24f   : > { %v7480_v34 = vadd.f32 %v1665_v44, %v7379_v33 }
 0x250   : > { %v7482_v4 = vpop.f32.mrf.mxu3  ;;  %v1578_v56 = vpop.f32.mrf.mxu1 }
 0x251   : > { %11797 = vst [vmem:[#allocation30_spill] sm:$0xff] %v7480_v34  ;;  %v7489_v14 = vadd.f32 %v2006_v53, %v7480_v34  ;;  %v7492_v15 = vadd.f32 %v1578_v56, %v7361_v0  ;;  %v7506_v53 = vadd.f32 %v7207_v18, %v7355_v52 }
 0x252   : > { %11798 = vst [vmem:[#allocation31_spill] sm:$0xff] %v7482_v4 }
 0x253   : > { %11800 = vst [vmem:[#allocation33_spill] sm:$0xff] %v7492_v15  ;;  %v2007_v43 = vadd.f32 %v7492_v15, %v7486_v11 }
 0x254   : > { %v7496_v19 = vpop.f32.mrf.mxu0  ;;  %11803 = vst [vmem:[#allocation36_spill] sm:$0xff] %v7506_v53 }
 0x256   : > { %v1667_v59 = vpop.f32.mrf.mxu2 }
 0x257   : > { %v7499_v44 = vadd.f32 %v1667_v59, %v7379_v33  ;;  %1842 = vmatmul.bf16.gmra.mxu0 %v6998_v17 }
 0x258   : > { %v7502_v4 = vpop.f32.mrf.mxu3  ;;  %v1581_v6 = vpop.f32.mrf.mxu1 }
 0x259   : > { %11801 = vst [vmem:[#allocation34_spill] sm:$0xff] %v7499_v44  ;;  %v7509_v56 = vadd.f32 %v2007_v43, %v7499_v44  ;;  %v7512_v15 = vadd.f32 %v1581_v6, %v7361_v0  ;;  %v7528_v6 = vadd.f32 %v7230_v41, %v7355_v52 }
 0x25a   : > { %11802 = vst [vmem:[#allocation35_spill] sm:$0xff] %v7502_v4 }
 0x25b   : > { %11804 = vst [vmem:[#allocation37_spill] sm:$0xff] %v7512_v15  ;;  %v2008_v11 = vadd.f32 %v7512_v15, %v7506_v53  ;;  %1620 = vmatmul.bf16.gmra.mxu1 %v7210_v23  ;;  %1709 = vmatmul.bf16.gmra.mxu2 %v7210_v23 }
 0x25c   : > { %v7518_v59 = vpop.f32.mrf.mxu0  ;;  %11807 = vst [vmem:[#allocation40_spill] sm:$0xff] %v7528_v6 }
 0x25d   : > { %1753 = vmatmul.bf16.gmra.mxu3 %v6998_v17 }
 0x25e   : > { %v1670_v4 = vpop.f32.mrf.mxu2 }
 0x25f   : > { %v7522_v18 = vadd.f32 %v1670_v4, %v7379_v33 }
 0x260   : > { %v7524_v43 = vpop.f32.mrf.mxu3  ;;  %v1583_v44 = vpop.f32.mrf.mxu1 }
 0x261   : > { %11805 = vst [vmem:[#allocation38_spill] sm:$0xff] %v7522_v18  ;;  %v7531_v53 = vadd.f32 %v2008_v11, %v7522_v18  ;;  %v7534_v15 = vadd.f32 %v1583_v44, %v7361_v0  ;;  %v7548_v11 = vadd.f32 %v7242_v60, %v7355_v52 }
 0x262   : > { %11806 = vst [vmem:[#allocation39_spill] sm:$0xff] %v7524_v43 }
 0x263   : > { %11808 = vst [vmem:[#allocation41_spill] sm:$0xff] %v7534_v15  ;;  %v2009_v34 = vadd.f32 %v7534_v15, %v7528_v6 }
 0x264   : > { %v7538_v24 = vpop.f32.mrf.mxu0  ;;  %11811 = vst [vmem:[#allocation44_spill] sm:$0xff] %v7548_v11 }
 0x266   : > { %v1672_v4 = vpop.f32.mrf.mxu2 }
 0x267   : > { %v7541_v1 = vadd.f32 %v1672_v4, %v7379_v33  ;;  %1847 = vmatmul.bf16.gmra.mxu0 %v7007_v42  ;;  %v5588_v4 = vld [vmem:[%s11366_s5 + $0x14] sm:$0xf] }
 0x268   : > { %v7544_v43 = vpop.f32.mrf.mxu3  ;;  %v1586_v41 = vpop.f32.mrf.mxu1 }
 0x269   : > { %11809 = vst [vmem:[#allocation42_spill] sm:$0xff] %v7541_v1  ;;  %v7551_v44 = vadd.f32 %v2009_v34, %v7541_v1  ;;  %v7554_v15 = vadd.f32 %v1586_v41, %v7361_v0  ;;  %v5383_v34 = vld [vmem:[%s11366_s5 + $0x28] sm:$0xf0] }
 0x26a   : > { %11810 = vst [vmem:[#allocation43_spill] sm:$0xff] %v7544_v43  ;;  %v5386_v41 = vor.u32 %v5588_v4, %v5383_v34 }
 0x26b   : > { %11812 = vst [vmem:[#allocation45_spill] sm:$0xff] %v7554_v15  ;;  %v7558_v6 = vadd.f32 %v7554_v15, %v7548_v11  ;;  %1625 = vmatmul.bf16.gmra.mxu1 %v7245_v63  ;;  %1714 = vmatmul.bf16.gmra.mxu2 %v7245_v63  ;;  %v7575_v11 = vadd.f32 %v7253_v13, %v7355_v52 }
 0x26c   : > { %v7568_v60 = vpop.f32.mrf.mxu0  ;;  %1920 = vmatpush.bf16.msra.mxu1 %v5386_v41  ;;  %v7591_v41 = vadd.f32 %v7259_v32, %v7355_v52  ;;  %v7609_v32 = vadd.f32 %v7294_v8, %v7355_v52 }
 0x26d   : > { %11813 = vst [vmem:[#allocation46_spill] sm:$0xff] %v7558_v6  ;;  %1758 = vmatmul.bf16.gmra.mxu3 %v7007_v42 }
 0x26e   : > { %11815 = vst [vmem:[#allocation48_spill] sm:$0xff] %v7575_v11 }
 0x26f   : > { %11819 = vst [vmem:[#allocation52_spill] sm:$0xff] %v7591_v41 }
 0x270   : > { %v7571_v43 = vpop.f32.mrf.mxu3  ;;  %v1588_v15 = vpop.f32.mrf.mxu1  ;;  %11823 = vst [vmem:[#allocation56_spill] sm:$0xff] %v7609_v32 }
 0x271   : > { %11814 = vst [vmem:[#allocation47_spill] sm:$0xff] %v7571_v43  ;;  %v7578_v1 = vadd.f32 %v1588_v15, %v7361_v0 }
 0x273   : > { %11816 = vst [vmem:[#allocation49_spill] sm:$0xff] %v7578_v1  ;;  %v7582_v6 = vadd.f32 %v7578_v1, %v7575_v11 }
 0x274   : > { %v7584_v18 = vpop.f32.mrf.mxu0 }
 0x275   : > { %11817 = vst [vmem:[#allocation50_spill] sm:$0xff] %v7582_v6 }
 0x277   : > { %1852 = vmatmul.bf16.gmra.mxu0 %v7040_v12 }
 0x278   : > { %v7587_v4 = vpop.f32.mrf.mxu3  ;;  %v1591_v34 = vpop.f32.mrf.mxu1 }
 0x279   : > { %11818 = vst [vmem:[#allocation51_spill] sm:$0xff] %v7587_v4  ;;  %v7594_v13 = vadd.f32 %v1591_v34, %v7361_v0 }
 0x27b   : > { %11820 = vst [vmem:[#allocation53_spill] sm:$0xff] %v7594_v13  ;;  %v7598_v15 = vadd.f32 %v7594_v13, %v7591_v41  ;;  %1630 = vmatmul.bf16.gmra.mxu1 %v7262_v35  ;;  %1719 = vmatmul.bf16.gmra.mxu2 %v7262_v35 }
 0x27c   : > { %v7602_v43 = vpop.f32.mrf.mxu0 }
 0x27d   : > { %11821 = vst [vmem:[#allocation54_spill] sm:$0xff] %v7598_v15  ;;  %1763 = vmatmul.bf16.gmra.mxu3 %v7040_v12 }
 0x280   : > { %v7605_v4 = vpop.f32.mrf.mxu3  ;;  %v1593_v11 = vpop.f32.mrf.mxu1 }
 0x281   : > { %11822 = vst [vmem:[#allocation55_spill] sm:$0xff] %v7605_v4  ;;  %v7612_v34 = vadd.f32 %v1593_v11, %v7361_v0  ;;  %v7625_v4 = vadd.f32 %v7324_v55, %v7355_v52  ;;  %v7643_v55 = vadd.f32 %v7341_v31, %v7355_v52 }
 0x283   : > { %11824 = vst [vmem:[#allocation57_spill] sm:$0xff] %v7612_v34  ;;  %v7616_v13 = vadd.f32 %v7612_v34, %v7609_v32 }
 0x284   : > { %v7618_v41 = vpop.f32.mrf.mxu0  ;;  %11827 = vst [vmem:[#allocation60_spill] sm:$0xff] %v7625_v4 }
 0x285   : > { %11825 = vst [vmem:[#allocation58_spill] sm:$0xff] %v7616_v13 }
 0x286   : > { %11831 = vst [vmem:[#allocation64_spill] sm:$0xff] %v7643_v55 }
 0x287   : > { %1857 = vmatmul.bf16.gmra.mxu0 %v7073_v51 }
 0x288   : > { %v7621_v1 = vpop.f32.mrf.mxu3  ;;  %v1596_v15 = vpop.f32.mrf.mxu1 }
 0x289   : > { %11826 = vst [vmem:[#allocation59_spill] sm:$0xff] %v7621_v1  ;;  %v7628_v8 = vadd.f32 %v1596_v15, %v7361_v0 }
 0x28b   : > { %11828 = vst [vmem:[#allocation61_spill] sm:$0xff] %v7628_v8  ;;  %v7632_v11 = vadd.f32 %v7628_v8, %v7625_v4  ;;  %1635 = vmatmul.bf16.gmra.mxu1 %v7327_v62  ;;  %1724 = vmatmul.bf16.gmra.mxu2 %v7327_v62 }
 0x28c   : > { %v7636_v34 = vpop.f32.mrf.mxu0 }
 0x28d   : > { %11829 = vst [vmem:[#allocation62_spill] sm:$0xff] %v7632_v11  ;;  %1768 = vmatmul.bf16.gmra.mxu3 %v7073_v51 }
 0x290   : > { %v7639_v1 = vpop.f32.mrf.mxu3  ;;  %v1598_v32 = vpop.f32.mrf.mxu1 }
 0x291   : > { %11830 = vst [vmem:[#allocation63_spill] sm:$0xff] %v7639_v1  ;;  %v7646_v15 = vadd.f32 %v1598_v32, %v7361_v0  ;;  %v7659_v1 = vadd.f32 %v7352_v49, %v7355_v52  ;;  %v7677_v49 = vadd.f32 %v7387_v40, %v7355_v52 }
 0x293   : > { %11832 = vst [vmem:[#allocation65_spill] sm:$0xff] %v7646_v15  ;;  %v7650_v4 = vadd.f32 %v7646_v15, %v7643_v55 }
 0x294   : > { %v7652_v8 = vpop.f32.mrf.mxu0  ;;  %11835 = vst [vmem:[#allocation68_spill] sm:$0xff] %v7659_v1 }
 0x295   : > { %11833 = vst [vmem:[#allocation66_spill] sm:$0xff] %v7650_v4 }
 0x296   : > { %11839 = vst [vmem:[#allocation72_spill] sm:$0xff] %v7677_v49 }
 0x297   : > { %1862 = vmatmul.bf16.gmra.mxu0 %v7106_v25 }
 0x298   : > { %v7655_v11 = vpop.f32.mrf.mxu3  ;;  %v1601_v13 = vpop.f32.mrf.mxu1 }
 0x299   : > { %11834 = vst [vmem:[#allocation67_spill] sm:$0xff] %v7655_v11  ;;  %v7662_v31 = vadd.f32 %v1601_v13, %v7361_v0 }
 0x29b   : > { %11836 = vst [vmem:[#allocation69_spill] sm:$0xff] %v7662_v31  ;;  %v7666_v32 = vadd.f32 %v7662_v31, %v7659_v1  ;;  %1640 = vmatmul.bf16.gmra.mxu1 %v7358_v58  ;;  %1729 = vmatmul.bf16.gmra.mxu2 %v7358_v58 }
 0x29c   : > { %v7670_v15 = vpop.f32.mrf.mxu0 }
 0x29d   : > { %11837 = vst [vmem:[#allocation70_spill] sm:$0xff] %v7666_v32  ;;  %1773 = vmatmul.bf16.gmra.mxu3 %v7106_v25 }
 0x2a0   : > { %v7673_v11 = vpop.f32.mrf.mxu3  ;;  %v1603_v55 = vpop.f32.mrf.mxu1 }
 0x2a1   : > { %11838 = vst [vmem:[#allocation71_spill] sm:$0xff] %v7673_v11  ;;  %v7680_v13 = vadd.f32 %v1603_v55, %v7361_v0  ;;  %v7693_v11 = vadd.f32 %v7406_v29, %v7355_v52  ;;  %v7710_v29 = vadd.f32 %v7428_v5, %v7355_v52 }
 0x2a3   : > { %11840 = vst [vmem:[#allocation73_spill] sm:$0xff] %v7680_v13  ;;  %v7684_v31 = vadd.f32 %v7680_v13, %v7677_v49 }
 0x2a4   : > { %v7686_v1 = vpop.f32.mrf.mxu0  ;;  %11843 = vst [vmem:[#allocation76_spill] sm:$0xff] %v7693_v11 }
 0x2a5   : > { %11841 = vst [vmem:[#allocation74_spill] sm:$0xff] %v7684_v31 }
 0x2a6   : > { %11847 = vst [vmem:[#allocation80_spill] sm:$0xff] %v7710_v29 }
 0x2a7   : > { %1867 = vmatmul.bf16.gmra.mxu0 %v7114_v45 }
 0x2a8   : > { %v7689_v32 = vpop.f32.mrf.mxu3  ;;  %v1606_v4 = vpop.f32.mrf.mxu1 }
 0x2a9   : > { %11842 = vst [vmem:[#allocation75_spill] sm:$0xff] %v7689_v32  ;;  %v7696_v40 = vadd.f32 %v1606_v4, %v7361_v0 }
 0x2ab   : > { %11844 = vst [vmem:[#allocation77_spill] sm:$0xff] %v7696_v40  ;;  %v7700_v55 = vadd.f32 %v7696_v40, %v7693_v11  ;;  %1921 = vmatmul.bf16.vlgmr.msra.gmra.mxu1 %v6974_v36 }
 0x2ac   : > { %v7703_v49 = vpop.f32.mrf.mxu0 }
 0x2ad   : > { %11845 = vst [vmem:[#allocation78_spill] sm:$0xff] %v7700_v55  ;;  %1778 = vmatmul.bf16.gmra.mxu3 %v7114_v45 }
 0x2b0   : > { %v7706_v13 = vpop.f32.mrf.mxu3  ;;  %v1608_v32 = vpop.f32.mrf.mxu1 }
 0x2b1   : > { %11846 = vst [vmem:[#allocation79_spill] sm:$0xff] %v7706_v13  ;;  %v7713_v4 = vadd.f32 %v1608_v32, %v7361_v0  ;;  %v7726_v13 = vadd.f32 %v7448_v50, %v7355_v52  ;;  %v7743_v50 = vadd.f32 %v7476_v37, %v7355_v52 }
 0x2b3   : > { %11848 = vst [vmem:[#allocation81_spill] sm:$0xff] %v7713_v4  ;;  %v7717_v11 = vadd.f32 %v7713_v4, %v7710_v29 }
 0x2b4   : > { %v7719_v40 = vpop.f32.mrf.mxu0  ;;  %11851 = vst [vmem:[#allocation84_spill] sm:$0xff] %v7726_v13 }
 0x2b5   : > { %11849 = vst [vmem:[#allocation82_spill] sm:$0xff] %v7717_v11  ;;  %v7759_v11 = vadd.f32 %v7496_v19, %v7355_v52  ;;  %v7776_v19 = vadd.f32 %v7518_v59, %v7355_v52 }
 0x2b6   : > { %11854 = vst [vmem:[#allocation87_spill] sm:$0xff] %v7743_v50 }
 0x2b7   : > { %1872 = vmatmul.bf16.gmra.mxu0 %v7143_v7  ;;  %11857 = vst [vmem:[#allocation90_spill] sm:$0xff] %v7759_v11 }
 0x2b8   : > { %v7722_v36 = vpop.f32.mrf.mxu3  ;;  %v1611_v55 = vpop.f32.mrf.mxu1  ;;  %11860 = vst [vmem:[#allocation93_spill] sm:$0xff] %v7776_v19 }
 0x2b9   : > { %11850 = vst [vmem:[#allocation83_spill] sm:$0xff] %v7722_v36  ;;  %v7729_v5 = vadd.f32 %v1611_v55, %v7361_v0 }
 0x2bb   : > { %11852 = vst [vmem:[#allocation85_spill] sm:$0xff] %v7729_v5  ;;  %v7733_v32 = vadd.f32 %v7729_v5, %v7726_v13  ;;  %1926 = vmatmul.bf16.gmra.mxu1 %v6983_v57 }
 0x2bc   : > { %v7736_v4 = vpop.f32.mrf.mxu0 }
 0x2bd   : > { %11853 = vst [vmem:[#allocation86_spill] sm:$0xff] %v7733_v32  ;;  %1783 = vmatmul.bf16.gmra.mxu3 %v7143_v7 }
 0x2c0   : > { %v1613_v29 = vpop.f32.mrf.mxu1  ;;  %v7739_v36 = vpop.f32.mrf.mxu3 }
 0x2c1   : > { %v7746_v55 = vadd.f32 %v1613_v29, %v7361_v0 }
 0x2c3   : > { %11855 = vst [vmem:[#allocation88_spill] sm:$0xff] %v7746_v55  ;;  %v7750_v13 = vadd.f32 %v7746_v55, %v7743_v50 }
 0x2c4   : > { %v7752_v5 = vpop.f32.mrf.mxu0 }
 0x2c5   : > { %11856 = vst [vmem:[#allocation89_spill] sm:$0xff] %v7750_v13 }
 0x2c7   : > { %1877 = vmatmul.bf16.gmra.mxu0 %v7158_v30 }
 0x2c8   : > { %v1616_v57 = vpop.f32.mrf.mxu1  ;;  %v7755_v32 = vpop.f32.mrf.mxu3 }
 0x2c9   : > { %v7762_v37 = vadd.f32 %v1616_v57, %v7361_v0 }
 0x2cb   : > { %11858 = vst [vmem:[#allocation91_spill] sm:$0xff] %v7762_v37  ;;  %v7766_v29 = vadd.f32 %v7762_v37, %v7759_v11  ;;  %1931 = vmatmul.bf16.gmra.mxu1 %v6998_v17 }
 0x2cc   : > { %v7770_v55 = vpop.f32.mrf.mxu0 }
 0x2cd   : > { %11859 = vst [vmem:[#allocation92_spill] sm:$0xff] %v7766_v29  ;;  %1788 = vmatmul.bf16.gmra.mxu3 %v7158_v30  ;;  %v7790_v29 = vadd.f32 %v7538_v24, %v7355_v52  ;;  %v7806_v24 = vadd.f32 %v7568_v60, %v7355_v52 }
 0x2cf   : > { %11863 = vst [vmem:[#allocation96_spill] sm:$0xff] %v7790_v29 }
 0x2d0   : > { %v1618_v50 = vpop.f32.mrf.mxu1  ;;  %v7772_v13 = vpop.f32.mrf.mxu3  ;;  %11866 = vst [vmem:[#allocation99_spill] sm:$0xff] %v7806_v24 }
 0x2d1   : > { %v7779_v57 = vadd.f32 %v1618_v50, %v7361_v0 }
 0x2d3   : > { %11861 = vst [vmem:[#allocation94_spill] sm:$0xff] %v7779_v57  ;;  %v7783_v37 = vadd.f32 %v7779_v57, %v7776_v19  ;;  %v7802_v19 = vperm.slane %v7350_v46, 3 }
 0x2d4   : > { %v1843_v31 = vpop.f32.mrf.mxu0 }
 0x2d5   : > { %11862 = vst [vmem:[#allocation95_spill] sm:$0xff] %v7783_v37 }
 0x2d7   : > { %1882 = vmatmul.bf16.gmra.mxu0 %v7193_v61 }
 0x2d8   : > { %v1621_v17 = vpop.f32.mrf.mxu1  ;;  %v7786_v11 = vpop.f32.mrf.mxu3 }
 0x2d9   : > { %v7793_v59 = vadd.f32 %v1621_v17, %v7361_v0  ;;  %v7809_v17 = vperm.slane %v7350_v46, 4 }
 0x2db   : > { %11864 = vst [vmem:[#allocation97_spill] sm:$0xff] %v7793_v59  ;;  %v7797_v50 = vadd.f32 %v7793_v59, %v7790_v29  ;;  %1936 = vmatmul.bf16.gmra.mxu1 %v7007_v42  ;;  %v7818_v42 = vadd.f32 %v1843_v31, %v7809_v17 }
 0x2dc   : > { %v1845_v29 = vpop.f32.mrf.mxu0 }
 0x2dd   : > { %11865 = vst [vmem:[#allocation98_spill] sm:$0xff] %v7797_v50  ;;  %1793 = vmatmul.bf16.gmra.mxu3 %v7193_v61 }
 0x2e0   : > { %v1623_v57 = vpop.f32.mrf.mxu1  ;;  %v1754_v37 = vpop.f32.mrf.mxu3 }
 0x2e1   : > { %v7812_v6 = vadd.f32 %v1623_v57, %v7361_v0  ;;  %v7815_v59 = vadd.f32 %v1754_v37, %v7802_v19  ;;  %v7832_v37 = vadd.f32 %v7584_v18, %v7355_v52 }
 0x2e3   : > { %11867 = vst [vmem:[#allocation100_spill] sm:$0xff] %v7812_v6  ;;  %v7822_v50 = vadd.f32 %v7812_v6, %v7806_v24  ;;  %v2070_v60 = vadd.f32 %v7489_v14, %v7815_v59  ;;  %v7841_v24 = vadd.f32 %v1845_v29, %v7809_v17  ;;  %v7856_v29 = vadd.f32 %v7602_v43, %v7355_v52 }
 0x2e4   : > { %11868 = vst [vmem:[#allocation101_spill] sm:$0xff] %v7815_v59  ;;  %v1848_v18 = vpop.f32.mrf.mxu0 }
 0x2e5   : > { %11869 = vst [vmem:[#allocation102_spill] sm:$0xff] %v7822_v50  ;;  %v7827_v33 = vadd.f32 %v2070_v60, %v7818_v42 }
 0x2e6   : > { %11870 = vst [vmem:[#allocation103_spill] sm:$0xff] %v7832_v37 }
 0x2e7   : > { %1887 = vmatmul.bf16.gmra.mxu0 %v7210_v23  ;;  %11873 = vst [vmem:[#allocation106_spill] sm:$0xff] %v7856_v29 }
 0x2e8   : > { %v1626_v57 = vpop.f32.mrf.mxu1  ;;  %v1756_v61 = vpop.f32.mrf.mxu3 }
 0x2e9   : > { %v7835_v31 = vadd.f32 %v1626_v57, %v7361_v0  ;;  %v7838_v6 = vadd.f32 %v1756_v61, %v7802_v19 }
 0x2eb   : > { %11871 = vst [vmem:[#allocation104_spill] sm:$0xff] %v7835_v31  ;;  %v7845_v14 = vadd.f32 %v7835_v31, %v7832_v37  ;;  %v2071_v60 = vadd.f32 %v7509_v56, %v7838_v6  ;;  %1941 = vmatmul.bf16.gmra.mxu1 %v7040_v12  ;;  %v7865_v12 = vadd.f32 %v1848_v18, %v7809_v17 }
 0x2ec   : > { %v1850_v43 = vpop.f32.mrf.mxu0 }
 0x2ed   : > { %11872 = vst [vmem:[#allocation105_spill] sm:$0xff] %v7845_v14  ;;  %1798 = vmatmul.bf16.gmra.mxu3 %v7210_v23  ;;  %v7852_v57 = vadd.f32 %v2071_v60, %v7841_v24 }
 0x2f0   : > { %v1628_v61 = vpop.f32.mrf.mxu1  ;;  %v1759_v50 = vpop.f32.mrf.mxu3 }
 0x2f1   : > { %v7859_v37 = vadd.f32 %v1628_v61, %v7361_v0  ;;  %v7862_v31 = vadd.f32 %v1759_v50, %v7802_v19  ;;  %v7879_v50 = vadd.f32 %v7618_v41, %v7355_v52 }
 0x2f3   : > { %11874 = vst [vmem:[#allocation107_spill] sm:$0xff] %v7859_v37  ;;  %v7869_v56 = vadd.f32 %v7859_v37, %v7856_v29  ;;  %v2072_v60 = vadd.f32 %v7531_v53, %v7862_v31  ;;  %v7888_v53 = vadd.f32 %v1850_v43, %v7809_v17 }
 0x2f4   : > { %11876 = vst [vmem:[#allocation109_spill] sm:$0xff] %v7879_v50 }
 0x2f5   : > { %11875 = vst [vmem:[#allocation108_spill] sm:$0xff] %v7869_v56  ;;  %v7874_v14 = vadd.f32 %v2072_v60, %v7865_v12  ;;  %v11948_v56 = vld [vmem:[#allocation36_spill] sm:$0xff] }
 0x2f7   : > { %1892 = vmatmul.bf16.gmra.mxu0 %v7245_v63 }
 0x2f8   : > { %v1631_v61 = vpop.f32.mrf.mxu1  ;;  %v1761_v59 = vpop.f32.mrf.mxu3 }
 0x2f9   : > { %v7882_v18 = vadd.f32 %v1631_v61, %v7361_v0  ;;  %v7885_v37 = vadd.f32 %v1761_v59, %v7802_v19  ;;  %v7903_v59 = vadd.f32 %v7636_v34, %v7355_v52 }
 0x2fb   : > { %11877 = vst [vmem:[#allocation110_spill] sm:$0xff] %v7882_v18  ;;  %v7892_v60 = vadd.f32 %v7882_v18, %v7879_v50  ;;  %v2073_v29 = vadd.f32 %v7551_v44, %v7885_v37  ;;  %1946 = vmatmul.bf16.gmra.mxu1 %v7073_v51  ;;  %v7915_v44 = vadd.f32 %v7652_v8, %v7355_v52  ;;  %v11930_v50 = vld [vmem:[#allocation34_spill] sm:$0xff] }
 0x2fc   : > { %11879 = vst [vmem:[#allocation112_spill] sm:$0xff] %v7903_v59 }
 0x2fd   : > { %11878 = vst [vmem:[#allocation111_spill] sm:$0xff] %v7892_v60  ;;  %1803 = vmatmul.bf16.gmra.mxu3 %v7245_v63  ;;  %v7899_v41 = vadd.f32 %v2073_v29, %v7888_v53  ;;  %v11946_v60 = vld [vmem:[#allocation46_spill] sm:$0xff] }
 0x2fe   : > { %11882 = vst [vmem:[#allocation115_spill] sm:$0xff] %v7915_v44 }
 0x300   : > { %v1633_v61 = vpop.f32.mrf.mxu1 }
 0x301   : > { %v7906_v43 = vadd.f32 %v1633_v61, %v7361_v0 }
 0x303   : > { %11880 = vst [vmem:[#allocation113_spill] sm:$0xff] %v7906_v43  ;;  %v7910_v18 = vadd.f32 %v7906_v43, %v7903_v59  ;;  %v7928_v59 = vadd.f32 %v7670_v15, %v7355_v52 }
 0x305   : > { %11881 = vst [vmem:[#allocation114_spill] sm:$0xff] %v7910_v18 }
 0x306   : > { %11885 = vst [vmem:[#allocation118_spill] sm:$0xff] %v7928_v59 }
 0x307   : > { %1897 = vmatmul.bf16.gmra.mxu0 %v7262_v35 }
 0x308   : > { %v1636_v51 = vpop.f32.mrf.mxu1 }
 0x309   : > { %v7918_v29 = vadd.f32 %v1636_v51, %v7361_v0 }
 0x30b   : > { %11883 = vst [vmem:[#allocation116_spill] sm:$0xff] %v7918_v29  ;;  %v7922_v34 = vadd.f32 %v7918_v29, %v7915_v44  ;;  %1951 = vmatmul.bf16.gmra.mxu1 %v7106_v25  ;;  %v7940_v25 = vadd.f32 %v7686_v1, %v7355_v52  ;;  %v1745_v1 = vadd.f32 %v7739_v36, %v7802_v19 }
 0x30d   : > { %11884 = vst [vmem:[#allocation117_spill] sm:$0xff] %v7922_v34  ;;  %1808 = vmatmul.bf16.gmra.mxu3 %v7262_v35 }
 0x30e   : > { %11888 = vst [vmem:[#allocation121_spill] sm:$0xff] %v7940_v25 }
 0x310   : > { %v1638_v61 = vpop.f32.mrf.mxu1 }
 0x311   : > { %v7931_v43 = vadd.f32 %v1638_v61, %v7361_v0 }
 0x313   : > { %11886 = vst [vmem:[#allocation119_spill] sm:$0xff] %v7931_v43  ;;  %v7935_v8 = vadd.f32 %v7931_v43, %v7928_v59  ;;  %v7953_v43 = vadd.f32 %v7703_v49, %v7355_v52  ;;  %v1747_v52 = vadd.f32 %v7755_v32, %v7802_v19 }
 0x315   : > { %11887 = vst [vmem:[#allocation120_spill] sm:$0xff] %v7935_v8 }
 0x316   : > { %11891 = vst [vmem:[#allocation124_spill] sm:$0xff] %v7953_v43 }
 0x317   : > { %1902 = vmatmul.bf16.gmra.mxu0 %v7327_v62 }
 0x318   : > { %v1641_v51 = vpop.f32.mrf.mxu1 }
 0x319   : > { %v7943_v29 = vadd.f32 %v1641_v51, %v7361_v0 }
 0x31b   : > { %11889 = vst [vmem:[#allocation122_spill] sm:$0xff] %v7943_v29  ;;  %v7947_v15 = vadd.f32 %v7943_v29, %v7940_v25  ;;  %1956 = vmatmul.bf16.gmra.mxu1 %v7114_v45  ;;  %v2066_v25 = vadd.f32 %v7399_v9, %v1745_v1  ;;  %v7966_v45 = vperm.slane %v7350_v46, 5  ;;  %v1834_v29 = vadd.f32 %v7719_v40, %v7809_v17 }
 0x31c   : > { %v2067_v46 = vadd.f32 %v7419_v47, %v1747_v52  ;;  %v1750_v47 = vadd.f32 %v7772_v13, %v7802_v19 }
 0x31d   : > { %11890 = vst [vmem:[#allocation123_spill] sm:$0xff] %v7947_v15  ;;  %1813 = vmatmul.bf16.gmra.mxu3 %v7327_v62  ;;  %v2098_v9 = vadd.f32 %v2066_v25, %v1834_v29 }
 0x320   : > { %v1643_v61 = vpop.f32.mrf.mxu1 }
 0x321   : > { %v7958_v59 = vadd.f32 %v1643_v61, %v7361_v0  ;;  %v7976_v0 = vld [vmem:[%s11369_s8] ss:$0 sm:$0xff] }
 0x322   : > { %v1087_v40 = vadd.f32 %v7976_v0, %v7152_v22  ;;  %v1089_v13 = vadd.f32 %v7976_v0, %v7168_v38 }
 0x323   : > { %11892 = vst [vmem:[#allocation125_spill] sm:$0xff] %v7958_v59  ;;  %v7962_v51 = vadd.f32 %v7958_v59, %v7953_v43  ;;  %v7983_v59 = vpop.f32.mrf.mxu2  ;;  %v7988_v43 = vadd.f32 %v7736_v4, %v7809_v17 }
 0x325   : > { %11893 = vst [vmem:[#allocation126_spill] sm:$0xff] %v7962_v51 }
 0x327   : > { %1907 = vmatmul.bf16.gmra.mxu0 %v7358_v58 }
 0x328   : > { %v1922_v49 = vpop.f32.mrf.mxu1 }
 0x329   : > { %v1923_v36 = vadd.f32 %v1922_v49, %v7966_v45  ;;  %v7990_v49 = vpop.f32.mrf.mxu3 }
 0x32b   : > { %v2130_v61 = vadd.f32 %v2098_v9, %v1923_v36  ;;  %1961 = vmatmul.bf16.gmra.mxu1 %v7143_v7  ;;  %v2099_v7 = vadd.f32 %v2067_v46, %v7988_v43  ;;  %v2068_v46 = vadd.f32 %v7441_v20, %v1750_v47 }
 0x32d   : > { %v2162_v32 = vmul.f32 0.16666667, %v2130_v61  ;;  %1818 = vmatmul.bf16.gmra.mxu3 %v7358_v58 }
 0x32f   : > { %v2194_v51 = vsub.f32 %v1087_v40, %v2162_v32  ;;  %v8011_v32 = vpop.f32.mrf.mxu0 }
 0x330   : > { %v1924_v25 = vpop.f32.mrf.mxu1 }
 0x331   : > { %v1925_v22 = vadd.f32 %v1924_v25, %v7966_v45  ;;  %v7997_v9 = vadd.f32 %v2194_v51, %v7390_v48  ;;  %v8000_v61 = vadd.f32 %v2194_v51, %v7372_v26  ;;  %v8003_v4 = vadd.f32 %v2194_v51, %v7369_v10  ;;  %v8013_v26 = vpop.f32.mrf.mxu2 }
 0x332   : > { %v1839_v10 = vadd.f32 %v7752_v5, %v7809_v17  ;;  %v8034_v5 = vadd.f32 %v2194_v51, %v1745_v1 }
 0x333   : > { %11894 = vst [vmem:[#allocation127_spill] sm:$0xff] %v7997_v9  ;;  %v2131_v40 = vadd.f32 %v2099_v7, %v1925_v22  ;;  %2962 = vmax.xlane.f32.xlu2 %v7997_v9  ;;  %2610 = vmax.xlane.f32.xlu1 %v8000_v61  ;;  %v8032_v9 = vadd.f32 %v2194_v51, %v1923_v36 }
 0x334   : > { %11895 = vst [vmem:[#allocation128_spill] sm:$0xff] %v8000_v61  ;;  %2258 = vmax.xlane.f32.xlu0 %v8003_v4  ;;  %v8021_v61 = vadd.f32 %v7786_v11, %v7802_v19  ;;  %v2100_v38 = vadd.f32 %v2068_v46, %v1839_v10 }
 0x335   : > { %11896 = vst [vmem:[#allocation129_spill] sm:$0xff] %v8003_v4  ;;  %v2163_v48 = vmul.f32 0.16666667, %v2131_v40  ;;  %v8030_v40 = vpop.f32.mrf.mxu3 }
 0x336   : > { %11898 = vst [vmem:[#allocation131_spill] sm:$0xff] %v8032_v9 }
 0x337   : > { %v8017_v25 = vsub.f32 %v1089_v13, %v2163_v48  ;;  %11899 = vst [vmem:[#allocation132_spill] sm:$0xff] %v8034_v5  ;;  %v8057_v48 = vpop.f32.mrf.mxu0 }
 0x338   : > { %v1927_v7 = vpop.f32.mrf.mxu1 }
 0x339   : > { %v8024_v4 = vadd.f32 %v1927_v7, %v7966_v45  ;;  %v8028_v20 = vadd.f32 %v8017_v25, %v7402_v16  ;;  %v8038_v13 = vadd.f32 %v8017_v25, %v7396_v2  ;;  %v8042_v11 = vadd.f32 %v8017_v25, %v7409_v39  ;;  %v8059_v7 = vpop.f32.mrf.mxu2 }
 0x33a   : > { %v1092_v16 = vadd.f32 %v7976_v0, %v7187_v54  ;;  %v2069_v2 = vadd.f32 %v7461_v3, %v8021_v61  ;;  %v1841_v39 = vadd.f32 %v7770_v55, %v7809_v17  ;;  %v8070_v3 = vadd.f32 %v8017_v25, %v1747_v52 }
 0x33b   : > { %11897 = vst [vmem:[#allocation130_spill] sm:$0xff] %v8028_v20  ;;  %v2132_v46 = vadd.f32 %v2100_v38, %v8024_v4  ;;  %1966 = vmatmul.bf16.gmra.mxu1 %v7158_v30  ;;  %2612 = vmax.xlane.f32.xlu2 %v8028_v20 }
 0x33c   : > { %11900 = vst [vmem:[#allocation133_spill] sm:$0xff] %v8038_v13  ;;  %4018 = vmax.xlane.f32.xlu1 %v8032_v9  ;;  %3314 = vmax.xlane.f32.xlu0 %v8034_v5  ;;  %v2101_v20 = vadd.f32 %v2069_v2, %v1841_v39  ;;  %v8067_v9 = vadd.f32 %v2194_v51, %v1834_v29 }
 0x33d   : > { %11901 = vst [vmem:[#allocation134_spill] sm:$0xff] %v8042_v11  ;;  %v2164_v1 = vmul.f32 0.16666667, %v2132_v46  ;;  %v8086_v29 = vpop.f32.mrf.mxu3 }
 0x33e   : > { %11903 = vst [vmem:[#allocation136_spill] sm:$0xff] %v8067_v9 }
 0x33f   : > { %v8055_v36 = vsub.f32 %v1092_v16, %v2164_v1  ;;  %11904 = vst [vmem:[#allocation137_spill] sm:$0xff] %v8070_v3  ;;  %v11910_v1 = vld [vmem:[#allocation26_spill] sm:$0xff] }
 0x340   : > { %v1929_v30 = vpop.f32.mrf.mxu1 }
 0x341   : > { %v8062_v38 = vadd.f32 %v1929_v30, %v7966_v45  ;;  %v8065_v54 = vadd.f32 %v8055_v36, %v1750_v47  ;;  %v8074_v55 = vadd.f32 %v8055_v36, %v7416_v28  ;;  %v8078_v46 = vadd.f32 %v8055_v36, %v7432_v27  ;;  %v11908_v28 = vld [vmem:[#allocation9_spill] sm:$0xff] }
 0x342   : > { %v8082_v16 = vadd.f32 %v8055_v36, %v7422_v21  ;;  %v1094_v51 = vadd.f32 %v7976_v0, %v11908_v28  ;;  %v11913_v28 = vld [vmem:[#allocation24_spill] sm:$0xff] }
 0x343   : > { %11902 = vst [vmem:[#allocation135_spill] sm:$0xff] %v8065_v54  ;;  %v2133_v47 = vadd.f32 %v2101_v20, %v8062_v38  ;;  %3318 = vmax.xlane.f32.xlu2 %v8065_v54  ;;  %v8098_v20 = vadd.f32 %v8055_v36, %v1839_v10  ;;  %v8104_v54 = vpop.f32.mrf.mxu0 }
 0x344   : > { %11905 = vst [vmem:[#allocation138_spill] sm:$0xff] %v8074_v55  ;;  %3316 = vmax.xlane.f32.xlu1 %v8070_v3  ;;  %3666 = vmax.xlane.f32.xlu0 %v8067_v9  ;;  %v8107_v3 = vadd.f32 %v8017_v25, %v1925_v22  ;;  %v11918_v22 = vld [vmem:[#allocation10_spill] sm:$0xff] }
 0x345   : > { %11906 = vst [vmem:[#allocation139_spill] sm:$0xff] %v8078_v46  ;;  %v2165_v52 = vmul.f32 0.16666667, %v2133_v47  ;;  %v8127_v5 = vpop.f32.mrf.mxu3 }
 0x346   : > { %11907 = vst [vmem:[#allocation140_spill] sm:$0xff] %v8082_v16 }
 0x347   : > { %v8092_v27 = vsub.f32 %v1094_v51, %v2165_v52  ;;  %11909 = vst [vmem:[#allocation9_spill] sm:$0xff] %v8098_v20  ;;  %v11915_v51 = vld [vmem:[#allocation25_spill] sm:$0xff] }
 0x348   : > { %v1932_v2 = vpop.f32.mrf.mxu1  ;;  %11912 = vst [vmem:[#allocation141_spill] sm:$0xff] %v8107_v3 }
 0x349   : > { %v8095_v21 = vadd.f32 %v1932_v2, %v7966_v45  ;;  %v8102_v30 = vadd.f32 %v8092_v27, %v11910_v1  ;;  %v8111_v47 = vadd.f32 %v8092_v27, %v11913_v28  ;;  %v8115_v52 = vadd.f32 %v8092_v27, %v11915_v51  ;;  %v8117_v2 = vpop.f32.mrf.mxu2  ;;  %v11917_v1 = vld [vmem:[#allocation8_spill] sm:$0xff] }
 0x34a   : > { %v1097_v28 = vadd.f32 %v7976_v0, %v11918_v22 }
 0x34b   : > { %11911 = vst [vmem:[#allocation26_spill] sm:$0xff] %v8102_v30  ;;  %v2134_v10 = vadd.f32 %v7827_v33, %v8095_v21  ;;  %1971 = vmatmul.bf16.gmra.mxu1 %v11917_v1  ;;  %3670 = vmax.xlane.f32.xlu2 %v8098_v20  ;;  %v11919_v33 = vld [vmem:[#allocation28_spill] sm:$0xff]  ;;  %v11921_v20 = vld [vmem:[#allocation29_spill] sm:$0xff] }
 0x34c   : > { %11914 = vst [vmem:[#allocation24_spill] sm:$0xff] %v8111_v47  ;;  %4020 = vmax.xlane.f32.xlu1 %v8107_v3  ;;  %2260 = vmax.xlane.f32.xlu0 %v8038_v13 }
 0x34d   : > { %11916 = vst [vmem:[#allocation25_spill] sm:$0xff] %v8115_v52  ;;  %v2166_v9 = vmul.f32 0.16666667, %v2134_v10  ;;  %v11924_v10 = vld [vmem:[#allocation30_spill] sm:$0xff] }
 0x34f   : > { %v8129_v51 = vsub.f32 %v1097_v28, %v2166_v9  ;;  %v8153_v28 = vpop.f32.mrf.mxu0 }
 0x350   : > { %v1934_v15 = vpop.f32.mrf.mxu1 }
 0x351   : > { %v8132_v44 = vadd.f32 %v1934_v15, %v7966_v45  ;;  %v8136_v1 = vadd.f32 %v8129_v51, %v11919_v33  ;;  %v8140_v3 = vadd.f32 %v8129_v51, %v11921_v20  ;;  %v8144_v22 = vadd.f32 %v8129_v51, %v7818_v42  ;;  %v11926_v20 = vld [vmem:[#allocation11_spill] sm:$0xff]  ;;  %v8159_v42 = vpop.f32.mrf.mxu2 }
 0x352   : > { %v8148_v9 = vadd.f32 %v8129_v51, %v11924_v10  ;;  %v1099_v33 = vadd.f32 %v7976_v0, %v11926_v20  ;;  %v8163_v10 = vpop.f32.mrf.mxu3 }
 0x353   : > { %11920 = vst [vmem:[#allocation8_spill] sm:$0xff] %v8136_v1  ;;  %v2135_v15 = vadd.f32 %v7852_v57, %v8132_v44  ;;  %2968 = vmax.xlane.f32.xlu2 %v8102_v30  ;;  %v8169_v30 = vadd.f32 %v8092_v27, %v1841_v39  ;;  %v11935_v39 = vld [vmem:[#allocation33_spill] sm:$0xff] }
 0x354   : > { %11922 = vst [vmem:[#allocation10_spill] sm:$0xff] %v8140_v3  ;;  %2262 = vmax.xlane.f32.xlu1 %v8074_v55  ;;  %2964 = vmax.xlane.f32.xlu0 %v8042_v11  ;;  %v11928_v55 = vld [vmem:[#allocation32_spill] sm:$0xff] }
 0x355   : > { %11923 = vst [vmem:[#allocation28_spill] sm:$0xff] %v8144_v22  ;;  %v2167_v13 = vmul.f32 0.16666667, %v2135_v15 }
 0x356   : > { %11925 = vst [vmem:[#allocation29_spill] sm:$0xff] %v8148_v9 }
 0x357   : > { %v8161_v8 = vsub.f32 %v1099_v33, %v2167_v13  ;;  %11927 = vst [vmem:[#allocation30_spill] sm:$0xff] %v8169_v30  ;;  %v8181_v13 = vadd.f32 %v8017_v25, %v7988_v43  ;;  %v11938_v25 = vld [vmem:[#allocation20_spill] sm:$0xff] }
 0x358   : > { %v1937_v34 = vpop.f32.mrf.mxu1  ;;  %v8205_v33 = vadd.f32 %v7983_v59, %v11938_v25  ;;  %v11944_v59 = vld [vmem:[#allocation38_spill] sm:$0xff] }
 0x359   : > { %v8166_v57 = vadd.f32 %v1937_v34, %v7966_v45  ;;  %v8173_v11 = vadd.f32 %v8161_v8, %v11928_v55  ;;  %v8177_v20 = vadd.f32 %v8161_v8, %v11930_v50  ;;  %11932 = vst [vmem:[#allocation34_spill] sm:$0xff] %v8181_v13  ;;  %v8185_v15 = vadd.f32 %v8161_v8, %v7838_v6  ;;  %v11937_v6 = vld [vmem:[#allocation12_spill] sm:$0xff]  ;;  %v8209_v18 = vpop.f32.mrf.mxu2 }
 0x35a   : > { %v8189_v34 = vadd.f32 %v8161_v8, %v7841_v24  ;;  %v8193_v55 = vadd.f32 %v8161_v8, %v11935_v39  ;;  %v1102_v43 = vadd.f32 %v7976_v0, %v11937_v6  ;;  %11939 = vst [vmem:[#allocation12_spill] sm:$0xff] %v8205_v33  ;;  %v8207_v39 = vpop.f32.mrf.mxu0  ;;  %v11942_v6 = vld [vmem:[#allocation37_spill] sm:$0xff] }
 0x35b   : > { %11929 = vst [vmem:[#allocation11_spill] sm:$0xff] %v8173_v11  ;;  %v2136_v50 = vadd.f32 %v7874_v14, %v8166_v57  ;;  %1976 = vmatmul.bf16.gmra.mxu1 %v7210_v23  ;;  %3672 = vmax.xlane.f32.xlu2 %v8169_v30  ;;  %v8215_v23 = vadd.f32 %v7990_v49, %v7802_v19 }
 0x35c   : > { %11931 = vst [vmem:[#allocation32_spill] sm:$0xff] %v8177_v20  ;;  %2966 = vmax.xlane.f32.xlu1 %v8078_v46  ;;  %3668 = vmax.xlane.f32.xlu0 %v8181_v13 }
 0x35d   : > { %11933 = vst [vmem:[#allocation142_spill] sm:$0xff] %v8185_v15  ;;  %v2168_v24 = vmul.f32 0.16666667, %v2136_v50 }
 0x35e   : > { %11934 = vst [vmem:[#allocation143_spill] sm:$0xff] %v8189_v34 }
 0x35f   : > { %11936 = vst [vmem:[#allocation33_spill] sm:$0xff] %v8193_v55  ;;  %v8211_v14 = vsub.f32 %v1102_v43, %v2168_v24  ;;  %v2042_v43 = vadd.f32 %v11946_v60, %v8205_v33  ;;  %v8230_v24 = vpop.f32.mrf.mxu3 }
 0x360   : > { %11940 = vst [vmem:[#allocation20_spill] sm:$0xff] %v8215_v23  ;;  %v1939_v30 = vpop.f32.mrf.mxu1 }
 0x361   : > { %v8218_v46 = vadd.f32 %v1939_v30, %v7966_v45  ;;  %v8222_v50 = vadd.f32 %v8211_v14, %v11942_v6  ;;  %v8226_v13 = vadd.f32 %v8211_v14, %v11944_v59  ;;  %v8234_v49 = vadd.f32 %v8211_v14, %v7865_v12  ;;  %v11951_v12 = vld [vmem:[#allocation13_spill] sm:$0xff] }
 0x362   : > { %v8238_v30 = vadd.f32 %v8211_v14, %v11948_v56  ;;  %v8242_v6 = vadd.f32 %v8211_v14, %v7862_v31  ;;  %v2074_v60 = vadd.f32 %v2042_v43, %v8215_v23  ;;  %v1104_v33 = vadd.f32 %v7976_v0, %v11951_v12  ;;  %v11955_v12 = vld [vmem:[#allocation40_spill] sm:$0xff]  ;;  %v11964_v23 = vld [vmem:[#allocation50_spill] sm:$0xff] }
 0x363   : > { %11941 = vst [vmem:[#allocation144_spill] sm:$0xff] %v8218_v46  ;;  %v2137_v59 = vadd.f32 %v7899_v41, %v8218_v46  ;;  %2266 = vmax.xlane.f32.xlu2 %v8136_v1  ;;  %v8258_v31 = vadd.f32 %v8013_v26, %v11938_v25  ;;  %v8262_v1 = vpop.f32.mrf.mxu0 }
 0x364   : > { %11943 = vst [vmem:[#allocation37_spill] sm:$0xff] %v8222_v50  ;;  %2264 = vmax.xlane.f32.xlu1 %v8111_v47  ;;  %2614 = vmax.xlane.f32.xlu0 %v8082_v16  ;;  %v8265_v16 = vpop.f32.mrf.mxu2 }
 0x365   : > { %11945 = vst [vmem:[#allocation38_spill] sm:$0xff] %v8226_v13  ;;  %v2169_v56 = vmul.f32 0.16666667, %v2137_v59  ;;  %v8269_v59 = vadd.f32 %v8030_v40, %v7802_v19 }
 0x366   : > { %11947 = vst [vmem:[#allocation46_spill] sm:$0xff] %v8234_v49 }
 0x367   : > { %11949 = vst [vmem:[#allocation36_spill] sm:$0xff] %v8238_v30  ;;  %v8254_v30 = vadd.f32 %v8011_v32, %v7809_v17  ;;  %v8260_v41 = vsub.f32 %v1104_v33, %v2169_v56  ;;  %v11957_v33 = vld [vmem:[#allocation41_spill] sm:$0xff] }
 0x368   : > { %11950 = vst [vmem:[#allocation145_spill] sm:$0xff] %v8242_v6  ;;  %v1942_v43 = vpop.f32.mrf.mxu1 }
 0x369   : > { %11952 = vst [vmem:[#allocation13_spill] sm:$0xff] %v8254_v30  ;;  %v2106_v47 = vadd.f32 %v2074_v60, %v8254_v30  ;;  %v8272_v32 = vadd.f32 %v1942_v43, %v7966_v45  ;;  %v8276_v26 = vadd.f32 %v8260_v41, %v11955_v12  ;;  %v8280_v56 = vadd.f32 %v8260_v41, %v11957_v33  ;;  %v11962_v43 = vld [vmem:[#allocation42_spill] sm:$0xff] }
 0x36a   : > { %11953 = vst [vmem:[#allocation146_spill] sm:$0xff] %v8258_v31  ;;  %v8284_v60 = vadd.f32 %v8055_v36, %v8024_v4  ;;  %v8288_v30 = vadd.f32 %v8260_v41, %v7885_v37  ;;  %v8292_v40 = vadd.f32 %v8260_v41, %v7888_v53  ;;  %v8296_v12 = vadd.f32 %v8260_v41, %v11962_v43  ;;  %v8303_v4 = vpop.f32.mrf.mxu3  ;;  %v11965_v37 = vld [vmem:[#allocation14_spill] sm:$0xff] }
 0x36b   : > { %11954 = vst [vmem:[#allocation147_spill] sm:$0xff] %v8269_v59  ;;  %v2043_v33 = vadd.f32 %v11964_v23, %v8258_v31  ;;  %v2138_v46 = vadd.f32 %v2106_v47, %v8272_v32  ;;  %1981 = vmatmul.bf16.gmra.mxu1 %v7245_v63  ;;  %2618 = vmax.xlane.f32.xlu2 %v8140_v3 }
 0x36c   : > { %11956 = vst [vmem:[#allocation40_spill] sm:$0xff] %v8276_v26  ;;  %2616 = vmax.xlane.f32.xlu1 %v8115_v52  ;;  %4022 = vmax.xlane.f32.xlu0 %v8284_v60  ;;  %v1107_v53 = vadd.f32 %v7976_v0, %v11965_v37  ;;  %v8312_v23 = vadd.f32 %v8059_v7, %v11938_v25 }
 0x36d   : > { %11958 = vst [vmem:[#allocation41_spill] sm:$0xff] %v8280_v56  ;;  %v2075_v36 = vadd.f32 %v2043_v33, %v8269_v59  ;;  %v2170_v43 = vmul.f32 0.16666667, %v2138_v46  ;;  %v8316_v63 = vadd.f32 %v8057_v48, %v7809_v17  ;;  %v8322_v52 = vadd.f32 %v8086_v29, %v7802_v19  ;;  %v11969_v33 = vld [vmem:[#allocation44_spill] sm:$0xff]  ;;  %v11971_v48 = vld [vmem:[#allocation101_spill] sm:$0xff] }
 0x36e   : > { %11959 = vst [vmem:[#allocation148_spill] sm:$0xff] %v8284_v60  ;;  %v8332_v60 = vpop.f32.mrf.mxu0  ;;  %v11974_v29 = vld [vmem:[#allocation45_spill] sm:$0xff] }
 0x36f   : > { %11960 = vst [vmem:[#allocation149_spill] sm:$0xff] %v8288_v30  ;;  %v8318_v47 = vsub.f32 %v1107_v53, %v2170_v43  ;;  %v2107_v46 = vadd.f32 %v2075_v36, %v8316_v63  ;;  %v8336_v53 = vadd.f32 %v8129_v51, %v11971_v48  ;;  %v8340_v43 = vadd.f32 %v8092_v27, %v8021_v61  ;;  %v11976_v36 = vld [vmem:[#allocation54_spill] sm:$0xff]  ;;  %v11977_v48 = vld [vmem:[#allocation15_spill] sm:$0xff] }
 0x370   : > { %11961 = vst [vmem:[#allocation150_spill] sm:$0xff] %v8292_v40  ;;  %v1944_v3 = vpop.f32.mrf.mxu1  ;;  %v2044_v59 = vadd.f32 %v11976_v36, %v8312_v23  ;;  %v1109_v61 = vadd.f32 %v7976_v0, %v11977_v48  ;;  %v8361_v36 = vadd.f32 %v8117_v2, %v11938_v25  ;;  %v11979_v48 = vld [vmem:[#allocation49_spill] sm:$0xff] }
 0x371   : > { %11963 = vst [vmem:[#allocation42_spill] sm:$0xff] %v8296_v12  ;;  %v8325_v37 = vadd.f32 %v1944_v3, %v7966_v45  ;;  %v8330_v7 = vadd.f32 %v8318_v47, %v11969_v33  ;;  %v8344_v3 = vadd.f32 %v8318_v47, %v11974_v29 }
 0x372   : > { %11966 = vst [vmem:[#allocation50_spill] sm:$0xff] %v8312_v23  ;;  %v2076_v31 = vadd.f32 %v2044_v59, %v8322_v52 }
 0x373   : > { %11967 = vst [vmem:[#allocation14_spill] sm:$0xff] %v8316_v63  ;;  %v8348_v63 = vpop.f32.mrf.mxu2  ;;  %v2139_v33 = vadd.f32 %v2107_v46, %v8325_v37  ;;  %3674 = vmax.xlane.f32.xlu2 %v8144_v22  ;;  %v8365_v46 = vadd.f32 %v8104_v54, %v7809_v17  ;;  %v8383_v54 = vadd.f32 %v8092_v27, %v8062_v38  ;;  %v11985_v38 = vld [vmem:[#allocation16_spill] sm:$0xff] }
 0x374   : > { %11968 = vst [vmem:[#allocation151_spill] sm:$0xff] %v8325_v37  ;;  %3322 = vmax.xlane.f32.xlu1 %v8336_v53  ;;  %3320 = vmax.xlane.f32.xlu0 %v8340_v43  ;;  %v1112_v27 = vadd.f32 %v7976_v0, %v11985_v38 }
 0x375   : > { %11970 = vst [vmem:[#allocation44_spill] sm:$0xff] %v8330_v7  ;;  %v2171_v29 = vmul.f32 0.16666667, %v2139_v33  ;;  %v2108_v33 = vadd.f32 %v2076_v31, %v8365_v46 }
 0x376   : > { %11972 = vst [vmem:[#allocation101_spill] sm:$0xff] %v8336_v53  ;;  %v8394_v31 = vpop.f32.mrf.mxu0 }
 0x377   : > { %11973 = vst [vmem:[#allocation152_spill] sm:$0xff] %v8340_v43  ;;  %v8367_v22 = vsub.f32 %v1109_v61, %v2171_v29  ;;  %v8371_v43 = vadd.f32 %v8127_v5, %v7802_v19  ;;  %v11982_v61 = vld [vmem:[#allocation48_spill] sm:$0xff]  ;;  %v11984_v5 = vld [vmem:[#allocation58_spill] sm:$0xff] }
 0x378   : > { %11975 = vst [vmem:[#allocation45_spill] sm:$0xff] %v8344_v3  ;;  %v8357_v3 = vpop.f32.mrf.mxu3  ;;  %v1947_v53 = vpop.f32.mrf.mxu1  ;;  %v2045_v23 = vadd.f32 %v11984_v5, %v8361_v36 }
 0x379   : > { %11978 = vst [vmem:[#allocation54_spill] sm:$0xff] %v8371_v43  ;;  %v8374_v59 = vadd.f32 %v1947_v53, %v7966_v45  ;;  %v8379_v2 = vadd.f32 %v8367_v22, %v11979_v48  ;;  %v8387_v29 = vadd.f32 %v8367_v22, %v11982_v61 }
 0x37a   : > { %11981 = vst [vmem:[#allocation49_spill] sm:$0xff] %v8383_v54  ;;  %v2077_v61 = vadd.f32 %v2045_v23, %v8371_v43 }
 0x37b   : > { %11980 = vst [vmem:[#allocation15_spill] sm:$0xff] %v8379_v2  ;;  %v2140_v53 = vadd.f32 %v2108_v33, %v8374_v59  ;;  %1986 = vmatmul.bf16.gmra.mxu1 %v7262_v35  ;;  %2268 = vmax.xlane.f32.xlu2 %v8173_v11  ;;  %v8400_v48 = vpop.f32.mrf.mxu2  ;;  %v8405_v33 = vadd.f32 %v8159_v42, %v11938_v25  ;;  %v11988_v42 = vld [vmem:[#allocation52_spill] sm:$0xff] }
 0x37c   : > { %11983 = vst [vmem:[#allocation48_spill] sm:$0xff] %v8387_v29  ;;  %2972 = vmax.xlane.f32.xlu1 %v8177_v20  ;;  %4024 = vmax.xlane.f32.xlu0 %v8383_v54  ;;  %v8409_v35 = vadd.f32 %v8153_v28, %v7809_v17  ;;  %v8415_v20 = vadd.f32 %v8163_v10, %v7802_v19  ;;  %v11990_v28 = vld [vmem:[#allocation62_spill] sm:$0xff] }
 0x37d   : > { %v2172_v5 = vmul.f32 0.16666667, %v2140_v53 }
 0x37e   : > { %11986 = vst [vmem:[#allocation58_spill] sm:$0xff] %v8409_v35  ;;  %v2109_v53 = vadd.f32 %v2077_v61, %v8409_v35  ;;  %v11993_v61 = vld [vmem:[#allocation17_spill] sm:$0xff] }
 0x37f   : > { %v8411_v11 = vsub.f32 %v1112_v27, %v2172_v5  ;;  %11987 = vst [vmem:[#allocation16_spill] sm:$0xff] %v8415_v20  ;;  %v2046_v27 = vadd.f32 %v11990_v28, %v8405_v33  ;;  %v11991_v5 = vld [vmem:[#allocation53_spill] sm:$0xff]  ;;  %v8442_v28 = vadd.f32 %v8207_v39, %v7809_v17 }
 0x380   : > { %v8417_v38 = vpop.f32.mrf.mxu3  ;;  %v1949_v54 = vpop.f32.mrf.mxu1 }
 0x381   : > { %v8420_v23 = vadd.f32 %v1949_v54, %v7966_v45  ;;  %v8425_v43 = vadd.f32 %v8411_v11, %v11988_v42  ;;  %v8431_v37 = vadd.f32 %v8411_v11, %v11991_v5  ;;  %v2078_v54 = vadd.f32 %v2046_v27, %v8415_v20  ;;  %11994 = vst [vmem:[#allocation53_spill] sm:$0xff] %v8442_v28  ;;  %v8444_v5 = vpop.f32.mrf.mxu0 }
 0x382   : > { %v1114_v42 = vadd.f32 %v7976_v0, %v11993_v61  ;;  %v8464_v61 = vadd.f32 %v8161_v8, %v8132_v44  ;;  %v12004_v8 = vld [vmem:[#allocation18_spill] sm:$0xff] }
 0x383   : > { %11989 = vst [vmem:[#allocation52_spill] sm:$0xff] %v8425_v43  ;;  %v2141_v10 = vadd.f32 %v2109_v53, %v8420_v23  ;;  %3324 = vmax.xlane.f32.xlu2 %v8185_v15  ;;  %v8448_v53 = vadd.f32 %v8209_v18, %v11938_v25  ;;  %v8450_v15 = vpop.f32.mrf.mxu2  ;;  %v11998_v18 = vld [vmem:[#allocation56_spill] sm:$0xff] }
 0x384   : > { %11992 = vst [vmem:[#allocation62_spill] sm:$0xff] %v8431_v37  ;;  %3676 = vmax.xlane.f32.xlu1 %v8189_v34  ;;  %2970 = vmax.xlane.f32.xlu0 %v8148_v9  ;;  %v2110_v9 = vadd.f32 %v2078_v54, %v8442_v28  ;;  %v8474_v54 = vadd.f32 %v8129_v51, %v8095_v21 }
 0x385   : > { %v2173_v35 = vmul.f32 0.16666667, %v2141_v10  ;;  %11995 = vst [vmem:[#allocation17_spill] sm:$0xff] %v8448_v53  ;;  %v8457_v10 = vadd.f32 %v8230_v24, %v7802_v19  ;;  %v1117_v21 = vadd.f32 %v7976_v0, %v12004_v8 }
 0x386   : > { %11997 = vst [vmem:[#allocation154_spill] sm:$0xff] %v8464_v61 }
 0x387   : > { %v8452_v27 = vsub.f32 %v1114_v42, %v2173_v35  ;;  %12000 = vst [vmem:[#allocation155_spill] sm:$0xff] %v8474_v54  ;;  %v12001_v42 = vld [vmem:[#allocation57_spill] sm:$0xff] }
 0x388   : > { %v1952_v34 = vpop.f32.mrf.mxu1  ;;  %v8470_v35 = vpop.f32.mrf.mxu3 }
 0x389   : > { %v8460_v39 = vadd.f32 %v1952_v34, %v7966_v45  ;;  %v8468_v20 = vadd.f32 %v8452_v27, %v11998_v18  ;;  %v8478_v24 = vadd.f32 %v8452_v27, %v12001_v42  ;;  %v12003_v34 = vld [vmem:[#allocation66_spill] sm:$0xff]  ;;  %v8492_v42 = vadd.f32 %v8265_v16, %v11938_v25 }
 0x38a   : > { %v2047_v28 = vadd.f32 %v12003_v34, %v8448_v53  ;;  %v8502_v34 = vadd.f32 %v8303_v4, %v7802_v19 }
 0x38b   : > { %11996 = vst [vmem:[#allocation153_spill] sm:$0xff] %v8460_v39  ;;  %v2142_v44 = vadd.f32 %v2110_v9, %v8460_v39  ;;  %1991 = vmatmul.bf16.gmra.mxu1 %v7327_v62  ;;  %4028 = vmax.xlane.f32.xlu2 %v8464_v61  ;;  %v8496_v9 = vadd.f32 %v8262_v1, %v7809_v17  ;;  %v8506_v61 = vpop.f32.mrf.mxu2 }
 0x38c   : > { %11999 = vst [vmem:[#allocation56_spill] sm:$0xff] %v8468_v20  ;;  %2622 = vmax.xlane.f32.xlu1 %v8222_v50  ;;  %4026 = vmax.xlane.f32.xlu0 %v8474_v54  ;;  %v2079_v51 = vadd.f32 %v2047_v28, %v8457_v10  ;;  %v8504_v50 = vpop.f32.mrf.mxu0  ;;  %v12011_v54 = vld [vmem:[#allocation60_spill] sm:$0xff] }
 0x38d   : > { %12002 = vst [vmem:[#allocation57_spill] sm:$0xff] %v8478_v24  ;;  %v2174_v18 = vmul.f32 0.16666667, %v2142_v44  ;;  %v12008_v44 = vld [vmem:[#allocation61_spill] sm:$0xff] }
 0x38e   : > { %12005 = vst [vmem:[#allocation66_spill] sm:$0xff] %v8492_v42  ;;  %v2111_v16 = vadd.f32 %v2079_v51, %v8496_v9  ;;  %v12013_v51 = vld [vmem:[#allocation19_spill] sm:$0xff] }
 0x38f   : > { %v8498_v62 = vsub.f32 %v1117_v21, %v2174_v18  ;;  %12006 = vst [vmem:[#allocation18_spill] sm:$0xff] %v8502_v34  ;;  %v12010_v21 = vld [vmem:[#allocation70_spill] sm:$0xff] }
 0x390   : > { %v1954_v8 = vpop.f32.mrf.mxu1  ;;  %v2048_v18 = vadd.f32 %v12010_v21, %v8492_v42  ;;  %v8525_v39 = vpop.f32.mrf.mxu3 }
 0x391   : > { %v8509_v28 = vadd.f32 %v1954_v8, %v7966_v45  ;;  %v8514_v1 = vadd.f32 %v8498_v62, %v12008_v44  ;;  %v8520_v4 = vadd.f32 %v8498_v62, %v12011_v54  ;;  %v1119_v44 = vadd.f32 %v7976_v0, %v12013_v51 }
 0x392   : > { %v2080_v8 = vadd.f32 %v2048_v18, %v8502_v34  ;;  %v8533_v54 = vadd.f32 %v8332_v60, %v7809_v17  ;;  %v8551_v60 = vadd.f32 %v8211_v14, %v8166_v57  ;;  %v12023_v57 = vld [vmem:[#allocation36_spill] sm:$0xff]  ;;  %v12024_v14 = vld [vmem:[#allocation21_spill] sm:$0xff] }
 0x393   : > { %12007 = vst [vmem:[#allocation156_spill] sm:$0xff] %v8509_v28  ;;  %v2143_v53 = vadd.f32 %v2111_v16, %v8509_v28  ;;  %2974 = vmax.xlane.f32.xlu2 %v8226_v13  ;;  %v8537_v16 = vadd.f32 %v8348_v63, %v11938_v25 }
 0x394   : > { %12009 = vst [vmem:[#allocation61_spill] sm:$0xff] %v8514_v1  ;;  %3678 = vmax.xlane.f32.xlu1 %v8234_v49  ;;  %2620 = vmax.xlane.f32.xlu0 %v8193_v55  ;;  %v2112_v34 = vadd.f32 %v2080_v8, %v8533_v54  ;;  %v8544_v49 = vadd.f32 %v8357_v3, %v7802_v19  ;;  %v12022_v3 = vld [vmem:[#allocation74_spill] sm:$0xff] }
 0x395   : > { %12012 = vst [vmem:[#allocation70_spill] sm:$0xff] %v8520_v4  ;;  %v2175_v21 = vmul.f32 0.16666667, %v2143_v53  ;;  %v12018_v53 = vld [vmem:[#allocation64_spill] sm:$0xff]  ;;  %v2049_v55 = vadd.f32 %v12022_v3, %v8537_v16  ;;  %v8579_v3 = vadd.f32 %v8400_v48, %v11938_v25 }
 0x396   : > { %12014 = vst [vmem:[#allocation60_spill] sm:$0xff] %v8533_v54  ;;  %v8565_v54 = vpop.f32.mrf.mxu2 }
 0x397   : > { %12015 = vst [vmem:[#allocation19_spill] sm:$0xff] %v8537_v16  ;;  %v8539_v13 = vsub.f32 %v1119_v44, %v2175_v21  ;;  %v8557_v44 = vpop.f32.mrf.mxu0  ;;  %v12020_v21 = vld [vmem:[#allocation65_spill] sm:$0xff] }
 0x398   : > { %v1957_v18 = vpop.f32.mrf.mxu1  ;;  %12016 = vst [vmem:[#allocation157_spill] sm:$0xff] %v8544_v49  ;;  %v8575_v28 = vpop.f32.mrf.mxu3 }
 0x399   : > { %v8547_v51 = vadd.f32 %v1957_v18, %v7966_v45  ;;  %12017 = vst [vmem:[#allocation158_spill] sm:$0xff] %v8551_v60  ;;  %v8555_v63 = vadd.f32 %v8539_v13, %v12018_v53  ;;  %v8561_v8 = vadd.f32 %v8539_v13, %v12020_v21  ;;  %v1122_v53 = vadd.f32 %v7976_v0, %v12024_v14  ;;  %v12029_v14 = vld [vmem:[#allocation68_spill] sm:$0xff] }
 0x39a   : > { %v2081_v21 = vadd.f32 %v2049_v55, %v8544_v49  ;;  %12025 = vst [vmem:[#allocation74_spill] sm:$0xff] %v8579_v3 }
 0x39b   : > { %12019 = vst [vmem:[#allocation64_spill] sm:$0xff] %v8555_v63  ;;  %v2144_v18 = vadd.f32 %v2112_v34, %v8547_v51  ;;  %1996 = vmatmul.bf16.gmra.mxu1 %v7358_v58  ;;  %4030 = vmax.xlane.f32.xlu2 %v8551_v60  ;;  %v8583_v58 = vadd.f32 %v8394_v31, %v7809_v17 }
 0x39c   : > { %12021 = vst [vmem:[#allocation65_spill] sm:$0xff] %v8561_v8  ;;  %2272 = vmax.xlane.f32.xlu1 %v8276_v26  ;;  %2270 = vmax.xlane.f32.xlu0 %v12023_v57  ;;  %v8589_v60 = vadd.f32 %v8417_v38, %v7802_v19  ;;  %v12031_v57 = vld [vmem:[#allocation69_spill] sm:$0xff] }
 0x39d   : > { %v2176_v42 = vmul.f32 0.16666667, %v2144_v18  ;;  %12026 = vst [vmem:[#allocation21_spill] sm:$0xff] %v8583_v58  ;;  %v2113_v18 = vadd.f32 %v2081_v21, %v8583_v58 }
 0x39e   : > { %12027 = vst [vmem:[#allocation159_spill] sm:$0xff] %v8589_v60 }
 0x39f   : > { %v8585_v34 = vsub.f32 %v1122_v53, %v2176_v42  ;;  %v12033_v42 = vld [vmem:[#allocation78_spill] sm:$0xff]  ;;  %v8607_v38 = vpop.f32.mrf.mxu0 }
 0x3a0   : > { %v1959_v26 = vpop.f32.mrf.mxu1  ;;  %v2050_v53 = vadd.f32 %v12033_v42, %v8579_v3 }
 0x3a1   : > { %v8592_v55 = vadd.f32 %v1959_v26, %v7966_v45  ;;  %v8597_v48 = vadd.f32 %v8585_v34, %v12029_v14  ;;  %v8601_v31 = vadd.f32 %v8585_v34, %v12031_v57  ;;  %v12034_v26 = vld [vmem:[#allocation22_spill] sm:$0xff]  ;;  %v8613_v14 = vpop.f32.mrf.mxu2 }
 0x3a2   : > { %v1124_v21 = vadd.f32 %v7976_v0, %v12034_v26  ;;  %v2082_v57 = vadd.f32 %v2050_v53, %v8589_v60  ;;  %v12040_v60 = vld [vmem:[#allocation12_spill] sm:$0xff] }
 0x3a3   : > { %12028 = vst [vmem:[#allocation160_spill] sm:$0xff] %v8592_v55  ;;  %v2145_v49 = vadd.f32 %v2113_v18, %v8592_v55  ;;  %2624 = vmax.xlane.f32.xlu2 %v8280_v56  ;;  %v8622_v18 = vadd.f32 %v8450_v15, %v11938_v25  ;;  %v8626_v56 = vadd.f32 %v8444_v5, %v7809_v17  ;;  %v12042_v5 = vld [vmem:[#allocation73_spill] sm:$0xff] }
 0x3a4   : > { %12030 = vst [vmem:[#allocation68_spill] sm:$0xff] %v8597_v48  ;;  %3328 = vmax.xlane.f32.xlu1 %v8288_v30  ;;  %3326 = vmax.xlane.f32.xlu0 %v8242_v6  ;;  %v8632_v30 = vpop.f32.mrf.mxu3  ;;  %v8642_v55 = vadd.f32 %v8318_v47, %v12040_v60  ;;  %v12047_v60 = vld [vmem:[#allocation23_spill] sm:$0xff] }
 0x3a5   : > { %12032 = vst [vmem:[#allocation69_spill] sm:$0xff] %v8601_v31  ;;  %v2177_v58 = vmul.f32 0.16666667, %v2145_v49  ;;  %v8636_v49 = vadd.f32 %v8470_v35, %v7802_v19  ;;  %v2114_v15 = vadd.f32 %v2082_v57, %v8626_v56  ;;  %v12045_v35 = vld [vmem:[#allocation72_spill] sm:$0xff]  ;;  %v1127_v57 = vadd.f32 %v7976_v0, %v12047_v60 }
 0x3a6   : > { %v8616_v16 = vpop.xlane.xlu2 %2962  ;;  %v8618_v42 = vpop.xlane.xlu1 %2610  ;;  %12036 = vst [vmem:[#allocation22_spill] sm:$0xff] %v8622_v18 }
 0x3a7   : > { %12035 = vst [vmem:[#allocation78_spill] sm:$0xff] %v8618_v42  ;;  %v8628_v6 = vsub.f32 %v1124_v21, %v2177_v58  ;;  %v8630_v26 = vpop.xlane.xlu0 %2258  ;;  %v12044_v21 = vld [vmem:[#allocation82_spill] sm:$0xff] }
 0x3a8   : > { %12037 = vst [vmem:[#allocation161_spill] sm:$0xff] %v8626_v56  ;;  %v1962_v53 = vpop.f32.mrf.mxu1  ;;  %v2051_v42 = vadd.f32 %v12044_v21, %v8622_v18  ;;  %v8660_v56 = vpop.f32.mrf.mxu0 }
 0x3a9   : > { %12038 = vst [vmem:[#allocation162_spill] sm:$0xff] %v8630_v26  ;;  %v1963_v3 = vadd.f32 %v1962_v53, %v7966_v45  ;;  %v8646_v58 = vadd.f32 %v8628_v6, %v12042_v5  ;;  %v8653_v31 = vadd.f32 %v8628_v6, %v12045_v35  ;;  %v8670_v35 = vadd.f32 %v8504_v50, %v7809_v17 }
 0x3aa   : > { %12039 = vst [vmem:[#allocation163_spill] sm:$0xff] %v8636_v49  ;;  %v2083_v53 = vadd.f32 %v2051_v42, %v8636_v49  ;;  %v8678_v42 = vpop.f32.mrf.mxu2  ;;  %v12055_v49 = vld [vmem:[#allocation144_spill] sm:$0xff] }
 0x3ab   : > { %12041 = vst [vmem:[#allocation12_spill] sm:$0xff] %v8642_v55  ;;  %v2146_v26 = vadd.f32 %v2114_v15, %v1963_v3  ;;  %3680 = vmax.xlane.f32.xlu2 %v8292_v40  ;;  %v8666_v15 = vadd.f32 %v8506_v61, %v11938_v25 }
 0x3ac   : > { %12043 = vst [vmem:[#allocation73_spill] sm:$0xff] %v8646_v58  ;;  %2978 = vmax.xlane.f32.xlu1 %v8642_v55  ;;  %2976 = vmax.xlane.f32.xlu0 %v8296_v12  ;;  %v8682_v12 = vadd.f32 %v8525_v39, %v7802_v19  ;;  %v2115_v50 = vadd.f32 %v2083_v53, %v8670_v35  ;;  %v12061_v53 = vld [vmem:[#allocation86_spill] sm:$0xff] }
 0x3ad   : > { %12046 = vst [vmem:[#allocation82_spill] sm:$0xff] %v8653_v31  ;;  %v2178_v5 = vmul.f32 0.16666667, %v2146_v26  ;;  %v12057_v31 = vld [vmem:[#allocation77_spill] sm:$0xff] }
 0x3ae   : > { %v8662_v21 = vpop.xlane.xlu2 %2612  ;;  %12049 = vst [vmem:[#allocation23_spill] sm:$0xff] %v8666_v15 }
 0x3af   : > { %12048 = vst [vmem:[#allocation72_spill] sm:$0xff] %v8662_v21  ;;  %v8672_v55 = vsub.f32 %v1127_v57, %v2178_v5  ;;  %v8674_v40 = vpop.xlane.xlu1 %4018  ;;  %v8676_v60 = vpop.xlane.xlu0 %3314  ;;  %v8693_v5 = vadd.f32 %v8318_v47, %v8272_v32  ;;  %v8697_v21 = vadd.f32 %v8260_v41, %v12055_v49  ;;  %v12062_v41 = vld [vmem:[#allocation27_spill] sm:$0xff] }
 0x3b0   : > { %12050 = vst [vmem:[#allocation164_spill] sm:$0xff] %v8670_v35  ;;  %v1964_v26 = vpop.f32.mrf.mxu1  ;;  %v8689_v57 = vpop.f32.mrf.mxu3  ;;  %v1129_v32 = vadd.f32 %v7976_v0, %v12062_v41 }
 0x3b1   : > { %12051 = vst [vmem:[#allocation165_spill] sm:$0xff] %v8672_v55  ;;  %v8685_v61 = vadd.f32 %v8672_v55, %v1963_v3  ;;  %v1965_v18 = vadd.f32 %v1964_v26, %v7966_v45  ;;  %v8701_v39 = vadd.f32 %v8672_v55, %v12057_v31  ;;  %v12059_v3 = vld [vmem:[#allocation76_spill] sm:$0xff]  ;;  %v2052_v26 = vadd.f32 %v12061_v53, %v8666_v15 }
 0x3b2   : > { %12052 = vst [vmem:[#allocation166_spill] sm:$0xff] %v8682_v12 }
 0x3b3   : > { %12053 = vst [vmem:[#allocation167_spill] sm:$0xff] %v8685_v61  ;;  %v8705_v61 = vadd.f32 %v8672_v55, %v12059_v3  ;;  %v2147_v35 = vadd.f32 %v2115_v50, %v1965_v18  ;;  %2274 = vmax.xlane.f32.xlu2 %v8330_v7  ;;  %v2084_v31 = vadd.f32 %v2052_v26, %v8682_v12  ;;  %v12073_v12 = vld [vmem:[#allocation89_spill] sm:$0xff] }
 0x3b4   : > { %12054 = vst [vmem:[#allocation168_spill] sm:$0xff] %v8693_v5  ;;  %4034 = vmax.xlane.f32.xlu1 %v8693_v5  ;;  %4032 = vmax.xlane.f32.xlu0 %v8697_v21  ;;  %v8717_v3 = vadd.f32 %v8565_v54, %v11938_v25  ;;  %v8723_v50 = vadd.f32 %v8557_v44, %v7809_v17 }
 0x3b5   : > { %12056 = vst [vmem:[#allocation144_spill] sm:$0xff] %v8697_v21  ;;  %v2179_v49 = vmul.f32 0.16666667, %v2147_v35  ;;  %v8733_v26 = vadd.f32 %v8575_v28, %v7802_v19  ;;  %v8735_v35 = vpop.f32.mrf.mxu0  ;;  %v12074_v28 = vld [vmem:[#allocation80_spill] sm:$0xff] }
 0x3b6   : > { %12058 = vst [vmem:[#allocation77_spill] sm:$0xff] %v8701_v39  ;;  %v8719_v55 = vpop.xlane.xlu2 %3318  ;;  %v2116_v44 = vadd.f32 %v2084_v31, %v8723_v50  ;;  %v2053_v15 = vadd.f32 %v12073_v12, %v8717_v3  ;;  %v12076_v31 = vld [vmem:[#allocation45_spill] sm:$0xff]  ;;  %v12079_v12 = vld [vmem:[#allocation31_spill] sm:$0xff] }
 0x3b7   : > { %12060 = vst [vmem:[#allocation76_spill] sm:$0xff] %v8705_v61  ;;  %v8725_v53 = vsub.f32 %v1129_v32, %v2179_v49  ;;  %v8727_v5 = vpop.xlane.xlu1 %3316  ;;  %v8729_v7 = vpop.xlane.xlu0 %3666  ;;  %v12071_v32 = vld [vmem:[#allocation20_spill] sm:$0xff] }
 0x3b8   : > { %12063 = vst [vmem:[#allocation86_spill] sm:$0xff] %v8717_v3  ;;  %v1967_v54 = vpop.f32.mrf.mxu1  ;;  %v8744_v49 = vadd.f32 %v8318_v47, %v12071_v32  ;;  %v12077_v32 = vld [vmem:[#allocation81_spill] sm:$0xff] }
 0x3b9   : > { %12064 = vst [vmem:[#allocation27_spill] sm:$0xff] %v8719_v55  ;;  %v8738_v41 = vadd.f32 %v8725_v53, %v1965_v18  ;;  %v1968_v21 = vadd.f32 %v1967_v54, %v7966_v45  ;;  %v1710_v55 = vpop.f32.mrf.mxu2  ;;  %v2085_v18 = vadd.f32 %v2053_v15, %v8733_v26  ;;  %v8754_v54 = vpop.f32.mrf.mxu3  ;;  %v8770_v15 = vadd.f32 %v8607_v38, %v7809_v17 }
 0x3ba   : > { %12065 = vst [vmem:[#allocation169_spill] sm:$0xff] %v8723_v50  ;;  %v1132_v50 = vadd.f32 %v7976_v0, %v12079_v12  ;;  %v8782_v12 = vadd.f32 %v8632_v30, %v7802_v19 }
 0x3bb   : > { %12066 = vst [vmem:[#allocation170_spill] sm:$0xff] %v8725_v53  ;;  %3330 = vmax.xlane.f32.xlu2 %v8744_v49 }
 0x3bc   : > { %12067 = vst [vmem:[#allocation171_spill] sm:$0xff] %v8727_v5  ;;  %v8750_v5 = vadd.f32 %v8725_v53, %v12074_v28  ;;  %2628 = vmax.xlane.f32.xlu1 %v8379_v2  ;;  %2626 = vmax.xlane.f32.xlu0 %v12076_v31 }
 0x3bd   : > { %12068 = vst [vmem:[#allocation172_spill] sm:$0xff] %v8729_v7  ;;  %v2148_v7 = vadd.f32 %v2116_v44, %v1968_v21  ;;  %v8766_v44 = vadd.f32 %v8613_v14, %v11938_v25  ;;  %v2117_v14 = vadd.f32 %v2085_v18, %v8770_v15 }
 0x3be   : > { %12069 = vst [vmem:[#allocation173_spill] sm:$0xff] %v8733_v26  ;;  %v12086_v26 = vld [vmem:[#allocation146_spill] sm:$0xff] }
 0x3bf   : > { %12070 = vst [vmem:[#allocation174_spill] sm:$0xff] %v8738_v41  ;;  %v8760_v41 = vadd.f32 %v8725_v53, %v12077_v32  ;;  %v2180_v28 = vmul.f32 0.16666667, %v2148_v7  ;;  %v8776_v31 = vpop.xlane.xlu1 %4020  ;;  %v8778_v32 = vpop.xlane.xlu0 %2260 }
 0x3c0   : > { %12072 = vst [vmem:[#allocation20_spill] sm:$0xff] %v8744_v49  ;;  %v8772_v49 = vpop.xlane.xlu2 %3670  ;;  %v1969_v7 = vpop.f32.mrf.mxu1 }
 0x3c1   : > { %12075 = vst [vmem:[#allocation89_spill] sm:$0xff] %v8750_v5  ;;  %v8774_v2 = vsub.f32 %v1132_v50, %v2180_v28  ;;  %v1970_v38 = vadd.f32 %v1969_v7, %v7966_v45  ;;  %v8791_v50 = vadd.f32 %v8367_v22, %v12086_v26  ;;  %v12088_v28 = vld [vmem:[#allocation85_spill] sm:$0xff]  ;;  %v1888_v53 = vpop.f32.mrf.mxu0  ;;  %v1712_v26 = vpop.f32.mrf.mxu2 }
 0x3c2   : > { %12078 = vst [vmem:[#allocation80_spill] sm:$0xff] %v8760_v41  ;;  %v12091_v5 = vld [vmem:[#allocation13_spill] sm:$0xff] }
 0x3c3   : > { %12080 = vst [vmem:[#allocation81_spill] sm:$0xff] %v8766_v44  ;;  %v8786_v3 = vadd.f32 %v8774_v2, %v1968_v21  ;;  %v8795_v41 = vadd.f32 %v8774_v2, %v12088_v28  ;;  %v8801_v18 = vadd.f32 %v8318_v47, %v12091_v5  ;;  %v12093_v21 = vld [vmem:[#allocation84_spill] sm:$0xff]  ;;  %v2149_v7 = vadd.f32 %v2117_v14, %v1970_v38  ;;  %v1801_v5 = vpop.f32.mrf.mxu3 }
 0x3c4   : > { %12081 = vst [vmem:[#allocation31_spill] sm:$0xff] %v8770_v15  ;;  %v8805_v15 = vadd.f32 %v8774_v2, %v12093_v21  ;;  %2980 = vmax.xlane.f32.xlu2 %v8791_v50  ;;  %2278 = vmax.xlane.f32.xlu1 %v8425_v43  ;;  %v8815_v47 = vadd.f32 %v8660_v56, %v7809_v17 }
 0x3c5   : > { %12082 = vst [vmem:[#allocation175_spill] sm:$0xff] %v8772_v49  ;;  %v12090_v49 = vld [vmem:[#allocation92_spill] sm:$0xff]  ;;  %3682 = vmax.xlane.f32.xlu0 %v8801_v18  ;;  %v8821_v14 = vadd.f32 %v8678_v42, %v11938_v25  ;;  %v12101_v42 = vld [vmem:[#allocation14_spill] sm:$0xff] }
 0x3c6   : > { %12083 = vst [vmem:[#allocation176_spill] sm:$0xff] %v8774_v2  ;;  %v2054_v30 = vadd.f32 %v12090_v49, %v8766_v44  ;;  %v12095_v49 = vld [vmem:[#allocation35_spill] sm:$0xff]  ;;  %v2181_v44 = vmul.f32 0.16666667, %v2149_v7  ;;  %v8831_v7 = vadd.f32 %v8689_v57, %v7802_v19  ;;  %v8848_v57 = vadd.f32 %v8411_v11, %v8322_v52 }
 0x3c7   : > { %12084 = vst [vmem:[#allocation177_spill] sm:$0xff] %v8782_v12  ;;  %v1134_v28 = vadd.f32 %v7976_v0, %v12095_v49  ;;  %v8825_v43 = vpop.xlane.xlu1 %2262 }
 0x3c8   : > { %12085 = vst [vmem:[#allocation178_spill] sm:$0xff] %v8786_v3  ;;  %v2086_v3 = vadd.f32 %v2054_v30, %v8782_v12  ;;  %v8817_v21 = vpop.xlane.xlu2 %2968  ;;  %v1972_v49 = vpop.f32.mrf.mxu1 }
 0x3c9   : > { %12087 = vst [vmem:[#allocation146_spill] sm:$0xff] %v8791_v50  ;;  %v8823_v30 = vsub.f32 %v1134_v28, %v2181_v44  ;;  %v8827_v50 = vpop.xlane.xlu0 %2964  ;;  %v1973_v12 = vadd.f32 %v1972_v49, %v7966_v45  ;;  %v8840_v44 = vadd.f32 %v8367_v22, %v12101_v42  ;;  %v12103_v28 = vld [vmem:[#allocation87_spill] sm:$0xff]  ;;  %v1890_v42 = vpop.f32.mrf.mxu0 }
 0x3ca   : > { %12089 = vst [vmem:[#allocation85_spill] sm:$0xff] %v8795_v41  ;;  %v2118_v56 = vadd.f32 %v2086_v3, %v8815_v47  ;;  %v12106_v41 = vld [vmem:[#allocation88_spill] sm:$0xff] }
 0x3cb   : > { %12092 = vst [vmem:[#allocation92_spill] sm:$0xff] %v8801_v18  ;;  %v8835_v18 = vadd.f32 %v8823_v30, %v1970_v38  ;;  %v8852_v3 = vadd.f32 %v8823_v30, %v12106_v41  ;;  %v12108_v38 = vld [vmem:[#allocation95_spill] sm:$0xff]  ;;  %v8863_v41 = vadd.f32 %v1710_v55, %v11938_v25 }
 0x3cc   : > { %12094 = vst [vmem:[#allocation13_spill] sm:$0xff] %v8805_v15  ;;  %v8844_v15 = vadd.f32 %v8823_v30, %v12103_v28  ;;  %v2150_v49 = vadd.f32 %v2118_v56, %v1973_v12  ;;  %3684 = vmax.xlane.f32.xlu2 %v8840_v44  ;;  %3334 = vmax.xlane.f32.xlu1 %v8848_v57  ;;  %v12109_v28 = vld [vmem:[#allocation39_spill] sm:$0xff] }
 0x3cd   : > { %12096 = vst [vmem:[#allocation84_spill] sm:$0xff] %v8815_v47  ;;  %v2055_v47 = vadd.f32 %v12108_v38, %v8821_v14  ;;  %2276 = vmax.xlane.f32.xlu0 %v8387_v29  ;;  %v8869_v56 = vadd.f32 %v8735_v35, %v7809_v17 }
 0x3ce   : > { %12097 = vst [vmem:[#allocation35_spill] sm:$0xff] %v8821_v14 }
 0x3cf   : > { %12098 = vst [vmem:[#allocation179_spill] sm:$0xff] %v8823_v30  ;;  %v2087_v52 = vadd.f32 %v2055_v47, %v8831_v7  ;;  %v1715_v30 = vpop.f32.mrf.mxu2  ;;  %v8879_v47 = vadd.f32 %v8754_v54, %v7802_v19  ;;  %v8894_v54 = vadd.f32 %v8411_v11, %v8365_v46 }
 0x3d0   : > { %12099 = vst [vmem:[#allocation180_spill] sm:$0xff] %v8831_v7  ;;  %v1974_v55 = vpop.f32.mrf.mxu1  ;;  %v12116_v7 = vld [vmem:[#allocation90_spill] sm:$0xff] }
 0x3d1   : > { %12100 = vst [vmem:[#allocation181_spill] sm:$0xff] %v8835_v18  ;;  %v1137_v18 = vadd.f32 %v7976_v0, %v12109_v28  ;;  %v1975_v29 = vadd.f32 %v1974_v55, %v7966_v45  ;;  %v2119_v35 = vadd.f32 %v2087_v52, %v8869_v56  ;;  %v12122_v55 = vld [vmem:[#allocation91_spill] sm:$0xff] }
 0x3d2   : > { %12102 = vst [vmem:[#allocation14_spill] sm:$0xff] %v8840_v44  ;;  %v8875_v44 = vpop.xlane.xlu0 %3668 }
 0x3d3   : > { %12104 = vst [vmem:[#allocation87_spill] sm:$0xff] %v8844_v15  ;;  %v2182_v15 = vmul.f32 0.16666667, %v2150_v49  ;;  %v1804_v49 = vpop.f32.mrf.mxu3 }
 0x3d4   : > { %12105 = vst [vmem:[#allocation182_spill] sm:$0xff] %v8848_v57  ;;  %v8873_v57 = vpop.xlane.xlu1 %2966  ;;  %2630 = vmax.xlane.f32.xlu2 %v8431_v37  ;;  %3686 = vmax.xlane.f32.xlu1 %v8894_v54  ;;  %v8916_v37 = vadd.f32 %v1712_v26, %v11938_v25  ;;  %v8934_v26 = vadd.f32 %v8411_v11, %v8374_v59  ;;  %v12138_v59 = vld [vmem:[#allocation102_spill] sm:$0xff] }
 0x3d5   : > { %12107 = vst [vmem:[#allocation88_spill] sm:$0xff] %v8852_v3  ;;  %v8865_v3 = vpop.xlane.xlu2 %3672  ;;  %v8871_v38 = vsub.f32 %v1137_v18, %v2182_v15  ;;  %v12118_v18 = vld [vmem:[#allocation98_spill] sm:$0xff] }
 0x3d6   : > { %12110 = vst [vmem:[#allocation95_spill] sm:$0xff] %v8863_v41  ;;  %v2056_v14 = vadd.f32 %v12118_v18, %v8863_v41  ;;  %v12124_v18 = vld [vmem:[#allocation43_spill] sm:$0xff]  ;;  %v8925_v41 = vadd.f32 %v1801_v5, %v7802_v19  ;;  %v8942_v5 = vadd.f32 %v8452_v27, %v8361_v36 }
 0x3d7   : > { %12111 = vst [vmem:[#allocation39_spill] sm:$0xff] %v8865_v3  ;;  %v8882_v28 = vadd.f32 %v8871_v38, %v1973_v12  ;;  %v8888_v15 = vadd.f32 %v8871_v38, %v12116_v7  ;;  %v12120_v3 = vld [vmem:[#allocation147_spill] sm:$0xff]  ;;  %v2151_v12 = vadd.f32 %v2119_v35, %v1975_v29  ;;  %v8903_v52 = vadd.f32 %v8871_v38, %v12122_v55  ;;  %v1893_v35 = vpop.f32.mrf.mxu0 }
 0x3d8   : > { %12112 = vst [vmem:[#allocation183_spill] sm:$0xff] %v8869_v56  ;;  %v8898_v2 = vadd.f32 %v8367_v22, %v12120_v3  ;;  %v2088_v7 = vadd.f32 %v2056_v14, %v8879_v47  ;;  %v1139_v46 = vadd.f32 %v7976_v0, %v12124_v18  ;;  %v8911_v3 = vadd.f32 %v1888_v53, %v7809_v17  ;;  %v12139_v36 = vld [vmem:[#allocation47_spill] sm:$0xff] }
 0x3d9   : > { %12113 = vst [vmem:[#allocation184_spill] sm:$0xff] %v8871_v38  ;;  %v12134_v38 = vld [vmem:[#allocation151_spill] sm:$0xff] }
 0x3da   : > { %12114 = vst [vmem:[#allocation185_spill] sm:$0xff] %v8879_v47  ;;  %3332 = vmax.xlane.f32.xlu0 %v8898_v2  ;;  %v2120_v53 = vadd.f32 %v2088_v7, %v8911_v3  ;;  %v8946_v7 = vadd.f32 %v8367_v22, %v12134_v38 }
 0x3db   : > { %12115 = vst [vmem:[#allocation186_spill] sm:$0xff] %v8882_v28  ;;  %v2183_v28 = vmul.f32 0.16666667, %v2151_v12  ;;  %v1977_v12 = vpop.f32.mrf.mxu1 }
 0x3dc   : > { %12117 = vst [vmem:[#allocation90_spill] sm:$0xff] %v8888_v15  ;;  %v8920_v14 = vpop.xlane.xlu1 %2264  ;;  %v1978_v47 = vadd.f32 %v1977_v12, %v7966_v45  ;;  %4038 = vmax.xlane.f32.xlu2 %v8934_v26  ;;  %2984 = vmax.xlane.f32.xlu1 %v8942_v5 }
 0x3dd   : > { %12119 = vst [vmem:[#allocation98_spill] sm:$0xff] %v8894_v54  ;;  %v8913_v56 = vpop.xlane.xlu2 %2266  ;;  %v8918_v55 = vsub.f32 %v1139_v46, %v2183_v28  ;;  %v8922_v54 = vpop.xlane.xlu0 %2614  ;;  %v12131_v28 = vld [vmem:[#allocation94_spill] sm:$0xff] }
 0x3de   : > { %12121 = vst [vmem:[#allocation147_spill] sm:$0xff] %v8898_v2  ;;  %v1717_v2 = vpop.f32.mrf.mxu2 }
 0x3df   : > { %12123 = vst [vmem:[#allocation91_spill] sm:$0xff] %v8903_v52  ;;  %v8929_v18 = vadd.f32 %v8918_v55, %v1975_v29  ;;  %v8938_v46 = vadd.f32 %v8918_v55, %v12131_v28  ;;  %v1806_v52 = vpop.f32.mrf.mxu3  ;;  %v12136_v29 = vld [vmem:[#allocation93_spill] sm:$0xff]  ;;  %v1142_v28 = vadd.f32 %v7976_v0, %v12139_v36  ;;  %v8975_v36 = vadd.f32 %v1804_v49, %v7802_v19 }
 0x3e0   : > { %12125 = vst [vmem:[#allocation43_spill] sm:$0xff] %v8911_v3  ;;  %v8950_v12 = vadd.f32 %v8918_v55, %v12136_v29  ;;  %v2057_v3 = vadd.f32 %v12138_v59, %v8916_v37  ;;  %v8966_v59 = vadd.f32 %v1890_v42, %v7809_v17  ;;  %v12145_v42 = vld [vmem:[#allocation96_spill] sm:$0xff]  ;;  %v8990_v49 = vadd.f32 %v8452_v27, %v8420_v23  ;;  %v12153_v23 = vld [vmem:[#allocation51_spill] sm:$0xff] }
 0x3e1   : > { %12126 = vst [vmem:[#allocation187_spill] sm:$0xff] %v8916_v37 }
 0x3e2   : > { %12127 = vst [vmem:[#allocation188_spill] sm:$0xff] %v8918_v55  ;;  %4036 = vmax.xlane.f32.xlu0 %v8946_v7  ;;  %v2089_v22 = vadd.f32 %v2057_v3, %v8925_v41  ;;  %v12149_v55 = vld [vmem:[#allocation50_spill] sm:$0xff] }
 0x3e3   : > { %12128 = vst [vmem:[#allocation189_spill] sm:$0xff] %v8925_v41  ;;  %v1979_v3 = vpop.f32.mrf.mxu1 }
 0x3e4   : > { %12129 = vst [vmem:[#allocation190_spill] sm:$0xff] %v8929_v18  ;;  %v2152_v18 = vadd.f32 %v2120_v53, %v1978_v47  ;;  %v2121_v37 = vadd.f32 %v2089_v22, %v8966_v59  ;;  %2280 = vmax.xlane.f32.xlu2 %v8468_v20  ;;  %4040 = vmax.xlane.f32.xlu1 %v8990_v49 }
 0x3e5   : > { %12130 = vst [vmem:[#allocation191_spill] sm:$0xff] %v8934_v26  ;;  %v8963_v29 = vpop.xlane.xlu2 %2618  ;;  %v8970_v26 = vpop.xlane.xlu1 %2616 }
 0x3e6   : > { %12132 = vst [vmem:[#allocation94_spill] sm:$0xff] %v8938_v46  ;;  %v2184_v38 = vmul.f32 0.16666667, %v2152_v18  ;;  %v8961_v46 = vadd.f32 %v1715_v30, %v11938_v25  ;;  %v1980_v30 = vadd.f32 %v1979_v3, %v7966_v45 }
 0x3e7   : > { %12133 = vst [vmem:[#allocation192_spill] sm:$0xff] %v8942_v5  ;;  %v8972_v5 = vpop.xlane.xlu0 %4022 }
 0x3e8   : > { %12135 = vst [vmem:[#allocation151_spill] sm:$0xff] %v8946_v7  ;;  %v8968_v53 = vsub.f32 %v1142_v28, %v2184_v38  ;;  %v1895_v7 = vpop.f32.mrf.mxu0  ;;  %v12147_v38 = vld [vmem:[#allocation105_spill] sm:$0xff]  ;;  %v2153_v22 = vadd.f32 %v2121_v37, %v1980_v30 }
 0x3e9   : > { %12137 = vst [vmem:[#allocation93_spill] sm:$0xff] %v8950_v12  ;;  %v2058_v41 = vadd.f32 %v12147_v38, %v8961_v46  ;;  %v1720_v12 = vpop.f32.mrf.mxu2  ;;  %v1144_v38 = vadd.f32 %v7976_v0, %v12153_v23 }
 0x3ea   : > { %12140 = vst [vmem:[#allocation102_spill] sm:$0xff] %v8961_v46  ;;  %v8978_v18 = vadd.f32 %v8968_v53, %v1978_v47  ;;  %v8984_v28 = vadd.f32 %v8968_v53, %v12145_v42  ;;  %v8994_v47 = vadd.f32 %v8411_v11, %v12149_v55  ;;  %v2185_v46 = vmul.f32 0.16666667, %v2153_v22  ;;  %v12159_v22 = vld [vmem:[#allocation54_spill] sm:$0xff] }
 0x3eb   : > { %12141 = vst [vmem:[#allocation47_spill] sm:$0xff] %v8966_v59  ;;  %v2090_v42 = vadd.f32 %v2058_v41, %v8975_v36  ;;  %v1809_v59 = vpop.f32.mrf.mxu3  ;;  %v9007_v11 = vadd.f32 %v1717_v2, %v11938_v25  ;;  %v9010_v55 = vadd.f32 %v1893_v35, %v7809_v17  ;;  %v9030_v23 = vadd.f32 %v8452_v27, %v12159_v22  ;;  %v9049_v22 = vld [vmem:[%s11369_s8] ss:$0 sm:$0xff] }
 0x3ec   : > { %12142 = vst [vmem:[#allocation193_spill] sm:$0xff] %v8968_v53  ;;  %2982 = vmax.xlane.f32.xlu0 %v8994_v47  ;;  %2634 = vmax.xlane.f32.xlu1 %v8514_v1 }
 0x3ed   : > { %12143 = vst [vmem:[#allocation194_spill] sm:$0xff] %v8975_v36  ;;  %v9012_v37 = vpop.xlane.xlu2 %3674  ;;  %v9016_v41 = vpop.xlane.xlu1 %3322  ;;  %v2122_v0 = vadd.f32 %v2090_v42, %v9010_v55  ;;  %3336 = vmax.xlane.f32.xlu2 %v9030_v23  ;;  %v12164_v42 = vld [vmem:[#allocation100_spill] sm:$0xff] }
 0x3ee   : > { %12144 = vst [vmem:[#allocation195_spill] sm:$0xff] %v8978_v18  ;;  %v12151_v18 = vld [vmem:[#allocation97_spill] sm:$0xff]  ;;  %v1982_v36 = vpop.f32.mrf.mxu1 }
 0x3ef   : > { %12146 = vst [vmem:[#allocation96_spill] sm:$0xff] %v8984_v28  ;;  %v8998_v3 = vadd.f32 %v8968_v53, %v12151_v18  ;;  %v9014_v18 = vsub.f32 %v1144_v38, %v2185_v46  ;;  %v9018_v20 = vpop.xlane.xlu0 %3320  ;;  %v1983_v35 = vadd.f32 %v1982_v36, %v7966_v45  ;;  %v12161_v46 = vld [vmem:[#allocation99_spill] sm:$0xff] }
 0x3f0   : > { %12148 = vst [vmem:[#allocation105_spill] sm:$0xff] %v8990_v49  ;;  %v9021_v49 = vadd.f32 %v1806_v52, %v7802_v19  ;;  %v1898_v53 = vpop.f32.mrf.mxu0 }
 0x3f1   : > { %12150 = vst [vmem:[#allocation50_spill] sm:$0xff] %v8994_v47  ;;  %v9025_v2 = vadd.f32 %v9014_v18, %v1980_v30  ;;  %v9034_v38 = vadd.f32 %v9014_v18, %v12161_v46  ;;  %v12163_v47 = vld [vmem:[#allocation108_spill] sm:$0xff]  ;;  %v2154_v28 = vadd.f32 %v2122_v0, %v1983_v35  ;;  %v9041_v30 = vadd.f32 %v9014_v18, %v12164_v42  ;;  %v1722_v36 = vpop.f32.mrf.mxu2 }
 0x3f2   : > { %12152 = vst [vmem:[#allocation97_spill] sm:$0xff] %v8998_v3  ;;  %v2059_v52 = vadd.f32 %v12163_v47, %v9007_v11  ;;  %v12166_v47 = vld [vmem:[#allocation55_spill] sm:$0xff]  ;;  %v9057_v42 = vadd.f32 %v1895_v7, %v7809_v17 }
 0x3f3   : > { %12154 = vst [vmem:[#allocation51_spill] sm:$0xff] %v9007_v11  ;;  %v1147_v0 = vadd.f32 %v9049_v22, %v12166_v47  ;;  %v2186_v46 = vmul.f32 0.16666667, %v2154_v28 }
 0x3f4   : > { %12155 = vst [vmem:[#allocation196_spill] sm:$0xff] %v9010_v55  ;;  %v2091_v55 = vadd.f32 %v2059_v52, %v9021_v49  ;;  %2632 = vmax.xlane.f32.xlu0 %v8478_v24  ;;  %v1811_v52 = vpop.f32.mrf.mxu3  ;;  %2284 = vmax.xlane.f32.xlu1 %v8555_v63 }
 0x3f5   : > { %12156 = vst [vmem:[#allocation197_spill] sm:$0xff] %v9014_v18  ;;  %v9061_v1 = vsub.f32 %v1147_v0, %v2186_v46  ;;  %v9063_v11 = vpop.xlane.xlu1 %2972  ;;  %v12173_v0 = vld [vmem:[#allocation104_spill] sm:$0xff]  ;;  %v12175_v18 = vld [vmem:[#allocation111_spill] sm:$0xff] }
 0x3f6   : > { %12157 = vst [vmem:[#allocation198_spill] sm:$0xff] %v9021_v49  ;;  %v9068_v49 = vadd.f32 %v1809_v59, %v7802_v19  ;;  %v1984_v47 = vpop.f32.mrf.mxu1  ;;  %v2123_v28 = vadd.f32 %v2091_v55, %v9057_v42  ;;  %v12178_v55 = vld [vmem:[#allocation103_spill] sm:$0xff] }
 0x3f7   : > { %12158 = vst [vmem:[#allocation199_spill] sm:$0xff] %v9025_v2  ;;  %v9054_v2 = vadd.f32 %v1720_v12, %v11938_v25  ;;  %v9065_v24 = vpop.xlane.xlu0 %4024  ;;  %v9072_v12 = vadd.f32 %v9061_v1, %v1983_v35  ;;  %v1985_v7 = vadd.f32 %v1984_v47, %v7966_v45  ;;  %v9081_v46 = vadd.f32 %v9061_v1, %v12173_v0  ;;  %v12180_v0 = vld [vmem:[#allocation59_spill] sm:$0xff] }
 0x3f8   : > { %12160 = vst [vmem:[#allocation54_spill] sm:$0xff] %v9030_v23  ;;  %v9059_v23 = vpop.xlane.xlu2 %2268  ;;  %v9091_v35 = vadd.f32 %v9061_v1, %v12178_v55 }
 0x3f9   : > { %12162 = vst [vmem:[#allocation99_spill] sm:$0xff] %v9034_v38  ;;  %v2060_v59 = vadd.f32 %v12175_v18, %v9054_v2  ;;  %v12176_v38 = vld [vmem:[#allocation58_spill] sm:$0xff]  ;;  %v2155_v47 = vadd.f32 %v2123_v28, %v1985_v7  ;;  %v1149_v18 = vadd.f32 %v9049_v22, %v12180_v0  ;;  %v9105_v28 = vadd.f32 %v1722_v36, %v11938_v25 }
 0x3fa   : > { %12165 = vst [vmem:[#allocation108_spill] sm:$0xff] %v9041_v30  ;;  %v9077_v30 = vadd.f32 %v8498_v62, %v8405_v33  ;;  %v9087_v3 = vadd.f32 %v8452_v27, %v12176_v38  ;;  %v1900_v33 = vpop.f32.mrf.mxu0  ;;  %v1725_v27 = vpop.f32.mrf.mxu2  ;;  %v9100_v38 = vadd.f32 %v1898_v53, %v7809_v17  ;;  %v9119_v53 = vadd.f32 %v1811_v52, %v7802_v19  ;;  %v12193_v52 = vld [vmem:[#allocation114_spill] sm:$0xff] }
 0x3fb   : > { %12167 = vst [vmem:[#allocation100_spill] sm:$0xff] %v9054_v2 }
 0x3fc   : > { %12168 = vst [vmem:[#allocation55_spill] sm:$0xff] %v9057_v42  ;;  %2986 = vmax.xlane.f32.xlu2 %v9077_v30  ;;  %3688 = vmax.xlane.f32.xlu0 %v9087_v3  ;;  %v2187_v42 = vmul.f32 0.16666667, %v2155_v47  ;;  %v12184_v47 = vld [vmem:[#allocation53_spill] sm:$0xff] }
 0x3fd   : > { %12169 = vst [vmem:[#allocation200_spill] sm:$0xff] %v9061_v1 }
 0x3fe   : > { %12170 = vst [vmem:[#allocation201_spill] sm:$0xff] %v9068_v49  ;;  %v1987_v2 = vpop.f32.mrf.mxu1 }
 0x3ff   : > { %12171 = vst [vmem:[#allocation202_spill] sm:$0xff] %v9072_v12  ;;  %v2092_v12 = vadd.f32 %v2060_v59, %v9068_v49  ;;  %v9109_v59 = vpop.xlane.xlu1 %3676  ;;  %v9111_v63 = vpop.xlane.xlu0 %2970  ;;  %v9116_v49 = vadd.f32 %v8498_v62, %v12184_v47 }
 0x400   : > { %12172 = vst [vmem:[#allocation203_spill] sm:$0xff] %v9077_v30  ;;  %v9102_v55 = vpop.xlane.xlu2 %3324  ;;  %v9107_v30 = vsub.f32 %v1149_v18, %v2187_v42  ;;  %v1988_v42 = vadd.f32 %v1987_v2, %v7966_v45  ;;  %v12188_v18 = vld [vmem:[#allocation106_spill] sm:$0xff]  ;;  %v12194_v2 = vld [vmem:[#allocation63_spill] sm:$0xff] }
 0x401   : > { %12174 = vst [vmem:[#allocation104_spill] sm:$0xff] %v9081_v46  ;;  %v2124_v0 = vadd.f32 %v2092_v12, %v9100_v38  ;;  %v9131_v46 = vadd.f32 %v8539_v13, %v8457_v10  ;;  %v12191_v12 = vld [vmem:[#allocation107_spill] sm:$0xff] }
 0x402   : > { %12177 = vst [vmem:[#allocation111_spill] sm:$0xff] %v9087_v3  ;;  %v1814_v3 = vpop.f32.mrf.mxu3  ;;  %v9122_v36 = vadd.f32 %v9107_v30, %v1985_v7  ;;  %v9135_v47 = vadd.f32 %v9107_v30, %v12191_v12  ;;  %v1152_v7 = vadd.f32 %v9049_v22, %v12194_v2  ;;  %v1903_v12 = vpop.f32.mrf.mxu0 }
 0x403   : > { %12179 = vst [vmem:[#allocation58_spill] sm:$0xff] %v9091_v35  ;;  %v9127_v35 = vadd.f32 %v9107_v30, %v12188_v18  ;;  %v2156_v1 = vadd.f32 %v2124_v0, %v1988_v42  ;;  %3340 = vmax.xlane.f32.xlu1 %v9131_v46  ;;  %v9151_v0 = vadd.f32 %v1900_v33, %v7809_v17  ;;  %v12201_v33 = vld [vmem:[#allocation109_spill] sm:$0xff] }
 0x404   : > { %12181 = vst [vmem:[#allocation103_spill] sm:$0xff] %v9100_v38  ;;  %v2061_v38 = vadd.f32 %v12193_v52, %v9105_v28  ;;  %3690 = vmax.xlane.f32.xlu2 %v9116_v49  ;;  %2282 = vmax.xlane.f32.xlu0 %v8520_v4  ;;  %v9160_v2 = vadd.f32 %v1814_v3, %v7802_v19 }
 0x405   : > { %12182 = vst [vmem:[#allocation59_spill] sm:$0xff] %v9105_v28  ;;  %v2188_v18 = vmul.f32 0.16666667, %v2156_v1  ;;  %v1727_v28 = vpop.f32.mrf.mxu2  ;;  %v9175_v3 = vadd.f32 %v8539_v13, %v8496_v9 }
 0x406   : > { %12183 = vst [vmem:[#allocation204_spill] sm:$0xff] %v9107_v30  ;;  %v2093_v10 = vadd.f32 %v2061_v38, %v9119_v53  ;;  %v1989_v1 = vpop.f32.mrf.mxu1 }
 0x407   : > { %12185 = vst [vmem:[#allocation53_spill] sm:$0xff] %v9116_v49  ;;  %v9153_v52 = vsub.f32 %v1152_v7, %v2188_v18  ;;  %v9157_v49 = vpop.xlane.xlu0 %4026  ;;  %v1990_v38 = vadd.f32 %v1989_v1, %v7966_v45  ;;  %v12203_v18 = vld [vmem:[#allocation117_spill] sm:$0xff] }
 0x408   : > { %12186 = vst [vmem:[#allocation205_spill] sm:$0xff] %v9119_v53  ;;  %v9148_v30 = vpop.xlane.xlu2 %4028  ;;  %v2125_v53 = vadd.f32 %v2093_v10, %v9151_v0  ;;  %v12207_v10 = vld [vmem:[#allocation110_spill] sm:$0xff] }
 0x409   : > { %12187 = vst [vmem:[#allocation206_spill] sm:$0xff] %v9122_v36  ;;  %v9146_v36 = vadd.f32 %v1725_v27, %v11938_v25  ;;  %v9163_v27 = vadd.f32 %v9153_v52, %v1988_v42  ;;  %v9169_v7 = vadd.f32 %v9153_v52, %v12201_v33  ;;  %v9184_v1 = vadd.f32 %v9153_v52, %v12207_v10 }
 0x40a   : > { %12189 = vst [vmem:[#allocation106_spill] sm:$0xff] %v9127_v35  ;;  %v1816_v35 = vpop.f32.mrf.mxu3 }
 0x40b   : > { %12190 = vst [vmem:[#allocation207_spill] sm:$0xff] %v9131_v46  ;;  %v9155_v46 = vpop.xlane.xlu1 %2622  ;;  %v2062_v4 = vadd.f32 %v12203_v18, %v9146_v36  ;;  %3692 = vmax.xlane.f32.xlu1 %v9175_v3  ;;  %v12209_v18 = vld [vmem:[#allocation67_spill] sm:$0xff] }
 0x40c   : > { %12192 = vst [vmem:[#allocation107_spill] sm:$0xff] %v9135_v47  ;;  %v12205_v47 = vld [vmem:[#allocation16_spill] sm:$0xff]  ;;  %2636 = vmax.xlane.f32.xlu2 %v8561_v8  ;;  %v1154_v9 = vadd.f32 %v9049_v22, %v12209_v18 }
 0x40d   : > { %12195 = vst [vmem:[#allocation114_spill] sm:$0xff] %v9146_v36  ;;  %v9179_v42 = vadd.f32 %v8498_v62, %v12205_v47  ;;  %v2094_v33 = vadd.f32 %v2062_v4, %v9160_v2  ;;  %v9192_v47 = vadd.f32 %v1903_v12, %v7809_v17  ;;  %v9197_v36 = vadd.f32 %v1727_v28, %v11938_v25  ;;  %v12213_v18 = vld [vmem:[#allocation156_spill] sm:$0xff] }
 0x40e   : > { %12196 = vst [vmem:[#allocation63_spill] sm:$0xff] %v9151_v0  ;;  %v9211_v12 = vadd.f32 %v1816_v35, %v7802_v19  ;;  %v12223_v35 = vld [vmem:[#allocation112_spill] sm:$0xff] }
 0x40f   : > { %12197 = vst [vmem:[#allocation208_spill] sm:$0xff] %v9153_v52  ;;  %3338 = vmax.xlane.f32.xlu0 %v9179_v42  ;;  %v9203_v4 = vpop.xlane.xlu0 %2620  ;;  %v1730_v52 = vpop.f32.mrf.mxu2 }
 0x410   : > { %12198 = vst [vmem:[#allocation209_spill] sm:$0xff] %v9155_v46 }
 0x411   : > { %12199 = vst [vmem:[#allocation210_spill] sm:$0xff] %v9160_v2  ;;  %v2126_v2 = vadd.f32 %v2094_v33, %v9192_v47 }
 0x412   : > { %12200 = vst [vmem:[#allocation211_spill] sm:$0xff] %v9163_v27  ;;  %v2157_v27 = vadd.f32 %v2125_v53, %v1990_v38  ;;  %v9194_v53 = vpop.xlane.xlu2 %2974 }
 0x413   : > { %12202 = vst [vmem:[#allocation109_spill] sm:$0xff] %v9169_v7  ;;  %v9201_v8 = vpop.xlane.xlu1 %3678  ;;  %v12219_v7 = vld [vmem:[#allocation66_spill] sm:$0xff] }
 0x414   : > { %12204 = vst [vmem:[#allocation117_spill] sm:$0xff] %v9175_v3  ;;  %v2189_v0 = vmul.f32 0.16666667, %v2157_v27  ;;  %v1905_v3 = vpop.f32.mrf.mxu0  ;;  %v9208_v27 = vadd.f32 %v8539_v13, %v12213_v18  ;;  %v9223_v33 = vadd.f32 %v8585_v34, %v12219_v7  ;;  %v12226_v7 = vld [vmem:[#allocation71_spill] sm:$0xff] }
 0x415   : > { %12206 = vst [vmem:[#allocation16_spill] sm:$0xff] %v9179_v42  ;;  %v1992_v42 = vpop.f32.mrf.mxu1 }
 0x416   : > { %12208 = vst [vmem:[#allocation110_spill] sm:$0xff] %v9184_v1  ;;  %v9199_v10 = vsub.f32 %v1154_v9, %v2189_v0  ;;  %v1993_v0 = vadd.f32 %v1992_v42, %v7966_v45  ;;  %v12217_v9 = vld [vmem:[#allocation113_spill] sm:$0xff]  ;;  %4044 = vmax.xlane.f32.xlu2 %v9208_v27  ;;  %2990 = vmax.xlane.f32.xlu1 %v9223_v33 }
 0x417   : > { %12210 = vst [vmem:[#allocation67_spill] sm:$0xff] %v9192_v47  ;;  %v12221_v47 = vld [vmem:[#allocation153_spill] sm:$0xff] }
 0x418   : > { %12211 = vst [vmem:[#allocation212_spill] sm:$0xff] %v9197_v36  ;;  %v9214_v28 = vadd.f32 %v9199_v10, %v1990_v38  ;;  %v9219_v1 = vadd.f32 %v9199_v10, %v12217_v9  ;;  %v9227_v18 = vadd.f32 %v8498_v62, %v12221_v47  ;;  %v9231_v46 = vadd.f32 %v9199_v10, %v12223_v35  ;;  %v12225_v38 = vld [vmem:[#allocation120_spill] sm:$0xff]  ;;  %v1819_v9 = vpop.f32.mrf.mxu3 }
 0x419   : > { %12212 = vst [vmem:[#allocation213_spill] sm:$0xff] %v9199_v10  ;;  %v2063_v42 = vadd.f32 %v12225_v38, %v9197_v36  ;;  %v9242_v35 = vadd.f32 %v1730_v52, %v11938_v25  ;;  %v12232_v36 = vld [vmem:[#allocation115_spill] sm:$0xff]  ;;  %v12236_v10 = vld [vmem:[#allocation17_spill] sm:$0xff] }
 0x41a   : > { %12214 = vst [vmem:[#allocation156_spill] sm:$0xff] %v9208_v27  ;;  %4042 = vmax.xlane.f32.xlu0 %v9227_v18 }
 0x41b   : > { %12215 = vst [vmem:[#allocation214_spill] sm:$0xff] %v9211_v12  ;;  %v2095_v62 = vadd.f32 %v2063_v42, %v9211_v12  ;;  %v9251_v27 = vpop.xlane.xlu1 %2272 }
 0x41c   : > { %12216 = vst [vmem:[#allocation215_spill] sm:$0xff] %v9214_v28  ;;  %v2158_v28 = vadd.f32 %v2126_v2, %v1993_v0  ;;  %v9247_v2 = vadd.f32 %v1905_v3, %v7809_v17  ;;  %v1908_v12 = vpop.f32.mrf.mxu0 }
 0x41d   : > { %12218 = vst [vmem:[#allocation113_spill] sm:$0xff] %v9219_v1  ;;  %v1157_v1 = vadd.f32 %v9049_v22, %v12226_v7  ;;  %v1994_v7 = vpop.f32.mrf.mxu1 }
 0x41e   : > { %12220 = vst [vmem:[#allocation66_spill] sm:$0xff] %v9223_v33  ;;  %v2190_v47 = vmul.f32 0.16666667, %v2158_v28  ;;  %v9253_v33 = vpop.xlane.xlu0 %2270  ;;  %v1995_v52 = vadd.f32 %v1994_v7, %v7966_v45  ;;  %v2127_v42 = vadd.f32 %v2095_v62, %v9247_v2  ;;  %2286 = vmax.xlane.f32.xlu2 %v8597_v48 }
 0x41f   : > { %12222 = vst [vmem:[#allocation153_spill] sm:$0xff] %v9227_v18  ;;  %v9256_v18 = vadd.f32 %v1819_v9, %v7802_v19  ;;  %v9271_v9 = vadd.f32 %v8585_v34, %v8547_v51  ;;  %v12241_v51 = vld [vmem:[#allocation75_spill] sm:$0xff] }
 0x420   : > { %12224 = vst [vmem:[#allocation112_spill] sm:$0xff] %v9231_v46  ;;  %v9244_v46 = vpop.xlane.xlu2 %4030  ;;  %v9249_v38 = vsub.f32 %v1157_v1, %v2190_v47  ;;  %v12234_v1 = vld [vmem:[#allocation123_spill] sm:$0xff]  ;;  %v2159_v62 = vadd.f32 %v2127_v42, %v1995_v52  ;;  %v1821_v42 = vpop.f32.mrf.mxu3 }
 0x421   : > { %12227 = vst [vmem:[#allocation120_spill] sm:$0xff] %v9242_v35  ;;  %v2064_v47 = vadd.f32 %v12234_v1, %v9242_v35  ;;  %4046 = vmax.xlane.f32.xlu1 %v9271_v9 }
 0x422   : > { %12228 = vst [vmem:[#allocation71_spill] sm:$0xff] %v9247_v2  ;;  %v9259_v28 = vadd.f32 %v9249_v38, %v1993_v0  ;;  %v9265_v3 = vadd.f32 %v9249_v38, %v12232_v36  ;;  %v9275_v0 = vadd.f32 %v8539_v13, %v12236_v10  ;;  %v1732_v36 = vpop.f32.mrf.mxu2  ;;  %v12240_v2 = vld [vmem:[#allocation127_spill] sm:$0xff]  ;;  %v1159_v13 = vadd.f32 %v9049_v22, %v12241_v51 }
 0x423   : > { %12229 = vst [vmem:[#allocation216_spill] sm:$0xff] %v9249_v38  ;;  %v3026_v1 = vsub.f32 %v12240_v2, %v8616_v16  ;;  %v2096_v35 = vadd.f32 %v2064_v47, %v9256_v18  ;;  %v2191_v10 = vmul.f32 0.16666667, %v2159_v62  ;;  %v9295_v48 = vadd.f32 %v1732_v36, %v11938_v25  ;;  %v9299_v2 = vpop.xlane.xlu1 %3328  ;;  %v12245_v62 = vld [vmem:[#allocation18_spill] sm:$0xff] }
 0x424   : > { %12230 = vst [vmem:[#allocation217_spill] sm:$0xff] %v9256_v18  ;;  %2988 = vmax.xlane.f32.xlu0 %v9275_v0 }
 0x425   : > { %12231 = vst [vmem:[#allocation218_spill] sm:$0xff] %v9259_v28  ;;  %v12238_v28 = vld [vmem:[#allocation116_spill] sm:$0xff]  ;;  %v9297_v16 = vsub.f32 %v1159_v13, %v2191_v10  ;;  %v1997_v18 = vpop.f32.mrf.mxu1  ;;  %v12249_v13 = vld [vmem:[#allocation118_spill] sm:$0xff] }
 0x426   : > { %12233 = vst [vmem:[#allocation115_spill] sm:$0xff] %v9265_v3  ;;  %v9279_v7 = vadd.f32 %v9249_v38, %v12238_v28  ;;  %v9290_v28 = vadd.f32 %v1908_v12, %v7809_v17  ;;  %v9301_v47 = vpop.xlane.xlu0 %3326  ;;  %v9306_v12 = vadd.f32 %v8585_v34, %v12245_v62  ;;  %v9309_v3 = vadd.f32 %v1821_v42, %v7802_v19  ;;  %v12252_v62 = vld [vmem:[#allocation119_spill] sm:$0xff]  ;;  %v1910_v19 = vpop.f32.mrf.mxu0 }
 0x427   : > { %12235 = vst [vmem:[#allocation123_spill] sm:$0xff] %v9271_v9  ;;  %v3058_v9 = vmul.f32 1.442695, %v3026_v1  ;;  %v9312_v25 = vadd.f32 %v9297_v16, %v1995_v52  ;;  %v1998_v36 = vadd.f32 %v1997_v18, %v7966_v45  ;;  %v9317_v10 = vadd.f32 %v9297_v16, %v12249_v13  ;;  %v12251_v1 = vld [vmem:[#allocation126_spill] sm:$0xff]  ;;  %v12254_v52 = vld [vmem:[#allocation132_spill] sm:$0xff]  ;;  %v12255_v18 = vld [vmem:[#allocation69_spill] sm:$0xff] }
 0x428   : > { %12237 = vst [vmem:[#allocation17_spill] sm:$0xff] %v9275_v0  ;;  %v9292_v38 = vpop.xlane.xlu2 %2624  ;;  %v2128_v51 = vadd.f32 %v2096_v35, %v9290_v28  ;;  %3342 = vmax.xlane.f32.xlu2 %v9306_v12  ;;  %v3378_v42 = vsub.f32 %v12254_v52, %v8676_v60  ;;  %v12256_v13 = vld [vmem:[#allocation79_spill] sm:$0xff] }
 0x429   : > { %12239 = vst [vmem:[#allocation116_spill] sm:$0xff] %v9279_v7  ;;  %v2065_v7 = vadd.f32 %v12251_v1, %v9295_v48  ;;  %2640 = vmax.xlane.f32.xlu1 %v8646_v58  ;;  %5691 = vpow2.f32 %v3058_v9 }
 0x42a   : > { %12242 = vst [vmem:[#allocation127_spill] sm:$0xff] %v9290_v28  ;;  %v2160_v35 = vadd.f32 %v2128_v51, %v1998_v36  ;;  %v9324_v28 = vadd.f32 %v9297_v16, %v12252_v62  ;;  %v9336_v62 = vadd.f32 %v1910_v19, %v7809_v17  ;;  %v3410_v52 = vmul.f32 1.442695, %v3378_v42  ;;  %v12264_v19 = vld [vmem:[#allocation60_spill] sm:$0xff] }
 0x42b   : > { %12243 = vst [vmem:[#allocation75_spill] sm:$0xff] %v9295_v48  ;;  %v2097_v51 = vadd.f32 %v2065_v7, %v9309_v3 }
 0x42c   : > { %12244 = vst [vmem:[#allocation219_spill] sm:$0xff] %v9297_v16  ;;  %2638 = vmax.xlane.f32.xlu0 %v12255_v18  ;;  %v2192_v1 = vmul.f32 0.16666667, %v2160_v35  ;;  %v12259_v16 = vld [vmem:[#allocation19_spill] sm:$0xff]  ;;  %v12262_v35 = vld [vmem:[#allocation122_spill] sm:$0xff]  ;;  %5693 = vpow2.f32 %v3410_v52  ;;  %v12278_v52 = vld [vmem:[#allocation125_spill] sm:$0xff] }
 0x42d   : > { %12246 = vst [vmem:[#allocation18_spill] sm:$0xff] %v9306_v12  ;;  %v1999_v58 = vpop.f32.mrf.mxu1  ;;  %v2129_v17 = vadd.f32 %v2097_v51, %v9336_v62  ;;  %v12290_v18 = vld [vmem:[#allocation160_spill] sm:$0xff] }
 0x42e   : > { %12247 = vst [vmem:[#allocation220_spill] sm:$0xff] %v9309_v3  ;;  %v9342_v60 = vpop.xlane.xlu0 %2976  ;;  %v2000_v7 = vadd.f32 %v1999_v58, %v7966_v45  ;;  %v12268_v45 = vld [vmem:[#allocation162_spill] sm:$0xff]  ;;  %v12269_v58 = vld [vmem:[#allocation129_spill] sm:$0xff] }
 0x42f   : > { %12248 = vst [vmem:[#allocation221_spill] sm:$0xff] %v9312_v25  ;;  %v1162_v25 = vadd.f32 %v9049_v22, %v12256_v13  ;;  %v9346_v13 = vadd.f32 %v8628_v6, %v12259_v16  ;;  %v9361_v42 = vpop.eup %5691  ;;  %v12266_v16 = vld [vmem:[#allocation121_spill] sm:$0xff]  ;;  %v2322_v51 = vsub.f32 %v12269_v58, %v12268_v45 }
 0x430   : > { %12250 = vst [vmem:[#allocation118_spill] sm:$0xff] %v9317_v10  ;;  %v9333_v12 = vpop.xlane.xlu2 %3680  ;;  %v2161_v3 = vadd.f32 %v2129_v17, %v2000_v7  ;;  %v9433_v10 = vadd.f32 %v8628_v6, %v12290_v18 }
 0x431   : > { %12253 = vst [vmem:[#allocation126_spill] sm:$0xff] %v9324_v28  ;;  %v9338_v48 = vsub.f32 %v1162_v25, %v2192_v1  ;;  %v9340_v28 = vpop.xlane.xlu1 %2978  ;;  %v9359_v1 = vadd.f32 %v8585_v34, %v12264_v19  ;;  %2992 = vmax.xlane.f32.xlu2 %v9346_v13  ;;  %3122 = vadd.xlane.f32.xlu1 %v9361_v42  ;;  %v12271_v19 = vld [vmem:[#allocation131_spill] sm:$0xff]  ;;  %v2354_v45 = vmul.f32 1.442695, %v2322_v51 }
 0x432   : > { %12257 = vst [vmem:[#allocation119_spill] sm:$0xff] %v9336_v62  ;;  %v4082_v62 = vsub.f32 %v12271_v19, %v8674_v40  ;;  %v2193_v17 = vmul.f32 0.16666667, %v2161_v3  ;;  %v12276_v40 = vld [vmem:[#allocation124_spill] sm:$0xff] }
 0x433   : > { %12258 = vst [vmem:[#allocation132_spill] sm:$0xff] %v9338_v48  ;;  %v9349_v9 = vadd.f32 %v9338_v48, %v1998_v36  ;;  %v9355_v25 = vadd.f32 %v9338_v48, %v12262_v35  ;;  %v9366_v36 = vadd.f32 %v9338_v48, %v12266_v16  ;;  %v12270_v35 = vld [vmem:[#allocation83_spill] sm:$0xff]  ;;  %v12274_v48 = vld [vmem:[#allocation21_spill] sm:$0xff]  ;;  %5695 = vpow2.f32 %v2354_v45  ;;  %v12285_v45 = vld [vmem:[#allocation134_spill] sm:$0xff] }
 0x434   : > { %12260 = vst [vmem:[#allocation79_spill] sm:$0xff] %v9346_v13  ;;  %3694 = vmax.xlane.f32.xlu0 %v9359_v1  ;;  %v1164_v34 = vadd.f32 %v9049_v22, %v12270_v35  ;;  %v4114_v58 = vmul.f32 1.442695, %v4082_v62  ;;  %v9389_v22 = vadd.f32 %v8628_v6, %v12274_v48  ;;  %v12280_v62 = vld [vmem:[#allocation82_spill] sm:$0xff] }
 0x435   : > { %12261 = vst [vmem:[#allocation19_spill] sm:$0xff] %v9349_v9 }
 0x436   : > { %12263 = vst [vmem:[#allocation122_spill] sm:$0xff] %v9355_v25  ;;  %v9378_v25 = vsub.f32 %v1164_v34, %v2193_v17  ;;  %v9399_v34 = vpop.eup %5693  ;;  %5697 = vpow2.f32 %v4114_v58  ;;  %v12282_v17 = vld [vmem:[#allocation157_spill] sm:$0xff]  ;;  %v12286_v58 = vld [vmem:[#allocation78_spill] sm:$0xff] }
 0x437   : > { %12265 = vst [vmem:[#allocation60_spill] sm:$0xff] %v9359_v1 }
 0x438   : > { %12267 = vst [vmem:[#allocation121_spill] sm:$0xff] %v9366_v36  ;;  %v9376_v9 = vpop.xlane.xlu2 %2274  ;;  %v9382_v36 = vpop.xlane.xlu0 %4032  ;;  %v9385_v1 = vadd.f32 %v9378_v25, %v2000_v7  ;;  %v9393_v3 = vadd.f32 %v9378_v25, %v12276_v40  ;;  %v9397_v35 = vadd.f32 %v9378_v25, %v12278_v52  ;;  %v9414_v40 = vadd.f32 %v8628_v6, %v12282_v17 }
 0x439   : > { %12272 = vst [vmem:[#allocation162_spill] sm:$0xff] %v9378_v25  ;;  %v9380_v16 = vpop.xlane.xlu1 %4034  ;;  %3696 = vmax.xlane.f32.xlu2 %v9389_v22  ;;  %3474 = vadd.xlane.f32.xlu1 %v9399_v34  ;;  %v9410_v19 = vpop.eup %5695 }
 0x43a   : > { %12273 = vst [vmem:[#allocation129_spill] sm:$0xff] %v9385_v1  ;;  %v3027_v1 = vsub.f32 %v12285_v45, %v8827_v50  ;;  %v12292_v50 = vld [vmem:[#allocation72_spill] sm:$0xff]  ;;  %v12293_v45 = vld [vmem:[#allocation130_spill] sm:$0xff] }
 0x43b   : > { %12275 = vst [vmem:[#allocation83_spill] sm:$0xff] %v9389_v22  ;;  %v12287_v22 = vld [vmem:[#allocation128_spill] sm:$0xff] }
 0x43c   : > { %12277 = vst [vmem:[#allocation131_spill] sm:$0xff] %v9393_v3  ;;  %2288 = vmax.xlane.f32.xlu0 %v12280_v62  ;;  %v9416_v52 = vpop.eup %5697  ;;  %v3060_v62 = vmul.f32 1.442695, %v3027_v1  ;;  %v12295_v1 = vld [vmem:[#allocation172_spill] sm:$0xff] }
 0x43d   : > { %12279 = vst [vmem:[#allocation21_spill] sm:$0xff] %v9397_v35  ;;  %v2674_v35 = vsub.f32 %v12287_v22, %v12286_v58 }
 0x43e   : > { %12283 = vst [vmem:[#allocation125_spill] sm:$0xff] %v9414_v40  ;;  %5699 = vpow2.f32 %v3060_v62  ;;  %v12300_v62 = vld [vmem:[#allocation165_spill] sm:$0xff] }
 0x43f   : > { %12284 = vst [vmem:[#allocation157_spill] sm:$0xff] %v9416_v52  ;;  %v2706_v13 = vmul.f32 1.442695, %v2674_v35  ;;  %v12296_v35 = vld [vmem:[#allocation136_spill] sm:$0xff] }
 0x440   : > { %v9404_v48 = vpop.xlane.xlu2 %3330  ;;  %v9408_v51 = vpop.xlane.xlu0 %2626  ;;  %12291 = vst [vmem:[#allocation128_spill] sm:$0xff] %v9433_v10  ;;  %v3730_v58 = vsub.f32 %v12296_v35, %v12295_v1 }
 0x441   : > { %v9406_v7 = vpop.xlane.xlu1 %2628  ;;  %2418 = vadd.xlane.f32.xlu2 %v9410_v19  ;;  %4178 = vadd.xlane.f32.xlu1 %v9416_v52  ;;  %v12294_v52 = vld [vmem:[#allocation141_spill] sm:$0xff]  ;;  %5701 = vpow2.f32 %v2706_v13  ;;  %v12302_v13 = vld [vmem:[#allocation34_spill] sm:$0xff] }
 0x442   : > { %12281 = vst [vmem:[#allocation124_spill] sm:$0xff] %v9406_v7  ;;  %v4083_v22 = vsub.f32 %v12294_v52, %v8776_v31  ;;  %v12299_v31 = vld [vmem:[#allocation159_spill] sm:$0xff]  ;;  %v12317_v7 = vld [vmem:[#allocation89_spill] sm:$0xff] }
 0x443   : > { %v9454_v52 = vadd.f32 %v12300_v62, %v12299_v31 }
 0x444   : > { %3344 = vmax.xlane.f32.xlu0 %v9414_v40  ;;  %v2675_v40 = vsub.f32 %v12293_v45, %v12292_v50  ;;  %v4116_v45 = vmul.f32 1.442695, %v4083_v22 }
 0x445   : > { %12301 = vst [vmem:[#allocation130_spill] sm:$0xff] %v9454_v52 }
 0x446   : > { %v2708_v6 = vmul.f32 1.442695, %v2675_v40  ;;  %v3731_v40 = vsub.f32 %v12302_v13, %v8875_v44 }
 0x448   : > { %v9425_v25 = vpop.xlane.xlu2 %2980  ;;  %v9429_v17 = vpop.xlane.xlu0 %3682  ;;  %5703 = vpow2.f32 %v2708_v6  ;;  %v3764_v6 = vmul.f32 1.442695, %v3731_v40 }
 0x449   : > { %12288 = vst [vmem:[#allocation134_spill] sm:$0xff] %v9425_v25  ;;  %v9427_v3 = vpop.xlane.xlu1 %2278  ;;  %2642 = vmax.xlane.f32.xlu2 %v8701_v39  ;;  %2290 = vmax.xlane.f32.xlu1 %v8705_v61  ;;  %v3762_v39 = vmul.f32 1.442695, %v3730_v58  ;;  %5705 = vpow2.f32 %v4116_v45 }
 0x44a   : > { %12289 = vst [vmem:[#allocation78_spill] sm:$0xff] %v9427_v3  ;;  %v9450_v3 = vpop.eup %5699 }
 0x44b   : > { %5707 = vpow2.f32 %v3762_v39  ;;  %v12308_v39 = vld [vmem:[#allocation133_spill] sm:$0xff] }
 0x44c   : > { %4048 = vmax.xlane.f32.xlu0 %v9433_v10  ;;  %v9456_v10 = vpop.eup %5701  ;;  %v2323_v44 = vsub.f32 %v12308_v39, %v8778_v32  ;;  %5709 = vpow2.f32 %v3764_v6  ;;  %v12318_v32 = vld [vmem:[#allocation140_spill] sm:$0xff]  ;;  %v12319_v39 = vld [vmem:[#allocation138_spill] sm:$0xff] }
 0x44d   : > { %v2676_v6 = vsub.f32 %v12318_v32, %v8922_v54  ;;  %v12326_v32 = vld [vmem:[#allocation22_spill] sm:$0xff] }
 0x44e   : > { %v9469_v58 = vpop.eup %5703  ;;  %v2356_v40 = vmul.f32 1.442695, %v2323_v44  ;;  %v2324_v44 = vsub.f32 %v12319_v39, %v8825_v43  ;;  %v12328_v43 = vld [vmem:[#allocation175_spill] sm:$0xff] }
 0x44f   : > { %v9471_v31 = vpop.eup %5705 }
 0x450   : > { %v9444_v0 = vpop.xlane.xlu2 %3684  ;;  %v9448_v50 = vpop.xlane.xlu0 %2276  ;;  %12306 = vst [vmem:[#allocation159_spill] sm:$0xff] %v9471_v31  ;;  %5711 = vpow2.f32 %v2356_v40 }
 0x451   : > { %12297 = vst [vmem:[#allocation160_spill] sm:$0xff] %v9444_v0  ;;  %v9446_v18 = vpop.xlane.xlu1 %3334  ;;  %3124 = vadd.xlane.f32.xlu2 %v9450_v3  ;;  %3346 = vmax.xlane.f32.xlu1 %v9454_v52  ;;  %v9473_v45 = vpop.eup %5707  ;;  %v12324_v0 = vld [vmem:[#allocation170_spill] sm:$0xff] }
 0x452   : > { %12298 = vst [vmem:[#allocation72_spill] sm:$0xff] %v9446_v18  ;;  %v12312_v18 = vld [vmem:[#allocation74_spill] sm:$0xff] }
 0x453   : > { %12307 = vst [vmem:[#allocation34_spill] sm:$0xff] %v9473_v45  ;;  %v9488_v61 = vadd.f32 %v12300_v62, %v12312_v18 }
 0x454   : > { %2770 = vadd.xlane.f32.xlu0 %v9456_v10 }
 0x455   : > { %12313 = vst [vmem:[#allocation74_spill] sm:$0xff] %v9488_v61 }
 0x458   : > { %v9463_v22 = vpop.xlane.xlu2 %2630  ;;  %v9467_v35 = vpop.xlane.xlu0 %3332 }
 0x459   : > { %12303 = vst [vmem:[#allocation141_spill] sm:$0xff] %v9463_v22  ;;  %v9465_v1 = vpop.xlane.xlu1 %3686  ;;  %4180 = vadd.xlane.f32.xlu2 %v9471_v31  ;;  %2772 = vadd.xlane.f32.xlu1 %v9469_v58  ;;  %v9490_v31 = vpop.eup %5709  ;;  %v12315_v22 = vld [vmem:[#allocation171_spill] sm:$0xff] }
 0x45a   : > { %12304 = vst [vmem:[#allocation172_spill] sm:$0xff] %v9465_v1  ;;  %v9515_v40 = vpop.eup %5711 }
 0x45b   : > { %12305 = vst [vmem:[#allocation136_spill] sm:$0xff] %v9467_v35  ;;  %v12316_v35 = vld [vmem:[#allocation137_spill] sm:$0xff] }
 0x45c   : > { %3826 = vadd.xlane.f32.xlu0 %v9473_v45  ;;  %12314 = vst [vmem:[#allocation224_spill] sm:$0xff] %v9490_v31  ;;  %v3379_v45 = vsub.f32 %v12316_v35, %v12315_v22  ;;  %v2710_v22 = vmul.f32 1.442695, %v2676_v6  ;;  %v2358_v35 = vmul.f32 1.442695, %v2324_v44  ;;  %v12330_v6 = vld [vmem:[#allocation27_spill] sm:$0xff] }
 0x460   : > { %v9480_v13 = vpop.xlane.xlu2 %4038  ;;  %v9484_v1 = vpop.xlane.xlu0 %4036 }
 0x461   : > { %12309 = vst [vmem:[#allocation133_spill] sm:$0xff] %v9480_v13  ;;  %v9482_v52 = vpop.xlane.xlu1 %2984  ;;  %2292 = vmax.xlane.f32.xlu2 %v12317_v7  ;;  %3828 = vadd.xlane.f32.xlu1 %v9490_v31  ;;  %v3412_v13 = vmul.f32 1.442695, %v3379_v45  ;;  %v12323_v7 = vld [vmem:[#allocation163_spill] sm:$0xff]  ;;  %v9513_v31 = vadd.f32 %v12324_v0, %v12326_v32  ;;  %v12329_v45 = vld [vmem:[#allocation9_spill] sm:$0xff] }
 0x462   : > { %12310 = vst [vmem:[#allocation222_spill] sm:$0xff] %v9482_v52  ;;  %v9509_v54 = vadd.f32 %v12324_v0, %v12323_v7  ;;  %v3732_v39 = vsub.f32 %v12329_v45, %v12328_v43  ;;  %v12331_v7 = vld [vmem:[#allocation135_spill] sm:$0xff] }
 0x463   : > { %12311 = vst [vmem:[#allocation223_spill] sm:$0xff] %v9484_v1  ;;  %5713 = vpow2.f32 %v3412_v13  ;;  %v3380_v44 = vsub.f32 %v12331_v7, %v12330_v6  ;;  %v4385_v6 = vld [vmem:[#allocation2 + $0x178] sm:$0xff]  ;;  %v12348_v1 = vld [vmem:[#allocation176_spill] sm:$0xff] }
 0x464   : > { %2994 = vmax.xlane.f32.xlu0 %v9488_v61  ;;  %12325 = vst [vmem:[#allocation138_spill] sm:$0xff] %v9509_v54  ;;  %5715 = vpow2.f32 %v2710_v22  ;;  %v3766_v13 = vmul.f32 1.442695, %v3732_v39  ;;  %v4384_v39 = vld [vmem:[#allocation2 + $0x170] sm:$0xff]  ;;  %4660 = vmatpush.msrb.mxu0 %v4385_v6  ;;  %v12341_v6 = vld [vmem:[#allocation24_spill] sm:$0xff] }
 0x465   : > { %12327 = vst [vmem:[#allocation163_spill] sm:$0xff] %v9513_v31  ;;  %5717 = vpow2.f32 %v2358_v35  ;;  %v3414_v61 = vmul.f32 1.442695, %v3380_v44  ;;  %v12335_v35 = vld [vmem:[#allocation139_spill] sm:$0xff] }
 0x466   : > { %5719 = vpow2.f32 %v3766_v13  ;;  %v3028_v45 = vsub.f32 %v12335_v35, %v8873_v57  ;;  %4661 = vmatpush.msrb.mxu0 %v4384_v39  ;;  %v4383_v13 = vld [vmem:[#allocation2 + $0x168] sm:$0xff]  ;;  %v4382_v35 = vld [vmem:[#allocation2 + $0x160] sm:$0xff] }
 0x467   : > { %5721 = vpow2.f32 %v3414_v61  ;;  %v12340_v61 = vld [vmem:[#allocation26_spill] sm:$0xff] }
 0x468   : > { %v9501_v18 = vpop.xlane.xlu2 %2280  ;;  %v9505_v52 = vpop.xlane.xlu0 %2982  ;;  %4662 = vmatpush.msrb.mxu0 %v4383_v13  ;;  %v3029_v57 = vsub.f32 %v12340_v61, %v8817_v21  ;;  %v4381_v13 = vld [vmem:[#allocation2 + $0x158] sm:$0xff]  ;;  %v4380_v21 = vld [vmem:[#allocation2 + $0x150] sm:$0xff] }
 0x469   : > { %12320 = vst [vmem:[#allocation171_spill] sm:$0xff] %v9501_v18  ;;  %v9503_v62 = vpop.xlane.xlu1 %4040  ;;  %3348 = vmax.xlane.f32.xlu2 %v9509_v54  ;;  %2996 = vmax.xlane.f32.xlu1 %v9513_v31  ;;  %v9530_v54 = vpop.eup %5713  ;;  %v3062_v31 = vmul.f32 1.442695, %v3028_v45  ;;  %v12343_v45 = vld [vmem:[#allocation148_spill] sm:$0xff]  ;;  %v4400_v61 = vld [vmem:[#allocation2 + $0x1f0] sm:$0xff] }
 0x46a   : > { %12321 = vst [vmem:[#allocation137_spill] sm:$0xff] %v9503_v62  ;;  %v9532_v43 = vpop.eup %5715  ;;  %v4084_v39 = vsub.f32 %v12343_v45, %v8972_v5  ;;  %4663 = vmatpush.msrb.mxu0 %v4382_v35  ;;  %v4379_v35 = vld [vmem:[#allocation2 + $0x148] sm:$0xff] }
 0x46b   : > { %12322 = vst [vmem:[#allocation140_spill] sm:$0xff] %v9505_v52  ;;  %v9534_v22 = vpop.eup %5717  ;;  %5723 = vpow2.f32 %v3062_v31  ;;  %v4399_v45 = vld [vmem:[#allocation2 + $0x1e8] sm:$0xff] }
 0x46c   : > { %2420 = vadd.xlane.f32.xlu0 %v9515_v40  ;;  %4664 = vmatpush.msrb.mxu0 %v4381_v13  ;;  %v4118_v31 = vmul.f32 1.442695, %v4084_v39  ;;  %v12352_v13 = vld [vmem:[#allocation39_spill] sm:$0xff] }
 0x46e   : > { %4665 = vmatpush.msrb.mxu0 %v4380_v21  ;;  %v12353_v21 = vld [vmem:[#allocation30_spill] sm:$0xff] }
 0x470   : > { %v9524_v62 = vpop.xlane.xlu2 %3336  ;;  %v9528_v0 = vpop.xlane.xlu0 %2632  ;;  %4666 = vmatpush.msrb.mxu0 %v4379_v35 }
 0x471   : > { %12332 = vst [vmem:[#allocation22_spill] sm:$0xff] %v9524_v62  ;;  %v9526_v32 = vpop.xlane.xlu1 %2634  ;;  %2774 = vadd.xlane.f32.xlu2 %v9532_v43  ;;  %2422 = vadd.xlane.f32.xlu1 %v9534_v22 }
 0x472   : > { %12333 = vst [vmem:[#allocation175_spill] sm:$0xff] %v9526_v32  ;;  %v9547_v32 = vpop.eup %5719 }
 0x473   : > { %12334 = vst [vmem:[#allocation9_spill] sm:$0xff] %v9528_v0  ;;  %v9549_v18 = vpop.eup %5721 }
 0x474   : > { %3476 = vadd.xlane.f32.xlu0 %v9530_v54  ;;  %12339 = vst [vmem:[#allocation225_spill] sm:$0xff] %v9547_v32 }
 0x478   : > { %v9541_v7 = vpop.xlane.xlu2 %2986  ;;  %v9545_v62 = vpop.xlane.xlu0 %3688 }
 0x479   : > { %12336 = vst [vmem:[#allocation27_spill] sm:$0xff] %v9541_v7  ;;  %v9543_v44 = vpop.xlane.xlu1 %2284  ;;  %3830 = vadd.xlane.f32.xlu2 %v9547_v32  ;;  %v2325_v7 = vsub.f32 %v12341_v6, %v8920_v14  ;;  %3478 = vadd.xlane.f32.xlu1 %v9549_v18  ;;  %v3064_v32 = vmul.f32 1.442695, %v3029_v57  ;;  %v4378_v57 = vld [vmem:[#allocation2 + $0x140] sm:$0xff] }
 0x47a   : > { %12337 = vst [vmem:[#allocation135_spill] sm:$0xff] %v9543_v44  ;;  %v12342_v44 = vld [vmem:[#allocation80_spill] sm:$0xff]  ;;  %4667 = vmatpush.msrb.mxu0 %v4378_v57  ;;  %v4351_v57 = vld [vmem:[#allocation2 + $0x68] sm:$0xff] }
 0x47b   : > { %12338 = vst [vmem:[#allocation139_spill] sm:$0xff] %v9545_v62  ;;  %v4401_v62 = vld [vmem:[#allocation2 + $0x1f8] sm:$0xff]  ;;  %v2360_v6 = vmul.f32 1.442695, %v2325_v7  ;;  %5725 = vpow2.f32 %v3064_v32  ;;  %v12350_v7 = vld [vmem:[#allocation49_spill] sm:$0xff] }
 0x47c   : > { %2644 = vmax.xlane.f32.xlu0 %v12342_v44  ;;  %4773 = vmatpush.msrb.mxu1 %v4401_v62  ;;  %v12347_v44 = vld [vmem:[#allocation23_spill] sm:$0xff]  ;;  %v9570_v62 = vpop.eup %5723  ;;  %v4085_v39 = vsub.f32 %v12350_v7, %v9065_v24 }
 0x47d   : > { %v9568_v5 = vadd.f32 %v12348_v1, %v12347_v44  ;;  %5727 = vpow2.f32 %v2360_v6  ;;  %v12351_v44 = vld [vmem:[#allocation85_spill] sm:$0xff]  ;;  %v4353_v32 = vld [vmem:[#allocation2 + $0x78] sm:$0xff]  ;;  %v4352_v6 = vld [vmem:[#allocation2 + $0x70] sm:$0xff] }
 0x47e   : > { %4774 = vmatpush.msrb.mxu1 %v4400_v61  ;;  %v3733_v61 = vsub.f32 %v12353_v21, %v12352_v13  ;;  %5729 = vpow2.f32 %v4118_v31  ;;  %4434 = vmatpush.msra.mxu2 %v4353_v32  ;;  %v4375_v13 = vld [vmem:[#allocation2 + $0x128] sm:$0xff] }
 0x47f   : > { %12349 = vst [vmem:[#allocation23_spill] sm:$0xff] %v9568_v5  ;;  %v4395_v32 = vld [vmem:[#allocation2 + $0x1c8] sm:$0xff] }
 0x480   : > { %v9560_v0 = vpop.xlane.xlu2 %3690  ;;  %v9564_v14 = vpop.xlane.xlu0 %2282  ;;  %4775 = vmatpush.msrb.mxu1 %v4399_v45  ;;  %v4377_v45 = vld [vmem:[#allocation2 + $0x138] sm:$0xff]  ;;  %4435 = vmatpush.msra.mxu2 %v4352_v6 }
 0x481   : > { %12344 = vst [vmem:[#allocation26_spill] sm:$0xff] %v9560_v0  ;;  %v9562_v52 = vpop.xlane.xlu1 %3340  ;;  %2998 = vmax.xlane.f32.xlu2 %v9568_v5  ;;  %2646 = vmax.xlane.f32.xlu1 %v12351_v44  ;;  %v4397_v0 = vld [vmem:[#allocation2 + $0x1d8] sm:$0xff]  ;;  %v4376_v5 = vld [vmem:[#allocation2 + $0x130] sm:$0xff]  ;;  %v4120_v44 = vmul.f32 1.442695, %v4085_v39  ;;  %v9585_v31 = vpop.eup %5725 }
 0x482   : > { %12345 = vst [vmem:[#allocation24_spill] sm:$0xff] %v9562_v52  ;;  %v4398_v52 = vld [vmem:[#allocation2 + $0x1e0] sm:$0xff]  ;;  %4668 = vmatpush.msrb.mxu0 %v4377_v45  ;;  %4436 = vmatpush.msra.mxu2 %v4351_v57  ;;  %v4373_v39 = vld [vmem:[#allocation2 + $0x118] sm:$0xff] }
 0x483   : > { %12346 = vst [vmem:[#allocation148_spill] sm:$0xff] %v9564_v14  ;;  %4776 = vmatpush.msrb.mxu1 %v4398_v52  ;;  %v4396_v14 = vld [vmem:[#allocation2 + $0x1d0] sm:$0xff]  ;;  %v3768_v52 = vmul.f32 1.442695, %v3733_v61  ;;  %v9587_v21 = vpop.eup %5727  ;;  %v4350_v45 = vld [vmem:[#allocation2 + $0x60] sm:$0xff]  ;;  %5731 = vpow2.f32 %v4120_v44  ;;  %v4393_v6 = vld [vmem:[#allocation2 + $0x1b8] sm:$0xff] }
 0x484   : > { %3126 = vadd.xlane.f32.xlu0 %v9570_v62  ;;  %4669 = vmatpush.msrb.mxu0 %v4376_v5  ;;  %v4394_v5 = vld [vmem:[#allocation2 + $0x1c0] sm:$0xff]  ;;  %v4348_v44 = vld [vmem:[#allocation2 + $0x50] sm:$0xff] }
 0x485   : > { %4777 = vmatpush.msrb.mxu1 %v4397_v0  ;;  %v4374_v0 = vld [vmem:[#allocation2 + $0x120] sm:$0xff]  ;;  %5733 = vpow2.f32 %v3768_v52  ;;  %4437 = vmatpush.msra.mxu2 %v4350_v45  ;;  %v4371_v45 = vld [vmem:[#allocation2 + $0x108] sm:$0xff] }
 0x486   : > { %4670 = vmatpush.msrb.mxu0 %v4375_v13 }
 0x487   : > { %4778 = vmatpush.msrb.mxu1 %v4396_v14  ;;  %v4349_v14 = vld [vmem:[#allocation2 + $0x58] sm:$0xff] }
 0x488   : > { %v9579_v35 = vpop.xlane.xlu2 %2636  ;;  %v9583_v7 = vpop.xlane.xlu0 %3338  ;;  %4671 = vmatpush.msrb.mxu0 %v4374_v0  ;;  %4438 = vmatpush.msra.mxu2 %v4349_v14  ;;  %v4391_v0 = vld [vmem:[#allocation2 + $0x1a8] sm:$0xff] }
 0x489   : > { %12354 = vst [vmem:[#allocation49_spill] sm:$0xff] %v9579_v35  ;;  %v9581_v24 = vpop.xlane.xlu1 %3692  ;;  %v9589_v35 = vpop.eup %5729  ;;  %2424 = vadd.xlane.f32.xlu2 %v9587_v21  ;;  %3128 = vadd.xlane.f32.xlu1 %v9585_v31 }
 0x48a   : > { %12355 = vst [vmem:[#allocation39_spill] sm:$0xff] %v9581_v24  ;;  %4779 = vmatpush.msrb.mxu1 %v4395_v32  ;;  %v4372_v24 = vld [vmem:[#allocation2 + $0x110] sm:$0xff]  ;;  %4672 = vmatpush.msrb.mxu0 %v4373_v39  ;;  %v9600_v52 = vpop.eup %5731  ;;  %v4347_v32 = vld [vmem:[#allocation2 + $0x48] sm:$0xff] }
 0x48b   : > { %12356 = vst [vmem:[#allocation30_spill] sm:$0xff] %v9583_v7  ;;  %4439 = vmatpush.msra.mxu2 %v4348_v44  ;;  %v12364_v39 = vld [vmem:[#allocation13_spill] sm:$0xff]  ;;  %v4370_v44 = vld [vmem:[#allocation2 + $0x100] sm:$0xff] }
 0x48c   : > { %12357 = vst [vmem:[#allocation226_spill] sm:$0xff] %v9589_v35  ;;  %4182 = vadd.xlane.f32.xlu0 %v9589_v35  ;;  %4780 = vmatpush.msrb.mxu1 %v4394_v5  ;;  %v4392_v35 = vld [vmem:[#allocation2 + $0x1b0] sm:$0xff]  ;;  %v12363_v5 = vld [vmem:[#allocation29_spill] sm:$0xff] }
 0x48d   : > { %12361 = vst [vmem:[#allocation230_spill] sm:$0xff] %v9600_v52  ;;  %4673 = vmatpush.msrb.mxu0 %v4372_v24  ;;  %v3030_v14 = vsub.f32 %v12363_v5, %v9111_v63  ;;  %v12365_v7 = vld [vmem:[#allocation25_spill] sm:$0xff]  ;;  %4440 = vmatpush.msra.mxu2 %v4347_v32  ;;  %v4389_v5 = vld [vmem:[#allocation2 + $0x198] sm:$0xff] }
 0x48e   : > { %4781 = vmatpush.msrb.mxu1 %v4393_v6  ;;  %v4346_v6 = vld [vmem:[#allocation2 + $0x40] sm:$0xff]  ;;  %v2677_v24 = vsub.f32 %v12365_v7, %v8970_v26  ;;  %v4344_v26 = vld [vmem:[#allocation2 + $0x30] sm:$0xff]  ;;  %v4367_v32 = vld [vmem:[#allocation2 + $0xe8] sm:$0xff] }
 0x48f   : > { %4674 = vmatpush.msrb.mxu0 %v4371_v45  ;;  %4441 = vmatpush.msra.mxu2 %v4346_v6  ;;  %v12368_v45 = vld [vmem:[#allocation166_spill] sm:$0xff] }
 0x490   : > { %v9594_v61 = vpop.xlane.xlu2 %4044  ;;  %v9598_v13 = vpop.xlane.xlu0 %4042  ;;  %4782 = vmatpush.msrb.mxu1 %v4392_v35  ;;  %v4345_v35 = vld [vmem:[#allocation2 + $0x38] sm:$0xff]  ;;  %v2712_v7 = vmul.f32 1.442695, %v2677_v24  ;;  %v12370_v6 = vld [vmem:[#allocation10_spill] sm:$0xff] }
 0x491   : > { %12358 = vst [vmem:[#allocation227_spill] sm:$0xff] %v9594_v61  ;;  %v9596_v57 = vpop.xlane.xlu1 %2990  ;;  %v9602_v61 = vpop.eup %5733  ;;  %4184 = vadd.xlane.f32.xlu2 %v9600_v52  ;;  %4675 = vmatpush.msrb.mxu0 %v4370_v44  ;;  %v2678_v44 = vsub.f32 %v12370_v6, %v8963_v29  ;;  %v12373_v24 = vld [vmem:[#allocation87_spill] sm:$0xff] }
 0x492   : > { %12359 = vst [vmem:[#allocation228_spill] sm:$0xff] %v9596_v57  ;;  %3832 = vadd.xlane.f32.xlu1 %v9602_v61  ;;  %v4369_v57 = vld [vmem:[#allocation2 + $0xf8] sm:$0xff]  ;;  %4783 = vmatpush.msrb.mxu1 %v4391_v0  ;;  %v9619_v0 = vadd.f32 %v12348_v1, %v12368_v45 }
 0x493   : > { %12360 = vst [vmem:[#allocation229_spill] sm:$0xff] %v9598_v13  ;;  %v4390_v13 = vld [vmem:[#allocation2 + $0x1a0] sm:$0xff]  ;;  %4547 = vmatpush.msra.mxu3 %v4369_v57  ;;  %4442 = vmatpush.msra.mxu2 %v4345_v35  ;;  %v4388_v57 = vld [vmem:[#allocation2 + $0x190] sm:$0xff]  ;;  %v4387_v35 = vld [vmem:[#allocation2 + $0x188] sm:$0xff] }
 0x494   : > { %12362 = vst [vmem:[#allocation231_spill] sm:$0xff] %v9602_v61  ;;  %2294 = vmax.xlane.f32.xlu0 %v12364_v39  ;;  %v4368_v61 = vld [vmem:[#allocation2 + $0xf0] sm:$0xff]  ;;  %v3066_v39 = vmul.f32 1.442695, %v3030_v14  ;;  %4784 = vmatpush.msrb.mxu1 %v4390_v13  ;;  %v4366_v13 = vld [vmem:[#allocation2 + $0xe0] sm:$0xff]  ;;  %v4365_v29 = vld [vmem:[#allocation2 + $0xd8] sm:$0xff] }
 0x495   : > { %4548 = vmatpush.msra.mxu3 %v4368_v61  ;;  %12369 = vst [vmem:[#allocation166_spill] sm:$0xff] %v9619_v0  ;;  %4443 = vmatpush.msra.mxu2 %v4344_v26  ;;  %v12372_v61 = vld [vmem:[#allocation101_spill] sm:$0xff]  ;;  %v4386_v26 = vld [vmem:[#allocation2 + $0x180] sm:$0xff]  ;;  %v4341_v1 = vld [vmem:[#allocation2 + $0x18] sm:$0xff] }
 0x496   : > { %4785 = vmatpush.msrb.mxu1 %v4389_v5  ;;  %v3382_v14 = vsub.f32 %v12372_v61, %v9016_v41  ;;  %5735 = vpow2.f32 %v3066_v39  ;;  %v4342_v5 = vld [vmem:[#allocation2 + $0x20] sm:$0xff]  ;;  %v2714_v41 = vmul.f32 1.442695, %v2678_v44  ;;  %v4339_v44 = vld [vmem:[#allocation2 + $0x8] sm:$0xff] }
 0x497   : > { %4549 = vmatpush.msra.mxu3 %v4367_v32  ;;  %5737 = vpow2.f32 %v2712_v7  ;;  %v12374_v32 = vld [vmem:[#allocation152_spill] sm:$0xff] }
 0x498   : > { %v9611_v25 = vpop.xlane.xlu2 %2286  ;;  %v9615_v63 = vpop.xlane.xlu0 %2988  ;;  %v3381_v45 = vsub.f32 %v12374_v32, %v9018_v20  ;;  %4786 = vmatpush.msrb.mxu1 %v4388_v57  ;;  %v3418_v7 = vmul.f32 1.442695, %v3382_v14  ;;  %v12377_v57 = vld [vmem:[#allocation173_spill] sm:$0xff]  ;;  %5739 = vpow2.f32 %v2714_v41  ;;  %v4362_v14 = vld [vmem:[#allocation2 + $0xc0] sm:$0xff] }
 0x499   : > { %12366 = vst [vmem:[#allocation29_spill] sm:$0xff] %v9611_v25  ;;  %v9613_v52 = vpop.xlane.xlu1 %4046  ;;  %v12371_v25 = vld [vmem:[#allocation88_spill] sm:$0xff]  ;;  %4550 = vmatpush.msra.mxu3 %v4366_v13  ;;  %v12378_v13 = vld [vmem:[#allocation179_spill] sm:$0xff] }
 0x49a   : > { %12367 = vst [vmem:[#allocation25_spill] sm:$0xff] %v9613_v52  ;;  %v4343_v52 = vld [vmem:[#allocation2 + $0x28] sm:$0xff]  ;;  %2648 = vmax.xlane.f32.xlu2 %v12371_v25  ;;  %2296 = vmax.xlane.f32.xlu1 %v12373_v24  ;;  %v4340_v24 = vld [vmem:[#allocation2 + $0x10] sm:$0xff]  ;;  %v3416_v20 = vmul.f32 1.442695, %v3381_v45  ;;  %v9640_v32 = vadd.f32 %v12378_v13, %v12377_v57  ;;  %5741 = vpow2.f32 %v3418_v7  ;;  %v4361_v45 = vld [vmem:[#allocation2 + $0xb8] sm:$0xff] }
 0x49b   : > { %4444 = vmatpush.msra.mxu2 %v4343_v52  ;;  %4787 = vmatpush.msrb.mxu1 %v4387_v35  ;;  %v12380_v35 = vld [vmem:[#allocation155_spill] sm:$0xff]  ;;  %v4359_v57 = vld [vmem:[#allocation2 + $0xa8] sm:$0xff] }
 0x49c   : > { %3350 = vmax.xlane.f32.xlu0 %v9619_v0  ;;  %v4364_v0 = vld [vmem:[#allocation2 + $0xd0] sm:$0xff]  ;;  %4551 = vmatpush.msra.mxu3 %v4365_v29  ;;  %v9636_v52 = vpop.eup %5735  ;;  %12379 = vst [vmem:[#allocation152_spill] sm:$0xff] %v9640_v32  ;;  %5743 = vpow2.f32 %v3416_v20 }
 0x49d   : > { %4445 = vmatpush.msra.mxu2 %v4342_v5  ;;  %4788 = vmatpush.msrb.mxu1 %v4386_v26  ;;  %v9642_v25 = vpop.eup %5737  ;;  %v4086_v5 = vsub.f32 %v12380_v35, %v9157_v49 }
 0x49e   : > { %4552 = vmatpush.msra.mxu3 %v4364_v0  ;;  %v9653_v41 = vpop.eup %5739 }
 0x49f   : > { %4446 = vmatpush.msra.mxu2 %v4341_v1  ;;  %v4338_v1 = vld [vmem:[#allocation2] sm:$0xff]  ;;  %v4122_v7 = vmul.f32 1.442695, %v4086_v5  ;;  %v4357_v5 = vld [vmem:[#allocation2 + $0x98] sm:$0xff] }
 0x4a0   : > { %v9630_v6 = vpop.xlane.xlu2 %3342  ;;  %v9634_v61 = vpop.xlane.xlu0 %2638 }
 0x4a1   : > { %12375 = vst [vmem:[#allocation10_spill] sm:$0xff] %v9630_v6  ;;  %v9632_v39 = vpop.xlane.xlu1 %2640  ;;  %v4363_v6 = vld [vmem:[#allocation2 + $0xc8] sm:$0xff]  ;;  %4447 = vmatpush.msra.mxu2 %v4340_v24  ;;  %v4360_v24 = vld [vmem:[#allocation2 + $0xb0] sm:$0xff]  ;;  %v9655_v20 = vpop.eup %5741 }
 0x4a2   : > { %12376 = vst [vmem:[#allocation101_spill] sm:$0xff] %v9632_v39  ;;  %3130 = vadd.xlane.f32.xlu2 %v9636_v52  ;;  %3352 = vmax.xlane.f32.xlu1 %v9640_v32  ;;  %v9657_v49 = vpop.eup %5743  ;;  %v12385_v39 = vld [vmem:[#allocation86_spill] sm:$0xff] }
 0x4a3   : > { %4448 = vmatpush.msra.mxu2 %v4339_v44  ;;  %4553 = vmatpush.msra.mxu3 %v4363_v6  ;;  %v4358_v6 = vld [vmem:[#allocation2 + $0xa0] sm:$0xff] }
 0x4a4   : > { %2776 = vadd.xlane.f32.xlu0 %v9642_v25  ;;  %v12383_v44 = vld [vmem:[#allocation8_spill] sm:$0xff] }
 0x4a5   : > { %4449 = vmatpush.msra.mxu2 %v4338_v1  ;;  %4554 = vmatpush.msra.mxu3 %v4362_v14  ;;  %v2326_v1 = vsub.f32 %v12383_v44, %v8913_v56  ;;  %v4356_v56 = vld [vmem:[#allocation2 + $0x90] sm:$0xff] }
 0x4a7   : > { %4555 = vmatpush.msra.mxu3 %v4361_v45 }
 0x4a8   : > { %v9649_v0 = vpop.xlane.xlu2 %2992  ;;  %v9651_v26 = vpop.xlane.xlu0 %3694 }
 0x4a9   : > { %12381 = vst [vmem:[#allocation173_spill] sm:$0xff] %v9649_v0  ;;  %v3123_v29 = vpop.xlane.xlu1 %3122  ;;  %4556 = vmatpush.msra.mxu3 %v4360_v24  ;;  %v2362_v24 = vmul.f32 1.442695, %v2326_v1  ;;  %v9671_v0 = vadd.f32 %v12378_v13, %v12385_v39  ;;  %v4355_v1 = vld [vmem:[#allocation2 + $0x88] sm:$0xff]  ;;  %v12389_v39 = vld [vmem:[#allocation11_spill] sm:$0xff]  ;;  %v12393_v13 = vld [vmem:[#allocation184_spill] sm:$0xff] }
 0x4aa   : > { %12382 = vst [vmem:[#allocation155_spill] sm:$0xff] %v9651_v26  ;;  %5745 = vrcp.f32 %v3123_v29  ;;  %3482 = vadd.xlane.f32.xlu2 %v9655_v20  ;;  %2778 = vadd.xlane.f32.xlu1 %v9653_v41 }
 0x4ab   : > { %5747 = vpow2.f32 %v4122_v7  ;;  %4557 = vmatpush.msra.mxu3 %v4359_v57  ;;  %v12387_v57 = vld [vmem:[#allocation28_spill] sm:$0xff] }
 0x4ac   : > { %3480 = vadd.xlane.f32.xlu0 %v9657_v49  ;;  %v3734_v44 = vsub.f32 %v12387_v57, %v9012_v37 }
 0x4ad   : > { %4558 = vmatpush.msra.mxu3 %v4358_v6 }
 0x4ae   : > { %v3770_v37 = vmul.f32 1.442695, %v3734_v44 }
 0x4af   : > { %4559 = vmatpush.msra.mxu3 %v4357_v5 }
 0x4b0   : > { %v5746_v14 = vpop.eup %5745  ;;  %v9664_v35 = vpop.xlane.xlu2 %3696 }
 0x4b1   : > { %12384 = vst [vmem:[#allocation8_spill] sm:$0xff] %v9664_v35  ;;  %v3218_v45 = vmul.f32 %v5746_v14, %v9361_v42  ;;  %v3475_v29 = vpop.xlane.xlu1 %3474  ;;  %v9667_v32 = vpop.xlane.xlu0 %2288  ;;  %v12388_v42 = vld [vmem:[#allocation33_spill] sm:$0xff]  ;;  %v2327_v14 = vsub.f32 %v12389_v39, %v9059_v23  ;;  %4560 = vmatpush.msra.mxu3 %v4356_v56  ;;  %v12397_v39 = vld [vmem:[#allocation142_spill] sm:$0xff] }
 0x4b2   : > { %5749 = vrcp.f32 %v3475_v29  ;;  %v9673_v7 = vpop.eup %5747  ;;  %2298 = vmax.xlane.f32.xlu2 %v8888_v15  ;;  %v2679_v6 = vsub.f32 %v12388_v42, %v9203_v4  ;;  %v4354_v29 = vld [vmem:[#allocation2 + $0x80] sm:$0xff]  ;;  %v12395_v23 = vld [vmem:[#allocation81_spill] sm:$0xff] }
 0x4b3   : > { %v3250_v26 = vmax.f32 %v3218_v45, 0.001  ;;  %12386 = vst [vmem:[#allocation86_spill] sm:$0xff] %v9673_v7  ;;  %4186 = vadd.xlane.f32.xlu1 %v9673_v7  ;;  %5751 = vpow2.f32 %v2362_v24  ;;  %4561 = vmatpush.msra.mxu3 %v4355_v1  ;;  %v2364_v7 = vmul.f32 1.442695, %v2327_v14  ;;  %v12392_v24 = vld [vmem:[#allocation177_spill] sm:$0xff]  ;;  %v9695_v56 = vadd.f32 %v12393_v13, %v12395_v23 }
 0x4b4   : > { %3000 = vmax.xlane.f32.xlu0 %v9671_v0  ;;  %v2716_v42 = vmul.f32 1.442695, %v2679_v6  ;;  %v9691_v15 = vadd.f32 %v12393_v13, %v12392_v24  ;;  %v3383_v14 = vsub.f32 %v12397_v39, %v9102_v55  ;;  %v12400_v55 = vld [vmem:[#allocation32_spill] sm:$0xff] }
 0x4b5   : > { %4676 = vmatmul.f32.vlgmr.msrb.gmra.mxu0 %v3250_v26  ;;  %4562 = vmatpush.msra.mxu3 %v4354_v29  ;;  %v12410_v13 = vld [vmem:[#allocation188_spill] sm:$0xff] }
 0x4b6   : > { %12394 = vst [vmem:[#allocation11_spill] sm:$0xff] %v9691_v15 }
 0x4b8   : > { %v5750_v5 = vpop.eup %5749  ;;  %v2419_v45 = vpop.xlane.xlu2 %2418 }
 0x4b9   : > { %v3570_v26 = vmul.f32 %v5750_v5, %v9399_v34  ;;  %5753 = vrcp.f32 %v2419_v45  ;;  %v9685_v57 = vpop.xlane.xlu1 %4178  ;;  %v9687_v4 = vpop.xlane.xlu0 %3344  ;;  %v12396_v34 = vld [vmem:[#allocation143_spill] sm:$0xff] }
 0x4ba   : > { %12390 = vst [vmem:[#allocation28_spill] sm:$0xff] %v9685_v57  ;;  %v9697_v44 = vpop.eup %5751  ;;  %5755 = vpow2.f32 %v3770_v37  ;;  %3354 = vmax.xlane.f32.xlu2 %v9691_v15  ;;  %v3735_v6 = vsub.f32 %v12396_v34, %v9109_v59 }
 0x4bb   : > { %12391 = vst [vmem:[#allocation33_spill] sm:$0xff] %v9687_v4  ;;  %v3602_v35 = vmax.f32 %v3570_v26, 0.001  ;;  %5757 = vpow2.f32 %v2716_v42  ;;  %3002 = vmax.xlane.f32.xlu1 %v9695_v56  ;;  %v3420_v42 = vmul.f32 1.442695, %v3383_v14 }
 0x4bc   : > { %2426 = vadd.xlane.f32.xlu0 %v9697_v44  ;;  %5759 = vpow2.f32 %v2364_v7  ;;  %v3772_v37 = vmul.f32 1.442695, %v3735_v6 }
 0x4bd   : > { %4789 = vmatmul.f32.vlgmr.msrb.gmra.mxu1 %v3602_v35 }
 0x4be   : > { %5761 = vpow2.f32 %v3772_v37 }
 0x4bf   : > { %v5754_v1 = vpop.eup %5753  ;;  %5763 = vpow2.f32 %v3420_v42  ;;  %v12405_v42 = vld [vmem:[#allocation91_spill] sm:$0xff] }
 0x4c0   : > { %v2514_v5 = vmul.f32 %v5754_v1, %v9410_v19  ;;  %v9707_v45 = vpop.xlane.xlu2 %2642  ;;  %v9713_v26 = vpop.eup %5755  ;;  %v3031_v19 = vsub.f32 %v12400_v55, %v9063_v11 }
 0x4c1   : > { %v9709_v35 = vpop.xlane.xlu1 %2290  ;;  %v9711_v29 = vpop.xlane.xlu0 %4048  ;;  %12399 = vst [vmem:[#allocation81_spill] sm:$0xff] %v9713_v26 }
 0x4c2   : > { %12398 = vst [vmem:[#allocation177_spill] sm:$0xff] %v9711_v29  ;;  %v2546_v59 = vmax.f32 %v2514_v5, 0.001  ;;  %v9715_v24 = vpop.eup %5757  ;;  %v3068_v1 = vmul.f32 1.442695, %v3031_v19  ;;  %v12403_v5 = vld [vmem:[#allocation154_spill] sm:$0xff] }
 0x4c3   : > { %v9717_v7 = vpop.eup %5759  ;;  %2780 = vadd.xlane.f32.xlu2 %v9715_v24  ;;  %v4087_v37 = vsub.f32 %v12403_v5, %v9148_v30  ;;  %v12406_v19 = vld [vmem:[#allocation38_spill] sm:$0xff] }
 0x4c4   : > { %4450 = vmatmul.f32.vlgmr.msra.gmra.mxu2 %v2546_v59  ;;  %3834 = vadd.xlane.f32.xlu0 %v9713_v26  ;;  %v9726_v39 = vpop.eup %5761  ;;  %v12404_v59 = vld [vmem:[#allocation36_spill] sm:$0xff] }
 0x4c5   : > { %2428 = vadd.xlane.f32.xlu1 %v9717_v7  ;;  %12402 = vst [vmem:[#allocation142_spill] sm:$0xff] %v9726_v39  ;;  %v9728_v14 = vpop.eup %5763  ;;  %v2328_v11 = vsub.f32 %v12404_v59, %v9253_v33  ;;  %v4124_v30 = vmul.f32 1.442695, %v4087_v37 }
 0x4c7   : > { %v2366_v33 = vmul.f32 1.442695, %v2328_v11 }
 0x4c8   : > { %v3125_v23 = vpop.xlane.xlu2 %3124 }
 0x4c9   : > { %v9724_v34 = vpop.xlane.xlu1 %3346  ;;  %5765 = vrcp.f32 %v3125_v23  ;;  %v2771_v6 = vpop.xlane.xlu0 %2770  ;;  %v3032_v23 = vsub.f32 %v12406_v19, %v9194_v53 }
 0x4ca   : > { %12401 = vst [vmem:[#allocation143_spill] sm:$0xff] %v9724_v34  ;;  %5767 = vrcp.f32 %v2771_v6 }
 0x4cb   : > { %3836 = vadd.xlane.f32.xlu2 %v9726_v39  ;;  %5769 = vpow2.f32 %v3068_v1  ;;  %v3070_v34 = vmul.f32 1.442695, %v3032_v23  ;;  %v12409_v1 = vld [vmem:[#allocation35_spill] sm:$0xff] }
 0x4cc   : > { %2650 = vmax.xlane.f32.xlu0 %v12405_v42  ;;  %v9747_v29 = vadd.f32 %v12410_v13, %v12409_v1 }
 0x4cd   : > { %3484 = vadd.xlane.f32.xlu1 %v9728_v14 }
 0x4cf   : > { %v5766_v55 = vpop.eup %5765 }
 0x4d0   : > { %v5768_v6 = vpop.eup %5767  ;;  %v9739_v26 = vpop.xlane.xlu2 %4180  ;;  %v3219_v15 = vmul.f32 %v5766_v55, %v9450_v3 }
 0x4d1   : > { %12407 = vst [vmem:[#allocation32_spill] sm:$0xff] %v9739_v26  ;;  %v2866_v5 = vmul.f32 %v5768_v6, %v9456_v10  ;;  %v2773_v39 = vpop.xlane.xlu1 %2772  ;;  %v9743_v57 = vpop.xlane.xlu0 %3826  ;;  %v12411_v10 = vld [vmem:[#allocation158_spill] sm:$0xff] }
 0x4d2   : > { %12408 = vst [vmem:[#allocation154_spill] sm:$0xff] %v9743_v57  ;;  %5771 = vrcp.f32 %v2773_v39  ;;  %v3251_v59 = vmax.f32 %v3219_v15, 0.001  ;;  %v9749_v53 = vpop.eup %5769  ;;  %v4088_v3 = vsub.f32 %v12411_v10, %v9244_v46  ;;  %v12412_v15 = vld [vmem:[#allocation94_spill] sm:$0xff] }
 0x4d3   : > { %v2898_v4 = vmax.f32 %v2866_v5, 0.001  ;;  %5773 = vpow2.f32 %v4124_v30  ;;  %3004 = vmax.xlane.f32.xlu2 %v9747_v29  ;;  %v12413_v39 = vld [vmem:[#allocation46_spill] sm:$0xff] }
 0x4d4   : > { %4679 = vmatmul.f32.gmra.mxu0 %v3251_v59  ;;  %5775 = vpow2.f32 %v2366_v33  ;;  %3132 = vadd.xlane.f32.xlu0 %v9749_v53  ;;  %v3736_v37 = vsub.f32 %v12413_v39, %v9201_v8  ;;  %v4126_v6 = vmul.f32 1.442695, %v4088_v3  ;;  %v12419_v3 = vld [vmem:[#allocation42_spill] sm:$0xff] }
 0x4d5   : > { %4563 = vmatmul.f32.vlgmr.msra.gmra.mxu3 %v2898_v4  ;;  %2652 = vmax.xlane.f32.xlu1 %v12412_v15  ;;  %5777 = vpow2.f32 %v3070_v34  ;;  %v3033_v39 = vsub.f32 %v12419_v3, %v9342_v60  ;;  %v12423_v60 = vld [vmem:[#allocation180_spill] sm:$0xff] }
 0x4d6   : > { %v3774_v30 = vmul.f32 1.442695, %v3736_v37  ;;  %5779 = vpow2.f32 %v4126_v6  ;;  %v12420_v37 = vld [vmem:[#allocation93_spill] sm:$0xff]  ;;  %v9792_v3 = vadd.f32 %v12410_v13, %v12423_v60 }
 0x4d8   : > { %v5772_v11 = vpop.eup %5771  ;;  %v9758_v55 = vpop.xlane.xlu2 %2292  ;;  %5781 = vpow2.f32 %v3774_v30  ;;  %12424 = vst [vmem:[#allocation46_spill] sm:$0xff] %v9792_v3 }
 0x4d9   : > { %v9760_v19 = vpop.xlane.xlu1 %3828  ;;  %v9762_v4 = vpop.xlane.xlu0 %2994  ;;  %v2867_v23 = vmul.f32 %v5772_v11, %v9469_v58  ;;  %v12421_v11 = vld [vmem:[#allocation209_spill] sm:$0xff] }
 0x4da   : > { %12414 = vst [vmem:[#allocation36_spill] sm:$0xff] %v9760_v19  ;;  %v9765_v46 = vpop.eup %5773  ;;  %v3072_v19 = vmul.f32 1.442695, %v3033_v39 }
 0x4db   : > { %12415 = vst [vmem:[#allocation91_spill] sm:$0xff] %v9765_v46  ;;  %v2899_v5 = vmax.f32 %v2867_v23, 0.001  ;;  %v9767_v33 = vpop.eup %5775  ;;  %v12422_v23 = vld [vmem:[#allocation37_spill] sm:$0xff] }
 0x4dc   : > { %v9769_v34 = vpop.eup %5777  ;;  %2430 = vadd.xlane.f32.xlu2 %v9767_v33  ;;  %4188 = vadd.xlane.f32.xlu0 %v9765_v46  ;;  %v2680_v6 = vsub.f32 %v12422_v23, %v12421_v11  ;;  %v12426_v11 = vld [vmem:[#allocation149_spill] sm:$0xff] }
 0x4dd   : > { %4566 = vmatmul.f32.gmra.mxu3 %v2899_v5  ;;  %3134 = vadd.xlane.f32.xlu1 %v9769_v34  ;;  %v9778_v1 = vpop.eup %5779  ;;  %v3385_v23 = vsub.f32 %v12426_v11, %v9299_v2 }
 0x4de   : > { %12417 = vst [vmem:[#allocation35_spill] sm:$0xff] %v9778_v1  ;;  %v9780_v10 = vpop.eup %5781 }
 0x4df   : > { %12418 = vst [vmem:[#allocation158_spill] sm:$0xff] %v9780_v10 }
 0x4e0   : > { %v9774_v8 = vpop.xlane.xlu2 %3348 }
 0x4e1   : > { %12416 = vst [vmem:[#allocation38_spill] sm:$0xff] %v9774_v8  ;;  %v9776_v58 = vpop.xlane.xlu1 %2996  ;;  %v2421_v59 = vpop.xlane.xlu0 %2420 }
 0x4e2   : > { %5783 = vrcp.f32 %v2421_v59 }
 0x4e4   : > { %4190 = vadd.xlane.f32.xlu2 %v9778_v1  ;;  %2300 = vmax.xlane.f32.xlu0 %v12420_v37  ;;  %v2718_v1 = vmul.f32 1.442695, %v2680_v6  ;;  %v12429_v6 = vld [vmem:[#allocation41_spill] sm:$0xff] }
 0x4e5   : > { %3838 = vadd.xlane.f32.xlu1 %v9780_v10  ;;  %v12425_v10 = vld [vmem:[#allocation97_spill] sm:$0xff] }
 0x4e8   : > { %v5784_v30 = vpop.eup %5783  ;;  %v2775_v5 = vpop.xlane.xlu2 %2774 }
 0x4e9   : > { %v2423_v46 = vpop.xlane.xlu1 %2422  ;;  %5785 = vrcp.f32 %v2775_v5  ;;  %v3477_v59 = vpop.xlane.xlu0 %3476  ;;  %v2515_v26 = vmul.f32 %v5784_v30, %v9515_v40  ;;  %v12427_v5 = vld [vmem:[#allocation96_spill] sm:$0xff]  ;;  %v2681_v30 = vsub.f32 %v12429_v6, %v9292_v38 }
 0x4ea   : > { %5787 = vrcp.f32 %v2423_v46  ;;  %v12428_v46 = vld [vmem:[#allocation145_spill] sm:$0xff] }
 0x4eb   : > { %5789 = vrcp.f32 %v3477_v59  ;;  %v2547_v57 = vmax.f32 %v2515_v26, 0.001  ;;  %v3384_v26 = vsub.f32 %v12428_v46, %v9301_v47  ;;  %v2720_v38 = vmul.f32 1.442695, %v2681_v30 }
 0x4ec   : > { %2654 = vmax.xlane.f32.xlu2 %v12425_v10  ;;  %5791 = vpow2.f32 %v3072_v19  ;;  %3356 = vmax.xlane.f32.xlu0 %v9792_v3  ;;  %v3424_v3 = vmul.f32 1.442695, %v3385_v23  ;;  %v12503_v10 = vld [vmem:[#allocation208_spill] sm:$0xff] }
 0x4ed   : > { %4453 = vmatmul.f32.gmra.mxu2 %v2547_v57  ;;  %2302 = vmax.xlane.f32.xlu1 %v12427_v5  ;;  %5793 = vpow2.f32 %v2718_v1  ;;  %v3422_v47 = vmul.f32 1.442695, %v3384_v26 }
 0x4ef   : > { %v5786_v40 = vpop.eup %5785 }
 0x4f0   : > { %v5788_v39 = vpop.eup %5787  ;;  %v9803_v57 = vpop.xlane.xlu2 %3830  ;;  %v2868_v59 = vmul.f32 %v5786_v40, %v9532_v43  ;;  %v12431_v43 = vld [vmem:[#allocation185_spill] sm:$0xff] }
 0x4f1   : > { %12430 = vst [vmem:[#allocation42_spill] sm:$0xff] %v9803_v57  ;;  %v5790_v60 = vpop.eup %5789  ;;  %v3479_v2 = vpop.xlane.xlu1 %3478  ;;  %v2516_v11 = vmul.f32 %v5788_v39, %v9534_v22  ;;  %v12432_v40 = vld [vmem:[#allocation193_spill] sm:$0xff]  ;;  %v12434_v22 = vld [vmem:[#allocation144_spill] sm:$0xff] }
 0x4f2   : > { %v9806_v19 = vpop.xlane.xlu0 %2644  ;;  %5795 = vrcp.f32 %v3479_v2  ;;  %v2900_v1 = vmax.f32 %v2868_v59, 0.001  ;;  %v3571_v8 = vmul.f32 %v5790_v60, %v9530_v54  ;;  %v9810_v13 = vpop.eup %5791  ;;  %v9816_v5 = vadd.f32 %v12432_v40, %v12431_v43 }
 0x4f3   : > { %v2548_v46 = vmax.f32 %v2516_v11, 0.001  ;;  %v9812_v57 = vpop.eup %5793  ;;  %5797 = vpow2.f32 %v3424_v3 }
 0x4f4   : > { %4569 = vmatmul.f32.gmra.mxu3 %v2900_v1  ;;  %v3603_v6 = vmax.f32 %v3571_v8, 0.001  ;;  %12433 = vst [vmem:[#allocation93_spill] sm:$0xff] %v9816_v5  ;;  %3136 = vadd.xlane.f32.xlu2 %v9810_v13  ;;  %5799 = vpow2.f32 %v3422_v47  ;;  %v4089_v8 = vsub.f32 %v12434_v22, %v9382_v36  ;;  %v12435_v36 = vld [vmem:[#allocation40_spill] sm:$0xff]  ;;  %v12437_v22 = vld [vmem:[#allocation95_spill] sm:$0xff] }
 0x4f5   : > { %4456 = vmatmul.f32.gmra.mxu2 %v2548_v46  ;;  %2782 = vadd.xlane.f32.xlu0 %v9812_v57  ;;  %5801 = vpow2.f32 %v2720_v38  ;;  %v2329_v1 = vsub.f32 %v12435_v36, %v9251_v27  ;;  %v12439_v27 = vld [vmem:[#allocation99_spill] sm:$0xff] }
 0x4f6   : > { %4792 = vmatmul.f32.gmra.mxu1 %v3603_v6  ;;  %3358 = vmax.xlane.f32.xlu1 %v9816_v5  ;;  %v4128_v60 = vmul.f32 1.442695, %v4089_v8  ;;  %v9844_v8 = vadd.f32 %v12432_v40, %v12437_v22 }
 0x4f7   : > { %v2368_v43 = vmul.f32 1.442695, %v2329_v1 }
 0x4f8   : > { %v5796_v54 = vpop.eup %5795  ;;  %v9823_v23 = vpop.xlane.xlu2 %2998  ;;  %12438 = vst [vmem:[#allocation37_spill] sm:$0xff] %v9844_v8 }
 0x4f9   : > { %v9825_v26 = vpop.xlane.xlu1 %2646  ;;  %v3572_v30 = vmul.f32 %v5796_v54, %v9549_v18  ;;  %v9828_v59 = vpop.eup %5797 }
 0x4fa   : > { %v3127_v39 = vpop.xlane.xlu0 %3126  ;;  %v9830_v2 = vpop.eup %5799 }
 0x4fb   : > { %5803 = vrcp.f32 %v3127_v39  ;;  %v3604_v3 = vmax.f32 %v3572_v30, 0.001  ;;  %v9833_v11 = vpop.eup %5801  ;;  %v12441_v30 = vld [vmem:[#allocation45_spill] sm:$0xff] }
 0x4fc   : > { %3488 = vadd.xlane.f32.xlu2 %v9828_v59  ;;  %5805 = vpow2.f32 %v4128_v60 }
 0x4fd   : > { %3486 = vadd.xlane.f32.xlu0 %v9830_v2 }
 0x4fe   : > { %4795 = vmatmul.f32.gmra.mxu1 %v3604_v3  ;;  %2784 = vadd.xlane.f32.xlu1 %v9833_v11  ;;  %v2682_v3 = vsub.f32 %v12441_v30, %v9408_v51 }
 0x500   : > { %v2425_v47 = vpop.xlane.xlu2 %2424 }
 0x501   : > { %v5804_v18 = vpop.eup %5803  ;;  %v3129_v46 = vpop.xlane.xlu1 %3128  ;;  %5807 = vrcp.f32 %v2425_v47 }
 0x502   : > { %v9839_v38 = vpop.xlane.xlu0 %4182  ;;  %v3220_v6 = vmul.f32 %v5804_v18, %v9570_v62  ;;  %5809 = vrcp.f32 %v3129_v46  ;;  %v9847_v39 = vpop.eup %5805  ;;  %v12442_v62 = vld [vmem:[#allocation150_spill] sm:$0xff]  ;;  %v12443_v18 = vld [vmem:[#allocation44_spill] sm:$0xff] }
 0x503   : > { %12436 = vst [vmem:[#allocation209_spill] sm:$0xff] %v9839_v38  ;;  %5811 = vpow2.f32 %v2368_v43  ;;  %v3737_v36 = vsub.f32 %v12442_v62, %v9333_v12  ;;  %v2330_v47 = vsub.f32 %v12443_v18, %v9376_v9  ;;  %v2722_v43 = vmul.f32 1.442695, %v2682_v3  ;;  %v12446_v62 = vld [vmem:[#allocation189_spill] sm:$0xff] }
 0x504   : > { %v3252_v54 = vmax.f32 %v3220_v6, 0.001  ;;  %2304 = vmax.xlane.f32.xlu2 %v12439_v27  ;;  %12440 = vst [vmem:[#allocation180_spill] sm:$0xff] %v9847_v39 }
 0x505   : > { %3006 = vmax.xlane.f32.xlu0 %v9844_v8  ;;  %v3776_v5 = vmul.f32 1.442695, %v3737_v36  ;;  %v2370_v40 = vmul.f32 1.442695, %v2330_v47  ;;  %5813 = vpow2.f32 %v2722_v43  ;;  %v12452_v36 = vld [vmem:[#allocation20_spill] sm:$0xff]  ;;  %v12505_v8 = vld [vmem:[#allocation51_spill] sm:$0xff] }
 0x506   : > { %4682 = vmatmul.f32.gmra.mxu0 %v3252_v54  ;;  %4192 = vadd.xlane.f32.xlu1 %v9847_v39  ;;  %v12447_v39 = vld [vmem:[#allocation197_spill] sm:$0xff] }
 0x507   : > { %v5808_v60 = vpop.eup %5807  ;;  %v9867_v38 = vadd.f32 %v12447_v39, %v12446_v62  ;;  %5815 = vpow2.f32 %v3776_v5 }
 0x508   : > { %v5810_v1 = vpop.eup %5809  ;;  %v9857_v46 = vpop.xlane.xlu2 %4184  ;;  %v2517_v6 = vmul.f32 %v5808_v60, %v9587_v21  ;;  %v12449_v21 = vld [vmem:[#allocation187_spill] sm:$0xff]  ;;  %5817 = vpow2.f32 %v2370_v40 }
 0x509   : > { %12444 = vst [vmem:[#allocation149_spill] sm:$0xff] %v9857_v46  ;;  %v9860_v54 = vpop.xlane.xlu1 %3832  ;;  %v3221_v22 = vmul.f32 %v5810_v1, %v9585_v31  ;;  %v9869_v9 = vpop.eup %5811  ;;  %v9874_v60 = vadd.f32 %v12447_v39, %v12449_v21  ;;  %v12451_v31 = vld [vmem:[#allocation92_spill] sm:$0xff]  ;;  %v3386_v1 = vsub.f32 %v12452_v36, %v9404_v48 }
 0x50a   : > { %12445 = vst [vmem:[#allocation145_spill] sm:$0xff] %v9860_v54  ;;  %v9862_v51 = vpop.xlane.xlu0 %2294  ;;  %v2549_v30 = vmax.f32 %v2517_v6, 0.001  ;;  %v3738_v3 = vsub.f32 %v12451_v31, %v9429_v17  ;;  %v12455_v48 = vld [vmem:[#allocation12_spill] sm:$0xff] }
 0x50b   : > { %v3253_v12 = vmax.f32 %v3221_v22, 0.001  ;;  %12448 = vst [vmem:[#allocation41_spill] sm:$0xff] %v9867_v38  ;;  %v9888_v43 = vpop.eup %5813  ;;  %v3034_v40 = vsub.f32 %v12455_v48, %v9340_v28  ;;  %v12458_v36 = vld [vmem:[#allocation168_spill] sm:$0xff] }
 0x50c   : > { %4459 = vmatmul.f32.gmra.mxu2 %v2549_v30  ;;  %3360 = vmax.xlane.f32.xlu2 %v9867_v38  ;;  %12450 = vst [vmem:[#allocation185_spill] sm:$0xff] %v9874_v60  ;;  %v3778_v22 = vmul.f32 1.442695, %v3738_v3  ;;  %v3426_v30 = vmul.f32 1.442695, %v3386_v1  ;;  %v4090_v1 = vsub.f32 %v12458_v36, %v9380_v16  ;;  %v12459_v28 = vld [vmem:[#allocation48_spill] sm:$0xff] }
 0x50d   : > { %2432 = vadd.xlane.f32.xlu0 %v9869_v9  ;;  %v9890_v17 = vpop.eup %5815  ;;  %v3074_v31 = vmul.f32 1.442695, %v3034_v40  ;;  %v2331_v48 = vsub.f32 %v12459_v28, %v9448_v50  ;;  %v12461_v40 = vld [vmem:[#allocation134_spill] sm:$0xff]  ;;  %v12464_v39 = vld [vmem:[#allocation200_spill] sm:$0xff] }
 0x50e   : > { %4685 = vmatmul.f32.gmra.mxu0 %v3253_v12  ;;  %3008 = vmax.xlane.f32.xlu1 %v9874_v60  ;;  %12454 = vst [vmem:[#allocation40_spill] sm:$0xff] %v9890_v17  ;;  %v9893_v5 = vpop.eup %5817  ;;  %5819 = vpow2.f32 %v3778_v22  ;;  %v4130_v36 = vmul.f32 1.442695, %v4090_v1 }
 0x50f   : > { %5821 = vpow2.f32 %v3426_v30  ;;  %v12460_v30 = vld [vmem:[#allocation108_spill] sm:$0xff] }
 0x510   : > { %v9882_v18 = vpop.xlane.xlu2 %2648 }
 0x511   : > { %v9884_v47 = vpop.xlane.xlu1 %2296 }
 0x512   : > { %v9886_v6 = vpop.xlane.xlu0 %3350 }
 0x513   : > { %12453 = vst [vmem:[#allocation144_spill] sm:$0xff] %v9886_v6  ;;  %v2372_v6 = vmul.f32 1.442695, %v2331_v48 }
 0x514   : > { %2786 = vadd.xlane.f32.xlu2 %v9888_v43  ;;  %v9901_v3 = vpop.eup %5819 }
 0x515   : > { %3840 = vadd.xlane.f32.xlu0 %v9890_v17  ;;  %12457 = vst [vmem:[#allocation45_spill] sm:$0xff] %v9901_v3  ;;  %v9906_v22 = vpop.eup %5821 }
 0x516   : > { %2434 = vadd.xlane.f32.xlu1 %v9893_v5 }
 0x518   : > { %v3131_v12 = vpop.xlane.xlu2 %3130 }
 0x519   : > { %v9899_v62 = vpop.xlane.xlu1 %3352  ;;  %5823 = vrcp.f32 %v3131_v12 }
 0x51a   : > { %12456 = vst [vmem:[#allocation95_spill] sm:$0xff] %v9899_v62  ;;  %v2777_v21 = vpop.xlane.xlu0 %2776 }
 0x51b   : > { %5825 = vrcp.f32 %v2777_v21  ;;  %v12462_v21 = vld [vmem:[#allocation146_spill] sm:$0xff] }
 0x51c   : > { %3842 = vadd.xlane.f32.xlu2 %v9901_v3  ;;  %5827 = vpow2.f32 %v3074_v31  ;;  %v3035_v17 = vsub.f32 %v12462_v21, %v12461_v40  ;;  %v12463_v31 = vld [vmem:[#allocation102_spill] sm:$0xff] }
 0x51d   : > { %2656 = vmax.xlane.f32.xlu0 %v12460_v30  ;;  %v9918_v60 = vadd.f32 %v12464_v39, %v12463_v31  ;;  %v12502_v30 = vld [vmem:[#allocation201_spill] sm:$0xff] }
 0x51e   : > { %3490 = vadd.xlane.f32.xlu1 %v9906_v22  ;;  %v3076_v27 = vmul.f32 1.442695, %v3035_v17  ;;  %v12470_v17 = vld [vmem:[#allocation14_spill] sm:$0xff] }
 0x51f   : > { %v5824_v38 = vpop.eup %5823  ;;  %12465 = vst [vmem:[#allocation150_spill] sm:$0xff] %v9918_v60 }
 0x520   : > { %v3483_v62 = vpop.xlane.xlu2 %3482  ;;  %v3222_v16 = vmul.f32 %v5824_v38, %v9636_v52  ;;  %v12466_v52 = vld [vmem:[#allocation223_spill] sm:$0xff] }
 0x521   : > { %v5826_v12 = vpop.eup %5825  ;;  %v2779_v3 = vpop.xlane.xlu1 %2778 }
 0x522   : > { %v3481_v46 = vpop.xlane.xlu0 %3480  ;;  %v2869_v54 = vmul.f32 %v5826_v12, %v9642_v25  ;;  %5829 = vrcp.f32 %v2779_v3  ;;  %v3254_v50 = vmax.f32 %v3222_v16, 0.001  ;;  %v9920_v40 = vpop.eup %5827  ;;  %v12467_v25 = vld [vmem:[#allocation151_spill] sm:$0xff]  ;;  %v12469_v3 = vld [vmem:[#allocation160_spill] sm:$0xff] }
 0x523   : > { %5831 = vrcp.f32 %v3481_v46  ;;  %v4091_v38 = vsub.f32 %v12467_v25, %v12466_v52  ;;  %v12468_v46 = vld [vmem:[#allocation104_spill] sm:$0xff]  ;;  %v3739_v1 = vsub.f32 %v12470_v17, %v12469_v3 }
 0x524   : > { %v2901_v28 = vmax.f32 %v2869_v54, 0.001  ;;  %4688 = vmatmul.f32.gmra.mxu0 %v3254_v50  ;;  %5833 = vpow2.f32 %v4130_v36  ;;  %3010 = vmax.xlane.f32.xlu2 %v9918_v60 }
 0x525   : > { %5835 = vpow2.f32 %v2372_v6  ;;  %3138 = vadd.xlane.f32.xlu0 %v9920_v40  ;;  %v4132_v36 = vmul.f32 1.442695, %v4091_v38 }
 0x526   : > { %4572 = vmatmul.f32.gmra.mxu3 %v2901_v28  ;;  %5837 = vrcp.f32 %v3483_v62  ;;  %2658 = vmax.xlane.f32.xlu1 %v12468_v46 }
 0x527   : > { %5839 = vpow2.f32 %v3076_v27  ;;  %v3780_v27 = vmul.f32 1.442695, %v3739_v1 }
 0x528   : > { %v5830_v54 = vpop.eup %5829  ;;  %v9929_v48 = vpop.xlane.xlu2 %2298  ;;  %5841 = vpow2.f32 %v4132_v36  ;;  %v12477_v36 = vld [vmem:[#allocation50_spill] sm:$0xff] }
 0x529   : > { %v5832_v12 = vpop.eup %5831  ;;  %v9931_v21 = vpop.xlane.xlu1 %4186  ;;  %v2870_v6 = vmul.f32 %v5830_v54, %v9653_v41  ;;  %5843 = vpow2.f32 %v3780_v27  ;;  %v12479_v27 = vld [vmem:[#allocation124_spill] sm:$0xff] }
 0x52a   : > { %12471 = vst [vmem:[#allocation44_spill] sm:$0xff] %v9931_v21  ;;  %v9933_v16 = vpop.xlane.xlu0 %3000  ;;  %v3573_v50 = vmul.f32 %v5832_v12, %v9657_v49  ;;  %v9937_v62 = vpop.eup %5833 }
 0x52b   : > { %12472 = vst [vmem:[#allocation189_spill] sm:$0xff] %v9937_v62  ;;  %v2902_v28 = vmax.f32 %v2870_v6, 0.001  ;;  %v9939_v31 = vpop.eup %5835  ;;  %v12476_v6 = vld [vmem:[#allocation140_spill] sm:$0xff] }
 0x52c   : > { %v3605_v52 = vmax.f32 %v3573_v50, 0.001  ;;  %v5838_v25 = vpop.eup %5837  ;;  %2436 = vadd.xlane.f32.xlu2 %v9939_v31  ;;  %v3036_v50 = vsub.f32 %v12477_v36, %v12476_v6 }
 0x52d   : > { %v9942_v3 = vpop.eup %5839  ;;  %4194 = vadd.xlane.f32.xlu0 %v9937_v62  ;;  %v3574_v49 = vmul.f32 %v5838_v25, %v9655_v20 }
 0x52e   : > { %4575 = vmatmul.f32.gmra.mxu3 %v2902_v28  ;;  %4798 = vmatmul.f32.gmra.mxu1 %v3605_v52  ;;  %v9951_v17 = vpop.eup %5841  ;;  %v12478_v28 = vld [vmem:[#allocation58_spill] sm:$0xff]  ;;  %v12480_v52 = vld [vmem:[#allocation15_spill] sm:$0xff] }
 0x52f   : > { %3140 = vadd.xlane.f32.xlu1 %v9942_v3  ;;  %12474 = vst [vmem:[#allocation92_spill] sm:$0xff] %v9951_v17  ;;  %v3606_v1 = vmax.f32 %v3574_v49, 0.001  ;;  %v9954_v12 = vpop.eup %5843  ;;  %v2683_v20 = vsub.f32 %v12480_v52, %v12479_v27  ;;  %v12484_v27 = vld [vmem:[#allocation107_spill] sm:$0xff] }
 0x530   : > { %v9946_v41 = vpop.xlane.xlu2 %3354  ;;  %12475 = vst [vmem:[#allocation20_spill] sm:$0xff] %v9954_v12 }
 0x531   : > { %12473 = vst [vmem:[#allocation187_spill] sm:$0xff] %v9946_v41  ;;  %v9949_v38 = vpop.xlane.xlu1 %3002  ;;  %v3078_v41 = vmul.f32 1.442695, %v3036_v50  ;;  %v2724_v21 = vmul.f32 1.442695, %v2683_v20  ;;  %v12488_v50 = vld [vmem:[#allocation141_spill] sm:$0xff] }
 0x532   : > { %v2427_v54 = vpop.xlane.xlu0 %2426 }
 0x533   : > { %5845 = vrcp.f32 %v2427_v54 }
 0x534   : > { %4196 = vadd.xlane.f32.xlu2 %v9951_v17 }
 0x535   : > { %2306 = vmax.xlane.f32.xlu0 %v12478_v28 }
 0x536   : > { %4801 = vmatmul.f32.gmra.mxu1 %v3606_v1  ;;  %v12482_v1 = vld [vmem:[#allocation194_spill] sm:$0xff] }
 0x537   : > { %3844 = vadd.xlane.f32.xlu1 %v9954_v12  ;;  %v9967_v36 = vadd.f32 %v12464_v39, %v12482_v1  ;;  %v12486_v12 = vld [vmem:[#allocation147_spill] sm:$0xff] }
 0x538   : > { %v2781_v54 = vpop.xlane.xlu2 %2780 }
 0x539   : > { %v5846_v25 = vpop.eup %5845  ;;  %v2429_v62 = vpop.xlane.xlu1 %2428  ;;  %5847 = vrcp.f32 %v2781_v54  ;;  %12483 = vst [vmem:[#allocation168_spill] sm:$0xff] %v9967_v36  ;;  %v12485_v54 = vld [vmem:[#allocation136_spill] sm:$0xff] }
 0x53a   : > { %v9962_v49 = vpop.xlane.xlu0 %3834  ;;  %v2518_v17 = vmul.f32 %v5846_v25, %v9697_v44  ;;  %5849 = vrcp.f32 %v2429_v62  ;;  %v12487_v44 = vld [vmem:[#allocation106_spill] sm:$0xff] }
 0x53b   : > { %12481 = vst [vmem:[#allocation12_spill] sm:$0xff] %v9962_v49  ;;  %5851 = vpow2.f32 %v3078_v41  ;;  %v3387_v49 = vsub.f32 %v12486_v12, %v12485_v54 }
 0x53c   : > { %v2550_v6 = vmax.f32 %v2518_v17, 0.001  ;;  %2660 = vmax.xlane.f32.xlu2 %v12484_v27  ;;  %5853 = vpow2.f32 %v2724_v21  ;;  %v12489_v17 = vld [vmem:[#allocation62_spill] sm:$0xff] }
 0x53d   : > { %3362 = vmax.xlane.f32.xlu0 %v9967_v36  ;;  %v2684_v20 = vsub.f32 %v12489_v17, %v12488_v50  ;;  %v3428_v36 = vmul.f32 1.442695, %v3387_v49  ;;  %v12491_v50 = vld [vmem:[#allocation198_spill] sm:$0xff]  ;;  %v12492_v17 = vld [vmem:[#allocation204_spill] sm:$0xff] }
 0x53e   : > { %4462 = vmatmul.f32.gmra.mxu2 %v2550_v6  ;;  %v10020_v15 = vadd.f32 %v12492_v17, %v12505_v8 }
 0x53f   : > { %v5848_v52 = vpop.eup %5847  ;;  %2308 = vmax.xlane.f32.xlu1 %v12487_v44  ;;  %v2726_v54 = vmul.f32 1.442695, %v2684_v20 }
 0x540   : > { %v5850_v62 = vpop.eup %5849  ;;  %v9976_v25 = vpop.xlane.xlu2 %3836  ;;  %v2871_v6 = vmul.f32 %v5848_v52, %v9715_v24  ;;  %12506 = vst [vmem:[#allocation223_spill] sm:$0xff] %v10020_v15 }
 0x541   : > { %12490 = vst [vmem:[#allocation48_spill] sm:$0xff] %v9976_v25  ;;  %v3485_v1 = vpop.xlane.xlu1 %3484  ;;  %v2519_v41 = vmul.f32 %v5850_v62, %v9717_v7  ;;  %v9982_v12 = vpop.eup %5851  ;;  %v9988_v25 = vadd.f32 %v12492_v17, %v12491_v50  ;;  %v12498_v50 = vld [vmem:[#allocation52_spill] sm:$0xff] }
 0x542   : > { %v9979_v39 = vpop.xlane.xlu0 %2650  ;;  %5855 = vrcp.f32 %v3485_v1  ;;  %v2903_v21 = vmax.f32 %v2871_v6, 0.001  ;;  %v9984_v44 = vpop.eup %5853  ;;  %v12494_v6 = vld [vmem:[#allocation109_spill] sm:$0xff] }
 0x543   : > { %v2551_v27 = vmax.f32 %v2519_v41, 0.001  ;;  %12493 = vst [vmem:[#allocation134_spill] sm:$0xff] %v9988_v25  ;;  %5857 = vpow2.f32 %v3428_v36  ;;  %v12495_v36 = vld [vmem:[#allocation9_spill] sm:$0xff] }
 0x544   : > { %4578 = vmatmul.f32.gmra.mxu3 %v2903_v21  ;;  %3142 = vadd.xlane.f32.xlu2 %v9982_v12  ;;  %5859 = vpow2.f32 %v2726_v54  ;;  %v12496_v41 = vld [vmem:[#allocation57_spill] sm:$0xff]  ;;  %v12497_v54 = vld [vmem:[#allocation78_spill] sm:$0xff] }
 0x545   : > { %2788 = vadd.xlane.f32.xlu0 %v9984_v44  ;;  %v2685_v21 = vsub.f32 %v12496_v41, %v12495_v36 }
 0x546   : > { %4465 = vmatmul.f32.gmra.mxu2 %v2551_v27 }
 0x547   : > { %3364 = vmax.xlane.f32.xlu1 %v9988_v25  ;;  %v2332_v25 = vsub.f32 %v12498_v50, %v12497_v54  ;;  %v2728_v28 = vmul.f32 1.442695, %v2685_v21  ;;  %v10016_v54 = vadd.f32 %v12503_v10, %v12502_v30 }
 0x548   : > { %v5856_v24 = vpop.eup %5855  ;;  %v9993_v7 = vpop.xlane.xlu2 %3004 }
 0x549   : > { %v9995_v49 = vpop.xlane.xlu1 %2652  ;;  %v3575_v27 = vmul.f32 %v5856_v24, %v9728_v14  ;;  %v9998_v20 = vpop.eup %5857  ;;  %v12499_v24 = vld [vmem:[#allocation171_spill] sm:$0xff]  ;;  %v2374_v36 = vmul.f32 1.442695, %v2332_v25  ;;  %12504 = vst [vmem:[#allocation102_spill] sm:$0xff] %v10016_v54 }
 0x54a   : > { %v3133_v52 = vpop.xlane.xlu0 %3132  ;;  %v10001_v1 = vpop.eup %5859 }
 0x54b   : > { %5861 = vrcp.f32 %v3133_v52  ;;  %v3607_v62 = vmax.f32 %v3575_v27, 0.001  ;;  %v12500_v52 = vld [vmem:[#allocation56_spill] sm:$0xff] }
 0x54c   : > { %2310 = vmax.xlane.f32.xlu2 %v12494_v6  ;;  %v2333_v27 = vsub.f32 %v12500_v52, %v12499_v24  ;;  %v12507_v24 = vld [vmem:[#allocation100_spill] sm:$0xff] }
 0x54d   : > { %4804 = vmatmul.f32.gmra.mxu1 %v3607_v62  ;;  %3492 = vadd.xlane.f32.xlu0 %v9998_v20 }
 0x54e   : > { %v2376_v50 = vmul.f32 1.442695, %v2333_v27 }
 0x54f   : > { %2790 = vadd.xlane.f32.xlu1 %v10001_v1 }
 0x550   : > { %v2431_v46 = vpop.xlane.xlu2 %2430 }
 0x551   : > { %v5862_v14 = vpop.eup %5861  ;;  %v3135_v62 = vpop.xlane.xlu1 %3134  ;;  %5863 = vrcp.f32 %v2431_v46  ;;  %v10024_v46 = vadd.f32 %v12503_v10, %v12507_v24  ;;  %v12513_v24 = vld [vmem:[#allocation222_spill] sm:$0xff] }
 0x552   : > { %v10011_v6 = vpop.xlane.xlu0 %4188  ;;  %v3223_v60 = vmul.f32 %v5862_v14, %v9749_v53  ;;  %5865 = vrcp.f32 %v3135_v62 }
 0x553   : > { %12501 = vst [vmem:[#allocation146_spill] sm:$0xff] %v10011_v6  ;;  %5867 = vpow2.f32 %v2728_v28 }
 0x554   : > { %v3255_v41 = vmax.f32 %v3223_v60, 0.001  ;;  %12508 = vst [vmem:[#allocation151_spill] sm:$0xff] %v10024_v46  ;;  %3366 = vmax.xlane.f32.xlu2 %v10016_v54  ;;  %5869 = vpow2.f32 %v2374_v36 }
 0x555   : > { %3012 = vmax.xlane.f32.xlu0 %v10020_v15  ;;  %5871 = vpow2.f32 %v2376_v50  ;;  %v12530_v15 = vld [vmem:[#allocation175_spill] sm:$0xff] }
 0x556   : > { %4691 = vmatmul.f32.gmra.mxu0 %v3255_v41  ;;  %v12511_v41 = vld [vmem:[#allocation148_spill] sm:$0xff] }
 0x557   : > { %v5864_v53 = vpop.eup %5863  ;;  %3014 = vmax.xlane.f32.xlu1 %v10024_v46  ;;  %v12528_v46 = vld [vmem:[#allocation116_spill] sm:$0xff] }
 0x558   : > { %v5866_v60 = vpop.eup %5865  ;;  %v10029_v30 = vpop.xlane.xlu2 %4190  ;;  %v2520_v8 = vmul.f32 %v5864_v53, %v9767_v33  ;;  %v12512_v33 = vld [vmem:[#allocation70_spill] sm:$0xff]  ;;  %v12514_v53 = vld [vmem:[#allocation192_spill] sm:$0xff] }
 0x559   : > { %12509 = vst [vmem:[#allocation160_spill] sm:$0xff] %v10029_v30  ;;  %v10032_v25 = vpop.xlane.xlu1 %3838  ;;  %v3224_v14 = vmul.f32 %v5866_v60, %v9769_v34  ;;  %v10037_v27 = vpop.eup %5867  ;;  %v2334_v50 = vsub.f32 %v12512_v33, %v12511_v41  ;;  %v3037_v34 = vsub.f32 %v12514_v53, %v12513_v24  ;;  %v12515_v60 = vld [vmem:[#allocation27_spill] sm:$0xff]  ;;  %v12519_v41 = vld [vmem:[#allocation213_spill] sm:$0xff]  ;;  %v12521_v24 = vld [vmem:[#allocation110_spill] sm:$0xff] }
 0x55a   : > { %12510 = vst [vmem:[#allocation14_spill] sm:$0xff] %v10032_v25  ;;  %v10034_v21 = vpop.xlane.xlu0 %2300  ;;  %v2552_v52 = vmax.f32 %v2520_v8, 0.001  ;;  %v10039_v62 = vpop.eup %5869  ;;  %v12516_v8 = vld [vmem:[#allocation203_spill] sm:$0xff]  ;;  %v12522_v53 = vld [vmem:[#allocation113_spill] sm:$0xff] }
 0x55b   : > { %v3256_v28 = vmax.f32 %v3224_v14, 0.001  ;;  %v10042_v36 = vpop.eup %5871  ;;  %v3038_v14 = vsub.f32 %v12516_v8, %v12515_v60  ;;  %v2378_v10 = vmul.f32 1.442695, %v2334_v50  ;;  %v3080_v30 = vmul.f32 1.442695, %v3037_v34 }
 0x55c   : > { %4468 = vmatmul.f32.gmra.mxu2 %v2552_v52  ;;  %2792 = vadd.xlane.f32.xlu2 %v10037_v27  ;;  %v12518_v25 = vld [vmem:[#allocation59_spill] sm:$0xff]  ;;  %v12526_v34 = vld [vmem:[#allocation17_spill] sm:$0xff] }
 0x55d   : > { %2438 = vadd.xlane.f32.xlu0 %v10039_v62  ;;  %v10060_v33 = vadd.f32 %v12519_v41, %v12518_v25  ;;  %v3082_v6 = vmul.f32 1.442695, %v3038_v14  ;;  %5873 = vpow2.f32 %v2378_v10  ;;  %v3039_v14 = vsub.f32 %v12526_v34, %v9615_v63 }
 0x55e   : > { %4694 = vmatmul.f32.gmra.mxu0 %v3256_v28  ;;  %5875 = vpow2.f32 %v3080_v30 }
 0x55f   : > { %2440 = vadd.xlane.f32.xlu1 %v10042_v36  ;;  %12520 = vst [vmem:[#allocation50_spill] sm:$0xff] %v10060_v33  ;;  %5877 = vpow2.f32 %v3082_v6 }
 0x560   : > { %v10052_v52 = vpop.xlane.xlu2 %2654 }
 0x561   : > { %v10054_v28 = vpop.xlane.xlu1 %2302 }
 0x562   : > { %v10056_v54 = vpop.xlane.xlu0 %3356 }
 0x563   : > { %12517 = vst [vmem:[#allocation140_spill] sm:$0xff] %v10056_v54  ;;  %v10067_v50 = vpop.eup %5873 }
 0x564   : > { %3016 = vmax.xlane.f32.xlu2 %v10060_v33  ;;  %12524 = vst [vmem:[#allocation15_spill] sm:$0xff] %v10067_v50  ;;  %v10069_v25 = vpop.eup %5875 }
 0x565   : > { %2662 = vmax.xlane.f32.xlu0 %v12521_v24  ;;  %12525 = vst [vmem:[#allocation194_spill] sm:$0xff] %v10069_v25  ;;  %v10074_v10 = vpop.eup %5877  ;;  %v12529_v24 = vld [vmem:[#allocation112_spill] sm:$0xff] }
 0x566   : > { %12527 = vst [vmem:[#allocation136_spill] sm:$0xff] %v10074_v10 }
 0x567   : > { %2664 = vmax.xlane.f32.xlu1 %v12522_v53 }
 0x568   : > { %v3137_v60 = vpop.xlane.xlu2 %3136 }
 0x569   : > { %5879 = vrcp.f32 %v3137_v60  ;;  %v10065_v54 = vpop.xlane.xlu1 %3358 }
 0x56a   : > { %v2783_v8 = vpop.xlane.xlu0 %2782  ;;  %12523 = vst [vmem:[#allocation124_spill] sm:$0xff] %v10065_v54  ;;  %v3084_v54 = vmul.f32 1.442695, %v3039_v14  ;;  %v12532_v14 = vld [vmem:[#allocation115_spill] sm:$0xff] }
 0x56b   : > { %5881 = vrcp.f32 %v2783_v8 }
 0x56c   : > { %2442 = vadd.xlane.f32.xlu2 %v10067_v50  ;;  %v12540_v50 = vld [vmem:[#allocation216_spill] sm:$0xff] }
 0x56d   : > { %3144 = vadd.xlane.f32.xlu0 %v10069_v25  ;;  %v12537_v25 = vld [vmem:[#allocation205_spill] sm:$0xff] }
 0x56f   : > { %v5880_v6 = vpop.eup %5879  ;;  %3146 = vadd.xlane.f32.xlu1 %v10074_v10  ;;  %v12531_v10 = vld [vmem:[#allocation61_spill] sm:$0xff] }
 0x570   : > { %v3489_v60 = vpop.xlane.xlu2 %3488  ;;  %v3225_v8 = vmul.f32 %v5880_v6, %v9810_v13  ;;  %v2686_v13 = vsub.f32 %v12531_v10, %v12530_v15 }
 0x571   : > { %v5882_v30 = vpop.eup %5881  ;;  %v2785_v33 = vpop.xlane.xlu1 %2784 }
 0x572   : > { %v3487_v17 = vpop.xlane.xlu0 %3486  ;;  %v2872_v53 = vmul.f32 %v5882_v30, %v9812_v57  ;;  %v3257_v63 = vmax.f32 %v3225_v8, 0.001  ;;  %v12533_v57 = vld [vmem:[#allocation49_spill] sm:$0xff]  ;;  %v2730_v15 = vmul.f32 1.442695, %v2686_v13 }
 0x573   : > { %5883 = vrcp.f32 %v3487_v17  ;;  %v12534_v30 = vld [vmem:[#allocation65_spill] sm:$0xff] }
 0x574   : > { %5885 = vrcp.f32 %v2785_v33  ;;  %v2904_v34 = vmax.f32 %v2872_v53, 0.001  ;;  %4697 = vmatmul.f32.gmra.mxu0 %v3257_v63  ;;  %2666 = vmax.xlane.f32.xlu2 %v12528_v46  ;;  %v2687_v17 = vsub.f32 %v12534_v30, %v12533_v57  ;;  %v10099_v57 = vadd.f32 %v12519_v41, %v12537_v25  ;;  %v12539_v30 = vld [vmem:[#allocation210_spill] sm:$0xff] }
 0x575   : > { %5887 = vpow2.f32 %v3084_v54  ;;  %2312 = vmax.xlane.f32.xlu0 %v12529_v24  ;;  %v12551_v41 = vld [vmem:[#allocation214_spill] sm:$0xff] }
 0x576   : > { %4581 = vmatmul.f32.gmra.mxu3 %v2904_v34  ;;  %5889 = vrcp.f32 %v3489_v60  ;;  %v2732_v46 = vmul.f32 1.442695, %v2687_v17  ;;  %12538 = vst [vmem:[#allocation62_spill] sm:$0xff] %v10099_v57 }
 0x577   : > { %2314 = vmax.xlane.f32.xlu1 %v12532_v14  ;;  %5891 = vpow2.f32 %v2730_v15 }
 0x578   : > { %v10087_v8 = vpop.xlane.xlu2 %2304  ;;  %5893 = vpow2.f32 %v2732_v46  ;;  %v12547_v46 = vld [vmem:[#allocation64_spill] sm:$0xff] }
 0x579   : > { %v5884_v6 = vpop.eup %5883  ;;  %12535 = vst [vmem:[#allocation147_spill] sm:$0xff] %v10087_v8  ;;  %v10092_v63 = vpop.xlane.xlu1 %4192  ;;  %v10103_v8 = vadd.f32 %v12540_v50, %v12539_v30  ;;  %v12549_v30 = vld [vmem:[#allocation68_spill] sm:$0xff] }
 0x57a   : > { %v5886_v33 = vpop.eup %5885  ;;  %v10089_v53 = vpop.xlane.xlu0 %3006  ;;  %v3576_v54 = vmul.f32 %v5884_v6, %v9830_v2  ;;  %12536 = vst [vmem:[#allocation141_spill] sm:$0xff] %v10092_v63  ;;  %v12552_v63 = vld [vmem:[#allocation219_spill] sm:$0xff] }
 0x57b   : > { %v2873_v60 = vmul.f32 %v5886_v33, %v9833_v11  ;;  %v10095_v34 = vpop.eup %5887  ;;  %12541 = vst [vmem:[#allocation198_spill] sm:$0xff] %v10103_v8  ;;  %v12543_v33 = vld [vmem:[#allocation118_spill] sm:$0xff] }
 0x57c   : > { %v3608_v10 = vmax.f32 %v3576_v54, 0.001  ;;  %v5890_v14 = vpop.eup %5889  ;;  %3148 = vadd.xlane.f32.xlu2 %v10095_v34  ;;  %v12545_v54 = vld [vmem:[#allocation69_spill] sm:$0xff] }
 0x57d   : > { %v2905_v24 = vmax.f32 %v2873_v60, 0.001  ;;  %3368 = vmax.xlane.f32.xlu0 %v10099_v57  ;;  %v3577_v2 = vmul.f32 %v5890_v14, %v9828_v59  ;;  %v10113_v17 = vpop.eup %5891  ;;  %v2688_v60 = vsub.f32 %v12545_v54, %v9634_v61  ;;  %v12546_v59 = vld [vmem:[#allocation135_spill] sm:$0xff] }
 0x57e   : > { %4807 = vmatmul.f32.gmra.mxu1 %v3608_v10  ;;  %v2335_v14 = vsub.f32 %v12547_v46, %v12546_v59  ;;  %v12548_v10 = vld [vmem:[#allocation29_spill] sm:$0xff]  ;;  %v10131_v59 = vadd.f32 %v12552_v63, %v12551_v41 }
 0x57f   : > { %4584 = vmatmul.f32.gmra.mxu3 %v2905_v24  ;;  %3370 = vmax.xlane.f32.xlu1 %v10103_v8  ;;  %v3609_v6 = vmax.f32 %v3577_v2, 0.001  ;;  %v10116_v24 = vpop.eup %5893  ;;  %v2336_v2 = vsub.f32 %v12549_v30, %v12548_v10  ;;  %v2734_v57 = vmul.f32 1.442695, %v2688_v60  ;;  %v12555_v10 = vld [vmem:[#allocation212_spill] sm:$0xff] }
 0x580   : > { %v10109_v11 = vpop.xlane.xlu2 %3360  ;;  %12544 = vst [vmem:[#allocation57_spill] sm:$0xff] %v10116_v24  ;;  %v2380_v61 = vmul.f32 1.442695, %v2335_v14  ;;  %v10139_v30 = vadd.f32 %v12552_v63, %v12555_v10  ;;  %v12560_v10 = vld [vmem:[#allocation79_spill] sm:$0xff]  ;;  %v12562_v63 = vld [vmem:[#allocation132_spill] sm:$0xff] }
 0x581   : > { %12542 = vst [vmem:[#allocation9_spill] sm:$0xff] %v10109_v11  ;;  %v10111_v13 = vpop.xlane.xlu1 %3008  ;;  %v2382_v46 = vmul.f32 1.442695, %v2336_v2 }
 0x582   : > { %v2433_v25 = vpop.xlane.xlu0 %2432  ;;  %12553 = vst [vmem:[#allocation52_spill] sm:$0xff] %v10131_v59 }
 0x583   : > { %5895 = vrcp.f32 %v2433_v25 }
 0x584   : > { %2316 = vmax.xlane.f32.xlu2 %v12543_v33  ;;  %v12554_v33 = vld [vmem:[#allocation114_spill] sm:$0xff] }
 0x585   : > { %2794 = vadd.xlane.f32.xlu0 %v10113_v17 }
 0x586   : > { %4810 = vmatmul.f32.gmra.mxu1 %v3609_v6 }
 0x587   : > { %2796 = vadd.xlane.f32.xlu1 %v10116_v24  ;;  %v10135_v24 = vadd.f32 %v12540_v50, %v12554_v33 }
 0x588   : > { %v2787_v25 = vpop.xlane.xlu2 %2786 }
 0x589   : > { %v5896_v15 = vpop.eup %5895  ;;  %5897 = vrcp.f32 %v2787_v25  ;;  %v2435_v11 = vpop.xlane.xlu1 %2434 }
 0x58a   : > { %v10126_v6 = vpop.xlane.xlu0 %3840  ;;  %v2521_v8 = vmul.f32 %v5896_v15, %v9869_v9  ;;  %5899 = vrcp.f32 %v2435_v11 }
 0x58b   : > { %12550 = vst [vmem:[#allocation78_spill] sm:$0xff] %v10126_v6  ;;  %5901 = vpow2.f32 %v2734_v57  ;;  %v12566_v6 = vld [vmem:[#allocation122_spill] sm:$0xff] }
 0x58c   : > { %v2553_v54 = vmax.f32 %v2521_v8, 0.001  ;;  %3372 = vmax.xlane.f32.xlu2 %v10131_v59  ;;  %5903 = vpow2.f32 %v2380_v61  ;;  %v12561_v59 = vld [vmem:[#allocation120_spill] sm:$0xff] }
 0x58d   : > { %3018 = vmax.xlane.f32.xlu0 %v10135_v24  ;;  %5905 = vpow2.f32 %v2382_v46  ;;  %v10170_v50 = vadd.f32 %v12562_v63, %v12561_v59 }
 0x58e   : > { %4471 = vmatmul.f32.gmra.mxu2 %v2553_v54  ;;  %v12558_v54 = vld [vmem:[#allocation66_spill] sm:$0xff] }
 0x58f   : > { %v5898_v9 = vpop.eup %5897  ;;  %3020 = vmax.xlane.f32.xlu1 %v10139_v30  ;;  %12563 = vst [vmem:[#allocation56_spill] sm:$0xff] %v10170_v50 }
 0x590   : > { %v10144_v41 = vpop.xlane.xlu2 %3842  ;;  %v2874_v8 = vmul.f32 %v5898_v9, %v9888_v43  ;;  %v5900_v11 = vpop.eup %5899  ;;  %v12557_v43 = vld [vmem:[#allocation228_spill] sm:$0xff] }
 0x591   : > { %12556 = vst [vmem:[#allocation171_spill] sm:$0xff] %v10144_v41  ;;  %v3491_v60 = vpop.xlane.xlu1 %3490  ;;  %v2522_v14 = vmul.f32 %v5900_v11, %v9893_v5  ;;  %v10150_v57 = vpop.eup %5901  ;;  %v3040_v46 = vsub.f32 %v12558_v54, %v12557_v43  ;;  %v12559_v5 = vld [vmem:[#allocation173_spill] sm:$0xff]  ;;  %v12565_v41 = vld [vmem:[#allocation126_spill] sm:$0xff] }
 0x592   : > { %v10147_v33 = vpop.xlane.xlu0 %2656  ;;  %v2906_v15 = vmax.f32 %v2874_v8, 0.001  ;;  %5907 = vrcp.f32 %v3491_v60  ;;  %v10152_v25 = vpop.eup %5903  ;;  %v3041_v9 = vsub.f32 %v12560_v10, %v12559_v5  ;;  %v12564_v5 = vld [vmem:[#allocation82_spill] sm:$0xff] }
 0x593   : > { %v2554_v2 = vmax.f32 %v2522_v14, 0.001  ;;  %v10155_v61 = vpop.eup %5905  ;;  %v2337_v10 = vsub.f32 %v12564_v5, %v9667_v32  ;;  %v12572_v5 = vld [vmem:[#allocation73_spill] sm:$0xff] }
 0x594   : > { %4587 = vmatmul.f32.gmra.mxu3 %v2906_v15  ;;  %2798 = vadd.xlane.f32.xlu2 %v10150_v57  ;;  %v3088_v43 = vmul.f32 1.442695, %v3041_v9 }
 0x595   : > { %2444 = vadd.xlane.f32.xlu0 %v10152_v25  ;;  %v2384_v9 = vmul.f32 1.442695, %v2337_v10 }
 0x596   : > { %4474 = vmatmul.f32.gmra.mxu2 %v2554_v2  ;;  %v3086_v2 = vmul.f32 1.442695, %v3040_v46 }
 0x597   : > { %2446 = vadd.xlane.f32.xlu1 %v10155_v61 }
 0x598   : > { %v10163_v8 = vpop.xlane.xlu2 %3010  ;;  %v5908_v11 = vpop.eup %5907 }
 0x599   : > { %v10165_v14 = vpop.xlane.xlu1 %2658  ;;  %v3578_v15 = vmul.f32 %v5908_v11, %v9906_v22 }
 0x59a   : > { %v3139_v60 = vpop.xlane.xlu0 %3138 }
 0x59b   : > { %5909 = vrcp.f32 %v3139_v60  ;;  %v3610_v54 = vmax.f32 %v3578_v15, 0.001 }
 0x59c   : > { %3022 = vmax.xlane.f32.xlu2 %v10170_v50  ;;  %5911 = vpow2.f32 %v3086_v2  ;;  %v12568_v50 = vld [vmem:[#allocation217_spill] sm:$0xff] }
 0x59d   : > { %4813 = vmatmul.f32.gmra.mxu1 %v3610_v54  ;;  %2668 = vmax.xlane.f32.xlu0 %v12565_v41  ;;  %5913 = vpow2.f32 %v3088_v43  ;;  %v10182_v32 = vadd.f32 %v12562_v63, %v12568_v50 }
 0x59f   : > { %2670 = vmax.xlane.f32.xlu1 %v12566_v6  ;;  %12569 = vst [vmem:[#allocation51_spill] sm:$0xff] %v10182_v32 }
 0x5a0   : > { %v2437_v22 = vpop.xlane.xlu2 %2436 }
 0x5a1   : > { %v5910_v60 = vpop.eup %5909  ;;  %5915 = vrcp.f32 %v2437_v22 }
 0x5a2   : > { %v10177_v46 = vpop.xlane.xlu0 %4194  ;;  %v3226_v59 = vmul.f32 %v5910_v60, %v9920_v40  ;;  %v3141_v11 = vpop.xlane.xlu1 %3140  ;;  %v12571_v40 = vld [vmem:[#allocation101_spill] sm:$0xff] }
 0x5a3   : > { %12567 = vst [vmem:[#allocation201_spill] sm:$0xff] %v10177_v46  ;;  %5917 = vrcp.f32 %v3141_v11  ;;  %v10184_v54 = vpop.eup %5911  ;;  %v2689_v10 = vsub.f32 %v12572_v5, %v12571_v40  ;;  %v12576_v40 = vld [vmem:[#allocation74_spill] sm:$0xff] }
 0x5a4   : > { %v3258_v15 = vmax.f32 %v3226_v59, 0.001  ;;  %3374 = vmax.xlane.f32.xlu2 %v10182_v32  ;;  %v10187_v2 = vpop.eup %5913  ;;  %5919 = vpow2.f32 %v2384_v9  ;;  %v3042_v5 = vsub.f32 %v12576_v40, %v9762_v4  ;;  %v12582_v4 = vld [vmem:[#allocation220_spill] sm:$0xff] }
 0x5a5   : > { %12570 = vst [vmem:[#allocation100_spill] sm:$0xff] %v10187_v2  ;;  %3150 = vadd.xlane.f32.xlu0 %v10184_v54  ;;  %v2736_v32 = vmul.f32 1.442695, %v2689_v10 }
 0x5a6   : > { %4700 = vmatmul.f32.gmra.mxu0 %v3258_v15 }
 0x5a7   : > { %v5916_v43 = vpop.eup %5915  ;;  %3152 = vadd.xlane.f32.xlu1 %v10187_v2  ;;  %5921 = vpow2.f32 %v2736_v32  ;;  %v12585_v32 = vld [vmem:[#allocation21_spill] sm:$0xff] }
 0x5a8   : > { %v10193_v60 = vpop.xlane.xlu2 %4196  ;;  %v2523_v50 = vmul.f32 %v5916_v43, %v9939_v31  ;;  %v12577_v31 = vld [vmem:[#allocation121_spill] sm:$0xff]  ;;  %v12578_v43 = vld [vmem:[#allocation131_spill] sm:$0xff] }
 0x5a9   : > { %12573 = vst [vmem:[#allocation148_spill] sm:$0xff] %v10193_v60  ;;  %v5918_v22 = vpop.eup %5917 }
 0x5aa   : > { %v10196_v59 = vpop.xlane.xlu0 %2306  ;;  %v10198_v11 = vpop.xlane.xlu1 %3844  ;;  %v2555_v15 = vmax.f32 %v2523_v50, 0.001  ;;  %v3227_v9 = vmul.f32 %v5918_v22, %v9942_v3  ;;  %v12579_v50 = vld [vmem:[#allocation77_spill] sm:$0xff]  ;;  %v3090_v22 = vmul.f32 1.442695, %v3042_v5 }
 0x5ab   : > { %12574 = vst [vmem:[#allocation70_spill] sm:$0xff] %v10198_v11  ;;  %v10201_v63 = vpop.eup %5919  ;;  %v2690_v11 = vsub.f32 %v12579_v50, %v9707_v45  ;;  %v12587_v50 = vld [vmem:[#allocation76_spill] sm:$0xff] }
 0x5ac   : > { %12575 = vst [vmem:[#allocation222_spill] sm:$0xff] %v10201_v63  ;;  %4477 = vmatmul.f32.gmra.mxu2 %v2555_v15  ;;  %v3259_v46 = vmax.f32 %v3227_v9, 0.001  ;;  %2448 = vadd.xlane.f32.xlu2 %v10201_v63  ;;  %5923 = vpow2.f32 %v3090_v22  ;;  %v2338_v5 = vsub.f32 %v12587_v50, %v9709_v35  ;;  %v12593_v50 = vld [vmem:[#allocation163_spill] sm:$0xff] }
 0x5ad   : > { %2318 = vmax.xlane.f32.xlu0 %v12577_v31  ;;  %v2738_v9 = vmul.f32 1.442695, %v2690_v11  ;;  %v10216_v60 = vpop.eup %5921  ;;  %v12588_v11 = vld [vmem:[#allocation89_spill] sm:$0xff] }
 0x5ae   : > { %4703 = vmatmul.f32.gmra.mxu0 %v3259_v46  ;;  %12581 = vst [vmem:[#allocation27_spill] sm:$0xff] %v10216_v60  ;;  %v12583_v46 = vld [vmem:[#allocation162_spill] sm:$0xff]  ;;  %v2386_v22 = vmul.f32 1.442695, %v2338_v5  ;;  %v3043_v5 = vsub.f32 %v12593_v50, %v9776_v58 }
 0x5af   : > { %2320 = vmax.xlane.f32.xlu1 %v12578_v43  ;;  %v10220_v40 = vadd.f32 %v12583_v46, %v12582_v4  ;;  %v12586_v43 = vld [vmem:[#allocation80_spill] sm:$0xff]  ;;  %5925 = vpow2.f32 %v2738_v9 }
 0x5b0   : > { %v10210_v3 = vpop.xlane.xlu2 %2660  ;;  %v2691_v45 = vsub.f32 %v12586_v43, %v9806_v19 }
 0x5b1   : > { %12584 = vst [vmem:[#allocation203_spill] sm:$0xff] %v10220_v40 }
 0x5b2   : > { %v10212_v10 = vpop.xlane.xlu0 %3362  ;;  %v10214_v15 = vpop.xlane.xlu1 %2308  ;;  %v2740_v2 = vmul.f32 1.442695, %v2691_v45 }
 0x5b3   : > { %12580 = vst [vmem:[#allocation192_spill] sm:$0xff] %v10212_v10  ;;  %v2339_v10 = vsub.f32 %v12588_v11, %v9758_v55  ;;  %v10233_v19 = vpop.eup %5923  ;;  %v12592_v55 = vld [vmem:[#allocation13_spill] sm:$0xff] }
 0x5b4   : > { %2672 = vmax.xlane.f32.xlu2 %v12585_v32 }
 0x5b5   : > { %2800 = vadd.xlane.f32.xlu0 %v10216_v60  ;;  %v2388_v43 = vmul.f32 1.442695, %v2339_v10  ;;  %v12590_v60 = vld [vmem:[#allocation75_spill] sm:$0xff]  ;;  %v10240_v9 = vpop.eup %5925 }
 0x5b6   : > { %v10237_v35 = vadd.f32 %v12583_v46, %v12590_v60  ;;  %v12594_v60 = vld [vmem:[#allocation23_spill] sm:$0xff]  ;;  %v3092_v46 = vmul.f32 1.442695, %v3043_v5 }
 0x5b7   : > { %3376 = vmax.xlane.f32.xlu1 %v10220_v40  ;;  %v3044_v11 = vsub.f32 %v12594_v60, %v9823_v23 }
 0x5b8   : > { %v3143_v63 = vpop.xlane.xlu2 %3142  ;;  %12591 = vst [vmem:[#allocation17_spill] sm:$0xff] %v10237_v35 }
 0x5b9   : > { %5927 = vrcp.f32 %v3143_v63  ;;  %v2340_v63 = vsub.f32 %v12592_v55, %v9862_v51 }
 0x5ba   : > { %v2789_v4 = vpop.xlane.xlu0 %2788  ;;  %v10231_v32 = vpop.xlane.xlu1 %3364 }
 0x5bb   : > { %12589 = vst [vmem:[#allocation59_spill] sm:$0xff] %v10231_v32  ;;  %5929 = vrcp.f32 %v2789_v4  ;;  %v2390_v55 = vmul.f32 1.442695, %v2340_v63  ;;  %v12596_v63 = vld [vmem:[#allocation88_spill] sm:$0xff] }
 0x5bc   : > { %3154 = vadd.xlane.f32.xlu2 %v10233_v19  ;;  %5931 = vpow2.f32 %v2740_v2 }
 0x5bd   : > { %3024 = vmax.xlane.f32.xlu0 %v10237_v35  ;;  %5933 = vpow2.f32 %v2386_v22 }
 0x5be   : > { %5935 = vpow2.f32 %v2388_v43  ;;  %v3094_v43 = vmul.f32 1.442695, %v3044_v11 }
 0x5bf   : > { %v5928_v45 = vpop.eup %5927  ;;  %2802 = vadd.xlane.f32.xlu1 %v10240_v9 }
 0x5c0   : > { %v10250_v4 = vpop.xlane.xlu2 %2310  ;;  %v3228_v2 = vmul.f32 %v5928_v45, %v9982_v12  ;;  %v12595_v12 = vld [vmem:[#allocation85_spill] sm:$0xff]  ;;  %v2693_v45 = vsub.f32 %v12596_v63, %v9882_v18  ;;  %v2694_v18 = vsub.f32 %v12405_v42, %v9979_v39 }
 0x5c1   : > { %v5930_v10 = vpop.eup %5929 }
 0x5c2   : > { %v3493_v40 = vpop.xlane.xlu0 %3492  ;;  %v2875_v51 = vmul.f32 %v5930_v10, %v9984_v44  ;;  %v2791_v35 = vpop.xlane.xlu1 %2790  ;;  %v3260_v22 = vmax.f32 %v3228_v2, 0.001  ;;  %v3045_v44 = vsub.f32 %v9671_v0, %v9933_v16  ;;  %v2746_v39 = vmul.f32 1.442695, %v2694_v18 }
 0x5c3   : > { %5937 = vrcp.f32 %v3493_v40  ;;  %v10254_v50 = vpop.eup %5931  ;;  %v2692_v40 = vsub.f32 %v12595_v12, %v9825_v26 }
 0x5c4   : > { %5939 = vrcp.f32 %v2791_v35  ;;  %v2907_v58 = vmax.f32 %v2875_v51, 0.001  ;;  %4706 = vmatmul.f32.gmra.mxu0 %v3260_v22  ;;  %v10256_v32 = vpop.eup %5933  ;;  %2804 = vadd.xlane.f32.xlu2 %v10254_v50  ;;  %v3096_v16 = vmul.f32 1.442695, %v3045_v44  ;;  %v12599_v44 = vld [vmem:[#allocation90_spill] sm:$0xff] }
 0x5c5   : > { %v10259_v23 = vpop.eup %5935  ;;  %5941 = vpow2.f32 %v2390_v55  ;;  %2450 = vadd.xlane.f32.xlu0 %v10256_v32  ;;  %v2742_v26 = vmul.f32 1.442695, %v2692_v40  ;;  %v2744_v55 = vmul.f32 1.442695, %v2693_v45  ;;  %v2342_v12 = vsub.f32 %v12599_v44, %v9929_v48 }
 0x5c6   : > { %4590 = vmatmul.f32.gmra.mxu3 %v2907_v58  ;;  %5943 = vpow2.f32 %v3092_v46  ;;  %v2343_v48 = vsub.f32 %v12420_v37, %v10034_v21 }
 0x5c7   : > { %2452 = vadd.xlane.f32.xlu1 %v10259_v23  ;;  %5945 = vpow2.f32 %v3094_v43 }
 0x5c8   : > { %v10269_v5 = vpop.xlane.xlu2 %3366  ;;  %5947 = vpow2.f32 %v3096_v16  ;;  %v2396_v18 = vmul.f32 1.442695, %v2343_v48 }
 0x5c9   : > { %v5938_v35 = vpop.eup %5937  ;;  %12597 = vst [vmem:[#allocation175_spill] sm:$0xff] %v10269_v5  ;;  %5949 = vpow2.f32 %v2742_v26 }
 0x5ca   : > { %v5940_v10 = vpop.eup %5939  ;;  %v10271_v60 = vpop.xlane.xlu0 %3012  ;;  %v3579_v0 = vmul.f32 %v5938_v35, %v9998_v20  ;;  %5951 = vpow2.f32 %v2744_v55 }
 0x5cb   : > { %v10274_v11 = vpop.xlane.xlu1 %3014  ;;  %v2876_v46 = vmul.f32 %v5940_v10, %v10001_v1  ;;  %v10277_v51 = vpop.eup %5941  ;;  %v12598_v1 = vld [vmem:[#allocation87_spill] sm:$0xff]  ;;  %v2394_v10 = vmul.f32 1.442695, %v2342_v12 }
 0x5cc   : > { %v3611_v2 = vmax.f32 %v3579_v0, 0.001  ;;  %v10279_v58 = vpop.eup %5943  ;;  %2454 = vadd.xlane.f32.xlu2 %v10277_v51  ;;  %v2341_v43 = vsub.f32 %v12598_v1, %v9884_v47 }
 0x5cd   : > { %v2908_v22 = vmax.f32 %v2876_v46, 0.001  ;;  %v10284_v20 = vpop.eup %5945  ;;  %3156 = vadd.xlane.f32.xlu0 %v10279_v58  ;;  %v3046_v46 = vsub.f32 %v9695_v56, %v9949_v38 }
 0x5ce   : > { %4816 = vmatmul.f32.gmra.mxu1 %v3611_v2  ;;  %v2392_v63 = vmul.f32 1.442695, %v2341_v43  ;;  %v10292_v45 = vpop.eup %5947  ;;  %v3047_v2 = vsub.f32 %v9747_v29, %v9993_v7  ;;  %v12600_v7 = vld [vmem:[#allocation94_spill] sm:$0xff] }
 0x5cf   : > { %4593 = vmatmul.f32.gmra.mxu3 %v2908_v22  ;;  %3158 = vadd.xlane.f32.xlu1 %v10284_v20  ;;  %v10294_v0 = vpop.eup %5949  ;;  %v3098_v38 = vmul.f32 1.442695, %v3046_v46 }
 0x5d0   : > { %v2793_v42 = vpop.xlane.xlu2 %2792  ;;  %v10297_v47 = vpop.eup %5951 }
 0x5d1   : > { %5953 = vrcp.f32 %v2793_v42  ;;  %v3100_v42 = vmul.f32 1.442695, %v3047_v2 }
 0x5d2   : > { %v2439_v40 = vpop.xlane.xlu0 %2438 }
 0x5d3   : > { %v2441_v35 = vpop.xlane.xlu1 %2440  ;;  %5955 = vrcp.f32 %v2439_v40 }
 0x5d4   : > { %5957 = vpow2.f32 %v2746_v39  ;;  %3160 = vadd.xlane.f32.xlu2 %v10292_v45  ;;  %v12601_v39 = vld [vmem:[#allocation37_spill] sm:$0xff] }
 0x5d5   : > { %5959 = vrcp.f32 %v2441_v35  ;;  %2806 = vadd.xlane.f32.xlu0 %v10294_v0  ;;  %v3048_v40 = vsub.f32 %v12601_v39, %v10089_v53 }
 0x5d6   : > { %5961 = vpow2.f32 %v2392_v63  ;;  %v12602_v63 = vld [vmem:[#allocation97_spill] sm:$0xff] }
 0x5d7   : > { %v5954_v16 = vpop.eup %5953  ;;  %2808 = vadd.xlane.f32.xlu1 %v10297_v47  ;;  %5963 = vpow2.f32 %v2394_v10 }
 0x5d8   : > { %v10307_v55 = vpop.xlane.xlu2 %3016  ;;  %v2877_v22 = vmul.f32 %v5954_v16, %v10037_v27  ;;  %v2695_v27 = vsub.f32 %v12600_v7, %v9995_v49  ;;  %5965 = vpow2.f32 %v2396_v18  ;;  %v2696_v49 = vsub.f32 %v12602_v63, %v10052_v52  ;;  %v12603_v52 = vld [vmem:[#allocation96_spill] sm:$0xff]  ;;  %v12606_v7 = vld [vmem:[#allocation99_spill] sm:$0xff]  ;;  %v12608_v63 = vld [vmem:[#allocation194_spill] sm:$0xff] }
 0x5d9   : > { %v5956_v26 = vpop.eup %5955  ;;  %5967 = vpow2.f32 %v3098_v38  ;;  %v2344_v18 = vsub.f32 %v12603_v52, %v10054_v28  ;;  %v12604_v38 = vld [vmem:[#allocation108_spill] sm:$0xff] }
 0x5da   : > { %v10310_v37 = vpop.xlane.xlu0 %2662  ;;  %v2524_v21 = vmul.f32 %v5956_v26, %v10039_v62  ;;  %v2909_v43 = vmax.f32 %v2877_v22, 0.001  ;;  %v10315_v56 = vpop.eup %5957  ;;  %5969 = vpow2.f32 %v3100_v42  ;;  %v2748_v48 = vmul.f32 1.442695, %v2695_v27  ;;  %v12605_v42 = vld [vmem:[#allocation147_spill] sm:$0xff] }
 0x5db   : > { %v10313_v1 = vpop.xlane.xlu1 %2664  ;;  %v5960_v12 = vpop.eup %5959  ;;  %v3102_v26 = vmul.f32 1.442695, %v3048_v40  ;;  %v2345_v27 = vsub.f32 %v12606_v7, %v12605_v42  ;;  %v12607_v40 = vld [vmem:[#allocation15_spill] sm:$0xff]  ;;  %v12611_v42 = vld [vmem:[#allocation136_spill] sm:$0xff] }
 0x5dc   : > { %v2556_v44 = vmax.f32 %v2524_v21, 0.001  ;;  %4596 = vmatmul.f32.gmra.mxu3 %v2909_v43  ;;  %v10317_v29 = vpop.eup %5961  ;;  %2810 = vadd.xlane.f32.xlu2 %v10315_v56  ;;  %v2525_v35 = vmul.f32 %v5960_v12, %v10042_v36  ;;  %v2750_v21 = vmul.f32 1.442695, %v2696_v49 }
 0x5dd   : > { %v10322_v62 = vpop.eup %5963  ;;  %2456 = vadd.xlane.f32.xlu0 %v10317_v29 }
 0x5de   : > { %4480 = vmatmul.f32.gmra.mxu2 %v2556_v44  ;;  %v2557_v2 = vmax.f32 %v2525_v35, 0.001  ;;  %v10331_v22 = vpop.eup %5965  ;;  %v2697_v44 = vsub.f32 %v12604_v38, %v10147_v33 }
 0x5df   : > { %2458 = vadd.xlane.f32.xlu1 %v10322_v62  ;;  %v10333_v53 = vpop.eup %5967 }
 0x5e0   : > { %v2443_v10 = vpop.xlane.xlu2 %2442  ;;  %v10336_v36 = vpop.eup %5969 }
 0x5e1   : > { %5971 = vrcp.f32 %v2443_v10  ;;  %v2398_v10 = vmul.f32 1.442695, %v2344_v18  ;;  %v12610_v18 = vld [vmem:[#allocation58_spill] sm:$0xff] }
 0x5e2   : > { %v3145_v16 = vpop.xlane.xlu0 %3144 }
 0x5e3   : > { %v3147_v46 = vpop.xlane.xlu1 %3146  ;;  %5973 = vrcp.f32 %v3145_v16 }
 0x5e4   : > { %5975 = vpow2.f32 %v2748_v48  ;;  %2460 = vadd.xlane.f32.xlu2 %v10331_v22 }
 0x5e5   : > { %5977 = vrcp.f32 %v3147_v46  ;;  %3162 = vadd.xlane.f32.xlu0 %v10333_v53  ;;  %v2752_v46 = vmul.f32 1.442695, %v2697_v44  ;;  %v2346_v44 = vsub.f32 %v12610_v18, %v10196_v59 }
 0x5e6   : > { %4483 = vmatmul.f32.gmra.mxu2 %v2557_v2  ;;  %5979 = vpow2.f32 %v3102_v26 }
 0x5e7   : > { %v5972_v43 = vpop.eup %5971  ;;  %3164 = vadd.xlane.f32.xlu1 %v10336_v36  ;;  %5981 = vpow2.f32 %v2750_v21  ;;  %v2400_v21 = vmul.f32 1.442695, %v2345_v27  ;;  %v12612_v27 = vld [vmem:[#allocation150_spill] sm:$0xff] }
 0x5e8   : > { %v10346_v39 = vpop.xlane.xlu2 %2666  ;;  %v2526_v35 = vmul.f32 %v5972_v43, %v12607_v40  ;;  %5983 = vpow2.f32 %v2398_v10  ;;  %v12609_v43 = vld [vmem:[#allocation185_spill] sm:$0xff]  ;;  %v3050_v40 = vsub.f32 %v12612_v27, %v10163_v8  ;;  %v2402_v10 = vmul.f32 1.442695, %v2346_v44  ;;  %v12617_v44 = vld [vmem:[#allocation107_spill] sm:$0xff] }
 0x5e9   : > { %v5974_v12 = vpop.eup %5973  ;;  %5985 = vpow2.f32 %v2752_v46 }
 0x5ea   : > { %v10349_v28 = vpop.xlane.xlu0 %2312  ;;  %v3229_v49 = vmul.f32 %v5974_v12, %v12608_v63  ;;  %v2558_v16 = vmax.f32 %v2526_v35, 0.001  ;;  %v10354_v33 = vpop.eup %5975  ;;  %v3049_v12 = vsub.f32 %v12609_v43, %v10111_v13  ;;  %5987 = vpow2.f32 %v2400_v21 }
 0x5eb   : > { %v10352_v48 = vpop.xlane.xlu1 %2314  ;;  %v5978_v2 = vpop.eup %5977  ;;  %v3106_v59 = vmul.f32 1.442695, %v3050_v40 }
 0x5ec   : > { %v3261_v26 = vmax.f32 %v3229_v49, 0.001  ;;  %v10356_v52 = vpop.eup %5979  ;;  %v3230_v7 = vmul.f32 %v5978_v2, %v12611_v42  ;;  %v3104_v13 = vmul.f32 1.442695, %v3049_v12  ;;  %v12615_v2 = vld [vmem:[#allocation104_spill] sm:$0xff]  ;;  %v12616_v12 = vld [vmem:[#allocation223_spill] sm:$0xff]  ;;  %v2699_v42 = vsub.f32 %v12617_v44, %v10210_v3 }
 0x5ed   : > { %v10358_v38 = vpop.eup %5981  ;;  %2812 = vadd.xlane.f32.xlu0 %v10354_v33  ;;  %3166 = vadd.xlane.f32.xlu2 %v10356_v52  ;;  %v2698_v21 = vsub.f32 %v12615_v2, %v10165_v14  ;;  %v3051_v18 = vsub.f32 %v12616_v12, %v10271_v60  ;;  %v12618_v3 = vld [vmem:[#allocation106_spill] sm:$0xff] }
 0x5ee   : > { %4486 = vmatmul.f32.gmra.mxu2 %v2558_v16  ;;  %4709 = vmatmul.f32.gmra.mxu0 %v3261_v26  ;;  %v3262_v16 = vmax.f32 %v3230_v7, 0.001  ;;  %v10374_v46 = vpop.eup %5983  ;;  %v2756_v2 = vmul.f32 1.442695, %v2699_v42  ;;  %v2347_v12 = vsub.f32 %v12618_v3, %v10214_v15 }
 0x5ef   : > { %2814 = vadd.xlane.f32.xlu1 %v10358_v38  ;;  %v10376_v26 = vpop.eup %5985  ;;  %v2754_v27 = vmul.f32 1.442695, %v2698_v21 }
 0x5f0   : > { %v3149_v35 = vpop.xlane.xlu2 %3148  ;;  %v10380_v43 = vpop.eup %5987 }
 0x5f1   : > { %5989 = vrcp.f32 %v3149_v35 }
 0x5f2   : > { %v10370_v63 = vpop.xlane.xlu0 %3368  ;;  %5991 = vpow2.f32 %v3104_v13 }
 0x5f3   : > { %12613 = vst [vmem:[#allocation61_spill] sm:$0xff] %v10370_v63  ;;  %v10372_v49 = vpop.xlane.xlu1 %3370  ;;  %5993 = vpow2.f32 %v2402_v10 }
 0x5f4   : > { %12614 = vst [vmem:[#allocation49_spill] sm:$0xff] %v10372_v49  ;;  %5995 = vpow2.f32 %v3106_v59 }
 0x5f5   : > { %2462 = vadd.xlane.f32.xlu0 %v10374_v46  ;;  %2816 = vadd.xlane.f32.xlu2 %v10376_v26 }
 0x5f6   : > { %4712 = vmatmul.f32.gmra.mxu0 %v3262_v16  ;;  %v3108_v16 = vmul.f32 1.442695, %v3051_v18  ;;  %v12620_v18 = vld [vmem:[#allocation109_spill] sm:$0xff] }
 0x5f7   : > { %v5990_v8 = vpop.eup %5989  ;;  %2464 = vadd.xlane.f32.xlu1 %v10380_v43  ;;  %v2348_v44 = vsub.f32 %v12620_v18, %v10250_v4  ;;  %v12625_v18 = vld [vmem:[#allocation50_spill] sm:$0xff] }
 0x5f8   : > { %v10389_v14 = vpop.xlane.xlu2 %2316  ;;  %v3231_v7 = vmul.f32 %v5990_v8, %v10095_v34  ;;  %v10392_v10 = vpop.eup %5991  ;;  %v12619_v34 = vld [vmem:[#allocation110_spill] sm:$0xff] }
 0x5f9   : > { %v10394_v60 = vpop.eup %5993  ;;  %v2700_v21 = vsub.f32 %v12619_v34, %v10310_v37  ;;  %v2406_v3 = vmul.f32 1.442695, %v2348_v44 }
 0x5fa   : > { %v2795_v40 = vpop.xlane.xlu0 %2794  ;;  %v3263_v13 = vmax.f32 %v3231_v7, 0.001  ;;  %v10396_v59 = vpop.eup %5995 }
 0x5fb   : > { %v2797_v35 = vpop.xlane.xlu1 %2796  ;;  %5997 = vrcp.f32 %v2795_v40 }
 0x5fc   : > { %5999 = vpow2.f32 %v2754_v27  ;;  %v2404_v27 = vmul.f32 1.442695, %v2347_v12 }
 0x5fd   : > { %6001 = vrcp.f32 %v2797_v35  ;;  %3168 = vadd.xlane.f32.xlu0 %v10392_v10  ;;  %2466 = vadd.xlane.f32.xlu2 %v10394_v60 }
 0x5fe   : > { %4715 = vmatmul.f32.gmra.mxu0 %v3263_v13  ;;  %6003 = vpow2.f32 %v3108_v16  ;;  %v2758_v13 = vmul.f32 1.442695, %v2700_v21  ;;  %v12624_v21 = vld [vmem:[#allocation57_spill] sm:$0xff] }
 0x5ff   : > { %3170 = vadd.xlane.f32.xlu1 %v10396_v59  ;;  %6005 = vpow2.f32 %v2756_v2  ;;  %v12622_v2 = vld [vmem:[#allocation151_spill] sm:$0xff] }
 0x600   : > { %v10407_v42 = vpop.xlane.xlu2 %3372  ;;  %v3052_v49 = vsub.f32 %v12622_v2, %v10274_v11  ;;  %6007 = vpow2.f32 %v2404_v27  ;;  %v3053_v11 = vsub.f32 %v12625_v18, %v10307_v55 }
 0x601   : > { %v5998_v8 = vpop.eup %5997  ;;  %12621 = vst [vmem:[#allocation65_spill] sm:$0xff] %v10407_v42  ;;  %6009 = vpow2.f32 %v2758_v13 }
 0x602   : > { %v3019_v7 = vpop.xlane.xlu0 %3018  ;;  %v2878_v15 = vmul.f32 %v5998_v8, %v10113_v17  ;;  %v10412_v35 = vpop.eup %5999  ;;  %v12623_v17 = vld [vmem:[#allocation112_spill] sm:$0xff]  ;;  %6011 = vpow2.f32 %v2406_v3  ;;  %v3112_v63 = vmul.f32 1.442695, %v3053_v11  ;;  %v12626_v3 = vld [vmem:[#allocation113_spill] sm:$0xff] }
 0x603   : > { %v10410_v40 = vpop.xlane.xlu1 %3020  ;;  %v6002_v37 = vpop.eup %6001  ;;  %v2349_v12 = vsub.f32 %v12623_v17, %v10349_v28  ;;  %v2701_v55 = vsub.f32 %v12626_v3, %v10313_v1  ;;  %v3054_v17 = vsub.f32 %v10135_v24, %v3019_v7 }
 0x604   : > { %v2910_v16 = vmax.f32 %v2878_v15, 0.001  ;;  %v10414_v34 = vpop.eup %6003  ;;  %v2879_v8 = vmul.f32 %v6002_v37, %v12624_v21  ;;  %v3110_v15 = vmul.f32 1.442695, %v3052_v49 }
 0x605   : > { %v10418_v4 = vpop.eup %6005  ;;  %2818 = vadd.xlane.f32.xlu0 %v10412_v35  ;;  %3172 = vadd.xlane.f32.xlu2 %v10414_v34  ;;  %v2408_v2 = vmul.f32 1.442695, %v2349_v12  ;;  %v3114_v24 = vmul.f32 1.442695, %v3054_v17 }
 0x606   : > { %4599 = vmatmul.f32.gmra.mxu3 %v2910_v16  ;;  %v2911_v42 = vmax.f32 %v2879_v8, 0.001  ;;  %v10428_v13 = vpop.eup %6007 }
 0x607   : > { %2820 = vadd.xlane.f32.xlu1 %v10418_v4  ;;  %v10430_v28 = vpop.eup %6009 }
 0x608   : > { %v2799_v44 = vpop.xlane.xlu2 %2798  ;;  %v10432_v37 = vpop.eup %6011 }
 0x609   : > { %6013 = vrcp.f32 %v2799_v44  ;;  %v2760_v44 = vmul.f32 1.442695, %v2701_v55 }
 0x60a   : > { %v2445_v27 = vpop.xlane.xlu0 %2444 }
 0x60b   : > { %v2447_v16 = vpop.xlane.xlu1 %2446  ;;  %6015 = vrcp.f32 %v2445_v27 }
 0x60c   : > { %6017 = vpow2.f32 %v3110_v15 }
 0x60d   : > { %6019 = vrcp.f32 %v2447_v16  ;;  %2468 = vadd.xlane.f32.xlu0 %v10428_v13  ;;  %2822 = vadd.xlane.f32.xlu2 %v10430_v28 }
 0x60e   : > { %4602 = vmatmul.f32.gmra.mxu3 %v2911_v42  ;;  %6021 = vpow2.f32 %v2408_v2  ;;  %v12627_v42 = vld [vmem:[#allocation116_spill] sm:$0xff] }
 0x60f   : > { %v6014_v49 = vpop.eup %6013  ;;  %2470 = vadd.xlane.f32.xlu1 %v10432_v37  ;;  %6023 = vpow2.f32 %v3112_v63  ;;  %v2702_v21 = vsub.f32 %v12627_v42, %v10346_v39  ;;  %v12628_v39 = vld [vmem:[#allocation115_spill] sm:$0xff] }
 0x610   : > { %v10442_v8 = vpop.xlane.xlu2 %3022  ;;  %v2880_v1 = vmul.f32 %v6014_v49, %v10150_v57  ;;  %v2350_v42 = vsub.f32 %v12628_v39, %v10352_v48  ;;  %6025 = vpow2.f32 %v2760_v44  ;;  %v12629_v49 = vld [vmem:[#allocation118_spill] sm:$0xff] }
 0x611   : > { %v6016_v12 = vpop.eup %6015  ;;  %v2762_v63 = vmul.f32 1.442695, %v2702_v21  ;;  %6027 = vpow2.f32 %v3114_v24  ;;  %v2351_v48 = vsub.f32 %v12629_v49, %v10389_v14  ;;  %v3055_v14 = vsub.f32 %v10139_v30, %v10410_v40 }
 0x612   : > { %v2669_v18 = vpop.xlane.xlu0 %2668  ;;  %v2527_v11 = vmul.f32 %v6016_v12, %v10152_v25  ;;  %v2912_v27 = vmax.f32 %v2880_v1, 0.001  ;;  %v10448_v16 = vpop.eup %6017  ;;  %v2410_v12 = vmul.f32 1.442695, %v2350_v42 }
 0x613   : > { %v10446_v15 = vpop.xlane.xlu1 %2670  ;;  %v6020_v2 = vpop.eup %6019  ;;  %v2703_v25 = vsub.f32 %v12565_v41, %v2669_v18  ;;  %6029 = vpow2.f32 %v2762_v63  ;;  %v2412_v24 = vmul.f32 1.442695, %v2351_v48 }
 0x614   : > { %v2559_v7 = vmax.f32 %v2527_v11, 0.001  ;;  %v10450_v3 = vpop.eup %6021  ;;  %v2528_v55 = vmul.f32 %v6020_v2, %v10155_v61 }
 0x615   : > { %v10454_v57 = vpop.eup %6023  ;;  %3174 = vadd.xlane.f32.xlu0 %v10448_v16  ;;  %2472 = vadd.xlane.f32.xlu2 %v10450_v3  ;;  %v2764_v11 = vmul.f32 1.442695, %v2703_v25 }
 0x616   : > { %4489 = vmatmul.f32.gmra.mxu2 %v2559_v7  ;;  %4605 = vmatmul.f32.gmra.mxu3 %v2912_v27  ;;  %v2560_v44 = vmax.f32 %v2528_v55, 0.001  ;;  %v10465_v27 = vpop.eup %6025  ;;  %v3116_v55 = vmul.f32 1.442695, %v3055_v14  ;;  %v12633_v14 = vld [vmem:[#allocation222_spill] sm:$0xff] }
 0x617   : > { %3176 = vadd.xlane.f32.xlu1 %v10454_v57  ;;  %v10467_v41 = vpop.eup %6027 }
 0x618   : > { %v10463_v17 = vpop.xlane.xlu2 %3374 }
 0x619   : > { %12630 = vst [vmem:[#allocation205_spill] sm:$0xff] %v10463_v17  ;;  %v10469_v61 = vpop.eup %6029 }
 0x61a   : > { %v3151_v21 = vpop.xlane.xlu0 %3150 }
 0x61b   : > { %v3153_v1 = vpop.xlane.xlu1 %3152  ;;  %6031 = vrcp.f32 %v3151_v21  ;;  %v12631_v21 = vld [vmem:[#allocation100_spill] sm:$0xff] }
 0x61c   : > { %6033 = vpow2.f32 %v2410_v12 }
 0x61d   : > { %6035 = vrcp.f32 %v3153_v1  ;;  %2824 = vadd.xlane.f32.xlu0 %v10465_v27  ;;  %3178 = vadd.xlane.f32.xlu2 %v10467_v41 }
 0x61e   : > { %4492 = vmatmul.f32.gmra.mxu2 %v2560_v44  ;;  %6037 = vpow2.f32 %v2764_v11  ;;  %v12632_v11 = vld [vmem:[#allocation56_spill] sm:$0xff] }
 0x61f   : > { %2826 = vadd.xlane.f32.xlu1 %v10469_v61  ;;  %6039 = vpow2.f32 %v2412_v24  ;;  %v3056_v44 = vsub.f32 %v12632_v11, %v10442_v8 }
 0x620   : > { %v2449_v7 = vpop.xlane.xlu2 %2448 }
 0x621   : > { %v6032_v18 = vpop.eup %6031  ;;  %6041 = vrcp.f32 %v2449_v7 }
 0x622   : > { %v2319_v2 = vpop.xlane.xlu0 %2318  ;;  %v3232_v63 = vmul.f32 %v6032_v18, %v10184_v54  ;;  %v10478_v25 = vpop.eup %6033 }
 0x623   : > { %v2321_v39 = vpop.xlane.xlu1 %2320  ;;  %v2352_v42 = vsub.f32 %v12577_v31, %v2319_v2  ;;  %v6036_v48 = vpop.eup %6035  ;;  %v2704_v31 = vsub.f32 %v12566_v6, %v10446_v15  ;;  %v3118_v6 = vmul.f32 1.442695, %v3056_v44 }
 0x624   : > { %v3264_v49 = vmax.f32 %v3232_v63, 0.001  ;;  %v10480_v30 = vpop.eup %6037  ;;  %v3233_v1 = vmul.f32 %v6036_v48, %v12631_v21  ;;  %v12635_v48 = vld [vmem:[#allocation161_spill] sm:$0xff]  ;;  %v12637_v21 = vld [vmem:[#allocation72_spill] sm:$0xff] }
 0x625   : > { %v2414_v12 = vmul.f32 1.442695, %v2352_v42  ;;  %v10482_v40 = vpop.eup %6039  ;;  %2474 = vadd.xlane.f32.xlu0 %v10478_v25  ;;  %2828 = vadd.xlane.f32.xlu2 %v10480_v30  ;;  %v2766_v42 = vmul.f32 1.442695, %v2704_v31  ;;  %v12639_v31 = vld [vmem:[#allocation131_spill] sm:$0xff] }
 0x626   : > { %4718 = vmatmul.f32.gmra.mxu0 %v3264_v49 }
 0x627   : > { %6043 = vpow2.f32 %v2414_v12  ;;  %v6042_v54 = vpop.eup %6041  ;;  %2476 = vadd.xlane.f32.xlu1 %v10482_v40  ;;  %v12636_v12 = vld [vmem:[#allocation165_spill] sm:$0xff] }
 0x628   : > { %6045 = vpow2.f32 %v3116_v55  ;;  %v2673_v24 = vpop.xlane.xlu2 %2672  ;;  %v2529_v18 = vmul.f32 %v6042_v54, %v12633_v14  ;;  %v3265_v55 = vmax.f32 %v3233_v1, 0.001  ;;  %v10501_v8 = vadd.f32 %v12636_v12, %v12635_v48  ;;  %v12638_v54 = vld [vmem:[#allocation182_spill] sm:$0xff]  ;;  %v12640_v14 = vld [vmem:[#allocation21_spill] sm:$0xff] }
 0x629   : > { %v3388_v11 = vsub.f32 %v12638_v54, %v12637_v21  ;;  %v2353_v1 = vsub.f32 %v12639_v31, %v2321_v39  ;;  %v12644_v39 = vld [vmem:[#allocation172_spill] sm:$0xff]  ;;  %v12645_v31 = vld [vmem:[#allocation98_spill] sm:$0xff] }
 0x62a   : > { %v2801_v7 = vpop.xlane.xlu0 %2800  ;;  %v2561_v63 = vmax.f32 %v2529_v18, 0.001  ;;  %v2705_v18 = vsub.f32 %v12640_v14, %v2673_v24  ;;  %v3740_v5 = vsub.f32 %v12645_v31, %v12644_v39  ;;  %v12647_v24 = vld [vmem:[#allocation167_spill] sm:$0xff] }
 0x62b   : > { %v10493_v2 = vpop.xlane.xlu1 %3376  ;;  %6047 = vrcp.f32 %v2801_v7  ;;  %v3430_v12 = vmul.f32 1.442695, %v3388_v11  ;;  %v2416_v54 = vmul.f32 1.442695, %v2353_v1  ;;  %v12648_v11 = vld [vmem:[#allocation133_spill] sm:$0xff]  ;;  %v12649_v14 = vld [vmem:[#allocation191_spill] sm:$0xff] }
 0x62c   : > { %12634 = vst [vmem:[#allocation210_spill] sm:$0xff] %v10493_v2  ;;  %4495 = vmatmul.f32.gmra.mxu2 %v2561_v63  ;;  %6049 = vpow2.f32 %v2766_v42  ;;  %v2768_v42 = vmul.f32 1.442695, %v2705_v18  ;;  %v4092_v1 = vsub.f32 %v12649_v14, %v12648_v11  ;;  %v12650_v18 = vld [vmem:[#allocation139_spill] sm:$0xff]  ;;  %v3782_v39 = vmul.f32 1.442695, %v3740_v5 }
 0x62d   : > { %v10495_v49 = vpop.eup %6043  ;;  %6051 = vpow2.f32 %v3118_v6 }
 0x62e   : > { %v10497_v15 = vpop.eup %6045  ;;  %4721 = vmatmul.f32.gmra.mxu0 %v3265_v55  ;;  %2478 = vadd.xlane.f32.xlu2 %v10495_v49  ;;  %v12642_v55 = vld [vmem:[#allocation27_spill] sm:$0xff]  ;;  %v4134_v14 = vmul.f32 1.442695, %v4092_v1 }
 0x62f   : > { %3180 = vadd.xlane.f32.xlu0 %v10497_v15  ;;  %3698 = vmax.xlane.f32.xlu1 %v10501_v8 }
 0x630   : > { %v3155_v7 = vpop.xlane.xlu2 %3154 }
 0x631   : > { %v6048_v44 = vpop.eup %6047  ;;  %6053 = vrcp.f32 %v3155_v7  ;;  %v12651_v7 = vld [vmem:[#allocation111_spill] sm:$0xff] }
 0x632   : > { %v10510_v63 = vpop.xlane.xlu0 %3024  ;;  %v2881_v48 = vmul.f32 %v6048_v44, %v12642_v55  ;;  %v10513_v17 = vpop.eup %6049  ;;  %v3741_v55 = vsub.f32 %v12651_v7, %v12650_v18 }
 0x633   : > { %12641 = vst [vmem:[#allocation69_spill] sm:$0xff] %v10510_v63  ;;  %v2803_v21 = vpop.xlane.xlu1 %2802  ;;  %v10517_v6 = vpop.eup %6051 }
 0x634   : > { %6055 = vrcp.f32 %v2803_v21  ;;  %v2913_v2 = vmax.f32 %v2881_v48, 0.001  ;;  %12643 = vst [vmem:[#allocation135_spill] sm:$0xff] %v10513_v17  ;;  %v10526_v48 = vpop.f32.mrf.mxu3  ;;  %v10532_v18 = vpop.f32.mrf.mxu2 }
 0x635   : > { %12646 = vst [vmem:[#allocation64_spill] sm:$0xff] %v10517_v6  ;;  %6057 = vpow2.f32 %v3430_v12 }
 0x636   : > { %4608 = vmatmul.f32.gmra.mxu3 %v2913_v2  ;;  %4050 = vmax.xlane.f32.xlu2 %v12647_v24  ;;  %6059 = vpow2.f32 %v2416_v54  ;;  %12652 = vst [vmem:[#allocation29_spill] sm:$0xff] %v10526_v48 }
 0x637   : > { %2830 = vadd.xlane.f32.xlu0 %v10513_v17  ;;  %v6054_v44 = vpop.eup %6053  ;;  %3182 = vadd.xlane.f32.xlu1 %v10517_v6  ;;  %6061 = vpow2.f32 %v2768_v42  ;;  %v3784_v17 = vmul.f32 1.442695, %v3741_v55  ;;  %12653 = vst [vmem:[#allocation68_spill] sm:$0xff] %v10532_v18 }
 0x638   : > { %v2805_v2 = vpop.xlane.xlu2 %2804  ;;  %v3234_v12 = vmul.f32 %v6054_v44, %v10233_v19 }
 0x639   : > { %6063 = vrcp.f32 %v2805_v2 }
 0x63a   : > { %v6056_v21 = vpop.eup %6055  ;;  %v2451_v31 = vpop.xlane.xlu0 %2450  ;;  %v3266_v54 = vmax.f32 %v3234_v12, 0.001 }
 0x63b   : > { %v2453_v63 = vpop.xlane.xlu1 %2452  ;;  %6065 = vrcp.f32 %v2451_v31  ;;  %v2882_v11 = vmul.f32 %v6056_v21, %v10240_v9  ;;  %v10530_v6 = vpop.eup %6057 }
 0x63c   : > { %4724 = vmatmul.f32.gmra.mxu0 %v3266_v54  ;;  %v10534_v42 = vpop.eup %6059  ;;  %6067 = vpow2.f32 %v3782_v39  ;;  %v10543_v12 = vpop.f32.mrf.mxu3  ;;  %v12656_v54 = vld [vmem:[#allocation137_spill] sm:$0xff] }
 0x63d   : > { %v2914_v7 = vmax.f32 %v2882_v11, 0.001  ;;  %v10536_v19 = vpop.eup %6061  ;;  %6069 = vrcp.f32 %v2453_v63  ;;  %12654 = vst [vmem:[#allocation214_spill] sm:$0xff] %v10543_v12  ;;  %v10549_v48 = vpop.f32.mrf.mxu2 }
 0x63e   : > { %6071 = vpow2.f32 %v4134_v14  ;;  %3494 = vadd.xlane.f32.xlu2 %v10530_v6  ;;  %v12657_v14 = vld [vmem:[#allocation105_spill] sm:$0xff]  ;;  %12658 = vst [vmem:[#allocation212_spill] sm:$0xff] %v10549_v48 }
 0x63f   : > { %4611 = vmatmul.f32.gmra.mxu3 %v2914_v7  ;;  %2480 = vadd.xlane.f32.xlu0 %v10534_v42  ;;  %v6064_v5 = vpop.eup %6063  ;;  %6073 = vpow2.f32 %v3784_v17  ;;  %v4093_v7 = vsub.f32 %v12657_v14, %v12656_v54  ;;  %v4433_v17 = vld [vmem:[#allocation2 + $0x2f8] sm:$0xff]  ;;  %v12663_v14 = vld [vmem:[#allocation229_spill] sm:$0xff] }
 0x640   : > { %2832 = vadd.xlane.f32.xlu1 %v10536_v19  ;;  %v2455_v44 = vpop.xlane.xlu2 %2454  ;;  %v2883_v1 = vmul.f32 %v6064_v5, %v10254_v50  ;;  %v12660_v50 = vld [vmem:[#allocation22_spill] sm:$0xff]  ;;  %4999 = vmatpush.msrb.mxu3 %v4433_v17 }
 0x641   : > { %v6066_v9 = vpop.eup %6065  ;;  %v12661_v5 = vld [vmem:[#allocation54_spill] sm:$0xff]  ;;  %v4136_v54 = vmul.f32 1.442695, %v4093_v7 }
 0x642   : > { %v3157_v55 = vpop.xlane.xlu0 %3156  ;;  %v2530_v2 = vmul.f32 %v6066_v9, %v10256_v32  ;;  %v2915_v21 = vmax.f32 %v2883_v1, 0.001  ;;  %v10545_v39 = vpop.eup %6067  ;;  %v3389_v32 = vsub.f32 %v12661_v5, %v12660_v50  ;;  %v4417_v9 = vld [vmem:[#allocation2 + $0x278] sm:$0xff]  ;;  %v12664_v50 = vld [vmem:[#allocation153_spill] sm:$0xff]  ;;  %v12667_v7 = vld [vmem:[#allocation170_spill] sm:$0xff] }
 0x643   : > { %v3159_v63 = vpop.xlane.xlu1 %3158  ;;  %6075 = vrcp.f32 %v3157_v55  ;;  %12655 = vst [vmem:[#allocation114_spill] sm:$0xff] %v10545_v39  ;;  %v6070_v11 = vpop.eup %6069  ;;  %4886 = vmatpush.msrb.mxu2 %v4417_v9  ;;  %v12669_v9 = vld [vmem:[#allocation176_spill] sm:$0xff] }
 0x644   : > { %v2562_v31 = vmax.f32 %v2530_v2, 0.001  ;;  %v10551_v18 = vpop.eup %6071  ;;  %6077 = vrcp.f32 %v2455_v44  ;;  %v2531_v1 = vmul.f32 %v6070_v11, %v10259_v23  ;;  %v3432_v17 = vmul.f32 1.442695, %v3389_v32  ;;  %v12666_v11 = vld [vmem:[#allocation164_spill] sm:$0xff]  ;;  %v12668_v32 = vld [vmem:[#allocation169_spill] sm:$0xff] }
 0x645   : > { %12659 = vst [vmem:[#allocation228_spill] sm:$0xff] %v10551_v18  ;;  %v10555_v55 = vpop.eup %6073  ;;  %6079 = vrcp.f32 %v3159_v63 }
 0x646   : > { %4498 = vmatmul.f32.gmra.mxu2 %v2562_v31  ;;  %12662 = vst [vmem:[#allocation66_spill] sm:$0xff] %v10555_v55  ;;  %3848 = vadd.xlane.f32.xlu2 %v10555_v55  ;;  %v4094_v31 = vsub.f32 %v12664_v50, %v12663_v14  ;;  %v2563_v48 = vmax.f32 %v2531_v1, 0.001  ;;  %v12672_v50 = vld [vmem:[#allocation26_spill] sm:$0xff] }
 0x647   : > { %4614 = vmatmul.f32.gmra.mxu3 %v2915_v21  ;;  %3846 = vadd.xlane.f32.xlu0 %v10545_v39  ;;  %v10564_v21 = vpop.f32.mrf.mxu3  ;;  %v10568_v39 = vadd.f32 %v12667_v7, %v12666_v11 }
 0x648   : > { %4198 = vadd.xlane.f32.xlu1 %v10551_v18  ;;  %v3161_v5 = vpop.xlane.xlu2 %3160  ;;  %12665 = vst [vmem:[#allocation173_spill] sm:$0xff] %v10564_v21  ;;  %v4138_v23 = vmul.f32 1.442695, %v4094_v31 }
 0x649   : > { %v6076_v2 = vpop.eup %6075 }
 0x64a   : > { %v2807_v12 = vpop.xlane.xlu0 %2806  ;;  %v3235_v44 = vmul.f32 %v6076_v2, %v10279_v58  ;;  %v6078_v55 = vpop.eup %6077  ;;  %v10572_v58 = vadd.f32 %v12669_v9, %v12668_v32 }
 0x64b   : > { %v2809_v63 = vpop.xlane.xlu1 %2808  ;;  %6081 = vrcp.f32 %v2807_v12  ;;  %v6080_v14 = vpop.eup %6079  ;;  %v12671_v12 = vld [vmem:[#allocation174_spill] sm:$0xff]  ;;  %v2532_v1 = vmul.f32 %v6078_v55, %v10277_v51 }
 0x64c   : > { %v3267_v18 = vmax.f32 %v3235_v44, 0.001  ;;  %6083 = vpow2.f32 %v4136_v54  ;;  %v10574_v2 = vpop.f32.mrf.mxu2 }
 0x64d   : > { %6085 = vpow2.f32 %v3432_v17  ;;  %12670 = vst [vmem:[#allocation79_spill] sm:$0xff] %v10574_v2  ;;  %v3236_v17 = vmul.f32 %v6080_v14, %v10284_v20  ;;  %v2564_v51 = vmax.f32 %v2532_v1, 0.001  ;;  %v12678_v2 = vld [vmem:[#allocation16_spill] sm:$0xff]  ;;  %v4432_v14 = vld [vmem:[#allocation2 + $0x2f0] sm:$0xff] }
 0x64e   : > { %4501 = vmatmul.f32.gmra.mxu2 %v2563_v48  ;;  %4727 = vmatmul.f32.gmra.mxu0 %v3267_v18  ;;  %6087 = vrcp.f32 %v2809_v63  ;;  %v12673_v48 = vld [vmem:[#allocation53_spill] sm:$0xff] }
 0x64f   : > { %3700 = vmax.xlane.f32.xlu0 %v10568_v39  ;;  %6089 = vrcp.f32 %v3161_v5  ;;  %3702 = vmax.xlane.f32.xlu2 %v10572_v58  ;;  %v3742_v18 = vsub.f32 %v12673_v48, %v12672_v50  ;;  %v10586_v5 = vpop.f32.mrf.mxu3  ;;  %v3268_v50 = vmax.f32 %v3236_v17, 0.001  ;;  %v12677_v48 = vld [vmem:[#allocation30_spill] sm:$0xff] }
 0x650   : > { %4052 = vmax.xlane.f32.xlu1 %v12671_v12  ;;  %6091 = vpow2.f32 %v4138_v23  ;;  %v2811_v31 = vpop.xlane.xlu2 %2810  ;;  %12675 = vst [vmem:[#allocation82_spill] sm:$0xff] %v10586_v5  ;;  %v3390_v20 = vsub.f32 %v12678_v2, %v12677_v48  ;;  %5000 = vmatpush.msrb.mxu3 %v4432_v14  ;;  %v12689_v14 = vld [vmem:[#allocation178_spill] sm:$0xff] }
 0x651   : > { %v6082_v54 = vpop.eup %6081  ;;  %v3786_v21 = vmul.f32 1.442695, %v3742_v18  ;;  %v12681_v18 = vld [vmem:[#allocation24_spill] sm:$0xff] }
 0x652   : > { %v2457_v44 = vpop.xlane.xlu0 %2456  ;;  %v2884_v63 = vmul.f32 %v6082_v54, %v10294_v0  ;;  %v10584_v11 = vpop.eup %6083  ;;  %v4416_v0 = vld [vmem:[#allocation2 + $0x270] sm:$0xff] }
 0x653   : > { %12674 = vst [vmem:[#allocation120_spill] sm:$0xff] %v10584_v11  ;;  %v2459_v7 = vpop.xlane.xlu1 %2458  ;;  %6093 = vrcp.f32 %v2457_v44  ;;  %v10588_v32 = vpop.eup %6085  ;;  %4887 = vmatpush.msrb.mxu2 %v4416_v0 }
 0x654   : > { %12676 = vst [vmem:[#allocation126_spill] sm:$0xff] %v10588_v32  ;;  %v2916_v55 = vmax.f32 %v2884_v63, 0.001  ;;  %v6088_v9 = vpop.eup %6087  ;;  %6095 = vrcp.f32 %v2811_v31  ;;  %v10594_v5 = vpop.f32.mrf.mxu2  ;;  %v12682_v31 = vld [vmem:[#allocation207_spill] sm:$0xff] }
 0x655   : > { %v6090_v23 = vpop.eup %6089  ;;  %12680 = vst [vmem:[#allocation217_spill] sm:$0xff] %v10594_v5  ;;  %6097 = vrcp.f32 %v2459_v7  ;;  %v2885_v1 = vmul.f32 %v6088_v9, %v10297_v47  ;;  %v3391_v17 = vsub.f32 %v12682_v31, %v12681_v18  ;;  %v3434_v7 = vmul.f32 1.442695, %v3390_v20  ;;  %v12684_v18 = vld [vmem:[#allocation39_spill] sm:$0xff]  ;;  %v12685_v31 = vld [vmem:[#allocation117_spill] sm:$0xff] }
 0x656   : > { %4504 = vmatmul.f32.gmra.mxu2 %v2564_v51  ;;  %4617 = vmatmul.f32.gmra.mxu3 %v2916_v55  ;;  %v10592_v54 = vpop.eup %6091  ;;  %6099 = vpow2.f32 %v3786_v21  ;;  %v3237_v63 = vmul.f32 %v6090_v23, %v10292_v45  ;;  %v12686_v23 = vld [vmem:[#allocation227_spill] sm:$0xff] }
 0x657   : > { %12679 = vst [vmem:[#allocation122_spill] sm:$0xff] %v10592_v54  ;;  %4730 = vmatmul.f32.gmra.mxu0 %v3268_v50  ;;  %4200 = vadd.xlane.f32.xlu0 %v10584_v11  ;;  %v3436_v9 = vmul.f32 1.442695, %v3391_v17  ;;  %v10604_v21 = vpop.f32.mrf.mxu3 }
 0x658   : > { %3496 = vadd.xlane.f32.xlu1 %v10588_v32  ;;  %4202 = vadd.xlane.f32.xlu2 %v10592_v54  ;;  %v2461_v44 = vpop.xlane.xlu2 %2460  ;;  %v2917_v54 = vmax.f32 %v2885_v1, 0.001  ;;  %12683 = vst [vmem:[#allocation101_spill] sm:$0xff] %v10604_v21  ;;  %v3269_v11 = vmax.f32 %v3237_v63, 0.001  ;;  %v3743_v32 = vsub.f32 %v12685_v31, %v12684_v18  ;;  %v12690_v1 = vld [vmem:[#allocation181_spill] sm:$0xff] }
 0x659   : > { %v6094_v2 = vpop.eup %6093  ;;  %v12691_v63 = vld [vmem:[#allocation155_spill] sm:$0xff] }
 0x65a   : > { %v3163_v51 = vpop.xlane.xlu0 %3162  ;;  %v2533_v55 = vmul.f32 %v6094_v2, %v10317_v29  ;;  %v6096_v48 = vpop.eup %6095  ;;  %v12687_v29 = vld [vmem:[#allocation156_spill] sm:$0xff]  ;;  %v3788_v17 = vmul.f32 1.442695, %v3743_v32 }
 0x65b   : > { %v3165_v50 = vpop.xlane.xlu1 %3164  ;;  %6101 = vrcp.f32 %v3163_v51  ;;  %v6098_v47 = vpop.eup %6097  ;;  %v4095_v20 = vsub.f32 %v12687_v29, %v12686_v23 }
 0x65c   : > { %v2565_v5 = vmax.f32 %v2533_v55, 0.001  ;;  %6103 = vpow2.f32 %v3434_v7  ;;  %v10608_v45 = vpop.eup %6099  ;;  %v10612_v0 = vpop.f32.mrf.mxu2  ;;  %v2534_v2 = vmul.f32 %v6098_v47, %v10322_v62  ;;  %v12692_v7 = vld [vmem:[#allocation60_spill] sm:$0xff] }
 0x65d   : > { %12688 = vst [vmem:[#allocation73_spill] sm:$0xff] %v10612_v0  ;;  %6105 = vrcp.f32 %v2461_v44  ;;  %v3744_v51 = vsub.f32 %v12692_v7, %v12691_v63  ;;  %v4140_v18 = vmul.f32 1.442695, %v4095_v20  ;;  %v4431_v20 = vld [vmem:[#allocation2 + $0x2e8] sm:$0xff] }
 0x65e   : > { %4507 = vmatmul.f32.gmra.mxu2 %v2565_v5  ;;  %4620 = vmatmul.f32.gmra.mxu3 %v2917_v54  ;;  %6107 = vrcp.f32 %v3165_v50  ;;  %v2886_v5 = vmul.f32 %v6096_v48, %v10315_v56  ;;  %v2566_v23 = vmax.f32 %v2534_v2, 0.001  ;;  %v12694_v48 = vld [vmem:[#allocation31_spill] sm:$0xff] }
 0x65f   : > { %4733 = vmatmul.f32.gmra.mxu0 %v3269_v11  ;;  %4054 = vmax.xlane.f32.xlu0 %v12689_v14  ;;  %6109 = vpow2.f32 %v3436_v9  ;;  %v10624_v47 = vpop.f32.mrf.mxu3  ;;  %v3790_v32 = vmul.f32 1.442695, %v3744_v51  ;;  %v12695_v9 = vld [vmem:[#allocation179_spill] sm:$0xff] }
 0x660   : > { %3850 = vadd.xlane.f32.xlu1 %v10608_v45  ;;  %4056 = vmax.xlane.f32.xlu2 %v12690_v1  ;;  %v3167_v55 = vpop.xlane.xlu2 %3166  ;;  %v2918_v29 = vmax.f32 %v2886_v5, 0.001  ;;  %12693 = vst [vmem:[#allocation74_spill] sm:$0xff] %v10624_v47  ;;  %v10628_v63 = vadd.f32 %v12695_v9, %v12694_v48 }
 0x661   : > { %v6102_v54 = vpop.eup %6101  ;;  %5001 = vmatpush.msrb.mxu3 %v4431_v20 }
 0x662   : > { %v2813_v44 = vpop.xlane.xlu0 %2812  ;;  %v3238_v11 = vmul.f32 %v6102_v54, %v10333_v53  ;;  %v10622_v31 = vpop.eup %6103  ;;  %v4415_v53 = vld [vmem:[#allocation2 + $0x268] sm:$0xff] }
 0x663   : > { %v2815_v50 = vpop.xlane.xlu1 %2814  ;;  %v6106_v62 = vpop.eup %6105  ;;  %6111 = vrcp.f32 %v2813_v44  ;;  %4888 = vmatpush.msrb.mxu2 %v4415_v53  ;;  %v12700_v53 = vld [vmem:[#allocation10_spill] sm:$0xff] }
 0x664   : > { %v3270_v21 = vmax.f32 %v3238_v11, 0.001  ;;  %v6108_v56 = vpop.eup %6107  ;;  %6113 = vpow2.f32 %v3788_v17  ;;  %v2535_v2 = vmul.f32 %v6106_v62, %v10331_v22  ;;  %v10636_v5 = vpop.f32.mrf.mxu2 }
 0x665   : > { %v10630_v54 = vpop.eup %6109  ;;  %6115 = vpow2.f32 %v4140_v18  ;;  %12696 = vst [vmem:[#allocation121_spill] sm:$0xff] %v10636_v5  ;;  %v3239_v17 = vmul.f32 %v6108_v56, %v10336_v36  ;;  %v12698_v56 = vld [vmem:[#allocation25_spill] sm:$0xff] }
 0x666   : > { %4510 = vmatmul.f32.gmra.mxu2 %v2566_v23  ;;  %4623 = vmatmul.f32.gmra.mxu3 %v2918_v29  ;;  %6117 = vrcp.f32 %v3167_v55  ;;  %v2567_v55 = vmax.f32 %v2535_v2, 0.001 }
 0x667   : > { %4736 = vmatmul.f32.gmra.mxu0 %v3270_v21  ;;  %3498 = vadd.xlane.f32.xlu0 %v10622_v31  ;;  %6119 = vrcp.f32 %v2815_v50  ;;  %v10644_v22 = vpop.f32.mrf.mxu3  ;;  %v3271_v50 = vmax.f32 %v3239_v17, 0.001 }
 0x668   : > { %3704 = vmax.xlane.f32.xlu1 %v10628_v63  ;;  %3500 = vadd.xlane.f32.xlu2 %v10630_v54  ;;  %6121 = vpow2.f32 %v3790_v32  ;;  %v2817_v7 = vpop.xlane.xlu2 %2816  ;;  %12697 = vst [vmem:[#allocation77_spill] sm:$0xff] %v10644_v22  ;;  %v12699_v32 = vld [vmem:[#allocation123_spill] sm:$0xff] }
 0x669   : > { %v6112_v21 = vpop.eup %6111  ;;  %v4096_v48 = vsub.f32 %v12699_v32, %v12698_v56  ;;  %v12703_v56 = vld [vmem:[#allocation177_spill] sm:$0xff]  ;;  %v12704_v32 = vld [vmem:[#allocation128_spill] sm:$0xff] }
 0x66a   : > { %v2463_v51 = vpop.xlane.xlu0 %2462  ;;  %v10639_v11 = vpop.eup %6113  ;;  %v2887_v18 = vmul.f32 %v6112_v21, %v10354_v33  ;;  %v12701_v33 = vld [vmem:[#allocation18_spill] sm:$0xff] }
 0x66b   : > { %v2465_v44 = vpop.xlane.xlu1 %2464  ;;  %v10642_v23 = vpop.eup %6115  ;;  %6123 = vrcp.f32 %v2463_v51  ;;  %v3392_v20 = vsub.f32 %v12701_v33, %v12700_v53  ;;  %v4097_v53 = vsub.f32 %v12704_v32, %v12703_v56 }
 0x66c   : > { %v6118_v29 = vpop.eup %6117  ;;  %v2919_v36 = vmax.f32 %v2887_v18, 0.001  ;;  %6125 = vrcp.f32 %v2817_v7  ;;  %v10654_v2 = vpop.f32.mrf.mxu2 }
 0x66d   : > { %v6120_v62 = vpop.eup %6119  ;;  %12702 = vst [vmem:[#allocation220_spill] sm:$0xff] %v10654_v2  ;;  %6127 = vrcp.f32 %v2465_v44  ;;  %v3240_v17 = vmul.f32 %v6118_v29, %v10356_v52  ;;  %v12705_v44 = vld [vmem:[#allocation84_spill] sm:$0xff] }
 0x66e   : > { %4513 = vmatmul.f32.gmra.mxu2 %v2567_v55  ;;  %v10649_v9 = vpop.eup %6121  ;;  %4626 = vmatmul.f32.gmra.mxu3 %v2919_v36  ;;  %v2888_v55 = vmul.f32 %v6120_v62, %v10358_v38  ;;  %v3438_v36 = vmul.f32 1.442695, %v3392_v20  ;;  %v12706_v2 = vld [vmem:[#allocation184_spill] sm:$0xff] }
 0x66f   : > { %4739 = vmatmul.f32.gmra.mxu0 %v3271_v50  ;;  %3852 = vadd.xlane.f32.xlu0 %v10639_v11  ;;  %v4142_v50 = vmul.f32 1.442695, %v4096_v48  ;;  %v3272_v22 = vmax.f32 %v3240_v17, 0.001  ;;  %v10664_v47 = vadd.f32 %v12706_v2, %v12705_v44  ;;  %v4414_v52 = vld [vmem:[#allocation2 + $0x260] sm:$0xff]  ;;  %v10666_v56 = vpop.f32.mrf.mxu3 }
 0x670   : > { %4204 = vadd.xlane.f32.xlu1 %v10642_v23  ;;  %3854 = vadd.xlane.f32.xlu2 %v10649_v9  ;;  %v2467_v51 = vpop.xlane.xlu2 %2466  ;;  %v4430_v29 = vld [vmem:[#allocation2 + $0x2e0] sm:$0xff]  ;;  %v2920_v38 = vmax.f32 %v2888_v55, 0.001  ;;  %v4144_v48 = vmul.f32 1.442695, %v4097_v53  ;;  %12707 = vst [vmem:[#allocation80_spill] sm:$0xff] %v10666_v56 }
 0x671   : > { %v6124_v18 = vpop.eup %6123  ;;  %4889 = vmatpush.msrb.mxu2 %v4414_v52  ;;  %5002 = vmatpush.msrb.mxu3 %v4430_v29  ;;  %v12709_v20 = vld [vmem:[#allocation188_spill] sm:$0xff] }
 0x672   : > { %v3169_v21 = vpop.xlane.xlu0 %3168  ;;  %v2536_v33 = vmul.f32 %v6124_v18, %v10374_v46  ;;  %v6126_v5 = vpop.eup %6125  ;;  %v12708_v46 = vld [vmem:[#allocation183_spill] sm:$0xff]  ;;  %v12710_v2 = vld [vmem:[#allocation8_spill] sm:$0xff] }
 0x673   : > { %v3171_v7 = vpop.xlane.xlu1 %3170  ;;  %6129 = vrcp.f32 %v3169_v21  ;;  %v6128_v62 = vpop.eup %6127  ;;  %v10671_v17 = vadd.f32 %v12709_v20, %v12708_v46  ;;  %v12711_v21 = vld [vmem:[#allocation83_spill] sm:$0xff]  ;;  %v12768_v56 = vld [vmem:[#allocation200_spill] sm:$0xff] }
 0x674   : > { %v2568_v0 = vmax.f32 %v2536_v33, 0.001  ;;  %6131 = vpow2.f32 %v4142_v50  ;;  %v3745_v18 = vsub.f32 %v12711_v21, %v12710_v2  ;;  %v10675_v55 = vpop.f32.mrf.mxu2  ;;  %v12713_v50 = vld [vmem:[#allocation186_spill] sm:$0xff]  ;;  %v2537_v53 = vmul.f32 %v6128_v62, %v10380_v43  ;;  %v12714_v2 = vld [vmem:[#allocation33_spill] sm:$0xff] }
 0x675   : > { %6133 = vpow2.f32 %v3438_v36  ;;  %12712 = vst [vmem:[#allocation76_spill] sm:$0xff] %v10675_v55  ;;  %v2889_v33 = vmul.f32 %v6126_v5, %v10376_v26  ;;  %v12715_v21 = vld [vmem:[#allocation125_spill] sm:$0xff] }
 0x676   : > { %4516 = vmatmul.f32.gmra.mxu2 %v2568_v0  ;;  %4629 = vmatmul.f32.gmra.mxu3 %v2920_v38  ;;  %6135 = vrcp.f32 %v2467_v51  ;;  %v3792_v52 = vmul.f32 1.442695, %v3745_v18  ;;  %v2569_v38 = vmax.f32 %v2537_v53, 0.001  ;;  %v3393_v43 = vsub.f32 %v12715_v21, %v12714_v2 }
 0x677   : > { %4742 = vmatmul.f32.gmra.mxu0 %v3272_v22  ;;  %3706 = vmax.xlane.f32.xlu0 %v10664_v47  ;;  %6137 = vrcp.f32 %v3171_v7  ;;  %v2921_v46 = vmax.f32 %v2889_v33, 0.001  ;;  %v10688_v62 = vpop.f32.mrf.mxu3  ;;  %v12717_v33 = vld [vmem:[#allocation143_spill] sm:$0xff] }
 0x678   : > { %4058 = vmax.xlane.f32.xlu1 %v12713_v50  ;;  %3708 = vmax.xlane.f32.xlu2 %v10671_v17  ;;  %v3173_v22 = vpop.xlane.xlu2 %3172  ;;  %6139 = vpow2.f32 %v4144_v48  ;;  %12716 = vst [vmem:[#allocation89_spill] sm:$0xff] %v10688_v62  ;;  %v3440_v53 = vmul.f32 1.442695, %v3393_v43 }
 0x679   : > { %v6130_v36 = vpop.eup %6129 }
 0x67a   : > { %v2819_v32 = vpop.xlane.xlu0 %2818  ;;  %v3241_v0 = vmul.f32 %v6130_v36, %v10392_v10  ;;  %v10682_v29 = vpop.eup %6131  ;;  %v12718_v36 = vld [vmem:[#allocation130_spill] sm:$0xff] }
 0x67b   : > { %v2821_v44 = vpop.xlane.xlu1 %2820  ;;  %6141 = vrcp.f32 %v2819_v32  ;;  %v10684_v51 = vpop.eup %6133 }
 0x67c   : > { %v3273_v7 = vmax.f32 %v3241_v0, 0.001  ;;  %v6136_v20 = vpop.eup %6135  ;;  %6143 = vpow2.f32 %v3792_v52  ;;  %v3394_v52 = vsub.f32 %v12718_v36, %v12717_v33  ;;  %v10698_v0 = vpop.f32.mrf.mxu2  ;;  %v12721_v36 = vld [vmem:[#allocation190_spill] sm:$0xff] }
 0x67d   : > { %v6138_v26 = vpop.eup %6137  ;;  %6145 = vrcp.f32 %v2821_v44  ;;  %v2538_v18 = vmul.f32 %v6136_v20, %v10394_v60  ;;  %12719 = vst [vmem:[#allocation75_spill] sm:$0xff] %v10698_v0 }
 0x67e   : > { %4519 = vmatmul.f32.gmra.mxu2 %v2569_v38  ;;  %4632 = vmatmul.f32.gmra.mxu3 %v2921_v46  ;;  %v10691_v10 = vpop.eup %6139  ;;  %6147 = vrcp.f32 %v3173_v22  ;;  %v3242_v44 = vmul.f32 %v6138_v26, %v10396_v59  ;;  %v3442_v20 = vmul.f32 1.442695, %v3394_v52  ;;  %v4413_v59 = vld [vmem:[#allocation2 + $0x258] sm:$0xff] }
 0x67f   : > { %4206 = vadd.xlane.f32.xlu0 %v10682_v29  ;;  %4745 = vmatmul.f32.gmra.mxu0 %v3273_v7  ;;  %v10702_v7 = vpop.f32.mrf.mxu0  ;;  %v2570_v2 = vmax.f32 %v2538_v18, 0.001  ;;  %v10706_v43 = vpop.f32.mrf.mxu3  ;;  %v12722_v26 = vld [vmem:[#allocation195_spill] sm:$0xff] }
 0x680   : > { %3502 = vadd.xlane.f32.xlu1 %v10684_v51  ;;  %4208 = vadd.xlane.f32.xlu2 %v10691_v10  ;;  %v2823_v5 = vpop.xlane.xlu2 %2822  ;;  %12720 = vst [vmem:[#allocation13_spill] sm:$0xff] %v10706_v43  ;;  %v3274_v33 = vmax.f32 %v3242_v44, 0.001 }
 0x681   : > { %v6142_v32 = vpop.eup %6141  ;;  %4890 = vmatpush.msrb.mxu2 %v4413_v59  ;;  %v12724_v59 = vld [vmem:[#allocation43_spill] sm:$0xff] }
 0x682   : > { %v2469_v48 = vpop.xlane.xlu0 %2468  ;;  %v2890_v46 = vmul.f32 %v6142_v32, %v10412_v35  ;;  %v10704_v22 = vpop.eup %6143  ;;  %v4429_v35 = vld [vmem:[#allocation2 + $0x2d8] sm:$0xff] }
 0x683   : > { %v2471_v38 = vpop.xlane.xlu1 %2470  ;;  %6149 = vrcp.f32 %v2469_v48  ;;  %v6146_v60 = vpop.eup %6145  ;;  %5003 = vmatpush.msrb.mxu3 %v4429_v35  ;;  %v4412_v35 = vld [vmem:[#allocation2 + $0x250] sm:$0xff] }
 0x684   : > { %v2922_v21 = vmax.f32 %v2890_v46, 0.001  ;;  %6151 = vpow2.f32 %v3440_v53  ;;  %v6148_v62 = vpop.eup %6147  ;;  %v2891_v32 = vmul.f32 %v6146_v60, %v10418_v4  ;;  %v10712_v52 = vpop.f32.mrf.mxu2  ;;  %4891 = vmatpush.msrb.mxu2 %v4412_v35 }
 0x685   : > { %6153 = vrcp.f32 %v2823_v5  ;;  %12723 = vst [vmem:[#allocation163_spill] sm:$0xff] %v10712_v52  ;;  %v3243_v44 = vmul.f32 %v6148_v62, %v10414_v34  ;;  %v12767_v52 = vld [vmem:[#allocation196_spill] sm:$0xff] }
 0x686   : > { %4522 = vmatmul.f32.gmra.mxu2 %v2570_v2  ;;  %4635 = vmatmul.f32.gmra.mxu3 %v2922_v21  ;;  %6155 = vrcp.f32 %v2471_v38  ;;  %v2923_v43 = vmax.f32 %v2891_v32, 0.001 }
 0x687   : > { %4060 = vmax.xlane.f32.xlu0 %v12721_v36  ;;  %4748 = vmatmul.f32.gmra.mxu0 %v3274_v33  ;;  %6157 = vpow2.f32 %v3442_v20  ;;  %v10718_v2 = vpop.f32.mrf.mxu0  ;;  %v3275_v60 = vmax.f32 %v3243_v44, 0.001  ;;  %v12725_v20 = vld [vmem:[#allocation193_spill] sm:$0xff] }
 0x688   : > { %3856 = vadd.xlane.f32.xlu1 %v10704_v22  ;;  %4062 = vmax.xlane.f32.xlu2 %v12722_v26  ;;  %v2473_v48 = vpop.xlane.xlu2 %2472  ;;  %v10722_v0 = vadd.f32 %v12725_v20, %v12724_v59 }
 0x689   : > { %v6150_v53 = vpop.eup %6149 }
 0x68a   : > { %v3175_v18 = vpop.xlane.xlu0 %3174  ;;  %v2539_v38 = vmul.f32 %v6150_v53, %v10428_v13  ;;  %v10716_v46 = vpop.eup %6151 }
 0x68b   : > { %v3177_v5 = vpop.xlane.xlu1 %3176  ;;  %6159 = vrcp.f32 %v3175_v18  ;;  %v6154_v21 = vpop.eup %6153  ;;  %v4428_v18 = vld [vmem:[#allocation2 + $0x2d0] sm:$0xff] }
 0x68c   : > { %v2571_v33 = vmax.f32 %v2539_v38, 0.001  ;;  %v6156_v4 = vpop.eup %6155  ;;  %v10727_v13 = vpop.f32.mrf.mxu3  ;;  %6161 = vrcp.f32 %v2473_v48  ;;  %v2892_v62 = vmul.f32 %v6154_v21, %v10430_v28  ;;  %5004 = vmatpush.msrb.mxu3 %v4428_v18  ;;  %v4411_v21 = vld [vmem:[#allocation2 + $0x248] sm:$0xff] }
 0x68d   : > { %v10725_v34 = vpop.eup %6157  ;;  %12726 = vst [vmem:[#allocation23_spill] sm:$0xff] %v10727_v13  ;;  %6163 = vrcp.f32 %v3177_v5  ;;  %v2540_v44 = vmul.f32 %v6156_v4, %v10432_v37  ;;  %v10733_v38 = vpop.f32.mrf.mxu2  ;;  %v4427_v5 = vld [vmem:[#allocation2 + $0x2c8] sm:$0xff]  ;;  %4892 = vmatpush.msrb.mxu2 %v4411_v21  ;;  %v4410_v13 = vld [vmem:[#allocation2 + $0x240] sm:$0xff] }
 0x68e   : > { %4525 = vmatmul.f32.gmra.mxu2 %v2571_v33  ;;  %4638 = vmatmul.f32.gmra.mxu3 %v2923_v43  ;;  %12727 = vst [vmem:[#allocation85_spill] sm:$0xff] %v10733_v38  ;;  %v2924_v28 = vmax.f32 %v2892_v62, 0.001  ;;  %v4426_v4 = vld [vmem:[#allocation2 + $0x2c0] sm:$0xff] }
 0x68f   : > { %3504 = vadd.xlane.f32.xlu0 %v10716_v46  ;;  %4751 = vmatmul.f32.gmra.mxu0 %v3275_v60  ;;  %v10736_v60 = vpop.f32.mrf.mxu0  ;;  %v2572_v59 = vmax.f32 %v2540_v44, 0.001 }
 0x690   : > { %3710 = vmax.xlane.f32.xlu1 %v10722_v0  ;;  %3506 = vadd.xlane.f32.xlu2 %v10725_v34  ;;  %v3179_v32 = vpop.xlane.xlu2 %3178 }
 0x691   : > { %v6160_v43 = vpop.eup %6159  ;;  %5005 = vmatpush.msrb.mxu3 %v4427_v5  ;;  %4893 = vmatpush.msrb.mxu2 %v4410_v13  ;;  %v4407_v13 = vld [vmem:[#allocation2 + $0x228] sm:$0xff] }
 0x692   : > { %v2825_v53 = vpop.xlane.xlu0 %2824  ;;  %v3244_v48 = vmul.f32 %v6160_v43, %v10448_v16  ;;  %v6162_v37 = vpop.eup %6161  ;;  %v4409_v16 = vld [vmem:[#allocation2 + $0x238] sm:$0xff] }
 0x693   : > { %v2827_v33 = vpop.xlane.xlu1 %2826  ;;  %6165 = vrcp.f32 %v2825_v53  ;;  %v6164_v35 = vpop.eup %6163  ;;  %v4425_v53 = vld [vmem:[#allocation2 + $0x2b8] sm:$0xff]  ;;  %v2541_v44 = vmul.f32 %v6162_v37, %v10450_v3  ;;  %5006 = vmatpush.msrb.mxu3 %v4426_v4  ;;  %4894 = vmatpush.msrb.mxu2 %v4409_v16  ;;  %v4423_v3 = vld [vmem:[#allocation2 + $0x2a8] sm:$0xff] }
 0x694   : > { %v3276_v20 = vmax.f32 %v3244_v48, 0.001  ;;  %6167 = vrcp.f32 %v2827_v33  ;;  %v10738_v18 = vpop.f32.mrf.mxu3  ;;  %v4408_v48 = vld [vmem:[#allocation2 + $0x230] sm:$0xff]  ;;  %v3245_v38 = vmul.f32 %v6164_v35, %v10454_v57  ;;  %v4406_v57 = vld [vmem:[#allocation2 + $0x220] sm:$0xff] }
 0x695   : > { %12728 = vst [vmem:[#allocation88_spill] sm:$0xff] %v10738_v18  ;;  %6169 = vrcp.f32 %v3179_v32  ;;  %v4424_v33 = vld [vmem:[#allocation2 + $0x2b0] sm:$0xff]  ;;  %5007 = vmatpush.msrb.mxu3 %v4425_v53  ;;  %4895 = vmatpush.msrb.mxu2 %v4408_v48 }
 0x696   : > { %4528 = vmatmul.f32.gmra.mxu2 %v2572_v59  ;;  %4641 = vmatmul.f32.gmra.mxu3 %v2924_v28  ;;  %v10743_v59 = vpop.f32.mrf.mxu2  ;;  %v3277_v4 = vmax.f32 %v3245_v38, 0.001 }
 0x697   : > { %4754 = vmatmul.f32.gmra.mxu0 %v3276_v20  ;;  %12729 = vst [vmem:[#allocation87_spill] sm:$0xff] %v10743_v59  ;;  %v2573_v20 = vmax.f32 %v2541_v44, 0.001  ;;  %5008 = vmatpush.msrb.mxu3 %v4424_v33  ;;  %v10745_v37 = vpop.f32.mrf.mxu0 }
 0x698   : > { %v2829_v62 = vpop.xlane.xlu2 %2828  ;;  %4896 = vmatpush.msrb.mxu2 %v4407_v13  ;;  %v4420_v13 = vld [vmem:[#allocation2 + $0x290] sm:$0xff] }
 0x699   : > { %v6166_v21 = vpop.eup %6165  ;;  %5009 = vmatpush.msrb.mxu3 %v4423_v3 }
 0x69a   : > { %v2475_v43 = vpop.xlane.xlu0 %2474  ;;  %v2893_v28 = vmul.f32 %v6166_v21, %v10465_v27  ;;  %v6168_v32 = vpop.eup %6167  ;;  %v4422_v27 = vld [vmem:[#allocation2 + $0x2a0] sm:$0xff]  ;;  %4897 = vmatpush.msrb.mxu2 %v4406_v57  ;;  %v4421_v21 = vld [vmem:[#allocation2 + $0x298] sm:$0xff] }
 0x69b   : > { %v2477_v5 = vpop.xlane.xlu1 %2476  ;;  %6171 = vrcp.f32 %v2475_v43  ;;  %v6170_v35 = vpop.eup %6169  ;;  %v2894_v53 = vmul.f32 %v6168_v32, %v10469_v61  ;;  %v4405_v43 = vld [vmem:[#allocation2 + $0x218] sm:$0xff]  ;;  %5010 = vmatpush.msrb.mxu3 %v4422_v27  ;;  %v4418_v27 = vld [vmem:[#allocation2 + $0x280] sm:$0xff] }
 0x69c   : > { %v2925_v18 = vmax.f32 %v2893_v28, 0.001  ;;  %6173 = vrcp.f32 %v2829_v62  ;;  %v10747_v16 = vpop.f32.mrf.mxu3  ;;  %v3246_v28 = vmul.f32 %v6170_v35, %v10467_v41  ;;  %v4404_v62 = vld [vmem:[#allocation2 + $0x210] sm:$0xff]  ;;  %4898 = vmatpush.msrb.mxu2 %v4405_v43 }
 0x69d   : > { %12730 = vst [vmem:[#allocation90_spill] sm:$0xff] %v10747_v16  ;;  %6175 = vrcp.f32 %v2477_v5  ;;  %v2926_v61 = vmax.f32 %v2894_v53, 0.001  ;;  %5011 = vmatpush.msrb.mxu3 %v4421_v21 }
 0x69e   : > { %4531 = vmatmul.f32.gmra.mxu2 %v2573_v20  ;;  %4644 = vmatmul.f32.gmra.mxu3 %v2925_v18  ;;  %v10755_v41 = vpop.f32.mrf.mxu2  ;;  %v3278_v35 = vmax.f32 %v3246_v28, 0.001 }
 0x69f   : > { %4757 = vmatmul.f32.gmra.mxu0 %v3277_v4  ;;  %4899 = vmatpush.msrb.mxu2 %v4404_v62  ;;  %v4403_v4 = vld [vmem:[#allocation2 + $0x208] sm:$0xff]  ;;  %v10753_v16 = vpop.f32.mrf.mxu0  ;;  %12732 = vst [vmem:[#allocation37_spill] sm:$0xff] %v10755_v41 }
 0x6a0   : > { %12731 = vst [vmem:[#allocation94_spill] sm:$0xff] %v10753_v16  ;;  %5012 = vmatpush.msrb.mxu3 %v4420_v13 }
 0x6a1   : > { %v2479_v44 = vpop.xlane.xlu2 %2478  ;;  %v6172_v38 = vpop.eup %6171  ;;  %4900 = vmatpush.msrb.mxu2 %v4403_v4 }
 0x6a2   : > { %v3181_v48 = vpop.xlane.xlu0 %3180  ;;  %v2542_v5 = vmul.f32 %v6172_v38, %v10478_v25  ;;  %v6174_v32 = vpop.eup %6173  ;;  %v4402_v25 = vld [vmem:[#allocation2 + $0x200] sm:$0xff] }
 0x6a3   : > { %v3699_v33 = vpop.xlane.xlu1 %3698  ;;  %6177 = vrcp.f32 %v3181_v48  ;;  %v6176_v57 = vpop.eup %6175  ;;  %v2895_v38 = vmul.f32 %v6174_v32, %v10480_v30  ;;  %4901 = vmatpush.msrb.mxu2 %v4402_v25 }
 0x6a4   : > { %v3746_v18 = vsub.f32 %v10501_v8, %v3699_v33  ;;  %v2574_v3 = vmax.f32 %v2542_v5, 0.001  ;;  %v4419_v8 = vld [vmem:[#allocation2 + $0x288] sm:$0xff]  ;;  %v2543_v21 = vmul.f32 %v6176_v57, %v10482_v40  ;;  %v10759_v33 = vpop.f32.mrf.mxu3  ;;  %v12736_v57 = vld [vmem:[#allocation135_spill] sm:$0xff] }
 0x6a5   : > { %5013 = vmatpush.msrb.mxu3 %v4419_v8  ;;  %12733 = vst [vmem:[#allocation97_spill] sm:$0xff] %v10759_v33  ;;  %v2927_v40 = vmax.f32 %v2895_v38, 0.001  ;;  %v12739_v38 = vld [vmem:[#allocation47_spill] sm:$0xff] }
 0x6a6   : > { %v3794_v20 = vmul.f32 1.442695, %v3746_v18  ;;  %4534 = vmatmul.f32.gmra.mxu2 %v2574_v3  ;;  %4647 = vmatmul.f32.gmra.mxu3 %v2926_v61  ;;  %v2575_v61 = vmax.f32 %v2543_v21, 0.001  ;;  %v10767_v32 = vpop.f32.mrf.mxu2 }
 0x6a7   : > { %4760 = vmatmul.f32.gmra.mxu0 %v3278_v35  ;;  %5014 = vmatpush.msrb.mxu3 %v4418_v27  ;;  %v10765_v30 = vpop.f32.mrf.mxu0  ;;  %12735 = vst [vmem:[#allocation108_spill] sm:$0xff] %v10767_v32  ;;  %v12737_v27 = vld [vmem:[#allocation64_spill] sm:$0xff] }
 0x6a8   : > { %6179 = vpow2.f32 %v3794_v20  ;;  %12734 = vst [vmem:[#allocation96_spill] sm:$0xff] %v10765_v30 }
 0x6a9   : > { %6181 = vrcp.f32 %v2479_v44  ;;  %v6178_v53 = vpop.eup %6177  ;;  %v4051_v43 = vpop.xlane.xlu2 %4050 }
 0x6aa   : > { %v2831_v48 = vpop.xlane.xlu0 %2830  ;;  %v4098_v62 = vsub.f32 %v12647_v24, %v4051_v43  ;;  %v3247_v18 = vmul.f32 %v6178_v53, %v10497_v15 }
 0x6ab   : > { %v3183_v28 = vpop.xlane.xlu1 %3182  ;;  %6183 = vrcp.f32 %v2831_v48 }
 0x6ac   : > { %6185 = vrcp.f32 %v3183_v28  ;;  %v4146_v44 = vmul.f32 1.442695, %v4098_v62  ;;  %v3279_v5 = vmax.f32 %v3247_v18, 0.001  ;;  %v10775_v21 = vpop.f32.mrf.mxu3  ;;  %v12740_v28 = vld [vmem:[#allocation197_spill] sm:$0xff] }
 0x6ad   : > { %12738 = vst [vmem:[#allocation147_spill] sm:$0xff] %v10775_v21  ;;  %v10779_v62 = vadd.f32 %v12740_v28, %v12739_v38 }
 0x6ae   : > { %v10763_v13 = vpop.eup %6179  ;;  %6187 = vpow2.f32 %v4146_v44  ;;  %4537 = vmatmul.f32.gmra.mxu2 %v2575_v61  ;;  %4650 = vmatmul.f32.gmra.mxu3 %v2927_v40  ;;  %v12741_v44 = vld [vmem:[#allocation38_spill] sm:$0xff]  ;;  %v12743_v40 = vld [vmem:[#allocation28_spill] sm:$0xff] }
 0x6af   : > { %v6182_v20 = vpop.eup %6181  ;;  %3858 = vadd.xlane.f32.xlu0 %v10763_v13  ;;  %4763 = vmatmul.f32.gmra.mxu0 %v3279_v5  ;;  %v12742_v5 = vld [vmem:[#allocation138_spill] sm:$0xff] }
 0x6b0   : > { %v2544_v4 = vmul.f32 %v6182_v20, %v10495_v49  ;;  %v3395_v61 = vsub.f32 %v12742_v5, %v12741_v44  ;;  %v12748_v5 = vld [vmem:[#allocation199_spill] sm:$0xff] }
 0x6b1   : > { %v6184_v15 = vpop.eup %6183  ;;  %v3495_v25 = vpop.xlane.xlu2 %3494 }
 0x6b2   : > { %v6186_v24 = vpop.eup %6185  ;;  %v2481_v3 = vpop.xlane.xlu0 %2480  ;;  %v2896_v35 = vmul.f32 %v6184_v15, %v12736_v57  ;;  %v2576_v49 = vmax.f32 %v2544_v4, 0.001  ;;  %v12744_v15 = vld [vmem:[#allocation154_spill] sm:$0xff] }
 0x6b3   : > { %v2833_v8 = vpop.xlane.xlu1 %2832  ;;  %6189 = vrcp.f32 %v2481_v3  ;;  %v3248_v53 = vmul.f32 %v6186_v24, %v12737_v27  ;;  %v10787_v24 = vpop.f32.mrf.mxu0 }
 0x6b4   : > { %6191 = vrcp.f32 %v2833_v8  ;;  %v2928_v43 = vmax.f32 %v2896_v35, 0.001  ;;  %v10773_v48 = vpop.eup %6187  ;;  %12745 = vst [vmem:[#allocation99_spill] sm:$0xff] %v10787_v24  ;;  %v10789_v3 = vpop.f32.mrf.mxu2 }
 0x6b5   : > { %6193 = vrcp.f32 %v3495_v25  ;;  %v3280_v18 = vmax.f32 %v3248_v53, 0.001  ;;  %4210 = vadd.xlane.f32.xlu1 %v10773_v48  ;;  %12746 = vst [vmem:[#allocation15_spill] sm:$0xff] %v10789_v3  ;;  %v3444_v25 = vmul.f32 1.442695, %v3395_v61 }
 0x6b6   : > { %6195 = vrcp.f32 %v12743_v40  ;;  %4540 = vmatmul.f32.gmra.mxu2 %v2576_v49  ;;  %4653 = vmatmul.f32.gmra.mxu3 %v2928_v43 }
 0x6b7   : > { %3712 = vmax.xlane.f32.xlu0 %v10779_v62  ;;  %6197 = vrcp.f32 %v12744_v15  ;;  %4766 = vmatmul.f32.gmra.mxu0 %v3280_v18 }
 0x6b8   : > { %6199 = vpow2.f32 %v3444_v25 }
 0x6b9   : > { %v6190_v20 = vpop.eup %6189  ;;  %v10796_v53 = vpop.xlane.xlu2 %3848 }
 0x6ba   : > { %v6192_v57 = vpop.eup %6191  ;;  %v10791_v35 = vpop.xlane.xlu0 %3846  ;;  %v2545_v4 = vmul.f32 %v6190_v20, %v10534_v42  ;;  %v12749_v42 = vld [vmem:[#allocation157_spill] sm:$0xff]  ;;  %v12750_v20 = vld [vmem:[#allocation36_spill] sm:$0xff] }
 0x6bb   : > { %v6194_v8 = vpop.eup %6193  ;;  %v10794_v27 = vpop.xlane.xlu1 %4198  ;;  %v2897_v43 = vmul.f32 %v6192_v57, %v10536_v19  ;;  %6201 = vrcp.f32 %v12750_v20  ;;  %v12752_v19 = vld [vmem:[#allocation32_spill] sm:$0xff] }
 0x6bc   : > { %v2577_v38 = vmax.f32 %v2545_v4, 0.001  ;;  %v3580_v28 = vmul.f32 %v6194_v8, %v10530_v6  ;;  %v10800_v49 = vpop.f32.mrf.mxu3  ;;  %v6196_v18 = vpop.eup %6195  ;;  %6203 = vrcp.f32 %v12752_v19  ;;  %v12753_v6 = vld [vmem:[#allocation34_spill] sm:$0xff] }
 0x6bd   : > { %12747 = vst [vmem:[#allocation194_spill] sm:$0xff] %v10800_v49  ;;  %v2929_v44 = vmax.f32 %v2897_v43, 0.001  ;;  %4064 = vmax.xlane.f32.xlu1 %v12748_v5  ;;  %v6198_v15 = vpop.eup %6197  ;;  %v4274_v61 = vmul.f32 %v6196_v18, %v12749_v42  ;;  %v10805_v21 = vpop.f32.mrf.mxu2  ;;  %v12754_v49 = vld [vmem:[#allocation42_spill] sm:$0xff] }
 0x6be   : > { %v3612_v40 = vmax.f32 %v3580_v28, 0.001  ;;  %4543 = vmatmul.f32.gmra.mxu2 %v2577_v38  ;;  %12751 = vst [vmem:[#allocation185_spill] sm:$0xff] %v10805_v21  ;;  %v3922_v57 = vmul.f32 %v6198_v15, %v12753_v6  ;;  %6205 = vrcp.f32 %v12754_v49  ;;  %v12757_v49 = vld [vmem:[#allocation224_spill] sm:$0xff] }
 0x6bf   : > { %4656 = vmatmul.f32.gmra.mxu3 %v2929_v44  ;;  %v10812_v44 = vpop.eup %6199  ;;  %v4306_v18 = vmax.f32 %v4274_v61, 0.001 }
 0x6c0   : > { %4819 = vmatmul.f32.gmra.mxu1 %v3612_v40  ;;  %v3954_v20 = vmax.f32 %v3922_v57, 0.001 }
 0x6c1   : > { %v6202_v15 = vpop.eup %6201 }
 0x6c2   : > { %v3701_v4 = vpop.xlane.xlu0 %3700  ;;  %v3703_v43 = vpop.xlane.xlu2 %3702  ;;  %v3923_v57 = vmul.f32 %v6202_v15, %v12757_v49 }
 0x6c3   : > { %v4053_v8 = vpop.xlane.xlu1 %4052  ;;  %v3747_v28 = vsub.f32 %v10568_v39, %v3701_v4  ;;  %v3748_v38 = vsub.f32 %v10572_v58, %v3703_v43  ;;  %v6204_v21 = vpop.eup %6203  ;;  %v12755_v58 = vld [vmem:[#allocation209_spill] sm:$0xff]  ;;  %v12758_v43 = vld [vmem:[#allocation159_spill] sm:$0xff] }
 0x6c4   : > { %v4099_v25 = vsub.f32 %v12671_v12, %v4053_v8  ;;  %v4612_v6 = vpop.f32.mrf.mxu3 }
 0x6c5   : > { %v3796_v42 = vmul.f32 1.442695, %v3747_v28  ;;  %v3798_v19 = vmul.f32 1.442695, %v3748_v38  ;;  %3508 = vadd.xlane.f32.xlu1 %v10812_v44  ;;  %v4275_v28 = vmul.f32 %v6204_v21, %v12758_v43  ;;  %v12761_v21 = vld [vmem:[#allocation145_spill] sm:$0xff] }
 0x6c6   : > { %v4148_v40 = vmul.f32 1.442695, %v4099_v25  ;;  %4902 = vmatmul.f32.vlgmr.msrb.gmra.mxu2 %v3954_v20  ;;  %v6206_v25 = vpop.eup %6205  ;;  %v12760_v20 = vld [vmem:[#allocation166_spill] sm:$0xff]  ;;  %v12762_v43 = vld [vmem:[#allocation149_spill] sm:$0xff] }
 0x6c7   : > { %6207 = vpow2.f32 %v3796_v42  ;;  %5015 = vmatmul.f32.vlgmr.msrb.gmra.mxu3 %v4306_v18  ;;  %v12759_v42 = vld [vmem:[#allocation144_spill] sm:$0xff]  ;;  %v4307_v15 = vmax.f32 %v4275_v28, 0.001 }
 0x6c8   : > { %6209 = vpow2.f32 %v4148_v40  ;;  %v3396_v40 = vsub.f32 %v12760_v20, %v12759_v42 }
 0x6c9   : > { %6211 = vpow2.f32 %v3798_v19  ;;  %v4499_v39 = vpop.f32.mrf.mxu2  ;;  %v3955_v19 = vmax.f32 %v3923_v57, 0.001 }
 0x6ca   : > { %6213 = vrcp.f32 %v12755_v58  ;;  %v10817_v12 = vadd.f32 %v4612_v6, %v4499_v39  ;;  %v10819_v61 = vpop.xlane.xlu0 %4200  ;;  %v3446_v57 = vmul.f32 1.442695, %v3396_v40 }
 0x6cb   : > { %v3497_v4 = vpop.xlane.xlu1 %3496  ;;  %v10822_v8 = vpop.xlane.xlu2 %4202 }
 0x6cc   : > { %12756 = vst [vmem:[#allocation58_spill] sm:$0xff] %v10817_v12  ;;  %6215 = vrcp.f32 %v3497_v4  ;;  %v4615_v58 = vpop.f32.mrf.mxu3  ;;  %v12764_v12 = vld [vmem:[#allocation225_spill] sm:$0xff] }
 0x6cd   : > { %v10825_v38 = vpop.eup %6207  ;;  %6217 = vrcp.f32 %v12761_v21  ;;  %v3924_v3 = vmul.f32 %v6206_v25, %v12764_v12  ;;  %v12766_v21 = vld [vmem:[#allocation226_spill] sm:$0xff]  ;;  %v12769_v12 = vld [vmem:[#allocation55_spill] sm:$0xff]  ;;  %v12770_v25 = vld [vmem:[#allocation204_spill] sm:$0xff] }
 0x6ce   : > { %v10827_v18 = vpop.eup %6209  ;;  %3860 = vadd.xlane.f32.xlu2 %v10825_v38  ;;  %4905 = vmatmul.f32.gmra.mxu2 %v3955_v19  ;;  %6219 = vrcp.f32 %v12762_v43  ;;  %v12765_v19 = vld [vmem:[#allocation126_spill] sm:$0xff]  ;;  %v10849_v43 = vadd.f32 %v12768_v56, %v12767_v52  ;;  %v12772_v56 = vld [vmem:[#allocation12_spill] sm:$0xff] }
 0x6cf   : > { %v10832_v6 = vpop.eup %6211  ;;  %4212 = vadd.xlane.f32.xlu0 %v10827_v18  ;;  %5018 = vmatmul.f32.gmra.mxu3 %v4307_v15  ;;  %6221 = vpow2.f32 %v3446_v57  ;;  %v3956_v55 = vmax.f32 %v3924_v3, 0.001 }
 0x6d0   : > { %v6214_v39 = vpop.eup %6213  ;;  %3862 = vadd.xlane.f32.xlu1 %v10832_v6 }
 0x6d1   : > { %v4502_v49 = vpop.f32.mrf.mxu2  ;;  %v4276_v59 = vmul.f32 %v6214_v39, %v12766_v21  ;;  %v12771_v39 = vld [vmem:[#allocation202_spill] sm:$0xff] }
 0x6d2   : > { %v6216_v4 = vpop.eup %6215  ;;  %v10838_v42 = vadd.f32 %v4615_v58, %v4502_v49  ;;  %v4055_v20 = vpop.xlane.xlu0 %4054 }
 0x6d3   : > { %v10841_v33 = vpop.xlane.xlu1 %3850  ;;  %v4057_v28 = vpop.xlane.xlu2 %4056  ;;  %v4100_v32 = vsub.f32 %v12689_v14, %v4055_v20  ;;  %v3581_v41 = vmul.f32 %v6216_v4, %v12765_v19  ;;  %v12775_v20 = vld [vmem:[#allocation231_spill] sm:$0xff] }
 0x6d4   : > { %12763 = vst [vmem:[#allocation136_spill] sm:$0xff] %v10838_v42  ;;  %v4101_v15 = vsub.f32 %v12690_v1, %v4057_v28  ;;  %v10853_v42 = vadd.f32 %v12770_v25, %v12769_v12  ;;  %v6218_v14 = vpop.eup %6217  ;;  %v4308_v1 = vmax.f32 %v4276_v59, 0.001  ;;  %v12776_v59 = vld [vmem:[#allocation230_spill] sm:$0xff] }
 0x6d5   : > { %v4150_v40 = vmul.f32 1.442695, %v4100_v32  ;;  %v3613_v58 = vmax.f32 %v3581_v41, 0.001  ;;  %v6220_v4 = vpop.eup %6219  ;;  %v12773_v32 = vld [vmem:[#allocation44_spill] sm:$0xff]  ;;  %v3925_v28 = vmul.f32 %v6218_v14, %v12775_v20 }
 0x6d6   : > { %v4152_v49 = vmul.f32 1.442695, %v4101_v15  ;;  %3714 = vmax.xlane.f32.xlu2 %v10849_v43  ;;  %4908 = vmatmul.f32.gmra.mxu2 %v3956_v55  ;;  %v4277_v15 = vmul.f32 %v6220_v4, %v12776_v59  ;;  %v12779_v14 = vld [vmem:[#allocation152_spill] sm:$0xff] }
 0x6d7   : > { %6223 = vpow2.f32 %v4150_v40  ;;  %4066 = vmax.xlane.f32.xlu0 %v12771_v39  ;;  %4822 = vmatmul.f32.gmra.mxu1 %v3613_v58  ;;  %v10864_v40 = vpop.eup %6221  ;;  %v3957_v25 = vmax.f32 %v3925_v28, 0.001  ;;  %v12782_v28 = vld [vmem:[#allocation48_spill] sm:$0xff] }
 0x6d8   : > { %6225 = vpow2.f32 %v4152_v49  ;;  %3716 = vmax.xlane.f32.xlu1 %v10853_v42  ;;  %5021 = vmatmul.f32.gmra.mxu3 %v4308_v1  ;;  %v4309_v4 = vmax.f32 %v4277_v15, 0.001  ;;  %v12785_v15 = vld [vmem:[#allocation81_spill] sm:$0xff] }
 0x6d9   : > { %6227 = vrcp.f32 %v12772_v56  ;;  %v4505_v52 = vpop.f32.mrf.mxu2  ;;  %v4618_v41 = vpop.f32.mrf.mxu3  ;;  %v12778_v56 = vld [vmem:[#allocation95_spill] sm:$0xff] }
 0x6da   : > { %6229 = vrcp.f32 %v12773_v32  ;;  %v10860_v3 = vadd.f32 %v4618_v41, %v4505_v52  ;;  %v3499_v57 = vpop.xlane.xlu0 %3498  ;;  %v3397_v52 = vsub.f32 %v12779_v14, %v12778_v56  ;;  %v12780_v32 = vld [vmem:[#allocation187_spill] sm:$0xff] }
 0x6db   : > { %v3705_v19 = vpop.xlane.xlu1 %3704  ;;  %v3501_v21 = vpop.xlane.xlu2 %3500  ;;  %6231 = vrcp.f32 %v3499_v57  ;;  %v12781_v57 = vld [vmem:[#allocation11_spill] sm:$0xff] }
 0x6dc   : > { %12774 = vst [vmem:[#allocation150_spill] sm:$0xff] %v10860_v3  ;;  %v3749_v55 = vsub.f32 %v10628_v63, %v3705_v19  ;;  %6233 = vrcp.f32 %v3501_v21  ;;  %v3398_v63 = vsub.f32 %v12781_v57, %v12780_v32 }
 0x6dd   : > { %v10867_v58 = vpop.eup %6223 }
 0x6de   : > { %v10869_v49 = vpop.eup %6225  ;;  %v3800_v12 = vmul.f32 1.442695, %v3749_v55  ;;  %4214 = vadd.xlane.f32.xlu2 %v10867_v58  ;;  %4911 = vmatmul.f32.gmra.mxu2 %v3957_v25  ;;  %v12783_v55 = vld [vmem:[#allocation146_spill] sm:$0xff]  ;;  %v3450_v24 = vmul.f32 1.442695, %v3398_v63 }
 0x6df   : > { %12777 = vst [vmem:[#allocation104_spill] sm:$0xff] %v10869_v49  ;;  %v6228_v1 = vpop.eup %6227  ;;  %3510 = vadd.xlane.f32.xlu0 %v10864_v40  ;;  %v12786_v25 = vld [vmem:[#allocation86_spill] sm:$0xff] }
 0x6e0   : > { %v6230_v41 = vpop.eup %6229  ;;  %6235 = vpow2.f32 %v3800_v12  ;;  %4216 = vadd.xlane.f32.xlu1 %v10869_v49  ;;  %5024 = vmatmul.f32.gmra.mxu3 %v4309_v4  ;;  %v3926_v14 = vmul.f32 %v6228_v1, %v12785_v15  ;;  %v3448_v12 = vmul.f32 1.442695, %v3397_v52  ;;  %v12789_v52 = vld [vmem:[#allocation211_spill] sm:$0xff]  ;;  %v12790_v63 = vld [vmem:[#allocation14_spill] sm:$0xff] }
 0x6e1   : > { %v6232_v20 = vpop.eup %6231  ;;  %6237 = vrcp.f32 %v12782_v28  ;;  %v4508_v19 = vpop.f32.mrf.mxu2  ;;  %v4278_v3 = vmul.f32 %v6230_v41, %v12786_v25  ;;  %v12793_v25 = vld [vmem:[#allocation142_spill] sm:$0xff] }
 0x6e2   : > { %v4621_v59 = vpop.f32.mrf.mxu3  ;;  %6239 = vrcp.f32 %v12783_v55  ;;  %v10882_v56 = vpop.xlane.xlu0 %3852  ;;  %v3582_v32 = vmul.f32 %v6232_v20, %v10622_v31 }
 0x6e3   : > { %v10880_v21 = vadd.f32 %v4621_v59, %v4508_v19  ;;  %v10886_v57 = vpop.xlane.xlu1 %4204  ;;  %v10889_v28 = vpop.xlane.xlu2 %3854  ;;  %v3958_v19 = vmax.f32 %v3926_v14, 0.001  ;;  %v12788_v59 = vld [vmem:[#allocation206_spill] sm:$0xff]  ;;  %6241 = vpow2.f32 %v3448_v12  ;;  %v4310_v31 = vmax.f32 %v4278_v3, 0.001  ;;  %v12791_v14 = vld [vmem:[#allocation160_spill] sm:$0xff] }
 0x6e4   : > { %v3614_v4 = vmax.f32 %v3582_v32, 0.001  ;;  %v6234_v30 = vpop.eup %6233  ;;  %6243 = vpow2.f32 %v3450_v24  ;;  %v12794_v24 = vld [vmem:[#allocation91_spill] sm:$0xff] }
 0x6e5   : > { %12784 = vst [vmem:[#allocation223_spill] sm:$0xff] %v10880_v21  ;;  %v3583_v41 = vmul.f32 %v6234_v30, %v10630_v54  ;;  %6245 = vrcp.f32 %v12790_v63 }
 0x6e6   : > { %v10891_v16 = vpop.eup %6235  ;;  %4068 = vmax.xlane.f32.xlu2 %v12788_v59  ;;  %4825 = vmatmul.f32.gmra.mxu1 %v3614_v4  ;;  %6247 = vrcp.f32 %v12791_v14  ;;  %v12796_v14 = vld [vmem:[#allocation103_spill] sm:$0xff] }
 0x6e7   : > { %12787 = vst [vmem:[#allocation107_spill] sm:$0xff] %v10891_v16  ;;  %v6238_v55 = vpop.eup %6237  ;;  %3864 = vadd.xlane.f32.xlu0 %v10891_v16  ;;  %4914 = vmatmul.f32.gmra.mxu2 %v3958_v19  ;;  %v3615_v49 = vmax.f32 %v3583_v41, 0.001 }
 0x6e8   : > { %v6240_v1 = vpop.eup %6239  ;;  %4070 = vmax.xlane.f32.xlu1 %v12789_v52  ;;  %5027 = vmatmul.f32.gmra.mxu3 %v4310_v31  ;;  %v3927_v4 = vmul.f32 %v6238_v55, %v12793_v25 }
 0x6e9   : > { %v4511_v20 = vpop.f32.mrf.mxu2  ;;  %v4279_v21 = vmul.f32 %v6240_v1, %v12794_v24  ;;  %v10904_v54 = vpop.eup %6241 }
 0x6ea   : > { %v4624_v15 = vpop.f32.mrf.mxu3  ;;  %v3707_v12 = vpop.xlane.xlu0 %3706  ;;  %12795 = vst [vmem:[#allocation110_spill] sm:$0xff] %v10904_v54  ;;  %v3959_v55 = vmax.f32 %v3927_v4, 0.001 }
 0x6eb   : > { %v10899_v32 = vadd.f32 %v4624_v15, %v4511_v20  ;;  %v3750_v3 = vsub.f32 %v10664_v47, %v3707_v12  ;;  %v4059_v16 = vpop.xlane.xlu1 %4058  ;;  %v3709_v19 = vpop.xlane.xlu2 %3708  ;;  %v12797_v20 = vld [vmem:[#allocation208_spill] sm:$0xff] }
 0x6ec   : > { %v4102_v30 = vsub.f32 %v12713_v50, %v4059_v16  ;;  %v3751_v31 = vsub.f32 %v10671_v17, %v3709_v19  ;;  %v10910_v15 = vadd.f32 %v12797_v20, %v12796_v14  ;;  %v4311_v50 = vmax.f32 %v4279_v21, 0.001  ;;  %v12800_v17 = vld [vmem:[#allocation78_spill] sm:$0xff]  ;;  %v12803_v19 = vld [vmem:[#allocation35_spill] sm:$0xff] }
 0x6ed   : > { %12792 = vst [vmem:[#allocation106_spill] sm:$0xff] %v10899_v32  ;;  %v3802_v63 = vmul.f32 1.442695, %v3750_v3  ;;  %v10912_v32 = vpop.eup %6243  ;;  %v12802_v3 = vld [vmem:[#allocation141_spill] sm:$0xff] }
 0x6ee   : > { %12798 = vst [vmem:[#allocation109_spill] sm:$0xff] %v10910_v15  ;;  %3512 = vadd.xlane.f32.xlu2 %v10904_v54  ;;  %4828 = vmatmul.f32.gmra.mxu1 %v3615_v49  ;;  %v6246_v47 = vpop.eup %6245  ;;  %v4154_v1 = vmul.f32 1.442695, %v4102_v30  ;;  %v3804_v41 = vmul.f32 1.442695, %v3751_v31  ;;  %v12801_v49 = vld [vmem:[#allocation158_spill] sm:$0xff] }
 0x6ef   : > { %12799 = vst [vmem:[#allocation151_spill] sm:$0xff] %v10912_v32  ;;  %6249 = vpow2.f32 %v3802_v63  ;;  %3718 = vmax.xlane.f32.xlu0 %v10910_v15  ;;  %v6248_v16 = vpop.eup %6247  ;;  %4917 = vmatmul.f32.gmra.mxu2 %v3959_v55  ;;  %v3928_v4 = vmul.f32 %v6246_v47, %v12801_v49  ;;  %v12806_v55 = vld [vmem:[#allocation140_spill] sm:$0xff] }
 0x6f0   : > { %6251 = vrcp.f32 %v12800_v17  ;;  %3514 = vadd.xlane.f32.xlu1 %v10912_v32  ;;  %5030 = vmatmul.f32.gmra.mxu3 %v4311_v50  ;;  %v4280_v30 = vmul.f32 %v6248_v16, %v12803_v19 }
 0x6f1   : > { %6253 = vpow2.f32 %v4154_v1  ;;  %v4514_v12 = vpop.f32.mrf.mxu2  ;;  %v12807_v1 = vld [vmem:[#allocation46_spill] sm:$0xff]  ;;  %v3960_v50 = vmax.f32 %v3928_v4, 0.001  ;;  %v12811_v4 = vld [vmem:[#allocation201_spill] sm:$0xff] }
 0x6f2   : > { %6255 = vpow2.f32 %v3804_v41  ;;  %v10918_v25 = vpop.xlane.xlu0 %4206  ;;  %v4627_v24 = vpop.f32.mrf.mxu3  ;;  %v3399_v41 = vsub.f32 %v12807_v1, %v12806_v55  ;;  %v4312_v17 = vmax.f32 %v4280_v30, 0.001  ;;  %v12812_v1 = vld [vmem:[#allocation40_spill] sm:$0xff] }
 0x6f3   : > { %6257 = vrcp.f32 %v12802_v3  ;;  %v10923_v21 = vadd.f32 %v4627_v24, %v4514_v12  ;;  %v3503_v31 = vpop.xlane.xlu1 %3502  ;;  %v10927_v14 = vpop.xlane.xlu2 %4208  ;;  %v12810_v3 = vld [vmem:[#allocation171_spill] sm:$0xff] }
 0x6f4   : > { %6259 = vrcp.f32 %v3503_v31  ;;  %v3452_v12 = vmul.f32 1.442695, %v3399_v41 }
 0x6f5   : > { %12804 = vst [vmem:[#allocation112_spill] sm:$0xff] %v10923_v21  ;;  %v10925_v63 = vpop.eup %6249  ;;  %6261 = vrcp.f32 %v12810_v3  ;;  %v12816_v3 = vld [vmem:[#allocation213_spill] sm:$0xff] }
 0x6f6   : > { %12805 = vst [vmem:[#allocation57_spill] sm:$0xff] %v10925_v63  ;;  %v6252_v20 = vpop.eup %6251  ;;  %3866 = vadd.xlane.f32.xlu2 %v10925_v63  ;;  %6263 = vrcp.f32 %v12811_v4 }
 0x6f7   : > { %v10932_v47 = vpop.eup %6253  ;;  %4920 = vmatmul.f32.gmra.mxu2 %v3960_v50  ;;  %v3929_v21 = vmul.f32 %v6252_v20, %v12812_v1  ;;  %6265 = vpow2.f32 %v3452_v12  ;;  %v12817_v20 = vld [vmem:[#allocation67_spill] sm:$0xff]  ;;  %v12821_v1 = vld [vmem:[#allocation70_spill] sm:$0xff] }
 0x6f8   : > { %12808 = vst [vmem:[#allocation50_spill] sm:$0xff] %v10932_v47  ;;  %v10934_v49 = vpop.eup %6255  ;;  %4218 = vadd.xlane.f32.xlu0 %v10932_v47  ;;  %5033 = vmatmul.f32.gmra.mxu3 %v4312_v17  ;;  %v12814_v17 = vld [vmem:[#allocation180_spill] sm:$0xff]  ;;  %v12815_v47 = vld [vmem:[#allocation63_spill] sm:$0xff] }
 0x6f9   : > { %12809 = vst [vmem:[#allocation113_spill] sm:$0xff] %v10934_v49  ;;  %v6258_v16 = vpop.eup %6257  ;;  %3868 = vadd.xlane.f32.xlu1 %v10934_v49  ;;  %v4517_v31 = vpop.f32.mrf.mxu2  ;;  %v10950_v32 = vadd.f32 %v12816_v3, %v12815_v47  ;;  %v12820_v47 = vld [vmem:[#allocation215_spill] sm:$0xff] }
 0x6fa   : > { %v4061_v24 = vpop.xlane.xlu0 %4060  ;;  %v6260_v19 = vpop.eup %6259  ;;  %v4281_v41 = vmul.f32 %v6258_v16, %v12814_v17  ;;  %v12819_v16 = vld [vmem:[#allocation148_spill] sm:$0xff] }
 0x6fb   : > { %v4630_v55 = vpop.f32.mrf.mxu3  ;;  %v4103_v30 = vsub.f32 %v12721_v36, %v4061_v24  ;;  %v10944_v50 = vpop.xlane.xlu1 %3856  ;;  %v3584_v49 = vmul.f32 %v6260_v19, %v10684_v51  ;;  %v12818_v24 = vld [vmem:[#allocation216_spill] sm:$0xff]  ;;  %v3961_v51 = vmax.f32 %v3929_v21, 0.001  ;;  %v12822_v21 = vld [vmem:[#allocation45_spill] sm:$0xff] }
 0x6fc   : > { %v10942_v63 = vadd.f32 %v4630_v55, %v4517_v31  ;;  %v4063_v54 = vpop.xlane.xlu2 %4062  ;;  %v10956_v31 = vadd.f32 %v12818_v24, %v12817_v20  ;;  %v6262_v19 = vpop.eup %6261 }
 0x6fd   : > { %v4156_v4 = vmul.f32 1.442695, %v4103_v30  ;;  %v4104_v15 = vsub.f32 %v12722_v26, %v4063_v54  ;;  %v3616_v36 = vmax.f32 %v3584_v49, 0.001  ;;  %v4313_v30 = vmax.f32 %v4281_v41, 0.001  ;;  %v6264_v12 = vpop.eup %6263 }
 0x6fe   : > { %12813 = vst [vmem:[#allocation116_spill] sm:$0xff] %v10942_v63  ;;  %3720 = vmax.xlane.f32.xlu2 %v10950_v32  ;;  %v3930_v17 = vmul.f32 %v6262_v19, %v12822_v21  ;;  %v10963_v3 = vpop.eup %6265  ;;  %v12824_v41 = vld [vmem:[#allocation189_spill] sm:$0xff]  ;;  %v12831_v63 = vld [vmem:[#allocation92_spill] sm:$0xff] }
 0x6ff   : > { %6267 = vpow2.f32 %v4156_v4  ;;  %v4158_v55 = vmul.f32 1.442695, %v4104_v15  ;;  %4831 = vmatmul.f32.gmra.mxu1 %v3616_v36  ;;  %4923 = vmatmul.f32.gmra.mxu2 %v3961_v51  ;;  %v4282_v36 = vmul.f32 %v6264_v12, %v12824_v41  ;;  %v12828_v41 = vld [vmem:[#allocation9_spill] sm:$0xff] }
 0x700   : > { %6269 = vrcp.f32 %v12819_v16  ;;  %4072 = vmax.xlane.f32.xlu0 %v12820_v47  ;;  %5036 = vmatmul.f32.gmra.mxu3 %v4313_v30  ;;  %v12825_v30 = vld [vmem:[#allocation124_spill] sm:$0xff]  ;;  %v3962_v21 = vmax.f32 %v3930_v17, 0.001 }
 0x701   : > { %6271 = vrcp.f32 %v12821_v1  ;;  %3722 = vmax.xlane.f32.xlu1 %v10956_v31  ;;  %v4520_v54 = vpop.f32.mrf.mxu2  ;;  %v12826_v1 = vld [vmem:[#allocation93_spill] sm:$0xff]  ;;  %v4314_v12 = vmax.f32 %v4282_v36, 0.001 }
 0x702   : > { %6273 = vpow2.f32 %v4158_v55  ;;  %v3505_v26 = vpop.xlane.xlu0 %3504 }
 0x703   : > { %v4633_v49 = vpop.f32.mrf.mxu3  ;;  %6275 = vrcp.f32 %v3505_v26  ;;  %v3711_v4 = vpop.xlane.xlu1 %3710  ;;  %v3400_v26 = vsub.f32 %v12826_v1, %v12825_v30  ;;  %v12830_v30 = vld [vmem:[#allocation20_spill] sm:$0xff] }
 0x704   : > { %v10965_v15 = vadd.f32 %v4633_v49, %v4520_v54  ;;  %v3752_v24 = vsub.f32 %v10722_v0, %v3711_v4  ;;  %v3507_v51 = vpop.xlane.xlu2 %3506 }
 0x705   : > { %v10968_v20 = vpop.eup %6267  ;;  %6277 = vrcp.f32 %v3507_v51 }
 0x706   : > { %12823 = vst [vmem:[#allocation115_spill] sm:$0xff] %v10965_v15  ;;  %v6270_v16 = vpop.eup %6269  ;;  %4220 = vadd.xlane.f32.xlu2 %v10968_v20  ;;  %v3806_v19 = vmul.f32 1.442695, %v3752_v24  ;;  %v12829_v15 = vld [vmem:[#allocation41_spill] sm:$0xff]  ;;  %v3454_v24 = vmul.f32 1.442695, %v3400_v26 }
 0x707   : > { %v6272_v55 = vpop.eup %6271  ;;  %v3401_v0 = vsub.f32 %v12829_v15, %v12828_v41  ;;  %4926 = vmatmul.f32.gmra.mxu2 %v3962_v21  ;;  %v4283_v15 = vmul.f32 %v6270_v16, %v12831_v63  ;;  %v12832_v21 = vld [vmem:[#allocation218_spill] sm:$0xff] }
 0x708   : > { %v10974_v54 = vpop.eup %6273  ;;  %3516 = vadd.xlane.f32.xlu0 %v10963_v3  ;;  %6279 = vpow2.f32 %v3806_v19  ;;  %5039 = vmatmul.f32.gmra.mxu3 %v4314_v12  ;;  %v3931_v36 = vmul.f32 %v6272_v55, %v12830_v30 }
 0x709   : > { %12827 = vst [vmem:[#allocation118_spill] sm:$0xff] %v10974_v54  ;;  %v6276_v49 = vpop.eup %6275  ;;  %4222 = vadd.xlane.f32.xlu1 %v10974_v54  ;;  %6281 = vrcp.f32 %v10791_v35  ;;  %v4523_v17 = vpop.f32.mrf.mxu2  ;;  %v3456_v54 = vmul.f32 1.442695, %v3401_v0  ;;  %v12834_v0 = vld [vmem:[#allocation114_spill] sm:$0xff] }
 0x70a   : > { %v3585_v4 = vmul.f32 %v6276_v49, %v10716_v46  ;;  %6283 = vrcp.f32 %v10794_v27  ;;  %v3963_v46 = vmax.f32 %v3931_v36, 0.001  ;;  %v4315_v27 = vmax.f32 %v4283_v15, 0.001  ;;  %v12833_v49 = vld [vmem:[#allocation221_spill] sm:$0xff]  ;;  %v12837_v36 = vld [vmem:[#allocation219_spill] sm:$0xff] }
 0x70b   : > { %v4636_v51 = vpop.f32.mrf.mxu3  ;;  %v6278_v41 = vpop.eup %6277  ;;  %6285 = vpow2.f32 %v3454_v24 }
 0x70c   : > { %v10984_v1 = vadd.f32 %v4636_v51, %v4523_v17  ;;  %v3617_v19 = vmax.f32 %v3585_v4, 0.001  ;;  %v3586_v55 = vmul.f32 %v6278_v41, %v10725_v34  ;;  %6287 = vpow2.f32 %v3456_v54  ;;  %v12835_v17 = vld [vmem:[#allocation228_spill] sm:$0xff]  ;;  %v12836_v54 = vld [vmem:[#allocation71_spill] sm:$0xff] }
 0x70d   : > { %6289 = vrcp.f32 %v10796_v53  ;;  %v11003_v15 = vadd.f32 %v12837_v36, %v12836_v54  ;;  %v12840_v36 = vld [vmem:[#allocation122_spill] sm:$0xff] }
 0x70e   : > { %4074 = vmax.xlane.f32.xlu2 %v12832_v21  ;;  %4834 = vmatmul.f32.gmra.mxu1 %v3617_v19  ;;  %v10988_v35 = vpop.eup %6279  ;;  %6291 = vrcp.f32 %v10819_v61  ;;  %v3618_v30 = vmax.f32 %v3586_v55, 0.001  ;;  %v12838_v55 = vld [vmem:[#allocation66_spill] sm:$0xff] }
 0x70f   : > { %v6282_v26 = vpop.eup %6281  ;;  %4929 = vmatmul.f32.gmra.mxu2 %v3963_v46  ;;  %6293 = vrcp.f32 %v10841_v33 }
 0x710   : > { %3870 = vadd.xlane.f32.xlu0 %v10988_v35  ;;  %v6284_v12 = vpop.eup %6283  ;;  %5042 = vmatmul.f32.gmra.mxu3 %v4315_v27  ;;  %v3932_v4 = vmul.f32 %v6282_v26, %v12834_v0  ;;  %6295 = vrcp.f32 %v10822_v8 }
 0x711   : > { %4076 = vmax.xlane.f32.xlu1 %v12833_v49  ;;  %v4526_v63 = vpop.f32.mrf.mxu2  ;;  %v4284_v51 = vmul.f32 %v6284_v12, %v12835_v17  ;;  %v10999_v34 = vpop.eup %6285  ;;  %6297 = vrcp.f32 %v10882_v56 }
 0x712   : > { %v11006_v53 = vpop.eup %6287  ;;  %v3964_v61 = vmax.f32 %v3932_v4, 0.001  ;;  %6299 = vrcp.f32 %v10886_v57 }
 0x713   : > { %v4639_v16 = vpop.f32.mrf.mxu3  ;;  %v6290_v19 = vpop.eup %6289  ;;  %v4316_v41 = vmax.f32 %v4284_v51, 0.001  ;;  %6301 = vrcp.f32 %v10889_v28 }
 0x714   : > { %v10996_v24 = vadd.f32 %v4639_v16, %v4526_v63  ;;  %v6292_v46 = vpop.eup %6291  ;;  %v3933_v12 = vmul.f32 %v6290_v19, %v12838_v55  ;;  %v12839_v63 = vld [vmem:[#allocation120_spill] sm:$0xff]  ;;  %6303 = vrcp.f32 %v10918_v25 }
 0x715   : > { %v4285_v16 = vmul.f32 %v6292_v46, %v12839_v63  ;;  %v6294_v4 = vpop.eup %6293 }
 0x716   : > { %3518 = vadd.xlane.f32.xlu2 %v10999_v34  ;;  %4837 = vmatmul.f32.gmra.mxu1 %v3618_v30  ;;  %v3965_v0 = vmax.f32 %v3933_v12, 0.001  ;;  %v6296_v51 = vpop.eup %6295  ;;  %v3934_v54 = vmul.f32 %v6294_v4, %v10608_v45 }
 0x717   : > { %4932 = vmatmul.f32.gmra.mxu2 %v3964_v61  ;;  %v4317_v17 = vmax.f32 %v4285_v16, 0.001  ;;  %v4286_v61 = vmul.f32 %v6296_v51, %v12840_v36 }
 0x718   : > { %3724 = vmax.xlane.f32.xlu0 %v11003_v15  ;;  %5045 = vmatmul.f32.gmra.mxu3 %v4316_v41  ;;  %v3966_v19 = vmax.f32 %v3934_v54, 0.001  ;;  %v6298_v41 = vpop.eup %6297 }
 0x719   : > { %3520 = vadd.xlane.f32.xlu1 %v11006_v53  ;;  %v11012_v26 = vpop.f32.mrf.mxu2  ;;  %v4318_v46 = vmax.f32 %v4286_v61, 0.001  ;;  %v6300_v55 = vpop.eup %6299  ;;  %v3935_v16 = vmul.f32 %v6298_v41, %v10639_v11 }
 0x71a   : > { %v6302_v51 = vpop.eup %6301 }
 0x71b   : > { %v11014_v27 = vpop.f32.mrf.mxu3  ;;  %v6304_v28 = vpop.eup %6303 }
 0x71f   : > { %4935 = vmatmul.f32.gmra.mxu2 %v3965_v0  ;;  %v4287_v0 = vmul.f32 %v6300_v55, %v10642_v23  ;;  %v3936_v23 = vmul.f32 %v6302_v51, %v10649_v9  ;;  %v12844_v51 = vld [vmem:[#allocation192_spill] sm:$0xff] }
 0x720   : > { %5048 = vmatmul.f32.gmra.mxu3 %v4317_v17  ;;  %v3967_v17 = vmax.f32 %v3935_v16, 0.001  ;;  %v4790_v16 = vpop.f32.mrf.mxu1 }
 0x721   : > { %v11020_v8 = vpop.f32.mrf.mxu2  ;;  %v4319_v54 = vmax.f32 %v4287_v0, 0.001  ;;  %v12842_v0 = vld [vmem:[#allocation127_spill] sm:$0xff] }
 0x722   : > { %v3859_v33 = vpop.xlane.xlu0 %3858 }
 0x723   : > { %v11022_v30 = vpop.f32.mrf.mxu3 }
 0x727   : > { %4938 = vmatmul.f32.gmra.mxu2 %v3966_v19  ;;  %v4288_v19 = vmul.f32 %v6304_v28, %v10682_v29 }
 0x728   : > { %v4211_v12 = vpop.xlane.xlu1 %4210  ;;  %5051 = vmatmul.f32.gmra.mxu3 %v4318_v46 }
 0x729   : > { %v11028_v57 = vpop.f32.mrf.mxu2  ;;  %v4320_v55 = vmax.f32 %v4288_v19, 0.001 }
 0x72a   : > { %v3713_v56 = vpop.xlane.xlu0 %3712 }
 0x72b   : > { %v11030_v63 = vpop.f32.mrf.mxu3  ;;  %v3753_v45 = vsub.f32 %v10779_v62, %v3713_v56 }
 0x72d   : > { %v3808_v4 = vmul.f32 1.442695, %v3753_v45 }
 0x72f   : > { %6305 = vpow2.f32 %v3808_v4  ;;  %4941 = vmatmul.f32.gmra.mxu2 %v3967_v17  ;;  %v12843_v4 = vld [vmem:[#allocation132_spill] sm:$0xff] }
 0x730   : > { %v4065_v36 = vpop.xlane.xlu1 %4064  ;;  %6307 = vrcp.f32 %v10944_v50  ;;  %5054 = vmatmul.f32.gmra.mxu3 %v4319_v54  ;;  %v3968_v50 = vmax.f32 %v3936_v23, 0.001  ;;  %v11056_v17 = vadd.f32 %v12843_v4, %v12842_v0  ;;  %v12845_v54 = vld [vmem:[#allocation168_spill] sm:$0xff] }
 0x731   : > { %v4105_v25 = vsub.f32 %v12748_v5, %v4065_v36  ;;  %6309 = vrcp.f32 %v10927_v14  ;;  %v11038_v62 = vpop.f32.mrf.mxu2 }
 0x733   : > { %v11040_v11 = vpop.f32.mrf.mxu3  ;;  %v4160_v61 = vmul.f32 1.442695, %v4105_v25 }
 0x735   : > { %v11044_v41 = vpop.eup %6305  ;;  %6311 = vpow2.f32 %v4160_v61 }
 0x736   : > { %3872 = vadd.xlane.f32.xlu2 %v11044_v41  ;;  %v6308_v46 = vpop.eup %6307  ;;  %6313 = vrcp.f32 %v3859_v33 }
 0x737   : > { %v6310_v5 = vpop.eup %6309  ;;  %4944 = vmatmul.f32.gmra.mxu2 %v3968_v50  ;;  %v3937_v29 = vmul.f32 %v6308_v46, %v10704_v22  ;;  %v12846_v50 = vld [vmem:[#allocation68_spill] sm:$0xff]  ;;  %v12847_v46 = vld [vmem:[#allocation29_spill] sm:$0xff] }
 0x738   : > { %v3509_v14 = vpop.xlane.xlu1 %3508  ;;  %5057 = vmatmul.f32.gmra.mxu3 %v4320_v55  ;;  %v4289_v33 = vmul.f32 %v6310_v5, %v10691_v10  ;;  %v4565_v55 = vadd.f32 %v12847_v46, %v12846_v50  ;;  %v12852_v50 = vld [vmem:[#allocation214_spill] sm:$0xff] }
 0x739   : > { %6315 = vrcp.f32 %v3509_v14  ;;  %v11047_v56 = vpop.f32.mrf.mxu2  ;;  %v3969_v36 = vmax.f32 %v3937_v29, 0.001 }
 0x73a   : > { %6317 = vrcp.f32 %v4211_v12  ;;  %v3402_v12 = vsub.f32 %v12845_v54, %v12844_v51  ;;  %v4321_v22 = vmax.f32 %v4289_v33, 0.001  ;;  %v4793_v33 = vpop.f32.mrf.mxu1  ;;  %v12850_v54 = vld [vmem:[#allocation19_spill] sm:$0xff] }
 0x73b   : > { %v11049_v9 = vpop.f32.mrf.mxu3  ;;  %v11052_v45 = vpop.eup %6311 }
 0x73c   : > { %12841 = vst [vmem:[#allocation100_spill] sm:$0xff] %v11049_v9  ;;  %4224 = vadd.xlane.f32.xlu0 %v11052_v45  ;;  %v6314_v28 = vpop.eup %6313  ;;  %v3458_v10 = vmul.f32 1.442695, %v3402_v12  ;;  %v4678_v12 = vadd.f32 %v10702_v7, %v4565_v55 }
 0x73d   : > { %v3938_v4 = vmul.f32 %v6314_v28, %v10763_v13 }
 0x73e   : > { %3726 = vmax.xlane.f32.xlu2 %v11056_v17 }
 0x73f   : > { %v6316_v25 = vpop.eup %6315  ;;  %4947 = vmatmul.f32.gmra.mxu2 %v3969_v36  ;;  %v3970_v36 = vmax.f32 %v3938_v4, 0.001 }
 0x740   : > { %v6318_v23 = vpop.eup %6317  ;;  %v3587_v19 = vmul.f32 %v6316_v25, %v10812_v44  ;;  %5060 = vmatmul.f32.gmra.mxu3 %v4321_v22 }
 0x741   : > { %v3861_v61 = vpop.xlane.xlu2 %3860  ;;  %v11066_v0 = vpop.f32.mrf.mxu2  ;;  %v4290_v44 = vmul.f32 %v6318_v23, %v10773_v48  ;;  %v4791_v48 = vadd.f32 %v4790_v16, %v4678_v12 }
 0x742   : > { %6319 = vrcp.f32 %v3861_v61  ;;  %v4213_v5 = vpop.xlane.xlu0 %4212  ;;  %12848 = vst [vmem:[#allocation56_spill] sm:$0xff] %v11066_v0  ;;  %v3619_v29 = vmax.f32 %v3587_v19, 0.001  ;;  %v12851_v19 = vld [vmem:[#allocation212_spill] sm:$0xff] }
 0x743   : > { %v3863_v14 = vpop.xlane.xlu1 %3862  ;;  %6321 = vrcp.f32 %v4213_v5  ;;  %v11069_v51 = vpop.f32.mrf.mxu3  ;;  %v4322_v22 = vmax.f32 %v4290_v44, 0.001  ;;  %v4568_v13 = vadd.f32 %v12852_v50, %v12851_v19 }
 0x744   : > { %12849 = vst [vmem:[#allocation222_spill] sm:$0xff] %v11069_v51  ;;  %4078 = vmax.xlane.f32.xlu0 %v12850_v54  ;;  %4840 = vmatmul.f32.gmra.mxu1 %v3619_v29  ;;  %6323 = vpow2.f32 %v3458_v10 }
 0x745   : > { %6325 = vrcp.f32 %v3863_v14  ;;  %v4681_v16 = vadd.f32 %v10718_v2, %v4568_v13 }
 0x747   : > { %4950 = vmatmul.f32.gmra.mxu2 %v3970_v36  ;;  %v4794_v19 = vadd.f32 %v4793_v33, %v4681_v16 }
 0x748   : > { %v6320_v25 = vpop.eup %6319  ;;  %5063 = vmatmul.f32.gmra.mxu3 %v4322_v22 }
 0x749   : > { %v6322_v61 = vpop.eup %6321  ;;  %v3715_v28 = vpop.xlane.xlu2 %3714  ;;  %v3939_v46 = vmul.f32 %v6320_v25, %v10825_v38 }
 0x74a   : > { %v3754_v7 = vsub.f32 %v10849_v43, %v3715_v28  ;;  %v4067_v23 = vpop.xlane.xlu0 %4066  ;;  %v4291_v55 = vmul.f32 %v6322_v61, %v10827_v18  ;;  %v4903_v5 = vpop.f32.mrf.mxu2 }
 0x74b   : > { %v3717_v10 = vpop.xlane.xlu1 %3716  ;;  %v4106_v29 = vsub.f32 %v12771_v39, %v4067_v23  ;;  %v11083_v4 = vpop.eup %6323  ;;  %v4904_v36 = vadd.f32 %v4903_v5, %v4791_v48  ;;  %v3971_v43 = vmax.f32 %v3939_v46, 0.001  ;;  %v12853_v48 = vld [vmem:[#allocation79_spill] sm:$0xff] }
 0x74c   : > { %v3755_v44 = vsub.f32 %v10853_v42, %v3717_v10  ;;  %v5016_v38 = vpop.f32.mrf.mxu3  ;;  %v3810_v14 = vmul.f32 1.442695, %v3754_v7  ;;  %3522 = vadd.xlane.f32.xlu0 %v11083_v4  ;;  %v4796_v25 = vpop.f32.mrf.mxu1  ;;  %v4323_v61 = vmax.f32 %v4291_v55, 0.001  ;;  %v12854_v7 = vld [vmem:[#allocation173_spill] sm:$0xff] }
 0x74d   : > { %v4162_v12 = vmul.f32 1.442695, %v4106_v29  ;;  %v5017_v18 = vadd.f32 %v5016_v38, %v4904_v36  ;;  %v6326_v39 = vpop.eup %6325  ;;  %v4571_v23 = vadd.f32 %v12854_v7, %v12853_v48  ;;  %v12856_v38 = vld [vmem:[#allocation134_spill] sm:$0xff] }
 0x74e   : > { %v3812_v22 = vmul.f32 1.442695, %v3755_v44  ;;  %6327 = vpow2.f32 %v3810_v14  ;;  %v3940_v28 = vmul.f32 %v6326_v39, %v10832_v6  ;;  %v12855_v6 = vld [vmem:[#allocation59_spill] sm:$0xff] }
 0x74f   : > { %6329 = vpow2.f32 %v4162_v12  ;;  %5112 = vst [vmem:[%s11088_s27] sm:$0xff] %v5017_v18  ;;  %4953 = vmatmul.f32.gmra.mxu2 %v3971_v43  ;;  %v4684_v29 = vadd.f32 %v10736_v60, %v4571_v23  ;;  %v3403_v14 = vsub.f32 %v12856_v38, %v12855_v6  ;;  %v12858_v60 = vld [vmem:[#allocation82_spill] sm:$0xff] }
 0x750   : > { %6331 = vpow2.f32 %v3812_v22  ;;  %5066 = vmatmul.f32.gmra.mxu3 %v4323_v61  ;;  %v3972_v16 = vmax.f32 %v3940_v28, 0.001  ;;  %v12857_v61 = vld [vmem:[#allocation217_spill] sm:$0xff]  ;;  %v12859_v28 = vld [vmem:[#allocation119_spill] sm:$0xff]  ;;  %v12860_v23 = vld [vmem:[#allocation162_spill] sm:$0xff] }
 0x751   : > { %v4215_v42 = vpop.xlane.xlu2 %4214  ;;  %v4574_v39 = vadd.f32 %v12858_v60, %v12857_v61  ;;  %v12862_v6 = vld [vmem:[#allocation102_spill] sm:$0xff] }
 0x752   : > { %6333 = vrcp.f32 %v4215_v42  ;;  %v3511_v2 = vpop.xlane.xlu0 %3510  ;;  %v4906_v13 = vpop.f32.mrf.mxu2  ;;  %v4797_v42 = vadd.f32 %v4796_v25, %v4684_v29 }
 0x753   : > { %v4217_v50 = vpop.xlane.xlu1 %4216  ;;  %6335 = vrcp.f32 %v3511_v2  ;;  %v4907_v55 = vadd.f32 %v4906_v13, %v4794_v19  ;;  %v3460_v13 = vmul.f32 1.442695, %v3403_v14  ;;  %v4687_v14 = vadd.f32 %v10745_v37, %v4574_v39  ;;  %v12867_v39 = vld [vmem:[#allocation107_spill] sm:$0xff] }
 0x754   : > { %v11092_v46 = vpop.eup %6327  ;;  %v5019_v10 = vpop.f32.mrf.mxu3  ;;  %6337 = vrcp.f32 %v4217_v50 }
 0x755   : > { %v11096_v5 = vpop.eup %6329  ;;  %3874 = vadd.xlane.f32.xlu1 %v11092_v46  ;;  %v4799_v44 = vpop.f32.mrf.mxu1  ;;  %v5020_v36 = vadd.f32 %v5019_v10, %v4907_v55  ;;  %v11114_v55 = vadd.f32 %v12860_v23, %v12859_v28 }
 0x756   : > { %v11099_v33 = vpop.eup %6331  ;;  %4226 = vadd.xlane.f32.xlu2 %v11096_v5 }
 0x757   : > { %3876 = vadd.xlane.f32.xlu0 %v11099_v33  ;;  %5113 = vst [vmem:[%s11088_s27 + $0x8] sm:$0xff] %v5020_v36  ;;  %4956 = vmatmul.f32.gmra.mxu2 %v3972_v16 }
 0x758   : > { %v6334_v12 = vpop.eup %6333 }
 0x759   : > { %v6336_v43 = vpop.eup %6335  ;;  %v4069_v22 = vpop.xlane.xlu2 %4068  ;;  %v4292_v18 = vmul.f32 %v6334_v12, %v10867_v58  ;;  %v12861_v58 = vld [vmem:[#allocation175_spill] sm:$0xff] }
 0x75a   : > { %v4107_v19 = vsub.f32 %v12788_v59, %v4069_v22  ;;  %v3865_v2 = vpop.xlane.xlu0 %3864  ;;  %v3588_v50 = vmul.f32 %v6336_v43, %v10864_v40  ;;  %v4909_v7 = vpop.f32.mrf.mxu2  ;;  %v3404_v38 = vsub.f32 %v12862_v6, %v12861_v58  ;;  %v12863_v43 = vld [vmem:[#allocation129_spill] sm:$0xff]  ;;  %v12864_v22 = vld [vmem:[#allocation104_spill] sm:$0xff] }
 0x75b   : > { %v4071_v48 = vpop.xlane.xlu1 %4070  ;;  %6339 = vrcp.f32 %v3865_v2  ;;  %v4324_v10 = vmax.f32 %v4292_v18, 0.001  ;;  %v6338_v36 = vpop.eup %6337  ;;  %v4910_v16 = vadd.f32 %v4909_v7, %v4797_v42  ;;  %v12868_v58 = vld [vmem:[#allocation109_spill] sm:$0xff] }
 0x75c   : > { %v5022_v25 = vpop.f32.mrf.mxu3  ;;  %v4164_v59 = vmul.f32 1.442695, %v4107_v19  ;;  %v3620_v29 = vmax.f32 %v3588_v50, 0.001  ;;  %v4108_v40 = vsub.f32 %v12789_v52, %v4071_v48  ;;  %v4293_v18 = vmul.f32 %v6338_v36, %v12864_v22  ;;  %v12865_v50 = vld [vmem:[#allocation73_spill] sm:$0xff]  ;;  %v12871_v22 = vld [vmem:[#allocation62_spill] sm:$0xff] }
 0x75d   : > { %3728 = vmax.xlane.f32.xlu1 %v11114_v55  ;;  %5069 = vmatmul.f32.gmra.mxu3 %v4324_v10  ;;  %v5023_v12 = vadd.f32 %v5022_v25, %v4910_v16  ;;  %v4802_v61 = vpop.f32.mrf.mxu1  ;;  %v3462_v60 = vmul.f32 1.442695, %v3404_v38  ;;  %v4800_v52 = vadd.f32 %v4799_v44, %v4687_v14  ;;  %v12866_v48 = vld [vmem:[#allocation101_spill] sm:$0xff] }
 0x75e   : > { %6341 = vpow2.f32 %v4164_v59  ;;  %4080 = vmax.xlane.f32.xlu2 %v12863_v43  ;;  %4843 = vmatmul.f32.gmra.mxu1 %v3620_v29  ;;  %v4166_v19 = vmul.f32 1.442695, %v4108_v40  ;;  %v4577_v7 = vadd.f32 %v12866_v48, %v12865_v50  ;;  %v4325_v6 = vmax.f32 %v4293_v18, 0.001  ;;  %v12869_v29 = vld [vmem:[#allocation94_spill] sm:$0xff] }
 0x75f   : > { %6343 = vpow2.f32 %v3460_v13  ;;  %5114 = vst [vmem:[%s11088_s27 + $0x10] sm:$0xff] %v5023_v12  ;;  %v12870_v12 = vld [vmem:[#allocation61_spill] sm:$0xff] }
 0x760   : > { %v4690_v40 = vadd.f32 %v12869_v29, %v4577_v7  ;;  %v3405_v18 = vsub.f32 %v12871_v22, %v12870_v12  ;;  %v12877_v12 = vld [vmem:[#allocation198_spill] sm:$0xff] }
 0x761   : > { %v6340_v42 = vpop.eup %6339  ;;  %v3513_v2 = vpop.xlane.xlu2 %3512 }
 0x762   : > { %6345 = vrcp.f32 %v3513_v2  ;;  %v3719_v37 = vpop.xlane.xlu0 %3718  ;;  %v3941_v28 = vmul.f32 %v6340_v42, %v12867_v39  ;;  %v4912_v10 = vpop.f32.mrf.mxu2  ;;  %v4803_v48 = vadd.f32 %v4802_v61, %v4690_v40  ;;  %v12875_v61 = vld [vmem:[#allocation96_spill] sm:$0xff] }
 0x763   : > { %v3515_v23 = vpop.xlane.xlu1 %3514  ;;  %v3756_v13 = vsub.f32 %v12868_v58, %v3719_v37  ;;  %6347 = vpow2.f32 %v3462_v60  ;;  %v4913_v38 = vadd.f32 %v4912_v10, %v4800_v52  ;;  %v3464_v37 = vmul.f32 1.442695, %v3405_v18  ;;  %v12873_v58 = vld [vmem:[#allocation121_spill] sm:$0xff]  ;;  %v12878_v18 = vld [vmem:[#allocation151_spill] sm:$0xff] }
 0x764   : > { %v11128_v36 = vpop.eup %6341  ;;  %v5025_v16 = vpop.f32.mrf.mxu3  ;;  %v3973_v25 = vmax.f32 %v3941_v28, 0.001  ;;  %6349 = vpow2.f32 %v4166_v19  ;;  %v12872_v19 = vld [vmem:[#allocation110_spill] sm:$0xff] }
 0x765   : > { %v11130_v44 = vpop.eup %6343  ;;  %v3814_v59 = vmul.f32 1.442695, %v3756_v13  ;;  %4228 = vadd.xlane.f32.xlu1 %v11128_v36  ;;  %5072 = vmatmul.f32.gmra.mxu3 %v4325_v6  ;;  %6351 = vrcp.f32 %v3515_v23  ;;  %v5026_v14 = vadd.f32 %v5025_v16, %v4913_v38  ;;  %v4805_v42 = vpop.f32.mrf.mxu1  ;;  %v12874_v13 = vld [vmem:[#allocation74_spill] sm:$0xff] }
 0x766   : > { %3524 = vadd.xlane.f32.xlu2 %v11130_v44  ;;  %4959 = vmatmul.f32.gmra.mxu2 %v3973_v25  ;;  %v4580_v6 = vadd.f32 %v12874_v13, %v12873_v58  ;;  %v12881_v58 = vld [vmem:[#allocation77_spill] sm:$0xff] }
 0x767   : > { %6353 = vpow2.f32 %v3814_v59  ;;  %5115 = vst [vmem:[%s11088_s27 + $0x18] sm:$0xff] %v5026_v14  ;;  %v12876_v14 = vld [vmem:[#allocation49_spill] sm:$0xff] }
 0x768   : > { %v6346_v60 = vpop.eup %6345  ;;  %v4693_v29 = vadd.f32 %v12875_v61, %v4580_v6  ;;  %v3406_v22 = vsub.f32 %v12877_v12, %v12876_v14  ;;  %v12882_v12 = vld [vmem:[#allocation50_spill] sm:$0xff] }
 0x769   : > { %v3867_v2 = vpop.xlane.xlu2 %3866  ;;  %v3589_v52 = vmul.f32 %v6346_v60, %v12872_v19  ;;  %v11139_v50 = vpop.eup %6347 }
 0x76a   : > { %6355 = vrcp.f32 %v3867_v2  ;;  %v11141_v7 = vpop.eup %6349  ;;  %v4915_v39 = vpop.f32.mrf.mxu2  ;;  %v4806_v6 = vadd.f32 %v4805_v42, %v4693_v29  ;;  %v12883_v29 = vld [vmem:[#allocation99_spill] sm:$0xff] }
 0x76b   : > { %v4219_v28 = vpop.xlane.xlu0 %4218  ;;  %v3621_v23 = vmax.f32 %v3589_v52, 0.001  ;;  %v6352_v10 = vpop.eup %6351  ;;  %v4916_v16 = vadd.f32 %v4915_v39, %v4803_v48  ;;  %v12879_v48 = vld [vmem:[#allocation57_spill] sm:$0xff] }
 0x76c   : > { %v3869_v38 = vpop.xlane.xlu1 %3868  ;;  %v5028_v25 = vpop.f32.mrf.mxu3  ;;  %6357 = vrcp.f32 %v4219_v28  ;;  %v3590_v60 = vmul.f32 %v6352_v10, %v12878_v18 }
 0x76d   : > { %v11145_v59 = vpop.eup %6353  ;;  %4230 = vadd.xlane.f32.xlu1 %v11141_v7  ;;  %4846 = vmatmul.f32.gmra.mxu1 %v3621_v23  ;;  %6359 = vrcp.f32 %v3869_v38  ;;  %v5029_v40 = vadd.f32 %v5028_v25, %v4916_v16  ;;  %v4808_v19 = vpop.f32.mrf.mxu1  ;;  %v12880_v23 = vld [vmem:[#allocation220_spill] sm:$0xff]  ;;  %v3466_v16 = vmul.f32 1.442695, %v3406_v22 }
 0x76e   : > { %3526 = vadd.xlane.f32.xlu2 %v11139_v50  ;;  %3878 = vadd.xlane.f32.xlu0 %v11145_v59  ;;  %6361 = vpow2.f32 %v3464_v37  ;;  %v4583_v13 = vadd.f32 %v12881_v58, %v12880_v23  ;;  %v3622_v14 = vmax.f32 %v3590_v60, 0.001  ;;  %v12885_v23 = vld [vmem:[#allocation52_spill] sm:$0xff]  ;;  %v12886_v58 = vld [vmem:[#allocation113_spill] sm:$0xff] }
 0x76f   : > { %5116 = vst [vmem:[%s11088_s27 + $0x20] sm:$0xff] %v5029_v40 }
 0x770   : > { %v6356_v2 = vpop.eup %6355  ;;  %v4696_v22 = vadd.f32 %v12883_v29, %v4583_v13  ;;  %v12888_v13 = vld [vmem:[#allocation80_spill] sm:$0xff]  ;;  %v12889_v29 = vld [vmem:[#allocation205_spill] sm:$0xff] }
 0x771   : > { %v3721_v52 = vpop.xlane.xlu2 %3720  ;;  %v3942_v39 = vmul.f32 %v6356_v2, %v12879_v48 }
 0x772   : > { %v6358_v28 = vpop.eup %6357  ;;  %v3757_v38 = vsub.f32 %v10950_v32, %v3721_v52  ;;  %v4918_v25 = vpop.f32.mrf.mxu2 }
 0x773   : > { %v4073_v61 = vpop.xlane.xlu0 %4072  ;;  %v3974_v37 = vmax.f32 %v3942_v39, 0.001  ;;  %v4294_v10 = vmul.f32 %v6358_v28, %v12882_v12  ;;  %v6360_v18 = vpop.eup %6359  ;;  %v4919_v40 = vadd.f32 %v4918_v25, %v4806_v6  ;;  %v12884_v28 = vld [vmem:[#allocation65_spill] sm:$0xff] }
 0x774   : > { %v3723_v51 = vpop.xlane.xlu1 %3722  ;;  %v5031_v0 = vpop.f32.mrf.mxu3  ;;  %v3816_v9 = vmul.f32 1.442695, %v3757_v38  ;;  %v4109_v2 = vsub.f32 %v12820_v47, %v4073_v61  ;;  %v3407_v47 = vsub.f32 %v12885_v23, %v12884_v28  ;;  %v3943_v6 = vmul.f32 %v6360_v18, %v12886_v58 }
 0x775   : > { %v11161_v48 = vpop.eup %6361  ;;  %v3758_v42 = vsub.f32 %v10956_v31, %v3723_v51  ;;  %4849 = vmatmul.f32.gmra.mxu1 %v3622_v14  ;;  %4962 = vmatmul.f32.gmra.mxu2 %v3974_v37  ;;  %v4326_v32 = vmax.f32 %v4294_v10, 0.001  ;;  %v5032_v60 = vadd.f32 %v5031_v0, %v4919_v40  ;;  %v4698_v39 = vpop.f32.mrf.mxu0  ;;  %v4809_v38 = vadd.f32 %v4808_v19, %v4696_v22  ;;  %v12890_v22 = vld [vmem:[#allocation51_spill] sm:$0xff] }
 0x776   : > { %6363 = vpow2.f32 %v3816_v9  ;;  %v4168_v52 = vmul.f32 1.442695, %v4109_v2  ;;  %3528 = vadd.xlane.f32.xlu2 %v11161_v48  ;;  %v4811_v25 = vpop.f32.mrf.mxu1  ;;  %v3468_v0 = vmul.f32 1.442695, %v3407_v47  ;;  %v12887_v9 = vld [vmem:[#allocation76_spill] sm:$0xff] }
 0x777   : > { %6365 = vpow2.f32 %v3466_v16  ;;  %5075 = vmatmul.f32.gmra.mxu3 %v4326_v32  ;;  %5117 = vst [vmem:[%s11088_s27 + $0x28] sm:$0xff] %v5032_v60  ;;  %v3818_v31 = vmul.f32 1.442695, %v3758_v42  ;;  %v4586_v61 = vadd.f32 %v12888_v13, %v12887_v9  ;;  %v3975_v37 = vmax.f32 %v3943_v6, 0.001 }
 0x778   : > { %6367 = vpow2.f32 %v4168_v52  ;;  %v3408_v60 = vsub.f32 %v12890_v22, %v12889_v29  ;;  %v12894_v22 = vld [vmem:[#allocation17_spill] sm:$0xff] }
 0x779   : > { %v4221_v51 = vpop.xlane.xlu2 %4220  ;;  %v4699_v32 = vadd.f32 %v4698_v39, %v4586_v61 }
 0x77a   : > { %6369 = vrcp.f32 %v4221_v51  ;;  %v4921_v14 = vpop.f32.mrf.mxu2  ;;  %v3470_v51 = vmul.f32 1.442695, %v3408_v60 }
 0x77b   : > { %v3517_v16 = vpop.xlane.xlu0 %3516  ;;  %v4922_v40 = vadd.f32 %v4921_v14, %v4809_v38  ;;  %v12891_v14 = vld [vmem:[#allocation75_spill] sm:$0xff] }
 0x77c   : > { %v11172_v12 = vpop.eup %6363  ;;  %v4223_v10 = vpop.xlane.xlu1 %4222  ;;  %6371 = vrcp.f32 %v3517_v16  ;;  %v12892_v16 = vld [vmem:[#allocation89_spill] sm:$0xff] }
 0x77d   : > { %v5034_v2 = vpop.f32.mrf.mxu3  ;;  %v11174_v18 = vpop.eup %6365  ;;  %6373 = vpow2.f32 %v3818_v31  ;;  %4965 = vmatmul.f32.gmra.mxu2 %v3975_v37  ;;  %3880 = vadd.xlane.f32.xlu0 %v11172_v12  ;;  %v4589_v37 = vadd.f32 %v12892_v16, %v12891_v14 }
 0x77e   : > { %v11177_v19 = vpop.eup %6367  ;;  %6375 = vrcp.f32 %v4223_v10  ;;  %v5035_v42 = vadd.f32 %v5034_v2, %v4922_v40  ;;  %3530 = vadd.xlane.f32.xlu2 %v11174_v18  ;;  %v4701_v52 = vpop.f32.mrf.mxu0 }
 0x77f   : > { %6377 = vpow2.f32 %v3468_v0  ;;  %4232 = vadd.xlane.f32.xlu1 %v11177_v19  ;;  %v4814_v38 = vpop.f32.mrf.mxu1  ;;  %v4812_v0 = vadd.f32 %v4811_v25, %v4699_v32  ;;  %v12893_v32 = vld [vmem:[#allocation69_spill] sm:$0xff] }
 0x780   : > { %v6370_v28 = vpop.eup %6369  ;;  %5118 = vst [vmem:[%s11088_s27 + $0x30] sm:$0xff] %v5035_v42  ;;  %v3057_v60 = vsub.f32 %v12894_v22, %v12893_v32  ;;  %v12899_v32 = vld [vmem:[#allocation203_spill] sm:$0xff] }
 0x781   : > { %v4075_v23 = vpop.xlane.xlu2 %4074  ;;  %v4295_v47 = vmul.f32 %v6370_v28, %v10968_v20 }
 0x782   : > { %v6372_v58 = vpop.eup %6371  ;;  %v4110_v6 = vsub.f32 %v12832_v21, %v4075_v23  ;;  %v4924_v40 = vpop.f32.mrf.mxu2  ;;  %v12895_v23 = vld [vmem:[#allocation118_spill] sm:$0xff] }
 0x783   : > { %v11186_v31 = vpop.eup %6373  ;;  %v3871_v39 = vpop.xlane.xlu0 %3870  ;;  %v3591_v9 = vmul.f32 %v6372_v58, %v10963_v3  ;;  %v4327_v13 = vmax.f32 %v4295_v47, 0.001  ;;  %v4925_v42 = vadd.f32 %v4924_v40, %v4812_v0  ;;  %v4702_v3 = vadd.f32 %v4701_v52, %v4589_v37  ;;  %v12896_v52 = vld [vmem:[#allocation163_spill] sm:$0xff] }
 0x784   : > { %v6376_v61 = vpop.eup %6375  ;;  %v4077_v10 = vpop.xlane.xlu1 %4076  ;;  %v4170_v2 = vmul.f32 1.442695, %v4110_v6  ;;  %6379 = vrcp.f32 %v3871_v39 }
 0x785   : > { %v11191_v20 = vpop.eup %6377  ;;  %v4111_v21 = vsub.f32 %v12833_v49, %v4077_v10  ;;  %v5037_v29 = vpop.f32.mrf.mxu3  ;;  %3882 = vadd.xlane.f32.xlu0 %v11186_v31  ;;  %v3623_v25 = vmax.f32 %v3591_v9, 0.001  ;;  %5078 = vmatmul.f32.gmra.mxu3 %v4327_v13  ;;  %v4296_v47 = vmul.f32 %v6376_v61, %v12895_v23  ;;  %v4815_v39 = vadd.f32 %v4814_v38, %v4702_v3  ;;  %v12897_v13 = vld [vmem:[#allocation13_spill] sm:$0xff] }
 0x786   : > { %6381 = vpow2.f32 %v4170_v2  ;;  %3532 = vadd.xlane.f32.xlu2 %v11191_v20  ;;  %v5038_v28 = vadd.f32 %v5037_v29, %v4925_v42  ;;  %v4704_v49 = vpop.f32.mrf.mxu0  ;;  %v3120_v9 = vmul.f32 1.442695, %v3057_v60  ;;  %v4592_v14 = vadd.f32 %v12897_v13, %v12896_v52 }
 0x787   : > { %6383 = vpow2.f32 %v3470_v51  ;;  %4852 = vmatmul.f32.gmra.mxu1 %v3623_v25  ;;  %v4172_v58 = vmul.f32 1.442695, %v4111_v21  ;;  %v4817_v16 = vpop.f32.mrf.mxu1  ;;  %v4328_v37 = vmax.f32 %v4296_v47, 0.001 }
 0x788   : > { %5119 = vst [vmem:[%s11088_s27 + $0x38] sm:$0xff] %v5038_v28  ;;  %v4705_v60 = vadd.f32 %v4704_v49, %v4592_v14  ;;  %v12900_v49 = vld [vmem:[#allocation85_spill] sm:$0xff] }
 0x789   : > { %v3519_v6 = vpop.xlane.xlu2 %3518 }
 0x78a   : > { %v6380_v0 = vpop.eup %6379  ;;  %6385 = vrcp.f32 %v3519_v6  ;;  %v4927_v61 = vpop.f32.mrf.mxu2 }
 0x78b   : > { %v3725_v51 = vpop.xlane.xlu0 %3724  ;;  %v3944_v10 = vmul.f32 %v6380_v0, %v10988_v35  ;;  %6387 = vpow2.f32 %v4172_v58  ;;  %v4928_v38 = vadd.f32 %v4927_v61, %v4815_v39  ;;  %v12898_v35 = vld [vmem:[#allocation210_spill] sm:$0xff]  ;;  %v4818_v0 = vadd.f32 %v4817_v16, %v4705_v60  ;;  %v12903_v60 = vld [vmem:[#allocation88_spill] sm:$0xff] }
 0x78c   : > { %v11203_v40 = vpop.eup %6381  ;;  %v3521_v2 = vpop.xlane.xlu1 %3520  ;;  %v3759_v21 = vsub.f32 %v11003_v15, %v3725_v51  ;;  %v3409_v22 = vsub.f32 %v12899_v32, %v12898_v35 }
 0x78d   : > { %v11206_v42 = vpop.eup %6383  ;;  %v5040_v29 = vpop.f32.mrf.mxu3  ;;  %5081 = vmatmul.f32.gmra.mxu3 %v4328_v37  ;;  %4234 = vadd.xlane.f32.xlu1 %v11203_v40  ;;  %v3976_v25 = vmax.f32 %v3944_v10, 0.001  ;;  %6389 = vrcp.f32 %v3521_v2 }
 0x78e   : > { %v3820_v3 = vmul.f32 1.442695, %v3759_v21  ;;  %3534 = vadd.xlane.f32.xlu2 %v11206_v42  ;;  %6391 = vpow2.f32 %v3120_v9  ;;  %v5041_v15 = vadd.f32 %v5040_v29, %v4928_v38  ;;  %v4707_v23 = vpop.f32.mrf.mxu0  ;;  %v3472_v6 = vmul.f32 1.442695, %v3409_v22  ;;  %v12901_v9 = vld [vmem:[#allocation23_spill] sm:$0xff] }
 0x78f   : > { %4968 = vmatmul.f32.gmra.mxu2 %v3976_v25  ;;  %v4820_v13 = vpop.f32.mrf.mxu1  ;;  %v4595_v14 = vadd.f32 %v12901_v9, %v12900_v49  ;;  %v12902_v22 = vld [vmem:[#allocation87_spill] sm:$0xff] }
 0x790   : > { %v6386_v28 = vpop.eup %6385  ;;  %6393 = vpow2.f32 %v3820_v3  ;;  %5120 = vst [vmem:[%s11088_s27 + $0x40] sm:$0xff] %v5041_v15  ;;  %v4598_v15 = vadd.f32 %v12903_v60, %v12902_v22 }
 0x791   : > { %v3592_v47 = vmul.f32 %v6386_v28, %v10999_v34  ;;  %v11214_v58 = vpop.eup %6387  ;;  %6395 = vpow2.f32 %v3472_v6  ;;  %v4708_v38 = vadd.f32 %v4707_v23, %v4595_v14 }
 0x792   : > { %v4930_v51 = vpop.f32.mrf.mxu2 }
 0x793   : > { %v3624_v39 = vmax.f32 %v3592_v47, 0.001  ;;  %v6390_v52 = vpop.eup %6389  ;;  %v4931_v10 = vadd.f32 %v4930_v51, %v4818_v0  ;;  %v4821_v29 = vadd.f32 %v4820_v13, %v4708_v38  ;;  %v12904_v13 = vld [vmem:[#allocation37_spill] sm:$0xff]  ;;  %v12905_v51 = vld [vmem:[#allocation90_spill] sm:$0xff] }
 0x794   : > { %v11216_v37 = vpop.eup %6391  ;;  %v3593_v61 = vmul.f32 %v6390_v52, %v11006_v53  ;;  %v4601_v49 = vadd.f32 %v12905_v51, %v12904_v13 }
 0x795   : > { %v5043_v2 = vpop.f32.mrf.mxu3  ;;  %4236 = vadd.xlane.f32.xlu1 %v11214_v58  ;;  %4855 = vmatmul.f32.gmra.mxu1 %v3624_v39 }
 0x796   : > { %v11221_v34 = vpop.eup %6393  ;;  %3184 = vadd.xlane.f32.xlu2 %v11216_v37  ;;  %v5044_v16 = vadd.f32 %v5043_v2, %v4931_v10  ;;  %v4710_v21 = vpop.f32.mrf.mxu0  ;;  %v3625_v25 = vmax.f32 %v3593_v61, 0.001 }
 0x797   : > { %3884 = vadd.xlane.f32.xlu0 %v11221_v34  ;;  %v4823_v3 = vpop.f32.mrf.mxu1  ;;  %v11227_v32 = vpop.eup %6395  ;;  %v4711_v6 = vadd.f32 %v4710_v21, %v4598_v15  ;;  %v12906_v21 = vld [vmem:[#allocation108_spill] sm:$0xff] }
 0x798   : > { %5121 = vst [vmem:[%s11088_s27 + $0x48] sm:$0xff] %v5044_v16 }
 0x799   : > { %v4824_v0 = vadd.f32 %v4823_v3, %v4711_v6 }
 0x79a   : > { %v4933_v35 = vpop.f32.mrf.mxu2 }
 0x79b   : > { %v4934_v28 = vadd.f32 %v4933_v35, %v4821_v29 }
 0x79d   : > { %v5046_v47 = vpop.f32.mrf.mxu3  ;;  %4858 = vmatmul.f32.gmra.mxu1 %v3625_v25  ;;  %v12907_v25 = vld [vmem:[#allocation97_spill] sm:$0xff] }
 0x79e   : > { %3536 = vadd.xlane.f32.xlu2 %v11227_v32  ;;  %v5047_v53 = vadd.f32 %v5046_v47, %v4934_v28  ;;  %v4713_v23 = vpop.f32.mrf.mxu0  ;;  %v4604_v35 = vadd.f32 %v12907_v25, %v12906_v21 }
 0x79f   : > { %v4826_v39 = vpop.f32.mrf.mxu1  ;;  %v4714_v2 = vadd.f32 %v4713_v23, %v4601_v49  ;;  %v12908_v49 = vld [vmem:[#allocation15_spill] sm:$0xff] }
 0x7a0   : > { %5122 = vst [vmem:[%s11088_s27 + $0x50] sm:$0xff] %v5047_v53 }
 0x7a1   : > { %v4827_v61 = vadd.f32 %v4826_v39, %v4714_v2 }
 0x7a2   : > { %v4936_v52 = vpop.f32.mrf.mxu2 }
 0x7a3   : > { %v4937_v9 = vadd.f32 %v4936_v52, %v4824_v0 }
 0x7a5   : > { %v5049_v14 = vpop.f32.mrf.mxu3 }
 0x7a6   : > { %v5050_v10 = vadd.f32 %v5049_v14, %v4937_v9  ;;  %v4716_v29 = vpop.f32.mrf.mxu0  ;;  %v12909_v9 = vld [vmem:[#allocation147_spill] sm:$0xff] }
 0x7a7   : > { %v4829_v60 = vpop.f32.mrf.mxu1  ;;  %v4717_v53 = vadd.f32 %v4716_v29, %v4604_v35  ;;  %v4607_v14 = vadd.f32 %v12909_v9, %v12908_v49 }
 0x7a8   : > { %5123 = vst [vmem:[%s11088_s27 + $0x58] sm:$0xff] %v5050_v10 }
 0x7a9   : > { %v3873_v16 = vpop.xlane.xlu2 %3872  ;;  %v4830_v39 = vadd.f32 %v4829_v60, %v4717_v53 }
 0x7aa   : > { %6397 = vrcp.f32 %v3873_v16  ;;  %v4939_v38 = vpop.f32.mrf.mxu2 }
 0x7ab   : > { %v4940_v3 = vadd.f32 %v4939_v38, %v4827_v61 }
 0x7ad   : > { %v5052_v22 = vpop.f32.mrf.mxu3 }
 0x7ae   : > { %v5053_v15 = vadd.f32 %v5052_v22, %v4940_v3  ;;  %v4719_v10 = vpop.f32.mrf.mxu0 }
 0x7af   : > { %v4225_v47 = vpop.xlane.xlu0 %4224  ;;  %v4832_v61 = vpop.f32.mrf.mxu1 }
 0x7b0   : > { %v6398_v28 = vpop.eup %6397  ;;  %5124 = vst [vmem:[%s11088_s27 + $0x60] sm:$0xff] %v5053_v15  ;;  %6399 = vrcp.f32 %v4225_v47  ;;  %v12911_v47 = vld [vmem:[#allocation194_spill] sm:$0xff] }
 0x7b1   : > { %v3727_v6 = vpop.xlane.xlu2 %3726  ;;  %v3945_v23 = vmul.f32 %v6398_v28, %v11044_v41  ;;  %v12910_v28 = vld [vmem:[#allocation185_spill] sm:$0xff] }
 0x7b2   : > { %v3760_v0 = vsub.f32 %v11056_v17, %v3727_v6  ;;  %v4942_v51 = vpop.f32.mrf.mxu2  ;;  %v4720_v17 = vadd.f32 %v4719_v10, %v4607_v14  ;;  %v4610_v53 = vadd.f32 %v12911_v47, %v12910_v28 }
 0x7b3   : > { %v3977_v52 = vmax.f32 %v3945_v23, 0.001  ;;  %v4943_v2 = vadd.f32 %v4942_v51, %v4830_v39 }
 0x7b4   : > { %v3822_v13 = vmul.f32 1.442695, %v3760_v0  ;;  %v4833_v3 = vadd.f32 %v4832_v61, %v4720_v17 }
 0x7b5   : > { %v5055_v16 = vpop.f32.mrf.mxu3  ;;  %4971 = vmatmul.f32.gmra.mxu2 %v3977_v52 }
 0x7b6   : > { %6401 = vpow2.f32 %v3822_v13  ;;  %v6400_v38 = vpop.eup %6399  ;;  %v5056_v29 = vadd.f32 %v5055_v16, %v4943_v2  ;;  %v4722_v0 = vpop.f32.mrf.mxu0 }
 0x7b7   : > { %v4079_v21 = vpop.xlane.xlu0 %4078  ;;  %v4297_v41 = vmul.f32 %v6400_v38, %v11052_v45  ;;  %v4835_v45 = vpop.f32.mrf.mxu1  ;;  %v4723_v52 = vadd.f32 %v4722_v0, %v4610_v53 }
 0x7b8   : > { %5125 = vst [vmem:[%s11088_s27 + $0x68] sm:$0xff] %v5056_v29  ;;  %v4112_v25 = vsub.f32 %v12850_v54, %v4079_v21  ;;  %v12912_v21 = vld [vmem:[#allocation58_spill] sm:$0xff] }
 0x7b9   : > { %v4329_v35 = vmax.f32 %v4297_v41, 0.001  ;;  %v4836_v51 = vadd.f32 %v4835_v45, %v4723_v52 }
 0x7ba   : > { %v4174_v22 = vmul.f32 1.442695, %v4112_v25  ;;  %v4945_v15 = vpop.f32.mrf.mxu2 }
 0x7bb   : > { %5084 = vmatmul.f32.gmra.mxu3 %v4329_v35  ;;  %v4946_v6 = vadd.f32 %v4945_v15, %v4833_v3 }
 0x7bc   : > { %v11246_v60 = vpop.eup %6401  ;;  %6403 = vpow2.f32 %v4174_v22 }
 0x7bd   : > { %v5058_v23 = vpop.f32.mrf.mxu3  ;;  %3886 = vadd.xlane.f32.xlu0 %v11246_v60 }
 0x7be   : > { %v5059_v39 = vadd.f32 %v5058_v23, %v4946_v6  ;;  %v4725_v2 = vpop.f32.mrf.mxu0 }
 0x7bf   : > { %v3523_v54 = vpop.xlane.xlu0 %3522  ;;  %v4838_v61 = vpop.f32.mrf.mxu1  ;;  %v4726_v41 = vadd.f32 %v4725_v2, %v12912_v21 }
 0x7c0   : > { %5126 = vst [vmem:[%s11088_s27 + $0x70] sm:$0xff] %v5059_v39  ;;  %6405 = vrcp.f32 %v3523_v54  ;;  %v12913_v39 = vld [vmem:[#allocation136_spill] sm:$0xff] }
 0x7c1   : > { %v4839_v3 = vadd.f32 %v4838_v61, %v4726_v41 }
 0x7c2   : > { %v11252_v13 = vpop.eup %6403  ;;  %v4948_v49 = vpop.f32.mrf.mxu2 }
 0x7c3   : > { %4238 = vadd.xlane.f32.xlu1 %v11252_v13  ;;  %v4949_v9 = vadd.f32 %v4948_v49, %v4836_v51 }
 0x7c5   : > { %v5061_v14 = vpop.f32.mrf.mxu3 }
 0x7c6   : > { %v6406_v10 = vpop.eup %6405  ;;  %v5062_v16 = vadd.f32 %v5061_v14, %v4949_v9  ;;  %v4728_v53 = vpop.f32.mrf.mxu0 }
 0x7c7   : > { %v3594_v29 = vmul.f32 %v6406_v10, %v11083_v4  ;;  %v4841_v4 = vpop.f32.mrf.mxu1  ;;  %v4729_v54 = vadd.f32 %v4728_v53, %v12913_v39 }
 0x7c8   : > { %v3875_v38 = vpop.xlane.xlu1 %3874  ;;  %5127 = vst [vmem:[%s11088_s27 + $0x78] sm:$0xff] %v5062_v16 }
 0x7c9   : > { %6407 = vrcp.f32 %v3875_v38  ;;  %v4227_v17 = vpop.xlane.xlu2 %4226  ;;  %v3626_v35 = vmax.f32 %v3594_v29, 0.001  ;;  %v4842_v2 = vadd.f32 %v4841_v4, %v4729_v54 }
 0x7ca   : > { %6409 = vrcp.f32 %v4227_v17  ;;  %v3877_v25 = vpop.xlane.xlu0 %3876  ;;  %v4951_v22 = vpop.f32.mrf.mxu2 }
 0x7cb   : > { %4861 = vmatmul.f32.gmra.mxu1 %v3626_v35  ;;  %6411 = vrcp.f32 %v3877_v25  ;;  %v4952_v15 = vadd.f32 %v4951_v22, %v4839_v3  ;;  %v12914_v25 = vld [vmem:[#allocation150_spill] sm:$0xff] }
 0x7cd   : > { %v5064_v28 = vpop.f32.mrf.mxu3 }
 0x7ce   : > { %v5065_v6 = vadd.f32 %v5064_v28, %v4952_v15  ;;  %v4731_v17 = vpop.f32.mrf.mxu0 }
 0x7cf   : > { %v6408_v47 = vpop.eup %6407  ;;  %v4732_v35 = vadd.f32 %v4731_v17, %v12914_v25 }
 0x7d0   : > { %v6410_v23 = vpop.eup %6409  ;;  %v3729_v45 = vpop.xlane.xlu1 %3728  ;;  %v3946_v0 = vmul.f32 %v6408_v47, %v11092_v46  ;;  %5128 = vst [vmem:[%s11088_s27 + $0x80] sm:$0xff] %v5065_v6 }
 0x7d1   : > { %v3761_v52 = vsub.f32 %v11114_v55, %v3729_v45  ;;  %v4081_v51 = vpop.xlane.xlu2 %4080  ;;  %v4298_v49 = vmul.f32 %v6410_v23, %v11096_v5  ;;  %v6412_v10 = vpop.eup %6411 }
 0x7d2   : > { %v4113_v9 = vsub.f32 %v12863_v43, %v4081_v51  ;;  %v3978_v14 = vmax.f32 %v3946_v0, 0.001  ;;  %v4954_v29 = vpop.f32.mrf.mxu2  ;;  %v3947_v55 = vmul.f32 %v6412_v10, %v11099_v33 }
 0x7d3   : > { %v3824_v16 = vmul.f32 1.442695, %v3761_v52  ;;  %v4330_v61 = vmax.f32 %v4298_v49, 0.001  ;;  %v4955_v46 = vadd.f32 %v4954_v29, %v4842_v2 }
 0x7d4   : > { %v4176_v38 = vmul.f32 1.442695, %v4113_v9  ;;  %4974 = vmatmul.f32.gmra.mxu2 %v3978_v14  ;;  %v3979_v3 = vmax.f32 %v3947_v55, 0.001 }
 0x7d5   : > { %6413 = vpow2.f32 %v3824_v16  ;;  %5087 = vmatmul.f32.gmra.mxu3 %v4330_v61  ;;  %v5067_v21 = vpop.f32.mrf.mxu3 }
 0x7d6   : > { %6415 = vpow2.f32 %v4176_v38  ;;  %v5068_v41 = vadd.f32 %v5067_v21, %v4955_v46  ;;  %v4734_v2 = vpop.f32.mrf.mxu0  ;;  %v12915_v38 = vld [vmem:[#allocation223_spill] sm:$0xff] }
 0x7d7   : > { %v4735_v29 = vadd.f32 %v4734_v2, %v12915_v38 }
 0x7d8   : > { %v4229_v5 = vpop.xlane.xlu1 %4228  ;;  %5129 = vst [vmem:[%s11088_s27 + $0x88] sm:$0xff] %v5068_v41 }
 0x7d9   : > { %6417 = vrcp.f32 %v4229_v5  ;;  %v3525_v43 = vpop.xlane.xlu2 %3524 }
 0x7da   : > { %6419 = vrcp.f32 %v3525_v43  ;;  %v4957_v33 = vpop.f32.mrf.mxu2 }
 0x7db   : > { %v11267_v22 = vpop.eup %6413  ;;  %v4844_v15 = vpop.f32.mrf.mxu1 }
 0x7dc   : > { %v11269_v28 = vpop.eup %6415  ;;  %v4845_v47 = vadd.f32 %v4844_v15, %v4732_v35  ;;  %3888 = vadd.xlane.f32.xlu0 %v11267_v22  ;;  %4977 = vmatmul.f32.gmra.mxu2 %v3979_v3 }
 0x7dd   : > { %4240 = vadd.xlane.f32.xlu1 %v11269_v28 }
 0x7de   : > { %v4958_v6 = vadd.f32 %v4957_v33, %v4845_v47 }
 0x7df   : > { %v6418_v53 = vpop.eup %6417 }
 0x7e0   : > { %v6420_v23 = vpop.eup %6419  ;;  %v4231_v4 = vpop.xlane.xlu1 %4230  ;;  %v4299_v0 = vmul.f32 %v6418_v53, %v11128_v36 }
 0x7e1   : > { %v5070_v45 = vpop.f32.mrf.mxu3  ;;  %6421 = vrcp.f32 %v4231_v4  ;;  %v3527_v54 = vpop.xlane.xlu2 %3526  ;;  %v3595_v51 = vmul.f32 %v6420_v23, %v11130_v44  ;;  %v12916_v23 = vld [vmem:[#allocation106_spill] sm:$0xff] }
 0x7e2   : > { %v5071_v39 = vadd.f32 %v5070_v45, %v4958_v6  ;;  %v3879_v52 = vpop.xlane.xlu0 %3878  ;;  %6423 = vrcp.f32 %v3527_v54  ;;  %v4331_v49 = vmax.f32 %v4299_v0, 0.001  ;;  %v4737_v53 = vpop.f32.mrf.mxu0 }
 0x7e3   : > { %6425 = vrcp.f32 %v3879_v52  ;;  %v3627_v9 = vmax.f32 %v3595_v51, 0.001  ;;  %v4738_v4 = vadd.f32 %v4737_v53, %v12916_v23 }
 0x7e4   : > { %5130 = vst [vmem:[%s11088_s27 + $0x90] sm:$0xff] %v5071_v39  ;;  %5090 = vmatmul.f32.gmra.mxu3 %v4331_v49 }
 0x7e5   : > { %4864 = vmatmul.f32.gmra.mxu1 %v3627_v9 }
 0x7e7   : > { %v6422_v14 = vpop.eup %6421 }
 0x7e8   : > { %v6424_v10 = vpop.eup %6423  ;;  %v4300_v16 = vmul.f32 %v6422_v14, %v11141_v7 }
 0x7e9   : > { %v6426_v61 = vpop.eup %6425  ;;  %v3529_v36 = vpop.xlane.xlu2 %3528  ;;  %v3596_v46 = vmul.f32 %v6424_v10, %v11139_v50 }
 0x7ea   : > { %6427 = vrcp.f32 %v3529_v36  ;;  %v4847_v44 = vpop.f32.mrf.mxu1  ;;  %v3948_v21 = vmul.f32 %v6426_v61, %v11145_v59  ;;  %v4332_v55 = vmax.f32 %v4300_v16, 0.001  ;;  %v4960_v17 = vpop.f32.mrf.mxu2 }
 0x7eb   : > { %v4848_v41 = vadd.f32 %v4847_v44, %v4735_v29  ;;  %v3628_v5 = vmax.f32 %v3596_v46, 0.001  ;;  %v5073_v7 = vpop.f32.mrf.mxu3 }
 0x7ec   : > { %v3980_v43 = vmax.f32 %v3948_v21, 0.001  ;;  %5093 = vmatmul.f32.gmra.mxu3 %v4332_v55  ;;  %v4740_v55 = vpop.f32.mrf.mxu0 }
 0x7ed   : > { %v4961_v25 = vadd.f32 %v4960_v17, %v4848_v41  ;;  %4867 = vmatmul.f32.gmra.mxu1 %v3628_v5 }
 0x7ee   : > { %4980 = vmatmul.f32.gmra.mxu2 %v3980_v43 }
 0x7ef   : > { %v5074_v35 = vadd.f32 %v5073_v7, %v4961_v25 }
 0x7f0   : > { %v6428_v3 = vpop.eup %6427  ;;  %v3881_v15 = vpop.xlane.xlu0 %3880 }
 0x7f1   : > { %5131 = vst [vmem:[%s11088_s27 + $0x98] sm:$0xff] %v5074_v35  ;;  %v3531_v50 = vpop.xlane.xlu2 %3530  ;;  %6429 = vrcp.f32 %v3881_v15  ;;  %v3597_v47 = vmul.f32 %v6428_v3, %v11161_v48 }
 0x7f2   : > { %6431 = vrcp.f32 %v3531_v50  ;;  %v4233_v59 = vpop.xlane.xlu1 %4232  ;;  %v4850_v6 = vpop.f32.mrf.mxu1 }
 0x7f3   : > { %6433 = vrcp.f32 %v4233_v59  ;;  %v3629_v33 = vmax.f32 %v3597_v47, 0.001  ;;  %v4851_v0 = vadd.f32 %v4850_v6, %v4738_v4 }
 0x7f5   : > { %4870 = vmatmul.f32.gmra.mxu1 %v3629_v33 }
 0x7f7   : > { %v6430_v45 = vpop.eup %6429 }
 0x7f8   : > { %v6432_v39 = vpop.eup %6431  ;;  %v4963_v54 = vpop.f32.mrf.mxu2  ;;  %v3949_v51 = vmul.f32 %v6430_v45, %v11172_v12 }
 0x7f9   : > { %v3883_v52 = vpop.xlane.xlu0 %3882  ;;  %v6434_v49 = vpop.eup %6433  ;;  %v4964_v48 = vadd.f32 %v4963_v54, %v4851_v0  ;;  %v3598_v14 = vmul.f32 %v6432_v39, %v11174_v18 }
 0x7fa   : > { %v3533_v9 = vpop.xlane.xlu2 %3532  ;;  %6435 = vrcp.f32 %v3883_v52  ;;  %v5076_v10 = vpop.f32.mrf.mxu3  ;;  %v3981_v2 = vmax.f32 %v3949_v51, 0.001  ;;  %v4301_v16 = vmul.f32 %v6434_v49, %v11177_v19  ;;  %v12917_v19 = vld [vmem:[#allocation112_spill] sm:$0xff] }
 0x7fb   : > { %6437 = vrcp.f32 %v3533_v9  ;;  %v5077_v61 = vadd.f32 %v5076_v10, %v4964_v48  ;;  %v3630_v36 = vmax.f32 %v3598_v14, 0.001  ;;  %v4741_v5 = vadd.f32 %v4740_v55, %v12917_v19  ;;  %v4743_v0 = vpop.f32.mrf.mxu0  ;;  %v12918_v52 = vld [vmem:[#allocation116_spill] sm:$0xff]  ;;  %v12919_v55 = vld [vmem:[#allocation115_spill] sm:$0xff] }
 0x7fc   : > { %4983 = vmatmul.f32.gmra.mxu2 %v3981_v2  ;;  %v4333_v38 = vmax.f32 %v4301_v16, 0.001  ;;  %v4744_v51 = vadd.f32 %v4743_v0, %v12918_v52 }
 0x7fd   : > { %5132 = vst [vmem:[%s11088_s27 + $0xa0] sm:$0xff] %v5077_v61  ;;  %4873 = vmatmul.f32.gmra.mxu1 %v3630_v36 }
 0x7fe   : > { %5096 = vmatmul.f32.gmra.mxu3 %v4333_v38 }
 0x800   : > { %v6436_v29 = vpop.eup %6435  ;;  %v4235_v46 = vpop.xlane.xlu1 %4234 }
 0x801   : > { %v6438_v12 = vpop.eup %6437  ;;  %v3950_v44 = vmul.f32 %v6436_v29, %v11186_v31  ;;  %6439 = vrcp.f32 %v4235_v46  ;;  %v4966_v7 = vpop.f32.mrf.mxu2 }
 0x802   : > { %v3535_v21 = vpop.xlane.xlu2 %3534  ;;  %v3599_v18 = vmul.f32 %v6438_v12, %v11191_v20 }
 0x803   : > { %6441 = vrcp.f32 %v3535_v21  ;;  %v3982_v41 = vmax.f32 %v3950_v44, 0.001  ;;  %v4746_v21 = vpop.f32.mrf.mxu0 }
 0x804   : > { %v3631_v17 = vmax.f32 %v3599_v18, 0.001  ;;  %v4853_v43 = vpop.f32.mrf.mxu1 }
 0x805   : > { %4986 = vmatmul.f32.gmra.mxu2 %v3982_v41  ;;  %v4854_v25 = vadd.f32 %v4853_v43, %v4741_v5  ;;  %v4747_v41 = vadd.f32 %v4746_v21, %v12919_v55 }
 0x806   : > { %4876 = vmatmul.f32.gmra.mxu1 %v3631_v17 }
 0x807   : > { %v6440_v35 = vpop.eup %6439  ;;  %v4967_v3 = vadd.f32 %v4966_v7, %v4854_v25 }
 0x808   : > { %v5079_v31 = vpop.f32.mrf.mxu3  ;;  %v4237_v50 = vpop.xlane.xlu1 %4236  ;;  %v4302_v47 = vmul.f32 %v6440_v35, %v11203_v40 }
 0x809   : > { %v6442_v15 = vpop.eup %6441  ;;  %v5080_v59 = vadd.f32 %v5079_v31, %v4967_v3  ;;  %6443 = vrcp.f32 %v4237_v50 }
 0x80a   : > { %v3185_v20 = vpop.xlane.xlu2 %3184  ;;  %v3600_v33 = vmul.f32 %v6442_v15, %v11206_v42  ;;  %v3885_v53 = vpop.xlane.xlu0 %3884  ;;  %v4334_v6 = vmax.f32 %v4302_v47, 0.001 }
 0x80b   : > { %6445 = vrcp.f32 %v3185_v20  ;;  %5133 = vst [vmem:[%s11088_s27 + $0xa8] sm:$0xff] %v5080_v59 }
 0x80c   : > { %6447 = vrcp.f32 %v3885_v53  ;;  %v3632_v23 = vmax.f32 %v3600_v33, 0.001  ;;  %5099 = vmatmul.f32.gmra.mxu3 %v4334_v6 }
 0x80e   : > { %4879 = vmatmul.f32.gmra.mxu1 %v3632_v23 }
 0x80f   : > { %v6444_v4 = vpop.eup %6443 }
 0x810   : > { %v4303_v39 = vmul.f32 %v6444_v4, %v11214_v58  ;;  %v5082_v58 = vpop.f32.mrf.mxu3 }
 0x811   : > { %v6446_v45 = vpop.eup %6445 }
 0x812   : > { %v6448_v54 = vpop.eup %6447  ;;  %v3537_v40 = vpop.xlane.xlu2 %3536  ;;  %v3249_v49 = vmul.f32 %v6446_v45, %v11216_v37  ;;  %v4335_v48 = vmax.f32 %v4303_v39, 0.001 }
 0x813   : > { %6449 = vrcp.f32 %v3537_v40  ;;  %v4856_v42 = vpop.f32.mrf.mxu1  ;;  %v3951_v9 = vmul.f32 %v6448_v54, %v11221_v34  ;;  %v4969_v2 = vpop.f32.mrf.mxu2 }
 0x814   : > { %v4857_v14 = vadd.f32 %v4856_v42, %v4744_v51  ;;  %v3281_v10 = vmax.f32 %v3249_v49, 0.001  ;;  %5102 = vmatmul.f32.gmra.mxu3 %v4335_v48 }
 0x815   : > { %v3983_v16 = vmax.f32 %v3951_v9, 0.001 }
 0x816   : > { %v4970_v61 = vadd.f32 %v4969_v2, %v4857_v14  ;;  %4769 = vmatmul.f32.gmra.mxu0 %v3281_v10 }
 0x817   : > { %4989 = vmatmul.f32.gmra.mxu2 %v3983_v16 }
 0x818   : > { %v5083_v36 = vadd.f32 %v5082_v58, %v4970_v61  ;;  %v4646_v58 = vadd.f32 %v11022_v30, %v11020_v8 }
 0x819   : > { %v6450_v38 = vpop.eup %6449 }
 0x81a   : > { %5134 = vst [vmem:[%s11088_s27 + $0xb0] sm:$0xff] %v5083_v36  ;;  %v3601_v37 = vmul.f32 %v6450_v38, %v11227_v32 }
 0x81b   : > { %v4859_v18 = vpop.f32.mrf.mxu1 }
 0x81c   : > { %v3633_v29 = vmax.f32 %v3601_v37, 0.001  ;;  %v4860_v17 = vadd.f32 %v4859_v18, %v4747_v41 }
 0x81e   : > { %4882 = vmatmul.f32.gmra.mxu1 %v3633_v29 }
 0x830   : > { %v3887_v12 = vpop.xlane.xlu0 %3886 }
 0x831   : > { %6451 = vrcp.f32 %v3887_v12 }
 0x836   : > { %v4239_v46 = vpop.xlane.xlu1 %4238 }
 0x837   : > { %v6452_v34 = vpop.eup %6451  ;;  %6453 = vrcp.f32 %v4239_v46  ;;  %v4649_v46 = vadd.f32 %v11030_v63, %v11028_v57 }
 0x838   : > { %v3952_v44 = vmul.f32 %v6452_v34, %v11246_v60  ;;  %v4972_v5 = vpop.f32.mrf.mxu2  ;;  %v4749_v60 = vpop.f32.mrf.mxu0 }
 0x839   : > { %v4973_v32 = vadd.f32 %v4972_v5, %v4860_v17  ;;  %v4750_v47 = vadd.f32 %v4749_v60, %v10984_v1  ;;  %v4652_v5 = vadd.f32 %v11040_v11, %v11038_v62 }
 0x83a   : > { %v3984_v19 = vmax.f32 %v3952_v44, 0.001 }
 0x83c   : > { %4992 = vmatmul.f32.gmra.mxu2 %v3984_v19 }
 0x83d   : > { %v6454_v43 = vpop.eup %6453 }
 0x83e   : > { %v5085_v25 = vpop.f32.mrf.mxu3  ;;  %v4304_v7 = vmul.f32 %v6454_v43, %v11252_v13 }
 0x83f   : > { %v5086_v35 = vadd.f32 %v5085_v25, %v4973_v32 }
 0x840   : > { %v4336_v3 = vmax.f32 %v4304_v7, 0.001  ;;  %v4752_v54 = vpop.f32.mrf.mxu0 }
 0x841   : > { %5135 = vst [vmem:[%s11088_s27 + $0xb8] sm:$0xff] %v5086_v35  ;;  %v4753_v1 = vadd.f32 %v4752_v54, %v10996_v24 }
 0x842   : > { %5105 = vmatmul.f32.gmra.mxu3 %v4336_v3  ;;  %v12920_v3 = vld [vmem:[#allocation100_spill] sm:$0xff] }
 0x848   : > { %v4862_v50 = vpop.f32.mrf.mxu1  ;;  %v4755_v9 = vpop.f32.mrf.mxu0 }
 0x849   : > { %v4863_v59 = vadd.f32 %v4862_v50, %v4750_v47 }
 0x84f   : > { %v3889_v15 = vpop.xlane.xlu0 %3888 }
 0x850   : > { %v4241_v31 = vpop.xlane.xlu1 %4240  ;;  %6455 = vrcp.f32 %v3889_v15  ;;  %v4758_v36 = vpop.f32.mrf.mxu0  ;;  %v4655_v15 = vadd.f32 %v12920_v3, %v11047_v56 }
 0x851   : > { %6457 = vrcp.f32 %v4241_v31  ;;  %v4759_v37 = vadd.f32 %v4758_v36, %v4646_v58 }
 0x856   : > { %v6456_v20 = vpop.eup %6455 }
 0x857   : > { %v6458_v33 = vpop.eup %6457  ;;  %v4975_v53 = vpop.f32.mrf.mxu2  ;;  %v3953_v6 = vmul.f32 %v6456_v20, %v11267_v22 }
 0x858   : > { %v4976_v13 = vadd.f32 %v4975_v53, %v4863_v59  ;;  %v4305_v23 = vmul.f32 %v6458_v33, %v11269_v28  ;;  %v5088_v4 = vpop.f32.mrf.mxu3  ;;  %v4643_v28 = vadd.f32 %v11014_v27, %v11012_v26  ;;  %v4761_v44 = vpop.f32.mrf.mxu0  ;;  %v12921_v53 = vld [vmem:[#allocation56_spill] sm:$0xff] }
 0x859   : > { %v3985_v45 = vmax.f32 %v3953_v6, 0.001  ;;  %v4762_v18 = vadd.f32 %v4761_v44, %v4649_v46  ;;  %v12922_v6 = vld [vmem:[#allocation222_spill] sm:$0xff] }
 0x85a   : > { %v5089_v0 = vadd.f32 %v5088_v4, %v4976_v13  ;;  %v4337_v39 = vmax.f32 %v4305_v23, 0.001  ;;  %v4756_v14 = vadd.f32 %v4755_v9, %v4643_v28  ;;  %v4658_v13 = vadd.f32 %v12922_v6, %v12921_v53 }
 0x85b   : > { %4995 = vmatmul.f32.gmra.mxu2 %v3985_v45 }
 0x85c   : > { %5136 = vst [vmem:[%s11088_s27 + $0xc0] sm:$0xff] %v5089_v0  ;;  %5108 = vmatmul.f32.gmra.mxu3 %v4337_v39 }
 0x85f   : > { %v4978_v51 = vpop.f32.mrf.mxu2 }
 0x860   : > { %v4764_v17 = vpop.f32.mrf.mxu0 }
 0x861   : > { %v4765_v32 = vadd.f32 %v4764_v17, %v4652_v5 }
 0x862   : > { %v4865_v40 = vpop.f32.mrf.mxu1 }
 0x863   : > { %v4866_v52 = vadd.f32 %v4865_v40, %v4753_v1 }
 0x865   : > { %v4979_v49 = vadd.f32 %v4978_v51, %v4866_v52 }
 0x867   : > { %v5091_v22 = vpop.f32.mrf.mxu3 }
 0x868   : > { %v5092_v42 = vadd.f32 %v5091_v22, %v4979_v49  ;;  %v4767_v31 = vpop.f32.mrf.mxu0 }
 0x869   : > { %v4768_v50 = vadd.f32 %v4767_v31, %v4655_v15 }
 0x86a   : > { %5137 = vst [vmem:[%s11088_s27 + $0xc8] sm:$0xff] %v5092_v42  ;;  %v4868_v48 = vpop.f32.mrf.mxu1 }
 0x86b   : > { %v4869_v10 = vadd.f32 %v4868_v48, %v4756_v14 }
 0x86f   : > { %v5094_v61 = vpop.f32.mrf.mxu3 }
 0x871   : > { %v4981_v2 = vpop.f32.mrf.mxu2 }
 0x872   : > { %v4982_v16 = vadd.f32 %v4981_v2, %v4869_v10  ;;  %v4871_v38 = vpop.f32.mrf.mxu1 }
 0x873   : > { %v4872_v29 = vadd.f32 %v4871_v38, %v4759_v37 }
 0x874   : > { %v5095_v24 = vadd.f32 %v5094_v61, %v4982_v16 }
 0x876   : > { %5138 = vst [vmem:[%s11088_s27 + $0xd0] sm:$0xff] %v5095_v24 }
 0x87a   : > { %v4874_v21 = vpop.f32.mrf.mxu1 }
 0x87b   : > { %v4875_v41 = vadd.f32 %v4874_v21, %v4762_v18 }
 0x87f   : > { %v4984_v26 = vpop.f32.mrf.mxu2 }
 0x880   : > { %v4985_v27 = vadd.f32 %v4984_v26, %v4872_v29 }
 0x881   : > { %v5097_v12 = vpop.f32.mrf.mxu3 }
 0x882   : > { %v5098_v34 = vadd.f32 %v5097_v12, %v4985_v27 }
 0x883   : > { %v4877_v43 = vpop.f32.mrf.mxu1 }
 0x884   : > { %5139 = vst [vmem:[%s11088_s27 + $0xd8] sm:$0xff] %v5098_v34  ;;  %v4878_v25 = vadd.f32 %v4877_v43, %v4765_v32 }
 0x888   : > { %v4987_v55 = vpop.f32.mrf.mxu2 }
 0x889   : > { %v4988_v8 = vadd.f32 %v4987_v55, %v4875_v41 }
 0x88b   : > { %v4880_v60 = vpop.f32.mrf.mxu1 }
 0x88c   : > { %v4881_v11 = vadd.f32 %v4880_v60, %v4768_v50 }
 0x88f   : > { %v5100_v30 = vpop.f32.mrf.mxu3 }
 0x890   : > { %v5101_v19 = vadd.f32 %v5100_v30, %v4988_v8 }
 0x892   : > { %5140 = vst [vmem:[%s11088_s27 + $0xe0] sm:$0xff] %v5101_v19 }
 0x893   : > { %v4770_v33 = vpop.f32.mrf.mxu0 }
 0x894   : > { %v4771_v56 = vadd.f32 %v4770_v33, %v4658_v13 }
 0x897   : > { %v5103_v7 = vpop.f32.mrf.mxu3 }
 0x89a   : > { %v4990_v57 = vpop.f32.mrf.mxu2 }
 0x89b   : > { %v4991_v63 = vadd.f32 %v4990_v57, %v4878_v25  ;;  %v4883_v23 = vpop.f32.mrf.mxu1 }
 0x89c   : > { %v4884_v4 = vadd.f32 %v4883_v23, %v4771_v56 }
 0x89d   : > { %v5104_v35 = vadd.f32 %v5103_v7, %v4991_v63 }
 0x89f   : > { %5141 = vst [vmem:[%s11088_s27 + $0xe8] sm:$0xff] %v5104_v35 }
 0x8bf   : > { %v4993_v62 = vpop.f32.mrf.mxu2 }
 0x8c0   : > { %v4994_v47 = vadd.f32 %v4993_v62, %v4881_v11 }
 0x8c5   : > { %v5106_v20 = vpop.f32.mrf.mxu3 }
 0x8c6   : > { %v5107_v59 = vadd.f32 %v5106_v20, %v4994_v47 }
 0x8c8   : > { %5142 = vst [vmem:[%s11088_s27 + $0xf0] sm:$0xff] %v5107_v59 }
 0x8de   : > { %v4996_v45 = vpop.f32.mrf.mxu2 }
 0x8df   : > { %v4997_v0 = vadd.f32 %v4996_v45, %v4884_v4  ;;  %v5109_v39 = vpop.f32.mrf.mxu3 }
 0x8e1   : > { %v5110_v54 = vadd.f32 %v5109_v39, %v4997_v0 }
 0x8e3   : > { %5143 = vst [vmem:[%s11088_s27 + $0xf8] sm:$0xff] %v5110_v54 }
 0x8e4   : > { %6517 = shalt.err (!%p6514_p8)
}
 0x8e5   : > { %s6561_s26 = smov 128   ;;  %s6562_s27 = smov 8  }
 0x8e6   : > { %5639 = dma.vmem_to_hbm [thread:$0]  (%p6656_p5), %s5158_s18, 4096, %s5160_s25, %s5145_s17, %s6561_s26, %s6561_s26, %s6562_s27  }
 0x8e7 PF: > { %p5651_p9 = scmp.ge.s32.totalorder %s6556_s16, 2  ;;  %s5174_s28 = sand.u32 1, %s6544_s13  }
 0x8e8   : > { %s5175_s29 = scalar_lea.sflag [#allocation4], %s5174_s28 }
 0x8e9   : > { %p5646_p10 = pnand %p5651_p9, %p6660_p6 }
 0x8eb   : > { %p5647_p11 = pneg %p5646_p10 }
 0x8ed   : > { %6539 = dma.done.wait (%p5647_p11), %s5175_s29, 4096  }
 0x8ee   : > { %6541 = vsyncadd (%p5647_p11), %s5175_s29, 4294963200  ;;  %p21_p12 = scmp.ge.s32.totalorder %s6643_s19, 4   ;;  %s12923_s13 = smov %s6548_s14 }
 0x8ef   : > { %s12924_s14 = smov %s6552_s15  ;;  %s12925_s15 = smov %s6654_s22 }
 0x8f0   : > { %s12926_s16 = smov %s6643_s19  ;;  %23 = sbr.rel (!%p21_p12) target bundleno = 4 (0x4), region = 100 }
 0x8f5   :  { %5181 = vsyncpa [#allocation3], 1 }
 0x8f6   :  { %5183 = vsyncpa [#allocation3 + $0x1], 1 }
 0x8f7   :  { %5184 = vsyncpa [#allocation4], 1 }
 0x8f8   :  { %5186 = vsyncpa [#allocation4 + $0x1], 1 }

</bundles_post_ra>
